<compile_context>
chip_gen: v7x
topology: tpu7x:2x2x1
jax: 0.10.0
libtpu: 0.0.40
codegen_flags: <defaults>
</compile_context>

<pallas_src>
import jax
import jax.numpy as jnp
from jax.experimental import pallas as pl
from jax.experimental.pallas import tpu as pltpu

LANES = 128


# ----------------------------- Pallas kernels ------------------------------

def _conv_relu_pool_kernel(p_ref, w_ref, b_ref, o_ref):
    """p_ref: (4, G, K) bf16 patches (leading dim = 2x2 pool member),
    w_ref: (K, 128) bf16, b_ref: (1, 128) f32, o_ref: (G, 128) bf16.
    Computes max_{m<4} relu(p[m] @ w + b): conv + bias + ReLU with the 2x2/2
    max-pool fused into the matmul epilogue. Everything lane-dense."""
    w = w_ref[...]
    b = b_ref[...]
    out = None
    for m in range(4):                                    # static unroll: 4 MXU dots
        y = jnp.dot(p_ref[m], w, preferred_element_type=jnp.float32)
        y = jnp.maximum(y + b, 0.0)
        out = y if out is None else jnp.maximum(out, y)
    o_ref[...] = out.astype(o_ref.dtype)


def _fc_head_kernel(x_ref, w1_ref, b1_ref, w2_ref, b2_ref, w3_ref, b3_ref, o_ref):
    """Fused fc1+fc2+fc3: bf16 matmul inputs, f32 accumulation / epilogue."""
    h = jnp.dot(x_ref[...], w1_ref[...], preferred_element_type=jnp.float32)
    h = jnp.maximum(h + b1_ref[...], 0.0)
    h = jnp.dot(h.astype(jnp.bfloat16), w2_ref[...],
                preferred_element_type=jnp.float32)
    h = jnp.maximum(h + b2_ref[...], 0.0)
    h = jnp.dot(h.astype(jnp.bfloat16), w3_ref[...],
                preferred_element_type=jnp.float32)
    o_ref[...] = (h + b3_ref[...]).astype(o_ref.dtype)


# ------------------------------ call wrappers -------------------------------

def conv_relu_pool(patches, w_col, b_col):
    """patches: (4, N, G, K) bf16, w_col: (K, 128) bf16, b_col: (1, 128) f32
    -> (N, G, 128) bf16 pooled NHWC feature map (channels zero-padded to 128)."""
    _, n, g, k = patches.shape
    return pl.pallas_call(
        _conv_relu_pool_kernel,
        out_shape=jax.ShapeDtypeStruct((n, g, LANES), jnp.bfloat16),
        grid_spec=pltpu.PrefetchScalarGridSpec(
            num_scalar_prefetch=0,
            grid=(n,),                                    # one image per step
            in_specs=[
                pl.BlockSpec((4, pl.Squeezed(), g, k), lambda i: (0, i, 0, 0)),
                pl.BlockSpec((k, LANES), lambda i: (0, 0)),   # weights resident
                pl.BlockSpec((1, LANES), lambda i: (0, 0)),   # bias resident
            ],
            out_specs=pl.BlockSpec((pl.Squeezed(), g, LANES), lambda i: (i, 0, 0)),
        ),
        compiler_params=pltpu.CompilerParams(
            dimension_semantics=("parallel",),            # v7x: 2 TCs split batch
            vmem_limit_bytes=32 * 1024 * 1024),
    )(patches, w_col, b_col)


def fc_head(x, w1, b1, w2, b2, w3, b3):
    """x: (N, 3200) bf16; weights (3200,128)/(128,128)/(128,128) bf16; biases f32."""
    n = x.shape[0]
    vmem = pl.BlockSpec(memory_space=pltpu.MemorySpace.VMEM)
    return pl.pallas_call(
        _fc_head_kernel,
        out_shape=jax.ShapeDtypeStruct((n, LANES), jnp.float32),
        in_specs=[vmem] * 7,
        out_specs=vmem,
        compiler_params=pltpu.CompilerParams(vmem_limit_bytes=32 * 1024 * 1024),
    )(x, w1, b1, w2, b2, w3, b3)


# ------------------------------ JAX glue (im2col) ----------------------------

def _conv_pool_patches(x_nhwc, k):
    """im2col for a valid kxk conv followed by a 2x2/stride-2 max pool.
    Returns (4, N, (OH//2)*(OW//2), k*k*C): leading dim = pool member; patch
    vector in natural (KH, KW, C) order matching the packed weight layout.
    Only strided slices + concat — no large transposes."""
    n, h, w, c = x_nhwc.shape
    oh, ow = h - k + 1, w - k + 1
    slabs = [x_nhwc[:, ki:ki + oh, kj:kj + ow, :]
             for ki in range(k) for kj in range(k)]
    p = jnp.stack(slabs, axis=3).reshape(n, oh, ow, k * k * c)
    groups = [p[:, py::2, px::2, :] for py in range(2) for px in range(2)]
    g = jnp.stack(groups, axis=0)                         # (4, N, OH//2, OW//2, K)
    return g.reshape(4, n, (oh // 2) * (ow // 2), k * k * c)


# ------------------------------ Model forward --------------------------------

def convnet_forward(packed, x_nchw):
    n = x_nchw.shape[0]
    x = jnp.transpose(x_nchw, (0, 2, 3, 1)).astype(jnp.bfloat16)   # NHWC, bf16

    # conv1 (3->6, k=5) + relu + pool : 32x32 -> 28x28 -> 14x14
    p1 = _conv_pool_patches(x, 5)                          # (4, N, 196, 75)
    h1 = conv_relu_pool(p1, packed["w1"], packed["b1"])    # (N, 196, 128)

    # conv2 (6->16, k=5) + relu + pool : 14x14 -> 10x10 -> 5x5
    # zero-padded channels are carried through (their weight rows are zero).
    p2 = _conv_pool_patches(h1.reshape(n, 14, 14, LANES), 5)   # (4, N, 25, 3200)
    h2 = conv_relu_pool(p2, packed["w2"], packed["b2"])    # (N, 25, 128)

    # Flatten; PyTorch's NCHW `view(-1, 400)` permutation is baked into w_fc1.
    feats = h2.reshape(n, 25 * LANES)                      # (N, 3200) bf16
    logits = fc_head(feats, packed["wf1"], packed["bf1"],
                     packed["wf2"], packed["bf2"],
                     packed["wf3"], packed["bf3"])         # (N, 128) f32
    return logits[:, :10]


# ------------------------------ Parameters -----------------------------------

def init_params(key):
    ks = jax.random.split(key, 10)
    s = 0.1
    return {
        # PyTorch shapes: conv weight (OC, IC, KH, KW), linear weight (out, in)
        "w_conv1": jax.random.normal(ks[0], (6, 3, 5, 5), jnp.float32) * s,
        "b_conv1": jax.random.normal(ks[1], (6,), jnp.float32) * s,
        "w_conv2": jax.random.normal(ks[2], (16, 6, 5, 5), jnp.float32) * s,
        "b_conv2": jax.random.normal(ks[3], (16,), jnp.float32) * s,
        "w_fc1": jax.random.normal(ks[4], (120, 400), jnp.float32) * s,
        "b_fc1": jax.random.normal(ks[5], (120,), jnp.float32) * s,
        "w_fc2": jax.random.normal(ks[6], (84, 120), jnp.float32) * s,
        "b_fc2": jax.random.normal(ks[7], (84,), jnp.float32) * s,
        "w_fc3": jax.random.normal(ks[8], (10, 84), jnp.float32) * s,
        "b_fc3": jax.random.normal(ks[9], (10,), jnp.float32) * s,
    }


def pack_params(params):
    """One-time repack (outside jit): transpose to (K, OC) matmul layout, zero-pad
    to 128 lanes, bake the NCHW flatten permutation into fc1, cast matmul weights
    to bf16; biases stay f32 as (1, 128) rows."""
    def pad_bias(b):
        return jnp.pad(b, (0, LANES - b.shape[0]))[None, :].astype(jnp.float32)

    # conv1: (6,3,5,5) -> (kh,kw,ic,oc) -> (75, 128)
    w1 = params["w_conv1"].transpose(2, 3, 1, 0)
    w1 = jnp.pad(w1, ((0, 0), (0, 0), (0, 0), (0, LANES - 6))).reshape(75, LANES)

    # conv2: gathered input carries 128 (padded) channels -> (5*5*128, 128)
    w2 = params["w_conv2"].transpose(2, 3, 1, 0)                    # (5,5,6,16)
    w2 = jnp.pad(w2, ((0, 0), (0, 0), (0, LANES - 6), (0, LANES - 16)))
    w2 = w2.reshape(5 * 5 * LANES, LANES)

    # fc1: PyTorch flatten order is (c,h,w); activation order is (h,w,c_pad128).
    wf1 = params["w_fc1"].reshape(120, 16, 5, 5).transpose(2, 3, 1, 0)  # (5,5,16,120)
    wf1 = jnp.pad(wf1, ((0, 0), (0, 0), (0, LANES - 16), (0, LANES - 120)))
    wf1 = wf1.reshape(5 * 5 * LANES, LANES)

    wf2 = jnp.pad(params["w_fc2"].T, ((0, LANES - 120), (0, LANES - 84)))
    wf3 = jnp.pad(params["w_fc3"].T, ((0, LANES - 84), (0, LANES - 10)))

    bf16 = jnp.bfloat16
    return {
        "w1": w1.astype(bf16), "b1": pad_bias(params["b_conv1"]),
        "w2": w2.astype(bf16), "b2": pad_bias(params["b_conv2"]),
        "wf1": wf1.astype(bf16), "bf1": pad_bias(params["b_fc1"]),
        "wf2": wf2.astype(bf16), "bf2": pad_bias(params["b_fc2"]),
        "wf3": wf3.astype(bf16), "bf3": pad_bias(params["b_fc3"]),
    }


# Independent pure-JAX reference (lax.conv + reshape-pool on original PyTorch-shaped
# weights), mirroring the bf16 rounding of matmul inputs so results match the Pallas
# path to f32-accumulation noise.
def convnet_forward_ref(params, x_nchw):
    f32 = jnp.float32
    q = lambda a: a.astype(jnp.bfloat16).astype(f32)

    def conv_relu(x, w, b):
        y = jax.lax.conv_general_dilated(
            x, q(w), window_strides=(1, 1), padding="VALID",
            dimension_numbers=("NCHW", "OIHW", "NCHW"))
        return jnp.maximum(y + b[None, :, None, None], 0.0)

    def pool(x):
        n, c, h, w = x.shape
        return x.reshape(n, c, h // 2, 2, w // 2, 2).max(axis=(3, 5))

    x = q(x_nchw)
    x = q(pool(conv_relu(x, params["w_conv1"], params["b_conv1"])))
    x = q(pool(conv_relu(x, params["w_conv2"], params["b_conv2"])))
    x = x.reshape(x.shape[0], -1)                          # NCHW flatten == torch view
    x = q(jnp.maximum(x @ q(params["w_fc1"]).T + params["b_fc1"], 0.0))
    x = q(jnp.maximum(x @ q(params["w_fc2"]).T + params["b_fc2"], 0.0))
    return x @ q(params["w_fc3"]).T + params["b_fc3"]


if __name__ == "__main__":
    key = jax.random.PRNGKey(0)
    k_params, k_x = jax.random.split(key)
    params = init_params(k_params)
    packed = pack_params(params)

    # Spatial size 32 is forced by fc1 expecting 16*5*5 features.
    x = jax.random.normal(k_x, (2, 3, 32, 32), jnp.float32)

    out = jax.block_until_ready(jax.jit(convnet_forward)(packed, x))
    assert out.shape == (2, 10), out.shape

    ref = jax.block_until_ready(jax.jit(convnet_forward_ref)(params, x))
    err = float(jnp.max(jnp.abs(out - ref)))
    assert err < 5e-3, err

    print("KERNEL_OK")
</pallas_src>

<mosaic_0001>
module attributes {stable_mosaic.version = 11 : i64} {
  func.func @_conv_relu_pool_kernel(%arg0: i32, %arg1: memref<4x1x196x75xbf16, #tpu.memory_space<vmem>>, %arg2: memref<75x128xbf16, #tpu.memory_space<vmem>>, %arg3: memref<1x128xf32, #tpu.memory_space<vmem>>, %arg4: memref<1x196x128xbf16, #tpu.memory_space<vmem>>) attributes {dimension_semantics = [#tpu.dimension_semantics<parallel>], iteration_bounds = array<i64: 2>, scalar_prefetch = 0 : i64, scratch_operands = 0 : i64, tpu.core_type = #tpu.core_type<tc>, window_params = [{transform_indices = @transform_0, window_bounds = array<i64: 4, 1, 196, 75>}, {pipeline_mode = #tpu.pipeline_mode<synchronous>, transform_indices = @transform_1, window_bounds = array<i64: 75, 128>}, {pipeline_mode = #tpu.pipeline_mode<synchronous>, transform_indices = @transform_2, window_bounds = array<i64: 1, 128>}, {transform_indices = @transform_3, window_bounds = array<i64: 1, 196, 128>}]} {
    %c0 = arith.constant 0 : index
    %c0_0 = arith.constant 0 : index
    %0 = vector.load %arg2[%c0, %c0_0] : memref<75x128xbf16, #tpu.memory_space<vmem>>, vector<75x128xbf16>
    %c0_1 = arith.constant 0 : index
    %c0_2 = arith.constant 0 : index
    %1 = vector.load %arg3[%c0_1, %c0_2] : memref<1x128xf32, #tpu.memory_space<vmem>>, vector<1x128xf32>
    %c0_3 = arith.constant 0 : index
    %c0_4 = arith.constant 0 : index
    %c0_5 = arith.constant 0 : index
    %c0_6 = arith.constant 0 : index
    %2 = vector.load %arg1[%c0_3, %c0_4, %c0_5, %c0_6] : memref<4x1x196x75xbf16, #tpu.memory_space<vmem>>, vector<1x1x196x75xbf16>
    %3 = vector.shape_cast %2 : vector<1x1x196x75xbf16> to vector<196x75xbf16>
    %cst = arith.constant dense<0.000000e+00> : vector<196x128xf32>
    %4 = tpu.matmul %3, %0, %cst {dimension_numbers = #tpu.dot_dimension_numbers<[1], [0], [0], [1], [0, 0, 1, 1], [], []>} : vector<196x75xbf16>, vector<75x128xbf16>, vector<196x128xf32> -> vector<196x128xf32>
    %5 = vector.broadcast %1 : vector<1x128xf32> to vector<196x128xf32>
    %6 = arith.addf %4, %5 : vector<196x128xf32>
    %cst_7 = arith.constant 0.000000e+00 : f32
    %7 = vector.broadcast %cst_7 : f32 to vector<196x128xf32>
    %8 = arith.maximumf %6, %7 : vector<196x128xf32>
    %c1 = arith.constant 1 : index
    %c0_8 = arith.constant 0 : index
    %c0_9 = arith.constant 0 : index
    %c0_10 = arith.constant 0 : index
    %9 = vector.load %arg1[%c1, %c0_8, %c0_9, %c0_10] : memref<4x1x196x75xbf16, #tpu.memory_space<vmem>>, vector<1x1x196x75xbf16>
    %10 = vector.shape_cast %9 : vector<1x1x196x75xbf16> to vector<196x75xbf16>
    %cst_11 = arith.constant dense<0.000000e+00> : vector<196x128xf32>
    %11 = tpu.matmul %10, %0, %cst_11 {dimension_numbers = #tpu.dot_dimension_numbers<[1], [0], [0], [1], [0, 0, 1, 1], [], []>} : vector<196x75xbf16>, vector<75x128xbf16>, vector<196x128xf32> -> vector<196x128xf32>
    %12 = vector.broadcast %1 : vector<1x128xf32> to vector<196x128xf32>
    %13 = arith.addf %11, %12 : vector<196x128xf32>
    %cst_12 = arith.constant 0.000000e+00 : f32
    %14 = vector.broadcast %cst_12 : f32 to vector<196x128xf32>
    %15 = arith.maximumf %13, %14 : vector<196x128xf32>
    %16 = arith.maximumf %8, %15 : vector<196x128xf32>
    %c2 = arith.constant 2 : index
    %c0_13 = arith.constant 0 : index
    %c0_14 = arith.constant 0 : index
    %c0_15 = arith.constant 0 : index
    %17 = vector.load %arg1[%c2, %c0_13, %c0_14, %c0_15] : memref<4x1x196x75xbf16, #tpu.memory_space<vmem>>, vector<1x1x196x75xbf16>
    %18 = vector.shape_cast %17 : vector<1x1x196x75xbf16> to vector<196x75xbf16>
    %cst_16 = arith.constant dense<0.000000e+00> : vector<196x128xf32>
    %19 = tpu.matmul %18, %0, %cst_16 {dimension_numbers = #tpu.dot_dimension_numbers<[1], [0], [0], [1], [0, 0, 1, 1], [], []>} : vector<196x75xbf16>, vector<75x128xbf16>, vector<196x128xf32> -> vector<196x128xf32>
    %20 = vector.broadcast %1 : vector<1x128xf32> to vector<196x128xf32>
    %21 = arith.addf %19, %20 : vector<196x128xf32>
    %cst_17 = arith.constant 0.000000e+00 : f32
    %22 = vector.broadcast %cst_17 : f32 to vector<196x128xf32>
    %23 = arith.maximumf %21, %22 : vector<196x128xf32>
    %24 = arith.maximumf %16, %23 : vector<196x128xf32>
    %c3 = arith.constant 3 : index
    %c0_18 = arith.constant 0 : index
    %c0_19 = arith.constant 0 : index
    %c0_20 = arith.constant 0 : index
    %25 = vector.load %arg1[%c3, %c0_18, %c0_19, %c0_20] : memref<4x1x196x75xbf16, #tpu.memory_space<vmem>>, vector<1x1x196x75xbf16>
    %26 = vector.shape_cast %25 : vector<1x1x196x75xbf16> to vector<196x75xbf16>
    %cst_21 = arith.constant dense<0.000000e+00> : vector<196x128xf32>
    %27 = tpu.matmul %26, %0, %cst_21 {dimension_numbers = #tpu.dot_dimension_numbers<[1], [0], [0], [1], [0, 0, 1, 1], [], []>} : vector<196x75xbf16>, vector<75x128xbf16>, vector<196x128xf32> -> vector<196x128xf32>
    %28 = vector.broadcast %1 : vector<1x128xf32> to vector<196x128xf32>
    %29 = arith.addf %27, %28 : vector<196x128xf32>
    %cst_22 = arith.constant 0.000000e+00 : f32
    %30 = vector.broadcast %cst_22 : f32 to vector<196x128xf32>
    %31 = arith.maximumf %29, %30 : vector<196x128xf32>
    %32 = arith.maximumf %24, %31 : vector<196x128xf32>
    %33 = arith.truncf %32 : vector<196x128xf32> to vector<196x128xbf16>
    %c0_23 = arith.constant 0 : index
    %c0_24 = arith.constant 0 : index
    %c0_25 = arith.constant 0 : index
    %34 = vector.load %arg4[%c0_23, %c0_24, %c0_25] : memref<1x196x128xbf16, #tpu.memory_space<vmem>>, vector<1x196x128xbf16>
    %35 = vector.shape_cast %34 : vector<1x196x128xbf16> to vector<196x128xbf16>
    %36 = vector.shape_cast %33 : vector<196x128xbf16> to vector<1x196x128xbf16>
    tpu.vector_store %arg4[%c0_23, %c0_24, %c0_25], %36 {strides = array<i32>} : memref<1x196x128xbf16, #tpu.memory_space<vmem>>, vector<1x196x128xbf16>,
    return
  }
  func.func @transform_0(%arg0: i32) -> (i32, i32, i32, i32) {
    %c0_i32 = arith.constant 0 : i32
    %c0_i32_0 = arith.constant 0 : i32
    %c0_i32_1 = arith.constant 0 : i32
    %c0_i32_2 = arith.constant 0 : i32
    return %c0_i32, %arg0, %c0_i32_0, %c0_i32_1 : i32, i32, i32, i32
  }
  func.func @transform_1(%arg0: i32) -> (i32, i32) {
    %c0_i32 = arith.constant 0 : i32
    %c0_i32_0 = arith.constant 0 : i32
    %c0_i32_1 = arith.constant 0 : i32
    return %c0_i32, %c0_i32_0 : i32, i32
  }
  func.func @transform_2(%arg0: i32) -> (i32, i32) {
    %c0_i32 = arith.constant 0 : i32
    %c0_i32_0 = arith.constant 0 : i32
    %c0_i32_1 = arith.constant 0 : i32
    return %c0_i32, %c0_i32_0 : i32, i32
  }
  func.func @transform_3(%arg0: i32) -> (i32, i32, i32) {
    %c0_i32 = arith.constant 0 : i32
    %c0_i32_0 = arith.constant 0 : i32
    %c0_i32_1 = arith.constant 0 : i32
    return %arg0, %c0_i32, %c0_i32_0 : i32, i32, i32
  }
}

module attributes {stable_mosaic.version = 11 : i64} {
  func.func @_conv_relu_pool_kernel(%arg0: i32, %arg1: memref<4x1x25x3200xbf16, #tpu.memory_space<vmem>>, %arg2: memref<3200x128xbf16, #tpu.memory_space<vmem>>, %arg3: memref<1x128xf32, #tpu.memory_space<vmem>>, %arg4: memref<1x25x128xbf16, #tpu.memory_space<vmem>>) attributes {dimension_semantics = [#tpu.dimension_semantics<parallel>], iteration_bounds = array<i64: 2>, scalar_prefetch = 0 : i64, scratch_operands = 0 : i64, tpu.core_type = #tpu.core_type<tc>, window_params = [{transform_indices = @transform_0, window_bounds = array<i64: 4, 1, 25, 3200>}, {pipeline_mode = #tpu.pipeline_mode<synchronous>, transform_indices = @transform_1, window_bounds = array<i64: 3200, 128>}, {pipeline_mode = #tpu.pipeline_mode<synchronous>, transform_indices = @transform_2, window_bounds = array<i64: 1, 128>}, {transform_indices = @transform_3, window_bounds = array<i64: 1, 25, 128>}]} {
    %c0 = arith.constant 0 : index
    %c0_0 = arith.constant 0 : index
    %0 = vector.load %arg2[%c0, %c0_0] : memref<3200x128xbf16, #tpu.memory_space<vmem>>, vector<3200x128xbf16>
    %c0_1 = arith.constant 0 : index
    %c0_2 = arith.constant 0 : index
    %1 = vector.load %arg3[%c0_1, %c0_2] : memref<1x128xf32, #tpu.memory_space<vmem>>, vector<1x128xf32>
    %c0_3 = arith.constant 0 : index
    %c0_4 = arith.constant 0 : index
    %c0_5 = arith.constant 0 : index
    %c0_6 = arith.constant 0 : index
    %2 = vector.load %arg1[%c0_3, %c0_4, %c0_5, %c0_6] : memref<4x1x25x3200xbf16, #tpu.memory_space<vmem>>, vector<1x1x25x3200xbf16>
    %3 = vector.shape_cast %2 : vector<1x1x25x3200xbf16> to vector<25x3200xbf16>
    %cst = arith.constant dense<0.000000e+00> : vector<25x128xf32>
    %4 = tpu.matmul %3, %0, %cst {dimension_numbers = #tpu.dot_dimension_numbers<[1], [0], [0], [1], [0, 0, 1, 1], [], []>} : vector<25x3200xbf16>, vector<3200x128xbf16>, vector<25x128xf32> -> vector<25x128xf32>
    %5 = vector.broadcast %1 : vector<1x128xf32> to vector<25x128xf32>
    %6 = arith.addf %4, %5 : vector<25x128xf32>
    %cst_7 = arith.constant 0.000000e+00 : f32
    %7 = vector.broadcast %cst_7 : f32 to vector<25x128xf32>
    %8 = arith.maximumf %6, %7 : vector<25x128xf32>
    %c1 = arith.constant 1 : index
    %c0_8 = arith.constant 0 : index
    %c0_9 = arith.constant 0 : index
    %c0_10 = arith.constant 0 : index
    %9 = vector.load %arg1[%c1, %c0_8, %c0_9, %c0_10] : memref<4x1x25x3200xbf16, #tpu.memory_space<vmem>>, vector<1x1x25x3200xbf16>
    %10 = vector.shape_cast %9 : vector<1x1x25x3200xbf16> to vector<25x3200xbf16>
    %cst_11 = arith.constant dense<0.000000e+00> : vector<25x128xf32>
    %11 = tpu.matmul %10, %0, %cst_11 {dimension_numbers = #tpu.dot_dimension_numbers<[1], [0], [0], [1], [0, 0, 1, 1], [], []>} : vector<25x3200xbf16>, vector<3200x128xbf16>, vector<25x128xf32> -> vector<25x128xf32>
    %12 = vector.broadcast %1 : vector<1x128xf32> to vector<25x128xf32>
    %13 = arith.addf %11, %12 : vector<25x128xf32>
    %cst_12 = arith.constant 0.000000e+00 : f32
    %14 = vector.broadcast %cst_12 : f32 to vector<25x128xf32>
    %15 = arith.maximumf %13, %14 : vector<25x128xf32>
    %16 = arith.maximumf %8, %15 : vector<25x128xf32>
    %c2 = arith.constant 2 : index
    %c0_13 = arith.constant 0 : index
    %c0_14 = arith.constant 0 : index
    %c0_15 = arith.constant 0 : index
    %17 = vector.load %arg1[%c2, %c0_13, %c0_14, %c0_15] : memref<4x1x25x3200xbf16, #tpu.memory_space<vmem>>, vector<1x1x25x3200xbf16>
    %18 = vector.shape_cast %17 : vector<1x1x25x3200xbf16> to vector<25x3200xbf16>
    %cst_16 = arith.constant dense<0.000000e+00> : vector<25x128xf32>
    %19 = tpu.matmul %18, %0, %cst_16 {dimension_numbers = #tpu.dot_dimension_numbers<[1], [0], [0], [1], [0, 0, 1, 1], [], []>} : vector<25x3200xbf16>, vector<3200x128xbf16>, vector<25x128xf32> -> vector<25x128xf32>
    %20 = vector.broadcast %1 : vector<1x128xf32> to vector<25x128xf32>
    %21 = arith.addf %19, %20 : vector<25x128xf32>
    %cst_17 = arith.constant 0.000000e+00 : f32
    %22 = vector.broadcast %cst_17 : f32 to vector<25x128xf32>
    %23 = arith.maximumf %21, %22 : vector<25x128xf32>
    %24 = arith.maximumf %16, %23 : vector<25x128xf32>
    %c3 = arith.constant 3 : index
    %c0_18 = arith.constant 0 : index
    %c0_19 = arith.constant 0 : index
    %c0_20 = arith.constant 0 : index
    %25 = vector.load %arg1[%c3, %c0_18, %c0_19, %c0_20] : memref<4x1x25x3200xbf16, #tpu.memory_space<vmem>>, vector<1x1x25x3200xbf16>
    %26 = vector.shape_cast %25 : vector<1x1x25x3200xbf16> to vector<25x3200xbf16>
    %cst_21 = arith.constant dense<0.000000e+00> : vector<25x128xf32>
    %27 = tpu.matmul %26, %0, %cst_21 {dimension_numbers = #tpu.dot_dimension_numbers<[1], [0], [0], [1], [0, 0, 1, 1], [], []>} : vector<25x3200xbf16>, vector<3200x128xbf16>, vector<25x128xf32> -> vector<25x128xf32>
    %28 = vector.broadcast %1 : vector<1x128xf32> to vector<25x128xf32>
    %29 = arith.addf %27, %28 : vector<25x128xf32>
    %cst_22 = arith.constant 0.000000e+00 : f32
    %30 = vector.broadcast %cst_22 : f32 to vector<25x128xf32>
    %31 = arith.maximumf %29, %30 : vector<25x128xf32>
    %32 = arith.maximumf %24, %31 : vector<25x128xf32>
    %33 = arith.truncf %32 : vector<25x128xf32> to vector<25x128xbf16>
    %c0_23 = arith.constant 0 : index
    %c0_24 = arith.constant 0 : index
    %c0_25 = arith.constant 0 : index
    %34 = vector.load %arg4[%c0_23, %c0_24, %c0_25] : memref<1x25x128xbf16, #tpu.memory_space<vmem>>, vector<1x25x128xbf16>
    %35 = vector.shape_cast %34 : vector<1x25x128xbf16> to vector<25x128xbf16>
    %36 = vector.shape_cast %33 : vector<25x128xbf16> to vector<1x25x128xbf16>
    tpu.vector_store %arg4[%c0_23, %c0_24, %c0_25], %36 {strides = array<i32>} : memref<1x25x128xbf16, #tpu.memory_space<vmem>>, vector<1x25x128xbf16>,
    return
  }
  func.func @transform_0(%arg0: i32) -> (i32, i32, i32, i32) {
    %c0_i32 = arith.constant 0 : i32
    %c0_i32_0 = arith.constant 0 : i32
    %c0_i32_1 = arith.constant 0 : i32
    %c0_i32_2 = arith.constant 0 : i32
    return %c0_i32, %arg0, %c0_i32_0, %c0_i32_1 : i32, i32, i32, i32
  }
  func.func @transform_1(%arg0: i32) -> (i32, i32) {
    %c0_i32 = arith.constant 0 : i32
    %c0_i32_0 = arith.constant 0 : i32
    %c0_i32_1 = arith.constant 0 : i32
    return %c0_i32, %c0_i32_0 : i32, i32
  }
  func.func @transform_2(%arg0: i32) -> (i32, i32) {
    %c0_i32 = arith.constant 0 : i32
    %c0_i32_0 = arith.constant 0 : i32
    %c0_i32_1 = arith.constant 0 : i32
    return %c0_i32, %c0_i32_0 : i32, i32
  }
  func.func @transform_3(%arg0: i32) -> (i32, i32, i32) {
    %c0_i32 = arith.constant 0 : i32
    %c0_i32_0 = arith.constant 0 : i32
    %c0_i32_1 = arith.constant 0 : i32
    return %arg0, %c0_i32, %c0_i32_0 : i32, i32, i32
  }
}

module attributes {stable_mosaic.version = 11 : i64} {
  func.func @_fc_head_kernel(%arg0: memref<2x3200xbf16, #tpu.memory_space<vmem>>, %arg1: memref<3200x128xbf16, #tpu.memory_space<vmem>>, %arg2: memref<1x128xf32, #tpu.memory_space<vmem>>, %arg3: memref<128x128xbf16, #tpu.memory_space<vmem>>, %arg4: memref<1x128xf32, #tpu.memory_space<vmem>>, %arg5: memref<128x128xbf16, #tpu.memory_space<vmem>>, %arg6: memref<1x128xf32, #tpu.memory_space<vmem>>, %arg7: memref<2x128xf32, #tpu.memory_space<vmem>>) attributes {dimension_semantics = [], scalar_prefetch = 0 : i64, scratch_operands = 0 : i64, tpu.core_type = #tpu.core_type<tc>} {
    %c0 = arith.constant 0 : index
    %c0_0 = arith.constant 0 : index
    %0 = vector.load %arg0[%c0, %c0_0] : memref<2x3200xbf16, #tpu.memory_space<vmem>>, vector<2x3200xbf16>
    %c0_1 = arith.constant 0 : index
    %c0_2 = arith.constant 0 : index
    %1 = vector.load %arg1[%c0_1, %c0_2] : memref<3200x128xbf16, #tpu.memory_space<vmem>>, vector<3200x128xbf16>
    %cst = arith.constant dense<0.000000e+00> : vector<2x128xf32>
    %2 = tpu.matmul %0, %1, %cst {dimension_numbers = #tpu.dot_dimension_numbers<[1], [0], [0], [1], [0, 0, 1, 1], [], []>} : vector<2x3200xbf16>, vector<3200x128xbf16>, vector<2x128xf32> -> vector<2x128xf32>
    %c0_3 = arith.constant 0 : index
    %c0_4 = arith.constant 0 : index
    %3 = vector.load %arg2[%c0_3, %c0_4] : memref<1x128xf32, #tpu.memory_space<vmem>>, vector<1x128xf32>
    %4 = vector.broadcast %3 : vector<1x128xf32> to vector<2x128xf32>
    %5 = arith.addf %2, %4 : vector<2x128xf32>
    %cst_5 = arith.constant 0.000000e+00 : f32
    %6 = vector.broadcast %cst_5 : f32 to vector<2x128xf32>
    %7 = arith.maximumf %5, %6 : vector<2x128xf32>
    %8 = arith.truncf %7 : vector<2x128xf32> to vector<2x128xbf16>
    %c0_6 = arith.constant 0 : index
    %c0_7 = arith.constant 0 : index
    %9 = vector.load %arg3[%c0_6, %c0_7] : memref<128x128xbf16, #tpu.memory_space<vmem>>, vector<128x128xbf16>
    %cst_8 = arith.constant dense<0.000000e+00> : vector<2x128xf32>
    %10 = tpu.matmul %8, %9, %cst_8 {dimension_numbers = #tpu.dot_dimension_numbers<[1], [0], [0], [1], [0, 0, 1, 1], [], []>} : vector<2x128xbf16>, vector<128x128xbf16>, vector<2x128xf32> -> vector<2x128xf32>
    %c0_9 = arith.constant 0 : index
    %c0_10 = arith.constant 0 : index
    %11 = vector.load %arg4[%c0_9, %c0_10] : memref<1x128xf32, #tpu.memory_space<vmem>>, vector<1x128xf32>
    %12 = vector.broadcast %11 : vector<1x128xf32> to vector<2x128xf32>
    %13 = arith.addf %10, %12 : vector<2x128xf32>
    %cst_11 = arith.constant 0.000000e+00 : f32
    %14 = vector.broadcast %cst_11 : f32 to vector<2x128xf32>
    %15 = arith.maximumf %13, %14 : vector<2x128xf32>
    %16 = arith.truncf %15 : vector<2x128xf32> to vector<2x128xbf16>
    %c0_12 = arith.constant 0 : index
    %c0_13 = arith.constant 0 : index
    %17 = vector.load %arg5[%c0_12, %c0_13] : memref<128x128xbf16, #tpu.memory_space<vmem>>, vector<128x128xbf16>
    %cst_14 = arith.constant dense<0.000000e+00> : vector<2x128xf32>
    %18 = tpu.matmul %16, %17, %cst_14 {dimension_numbers = #tpu.dot_dimension_numbers<[1], [0], [0], [1], [0, 0, 1, 1], [], []>} : vector<2x128xbf16>, vector<128x128xbf16>, vector<2x128xf32> -> vector<2x128xf32>
    %c0_15 = arith.constant 0 : index
    %c0_16 = arith.constant 0 : index
    %19 = vector.load %arg6[%c0_15, %c0_16] : memref<1x128xf32, #tpu.memory_space<vmem>>, vector<1x128xf32>
    %20 = vector.broadcast %19 : vector<1x128xf32> to vector<2x128xf32>
    %21 = arith.addf %18, %20 : vector<2x128xf32>
    %c0_17 = arith.constant 0 : index
    %c0_18 = arith.constant 0 : index
    %22 = vector.load %arg7[%c0_17, %c0_18] : memref<2x128xf32, #tpu.memory_space<vmem>>, vector<2x128xf32>
    tpu.vector_store %arg7[%c0_17, %c0_18], %21 {strides = array<i32>} : memref<2x128xf32, #tpu.memory_space<vmem>>, vector<2x128xf32>,
    return
  }
}

</mosaic_0001>

<bundles_post_ra>
// kernel: convnet_forward.3
= control target key start
LH: loop header
LB: loop body
LE: loop exit
PB: predicated region body
PF: predicated region fallthrough
CT: control target
= control target key end

     0   :  { %s2851_s12 = smov 0   ;;  %s2853_s13 = smov 0   ;;  %s3453_s0 = inlined_call_operand.vmem [shape: bf16[4,2,196,75], index: 0, kind: input, shape index: {}]   ;;  %s3454_s1 = inlined_call_operand.vmem [shape: bf16[75,128], index: 1, kind: input, shape index: {}]   ;;  %s3455_s2 = inlined_call_operand.vmem [shape: f32[1,128], index: 2, kind: input, shape index: {}]   ;;  %s3456_s3 = inlined_call_operand.vmem [shape: bf16[2,196,128], index: 3, kind: output, shape index: {}]  }
   0x1   :  { %s2855_s14 = smov 0  }
   0x2 LB: > { %s2081_s15 = sadd.s32 4294967295, %s2826_s14   ;;  %s2868_s16 = sadd.s32 1, %s2826_s14   ;;  %s2826_s14 = sphi %s2855_s14, %s3459_s14   ;;  %s2822_s13 = sphi %s2853_s13, %s3458_s13   ;;  %s2818_s12 = sphi %s2851_s12, %s3457_s12  }
   0x3   : > { %s17_s17 = ssub.s32 %s2826_s14, %s2868_s16  ;;  %s20_s18 = sadd.s32 1, %s2822_s13 }
   0x4   : > { %p18_p0 = scmp.eq.s32.totalorder %s17_s17, 0  ;;  %p27_p1 = scmp.ne.s32.totalorder %s2822_s13, %s2818_s12 }
   0x5   : > { %p28_p2 = scmp.eq.s32.totalorder %s2826_s14, 0  ;;  %p2084_p4 = scmp.ge.s32.totalorder %s2826_s14, 2 }
   0x6   : > { %s2877_s19 = scalar_select %p18_p0, %s2822_s13, %s20_s18  }
   0x7   : > { %p29_p3 = por %p28_p2, %p27_p1  ;;  %127 = sbr.rel (%p2084_p4) target bundleno = 45 (0x2d), region = 24 }
   0xe   : > { %130 = sbr.rel (!%p29_p3) target bundleno = 45 (0x2d), region = 28  ;;  %s132_s20 = sand.u32 (%p29_p3), 1, %s2822_s13  }
   0xf   : > { %s2717_s21 = smul.u32 (%p29_p3), 100, %s2826_s14 }
  0x10   : > { %s2716_s22 = smul.u32 (%p29_p3), 400, %s132_s20 }
  0x11   : > { %s2885_s25 = scalar_lea.vmem (%p29_p3), %s3453_s0, %s2717_s21 }
  0x12   : > { %v153_v0 = vld [vmem:[%s2885_s25] sm:$0xff] (%p29_p3)   ;;  %v157_v1 = vld [vmem:[%s2885_s25 + $0x8] sm:$0xff] (%p29_p3)   ;;  %v161_v2 = vld [vmem:[%s2885_s25 + $0x10] sm:$0xff] (%p29_p3)   ;;  %s2890_s26 = scalar_lea.vmem (%p29_p3), [#allocation2], %s2716_s22 }
  0x13   : > { %154 = vst [vmem:[%s2890_s26] sm:$0xff] (%p29_p3), %v153_v0   ;;  %158 = vst [vmem:[%s2890_s26 + $0x8] sm:$0xff] (%p29_p3), %v157_v1   ;;  %v165_v3 = vld [vmem:[%s2885_s25 + $0x18] sm:$0xff] (%p29_p3)   ;;  %v169_v4 = vld [vmem:[%s2885_s25 + $0x20] sm:$0xff] (%p29_p3)  }
  0x14   : > { %162 = vst [vmem:[%s2890_s26 + $0x10] sm:$0xff] (%p29_p3), %v161_v2   ;;  %v173_v5 = vld [vmem:[%s2885_s25 + $0x28] sm:$0xff] (%p29_p3)   ;;  %166 = vst [vmem:[%s2890_s26 + $0x18] sm:$0xff] (%p29_p3), %v165_v3   ;;  %v177_v6 = vld [vmem:[%s2885_s25 + $0x30] sm:$0xff] (%p29_p3)  }
  0x15   : > { %170 = vst [vmem:[%s2890_s26 + $0x20] sm:$0xff] %v169_v4   ;;  %174 = vst [vmem:[%s2890_s26 + $0x28] sm:$0xff] %v173_v5   ;;  %v181_v7 = vld [vmem:[%s2885_s25 + $0x38] sm:$0xff]   ;;  %v185_v8 = vld [vmem:[%s2885_s25 + $0x40] sm:$0xff]  }
  0x16   : > { %178 = vst [vmem:[%s2890_s26 + $0x30] sm:$0xff] %v177_v6   ;;  %182 = vst [vmem:[%s2890_s26 + $0x38] sm:$0xff] %v181_v7   ;;  %v189_v9 = vld [vmem:[%s2885_s25 + $0x48] sm:$0xff]   ;;  %v193_v10 = vld [vmem:[%s2885_s25 + $0x50] sm:$0xff]  }
  0x17   : > { %186 = vst [vmem:[%s2890_s26 + $0x40] sm:$0xff] %v185_v8   ;;  %v197_v11 = vld [vmem:[%s2885_s25 + $0x58] sm:$0xff]   ;;  %190 = vst [vmem:[%s2890_s26 + $0x48] sm:$0xff] %v189_v9   ;;  %v201_v12 = vld [vmem:[%s2885_s25 + $0x60] sm:$0xf] }
  0x18   : > { %194 = vst [vmem:[%s2890_s26 + $0x50] sm:$0xff] %v193_v10   ;;  %198 = vst [vmem:[%s2890_s26 + $0x58] sm:$0xff] %v197_v11   ;;  %v203_v13 = vld [vmem:[%s2885_s25 + $0xc8] sm:$0xff]   ;;  %v207_v14 = vld [vmem:[%s2885_s25 + $0xd0] sm:$0xff]  }
  0x19   : > { %202 = vst [vmem:[%s2890_s26 + $0x60] sm:$0xf] %v201_v12  ;;  %204 = vst [vmem:[%s2890_s26 + $0x64] sm:$0xff] %v203_v13   ;;  %v211_v15 = vld [vmem:[%s2885_s25 + $0xd8] sm:$0xff]   ;;  %v215_v16 = vld [vmem:[%s2885_s25 + $0xe0] sm:$0xff]  }
  0x1a   : > { %208 = vst [vmem:[%s2890_s26 + $0x6c] sm:$0xff] %v207_v14   ;;  %v219_v17 = vld [vmem:[%s2885_s25 + $0xe8] sm:$0xff]   ;;  %212 = vst [vmem:[%s2890_s26 + $0x74] sm:$0xff] %v211_v15   ;;  %v223_v18 = vld [vmem:[%s2885_s25 + $0xf0] sm:$0xff]  }
  0x1b   : > { %216 = vst [vmem:[%s2890_s26 + $0x7c] sm:$0xff] %v215_v16   ;;  %220 = vst [vmem:[%s2890_s26 + $0x84] sm:$0xff] %v219_v17   ;;  %v227_v19 = vld [vmem:[%s2885_s25 + $0xf8] sm:$0xff]   ;;  %v231_v20 = vld [vmem:[%s2885_s25 + $0x100] sm:$0xff]  }
  0x1c   : > { %224 = vst [vmem:[%s2890_s26 + $0x8c] sm:$0xff] %v223_v18   ;;  %228 = vst [vmem:[%s2890_s26 + $0x94] sm:$0xff] %v227_v19   ;;  %v235_v21 = vld [vmem:[%s2885_s25 + $0x108] sm:$0xff]   ;;  %v239_v22 = vld [vmem:[%s2885_s25 + $0x110] sm:$0xff]  }
  0x1d   : > { %232 = vst [vmem:[%s2890_s26 + $0x9c] sm:$0xff] %v231_v20   ;;  %v243_v23 = vld [vmem:[%s2885_s25 + $0x118] sm:$0xff]   ;;  %236 = vst [vmem:[%s2890_s26 + $0xa4] sm:$0xff] %v235_v21   ;;  %v247_v24 = vld [vmem:[%s2885_s25 + $0x120] sm:$0xff]  }
  0x1e   : > { %240 = vst [vmem:[%s2890_s26 + $0xac] sm:$0xff] %v239_v22   ;;  %244 = vst [vmem:[%s2890_s26 + $0xb4] sm:$0xff] %v243_v23   ;;  %v251_v25 = vld [vmem:[%s2885_s25 + $0x128] sm:$0xf]  ;;  %v253_v26 = vld [vmem:[%s2885_s25 + $0x190] sm:$0xff]  }
  0x1f   : > { %248 = vst [vmem:[%s2890_s26 + $0xbc] sm:$0xff] %v247_v24   ;;  %252 = vst [vmem:[%s2890_s26 + $0xc4] sm:$0xf] %v251_v25  ;;  %v257_v27 = vld [vmem:[%s2885_s25 + $0x198] sm:$0xff]   ;;  %v261_v28 = vld [vmem:[%s2885_s25 + $0x1a0] sm:$0xff]  }
  0x20   : > { %254 = vst [vmem:[%s2890_s26 + $0xc8] sm:$0xff] %v253_v26   ;;  %v265_v29 = vld [vmem:[%s2885_s25 + $0x1a8] sm:$0xff]   ;;  %258 = vst [vmem:[%s2890_s26 + $0xd0] sm:$0xff] %v257_v27   ;;  %v269_v30 = vld [vmem:[%s2885_s25 + $0x1b0] sm:$0xff]  }
  0x21   : > { %262 = vst [vmem:[%s2890_s26 + $0xd8] sm:$0xff] %v261_v28   ;;  %266 = vst [vmem:[%s2890_s26 + $0xe0] sm:$0xff] %v265_v29   ;;  %v273_v31 = vld [vmem:[%s2885_s25 + $0x1b8] sm:$0xff]   ;;  %v277_v32 = vld [vmem:[%s2885_s25 + $0x1c0] sm:$0xff]  }
  0x22   : > { %270 = vst [vmem:[%s2890_s26 + $0xe8] sm:$0xff] %v269_v30   ;;  %274 = vst [vmem:[%s2890_s26 + $0xf0] sm:$0xff] %v273_v31   ;;  %v281_v33 = vld [vmem:[%s2885_s25 + $0x1c8] sm:$0xff]   ;;  %v285_v34 = vld [vmem:[%s2885_s25 + $0x1d0] sm:$0xff]  }
  0x23   : > { %278 = vst [vmem:[%s2890_s26 + $0xf8] sm:$0xff] %v277_v32   ;;  %v289_v35 = vld [vmem:[%s2885_s25 + $0x1d8] sm:$0xff]   ;;  %282 = vst [vmem:[%s2890_s26 + $0x100] sm:$0xff] %v281_v33   ;;  %v293_v36 = vld [vmem:[%s2885_s25 + $0x1e0] sm:$0xff]  }
  0x24   : > { %286 = vst [vmem:[%s2890_s26 + $0x108] sm:$0xff] %v285_v34   ;;  %290 = vst [vmem:[%s2890_s26 + $0x110] sm:$0xff] %v289_v35   ;;  %v297_v37 = vld [vmem:[%s2885_s25 + $0x1e8] sm:$0xff]   ;;  %v301_v38 = vld [vmem:[%s2885_s25 + $0x1f0] sm:$0xf] }
  0x25   : > { %294 = vst [vmem:[%s2890_s26 + $0x118] sm:$0xff] %v293_v36   ;;  %298 = vst [vmem:[%s2890_s26 + $0x120] sm:$0xff] %v297_v37   ;;  %v303_v39 = vld [vmem:[%s2885_s25 + $0x258] sm:$0xff]   ;;  %v307_v40 = vld [vmem:[%s2885_s25 + $0x260] sm:$0xff]  }
  0x26   : > { %302 = vst [vmem:[%s2890_s26 + $0x128] sm:$0xf] %v301_v38  ;;  %v311_v41 = vld [vmem:[%s2885_s25 + $0x268] sm:$0xff]   ;;  %304 = vst [vmem:[%s2890_s26 + $0x12c] sm:$0xff] %v303_v39   ;;  %v315_v42 = vld [vmem:[%s2885_s25 + $0x270] sm:$0xff]  }
  0x27   : > { %308 = vst [vmem:[%s2890_s26 + $0x134] sm:$0xff] %v307_v40   ;;  %312 = vst [vmem:[%s2890_s26 + $0x13c] sm:$0xff] %v311_v41   ;;  %v319_v43 = vld [vmem:[%s2885_s25 + $0x278] sm:$0xff]   ;;  %v323_v44 = vld [vmem:[%s2885_s25 + $0x280] sm:$0xff]  }
  0x28   : > { %316 = vst [vmem:[%s2890_s26 + $0x144] sm:$0xff] %v315_v42   ;;  %320 = vst [vmem:[%s2890_s26 + $0x14c] sm:$0xff] %v319_v43   ;;  %v327_v45 = vld [vmem:[%s2885_s25 + $0x288] sm:$0xff]   ;;  %v331_v46 = vld [vmem:[%s2885_s25 + $0x290] sm:$0xff]  }
  0x29   : > { %324 = vst [vmem:[%s2890_s26 + $0x154] sm:$0xff] %v323_v44   ;;  %v335_v47 = vld [vmem:[%s2885_s25 + $0x298] sm:$0xff]   ;;  %328 = vst [vmem:[%s2890_s26 + $0x15c] sm:$0xff] %v327_v45   ;;  %v339_v48 = vld [vmem:[%s2885_s25 + $0x2a0] sm:$0xff]  }
  0x2a   : > { %332 = vst [vmem:[%s2890_s26 + $0x164] sm:$0xff] %v331_v46   ;;  %336 = vst [vmem:[%s2890_s26 + $0x16c] sm:$0xff] %v335_v47   ;;  %v343_v49 = vld [vmem:[%s2885_s25 + $0x2a8] sm:$0xff]   ;;  %v347_v50 = vld [vmem:[%s2885_s25 + $0x2b0] sm:$0xff]  }
  0x2b   : > { %340 = vst [vmem:[%s2890_s26 + $0x174] sm:$0xff] %v339_v48   ;;  %344 = vst [vmem:[%s2890_s26 + $0x17c] sm:$0xff] %v343_v49   ;;  %v351_v51 = vld [vmem:[%s2885_s25 + $0x2b8] sm:$0xf] }
  0x2c   : > { %348 = vst [vmem:[%s2890_s26 + $0x184] sm:$0xff] %v347_v50   ;;  %352 = vst [vmem:[%s2890_s26 + $0x18c] sm:$0xf] %v351_v51 }
  0x2d PF: > { %p2086_p5 = scmp.ge.s32.totalorder %s2826_s14, 1  ;;  %p574_p6 = scmp.lt.s32.totalorder %s2826_s14, 3 }
  0x2f   : > { %p575_p7 = pnand %p2086_p5, %p574_p6 }
  0x30   : > { %v2747_v52 = vld [vmem:[%s3454_s1] sm:$0xff] (!%p575_p7)   ;;  %v2828_v53 = vmov (!%p575_p7), 0.0   ;;  %v2748_v54 = vld [vmem:[%s3454_s1 + $0x8] sm:$0xff] (!%p575_p7)   ;;  %vm784_vm0 = vcmask (!%p575_p7), 1044480   ;;  %s581_s4 = sand.u32 (!%p575_p7), 1, %s2818_s12   ;;  %v2749_v55 = vld [vmem:[%s3454_s1 + $0x10] sm:$0xff] (!%p575_p7)  }
  0x31   : > { %578 = sbr.rel (%p575_p7) target bundleno = 492 (0x1ec), region = 69  ;;  %2468 = vmatprep.subr.bf16.mxu0 (!%p575_p7), %v2828_v53  ;;  %2530 = vmatprep.subr.bf16.mxu1 (!%p575_p7), %v2828_v53  ;;  %vm785_vm1 = vcmask (!%p575_p7), 1045504   ;;  %v2829_v56 = vmov (!%p575_p7), 65535   ;;  %vm2830_vm2 = vmmov (!%p575_p7), 0   ;;  %v2750_v58 = vld [vmem:[%s3454_s1 + $0x18] sm:$0xff] (!%p575_p7)   ;;  %vm744_vm3 = vcmask (!%p575_p7), 613376  }
  0x32   : > { %2469 = vmatpush3.bf16.msra.mxu0 (!%p575_p7), %v2747_v52  ;;  %2531 = vmatpush3.bf16.msra.mxu1 (!%p575_p7), %v2747_v52  ;;  %s2718_s7 = smul.u32 (!%p575_p7), 400, %s581_s4  ;;  %v786_v57 = vsel (!%p575_p7), %vm784_vm0, 4294967295, %v2829_v56  ;;  %v2751_v59 = vld [vmem:[%s3454_s1 + $0x20] sm:$0x3f] (!%p575_p7)   ;;  %p604_p8 = scmp.lt.s32.totalorder (!%p575_p7), %s2081_s15, 1 }
  0x33   : > { %2470 = vmatprep.subr.bf16.mxu0 (!%p575_p7), %v2828_v53  ;;  %2532 = vmatprep.subr.bf16.mxu1 (!%p575_p7), %v2828_v53  ;;  %v787_v60 = vsel (!%p575_p7), %vm785_vm1, %v786_v57, 0  ;;  %v3244_v50 = vld [vmem:[%s3455_s2] ss:$0 sm:$0xff] (!%p575_p7) }
  0x34   : > { %2478 = vmatprep.mubr.msk.bf16.mxu0 (!%p575_p7), %vm2830_vm2, %v2828_v53  ;;  %2540 = vmatprep.mubr.msk.bf16.mxu1 (!%p575_p7), %vm2830_vm2, %v2828_v53  ;;  %s3018_s10 = scalar_lea.vmem (!%p575_p7), [#allocation2], %s2718_s7  ;;  %v789_v61 = vand.u32 (!%p575_p7), %v2751_v59, %v787_v60 }
  0x35   : > { %v2752_v62 = vld [vmem:[%s3018_s10] sm:$0xff] (!%p575_p7)   ;;  %v2754_v0 = vld [vmem:[%s3018_s10 + $0x8] sm:$0xff] (!%p575_p7)   ;;  %v2756_v2 = vld [vmem:[%s3018_s10 + $0x10] sm:$0xff] (!%p575_p7)  }
  0x36   : > { %2471 = vmatpush3.bf16.msra.mxu0 (!%p575_p7), %v2748_v54  ;;  %2533 = vmatpush3.bf16.msra.mxu1 (!%p575_p7), %v2748_v54  ;;  %v2753_v63 = vld [vmem:[%s3018_s10 + $0x64] sm:$0xff] (!%p575_p7)   ;;  %v2755_v1 = vld [vmem:[%s3018_s10 + $0x6c] sm:$0xff] (!%p575_p7)   ;;  %v2757_v3 = vld [vmem:[%s3018_s10 + $0x74] sm:$0xff] (!%p575_p7)  }
  0x37   : > { %2472 = vmatprep.subr.bf16.mxu0 (!%p575_p7), %v2828_v53  ;;  %2534 = vmatprep.subr.bf16.mxu1 (!%p575_p7), %v2828_v53  ;;  %v2758_v4 = vld [vmem:[%s3018_s10 + $0x18] sm:$0xff] (!%p575_p7)   ;;  %v2760_v6 = vld [vmem:[%s3018_s10 + $0x20] sm:$0xff] (!%p575_p7)   ;;  %v2762_v8 = vld [vmem:[%s3018_s10 + $0x28] sm:$0xff] (!%p575_p7)  }
  0x38   : > { %v2759_v5 = vld [vmem:[%s3018_s10 + $0x7c] sm:$0xff]   ;;  %v2761_v7 = vld [vmem:[%s3018_s10 + $0x84] sm:$0xff]   ;;  %v2763_v9 = vld [vmem:[%s3018_s10 + $0x8c] sm:$0xff]   ;;  %s3461_s15 = smov (!%p604_p8, %s2081_s15), 1 }
  0x39   : > { %v2764_v10 = vld [vmem:[%s3018_s10 + $0x30] sm:$0xff]   ;;  %v2766_v12 = vld [vmem:[%s3018_s10 + $0x38] sm:$0xff]   ;;  %v2768_v14 = vld [vmem:[%s3018_s10 + $0x40] sm:$0xff]   ;;  %s2719_s20 = smul.u32 100, %s3461_s15 }
  0x3a   : > { %2473 = vmatpush3.bf16.msra.mxu0 %v2749_v55  ;;  %2535 = vmatpush3.bf16.msra.mxu1 %v2749_v55  ;;  %v2765_v11 = vld [vmem:[%s3018_s10 + $0x94] sm:$0xff]   ;;  %v2767_v13 = vld [vmem:[%s3018_s10 + $0x9c] sm:$0xff]   ;;  %v2769_v15 = vld [vmem:[%s3018_s10 + $0xa4] sm:$0xff]  }
  0x3b   : > { %2474 = vmatprep.subr.bf16.mxu0 %v2828_v53  ;;  %2536 = vmatprep.subr.bf16.mxu1 %v2828_v53  ;;  %v2770_v16 = vld [vmem:[%s3018_s10 + $0x48] sm:$0xff]   ;;  %v2772_v18 = vld [vmem:[%s3018_s10 + $0x50] sm:$0xff]   ;;  %v2774_v20 = vld [vmem:[%s3018_s10 + $0x58] sm:$0xff]   ;;  %s3361_s22 = scalar_lea.vmem %s3456_s3, %s2719_s20 }
  0x3c   : > { %v2771_v17 = vld [vmem:[%s3018_s10 + $0xac] sm:$0xff]   ;;  %v2773_v19 = vld [vmem:[%s3018_s10 + $0xb4] sm:$0xff]   ;;  %v2775_v21 = vld [vmem:[%s3018_s10 + $0xbc] sm:$0xff]  }
  0x3d   : > { %v2776_v22 = vld [vmem:[%s3018_s10 + $0x60] ss:$0 sps:$4 sm:$0x33]   ;;  %v2777_v23 = vld [vmem:[%s3018_s10 + $0xc4] ss:$0 sps:$4 sm:$0x33]  }
  0x3e   : > { %2475 = vmatpush3.bf16.msra.mxu0 %v2750_v58  ;;  %2537 = vmatpush3.bf16.msra.mxu1 %v2750_v58  ;;  %v2778_v24 = vld [vmem:[%s3018_s10 + $0xc8] sm:$0xff]   ;;  %v2780_v26 = vld [vmem:[%s3018_s10 + $0xd0] sm:$0xff]   ;;  %v2782_v28 = vld [vmem:[%s3018_s10 + $0xd8] sm:$0xff]  }
  0x3f   : > { %2476 = vmatprep.subr.bf16.mxu0 %v2828_v53  ;;  %2538 = vmatprep.subr.bf16.mxu1 %v2828_v53  ;;  %v2779_v25 = vld [vmem:[%s3018_s10 + $0x12c] sm:$0xff]   ;;  %v2781_v27 = vld [vmem:[%s3018_s10 + $0x134] sm:$0xff]   ;;  %v2783_v29 = vld [vmem:[%s3018_s10 + $0x13c] sm:$0xff]  }
  0x40   : > { %v2784_v30 = vld [vmem:[%s3018_s10 + $0xe0] sm:$0xff]   ;;  %v2786_v32 = vld [vmem:[%s3018_s10 + $0xe8] sm:$0xff]   ;;  %v2788_v34 = vld [vmem:[%s3018_s10 + $0xf0] sm:$0xff]  }
  0x41   : > { %v2785_v31 = vld [vmem:[%s3018_s10 + $0x144] sm:$0xff]   ;;  %v2787_v33 = vld [vmem:[%s3018_s10 + $0x14c] sm:$0xff]   ;;  %v2789_v35 = vld [vmem:[%s3018_s10 + $0x154] sm:$0xff]  }
  0x42   : > { %2477 = vmatpush3.bf16.msra.mxu0 %v789_v61  ;;  %2539 = vmatpush3.bf16.msra.mxu1 %v789_v61  ;;  %v2790_v36 = vld [vmem:[%s3018_s10 + $0xf8] sm:$0xff]   ;;  %v2792_v38 = vld [vmem:[%s3018_s10 + $0x100] sm:$0xff]   ;;  %v2794_v40 = vld [vmem:[%s3018_s10 + $0x108] sm:$0xff]  }
  0x43   : > { %2592 = vmatprep.subr.bf16.mxu0 %v2828_v53  ;;  %2654 = vmatprep.subr.bf16.mxu1 %v2828_v53  ;;  %v2791_v37 = vld [vmem:[%s3018_s10 + $0x15c] sm:$0xff]   ;;  %v2793_v39 = vld [vmem:[%s3018_s10 + $0x164] sm:$0xff]   ;;  %v2795_v41 = vld [vmem:[%s3018_s10 + $0x16c] sm:$0xff]  }
  0x44   : > { %v2796_v42 = vld [vmem:[%s3018_s10 + $0x110] sm:$0xff]   ;;  %v2798_v44 = vld [vmem:[%s3018_s10 + $0x118] sm:$0xff]   ;;  %v2800_v46 = vld [vmem:[%s3018_s10 + $0x120] sm:$0xff]  }
  0x45   : > { %2479 = vmatmul.mubr.msk.bf16.vlgmr.msra.gmra.mrb[0].mxu0 %vm744_vm3, %v2752_v62  ;;  %2541 = vmatmul.mubr.msk.bf16.vlgmr.msra.gmra.mrb[0].mxu1 %vm744_vm3, %v2753_v63  ;;  %v2797_v43 = vld [vmem:[%s3018_s10 + $0x174] sm:$0xff]   ;;  %v2799_v45 = vld [vmem:[%s3018_s10 + $0x17c] sm:$0xff]   ;;  %v2801_v47 = vld [vmem:[%s3018_s10 + $0x184] sm:$0xff]  }
  0x46   : > { %2593 = vmatpush3.bf16.msra.mxu0 %v2747_v52  ;;  %2655 = vmatpush3.bf16.msra.mxu1 %v2747_v52  ;;  %v2802_v48 = vld [vmem:[%s3018_s10 + $0x128] ss:$0 sps:$4 sm:$0x33]   ;;  %v2803_v49 = vld [vmem:[%s3018_s10 + $0x18c] ss:$0 sps:$4 sm:$0x33]  }
  0x47   : > { %2482 = vmatprep.mubr.msk.bf16.mxu0 %vm2830_vm2, %v2828_v53  ;;  %2544 = vmatprep.mubr.msk.bf16.mxu1 %vm2830_vm2, %v2828_v53 }
  0x48   : > { %2594 = vmatprep.subr.bf16.mxu0 %v2828_v53  ;;  %2656 = vmatprep.subr.bf16.mxu1 %v2828_v53 }
  0x4a   : > { %2595 = vmatpush3.bf16.msra.mxu0 %v2748_v54  ;;  %2657 = vmatpush3.bf16.msra.mxu1 %v2748_v54 }
  0x4b   : > { %2596 = vmatprep.subr.bf16.mxu0 %v2828_v53  ;;  %2658 = vmatprep.subr.bf16.mxu1 %v2828_v53 }
  0x4d   : > { %2483 = vmatmul.mubr.msk.bf16.gmra.mrb[4].mxu0 %vm744_vm3, %v2754_v0  ;;  %2545 = vmatmul.mubr.msk.bf16.gmra.mrb[4].mxu1 %vm744_vm3, %v2755_v1 }
  0x4e   : > { %2486 = vmatprep.mubr.msk.bf16.mxu0 %vm2830_vm2, %v2828_v53  ;;  %2548 = vmatprep.mubr.msk.bf16.mxu1 %vm2830_vm2, %v2828_v53 }
  0x4f   : > { %2597 = vmatpush3.bf16.msra.mxu0 %v2749_v55  ;;  %2659 = vmatpush3.bf16.msra.mxu1 %v2749_v55 }
  0x50   : > { %2598 = vmatprep.subr.bf16.mxu0 %v2828_v53  ;;  %2660 = vmatprep.subr.bf16.mxu1 %v2828_v53 }
  0x53   : > { %2599 = vmatpush3.bf16.msra.mxu0 %v2750_v58  ;;  %2661 = vmatpush3.bf16.msra.mxu1 %v2750_v58 }
  0x54   : > { %2600 = vmatprep.subr.bf16.mxu0 %v2828_v53  ;;  %2662 = vmatprep.subr.bf16.mxu1 %v2828_v53 }
  0x55   : > { %2487 = vmatmul.mubr.msk.bf16.gmra.mrb[8].mxu0 %vm744_vm3, %v2756_v2  ;;  %2549 = vmatmul.mubr.msk.bf16.gmra.mrb[8].mxu1 %vm744_vm3, %v2757_v3 }
  0x56   : > { %2490 = vmatprep.mubr.msk.bf16.mxu0 %vm2830_vm2, %v2828_v53  ;;  %2552 = vmatprep.mubr.msk.bf16.mxu1 %vm2830_vm2, %v2828_v53 }
  0x57   : > { %2601 = vmatpush3.bf16.msra.mxu0 %v789_v61  ;;  %2663 = vmatpush3.bf16.msra.mxu1 %v789_v61 }
  0x5d   : > { %2491 = vmatmul.mubr.msk.bf16.gmra.mrb[12].mxu0 %vm744_vm3, %v2758_v4  ;;  %2553 = vmatmul.mubr.msk.bf16.gmra.mrb[12].mxu1 %vm744_vm3, %v2759_v5 }
  0x5e   : > { %2494 = vmatprep.mubr.msk.bf16.mxu0 %vm2830_vm2, %v2828_v53  ;;  %2556 = vmatprep.mubr.msk.bf16.mxu1 %vm2830_vm2, %v2828_v53 }
  0x65   : > { %2495 = vmatmul.mubr.msk.bf16.gmra.mrb[16].mxu0 %vm744_vm3, %v2760_v6  ;;  %2557 = vmatmul.mubr.msk.bf16.gmra.mrb[16].mxu1 %vm744_vm3, %v2761_v7 }
  0x66   : > { %2498 = vmatprep.mubr.msk.bf16.mxu0 %vm2830_vm2, %v2828_v53  ;;  %2560 = vmatprep.mubr.msk.bf16.mxu1 %vm2830_vm2, %v2828_v53 }
  0x6d   : > { %2499 = vmatmul.mubr.msk.bf16.gmra.mrb[20].mxu0 %vm744_vm3, %v2762_v8  ;;  %2561 = vmatmul.mubr.msk.bf16.gmra.mrb[20].mxu1 %vm744_vm3, %v2763_v9 }
  0x6e   : > { %2502 = vmatprep.mubr.msk.bf16.mxu0 %vm2830_vm2, %v2828_v53  ;;  %2564 = vmatprep.mubr.msk.bf16.mxu1 %vm2830_vm2, %v2828_v53 }
  0x75   : > { %2503 = vmatmul.mubr.msk.bf16.gmra.mrb[24].mxu0 %vm744_vm3, %v2764_v10  ;;  %2565 = vmatmul.mubr.msk.bf16.gmra.mrb[24].mxu1 %vm744_vm3, %v2765_v11 }
  0x76   : > { %2506 = vmatprep.mubr.msk.bf16.mxu0 %vm2830_vm2, %v2828_v53  ;;  %2568 = vmatprep.mubr.msk.bf16.mxu1 %vm2830_vm2, %v2828_v53 }
  0x7d   : > { %2507 = vmatmul.mubr.msk.bf16.gmra.mrb[28].mxu0 %vm744_vm3, %v2766_v12  ;;  %2569 = vmatmul.mubr.msk.bf16.gmra.mrb[28].mxu1 %vm744_vm3, %v2767_v13 }
  0x7e   : > { %2510 = vmatprep.mubr.msk.bf16.mxu0 %vm2830_vm2, %v2828_v53  ;;  %2572 = vmatprep.mubr.msk.bf16.mxu1 %vm2830_vm2, %v2828_v53 }
  0x85   : > { %2511 = vmatmul.mubr.msk.bf16.gmra.mrb[32].mxu0 %vm744_vm3, %v2768_v14  ;;  %2573 = vmatmul.mubr.msk.bf16.gmra.mrb[32].mxu1 %vm744_vm3, %v2769_v15 }
  0x86   : > { %2514 = vmatprep.mubr.msk.bf16.mxu0 %vm2830_vm2, %v2828_v53  ;;  %2576 = vmatprep.mubr.msk.bf16.mxu1 %vm2830_vm2, %v2828_v53 }
  0x8d   : > { %2515 = vmatmul.mubr.msk.bf16.gmra.mrb[36].mxu0 %vm744_vm3, %v2770_v16  ;;  %2577 = vmatmul.mubr.msk.bf16.gmra.mrb[36].mxu1 %vm744_vm3, %v2771_v17 }
  0x8e   : > { %2518 = vmatprep.mubr.msk.bf16.mxu0 %vm2830_vm2, %v2828_v53  ;;  %2580 = vmatprep.mubr.msk.bf16.mxu1 %vm2830_vm2, %v2828_v53 }
  0x95   : > { %2519 = vmatmul.mubr.msk.bf16.gmra.mrb[40].mxu0 %vm744_vm3, %v2772_v18  ;;  %2581 = vmatmul.mubr.msk.bf16.gmra.mrb[40].mxu1 %vm744_vm3, %v2773_v19 }
  0x96   : > { %2522 = vmatprep.mubr.msk.bf16.mxu0 %vm2830_vm2, %v2828_v53  ;;  %2584 = vmatprep.mubr.msk.bf16.mxu1 %vm2830_vm2, %v2828_v53 }
  0x9d   : > { %2523 = vmatmul.mubr.msk.bf16.gmra.mrb[44].mxu0 %vm744_vm3, %v2774_v20  ;;  %2585 = vmatmul.mubr.msk.bf16.gmra.mrb[44].mxu1 %vm744_vm3, %v2775_v21 }
  0x9e   : > { %2526 = vmatprep.mubr.msk.bf16.mxu0 %vm2830_vm2, %v2828_v53  ;;  %2588 = vmatprep.mubr.msk.bf16.mxu1 %vm2830_vm2, %v2828_v53 }
  0xa5   : > { %2527 = vmatmul.mubr.msk.bf16.gmra.mrb[48].mxu0 %vm744_vm3, %v2776_v22  ;;  %2589 = vmatmul.mubr.msk.bf16.gmra.mrb[48].mxu1 %vm744_vm3, %v2777_v23 }
  0xa6   : > { %2602 = vmatprep.mubr.msk.bf16.mxu0 %vm2830_vm2, %v2828_v53  ;;  %2664 = vmatprep.mubr.msk.bf16.mxu1 %vm2830_vm2, %v2828_v53 }
  0xad   : > { %2603 = vmatmul.mubr.msk.bf16.vlgmr.msra.gmra.mrb[52].mxu0 %vm744_vm3, %v2778_v24  ;;  %2665 = vmatmul.mubr.msk.bf16.vlgmr.msra.gmra.mrb[52].mxu1 %vm744_vm3, %v2779_v25 }
  0xae   : > { %2606 = vmatprep.mubr.msk.bf16.mxu0 %vm2830_vm2, %v2828_v53  ;;  %2668 = vmatprep.mubr.msk.bf16.mxu1 %vm2830_vm2, %v2828_v53 }
  0xb5   : > { %2607 = vmatmul.mubr.msk.bf16.gmra.mrb[56].mxu0 %vm744_vm3, %v2780_v26  ;;  %2669 = vmatmul.mubr.msk.bf16.gmra.mrb[56].mxu1 %vm744_vm3, %v2781_v27 }
  0xb6   : > { %2610 = vmatprep.mubr.msk.bf16.mxu0 %vm2830_vm2, %v2828_v53  ;;  %2672 = vmatprep.mubr.msk.bf16.mxu1 %vm2830_vm2, %v2828_v53 }
  0xbd   : > { %2611 = vmatmul.mubr.msk.bf16.gmra.mrb[60].mxu0 %vm744_vm3, %v2782_v28  ;;  %2673 = vmatmul.mubr.msk.bf16.gmra.mrb[60].mxu1 %vm744_vm3, %v2783_v29 }
  0xbe   : > { %2614 = vmatprep.mubr.msk.bf16.mxu0 %vm2830_vm2, %v2828_v53  ;;  %2676 = vmatprep.mubr.msk.bf16.mxu1 %vm2830_vm2, %v2828_v53 }
  0xc5   : > { %2615 = vmatmul.mubr.msk.bf16.gmra.mrb[64].mxu0 %vm744_vm3, %v2784_v30  ;;  %2677 = vmatmul.mubr.msk.bf16.gmra.mrb[64].mxu1 %vm744_vm3, %v2785_v31 }
  0xc6   : > { %2618 = vmatprep.mubr.msk.bf16.mxu0 %vm2830_vm2, %v2828_v53  ;;  %2680 = vmatprep.mubr.msk.bf16.mxu1 %vm2830_vm2, %v2828_v53 }
  0xcd   : > { %2619 = vmatmul.mubr.msk.bf16.gmra.mrb[68].mxu0 %vm744_vm3, %v2786_v32  ;;  %2681 = vmatmul.mubr.msk.bf16.gmra.mrb[68].mxu1 %vm744_vm3, %v2787_v33 }
  0xce   : > { %2622 = vmatprep.mubr.msk.bf16.mxu0 %vm2830_vm2, %v2828_v53  ;;  %2684 = vmatprep.mubr.msk.bf16.mxu1 %vm2830_vm2, %v2828_v53 }
  0xd5   : > { %2623 = vmatmul.mubr.msk.bf16.gmra.mrb[72].mxu0 %vm744_vm3, %v2788_v34  ;;  %2685 = vmatmul.mubr.msk.bf16.gmra.mrb[72].mxu1 %vm744_vm3, %v2789_v35 }
  0xd6   : > { %2626 = vmatprep.mubr.msk.bf16.mxu0 %vm2830_vm2, %v2828_v53  ;;  %2688 = vmatprep.mubr.msk.bf16.mxu1 %vm2830_vm2, %v2828_v53 }
  0xdd   : > { %2627 = vmatmul.mubr.msk.bf16.gmra.mrb[76].mxu0 %vm744_vm3, %v2790_v36  ;;  %2689 = vmatmul.mubr.msk.bf16.gmra.mrb[76].mxu1 %vm744_vm3, %v2791_v37 }
  0xde   : > { %2630 = vmatprep.mubr.msk.bf16.mxu0 %vm2830_vm2, %v2828_v53  ;;  %2692 = vmatprep.mubr.msk.bf16.mxu1 %vm2830_vm2, %v2828_v53 }
  0xe5   : > { %2631 = vmatmul.mubr.msk.bf16.gmra.mrb[80].mxu0 %vm744_vm3, %v2792_v38  ;;  %2693 = vmatmul.mubr.msk.bf16.gmra.mrb[80].mxu1 %vm744_vm3, %v2793_v39 }
  0xe6   : > { %2634 = vmatprep.mubr.msk.bf16.mxu0 %vm2830_vm2, %v2828_v53  ;;  %2696 = vmatprep.mubr.msk.bf16.mxu1 %vm2830_vm2, %v2828_v53 }
  0xed   : > { %2635 = vmatmul.mubr.msk.bf16.gmra.mrb[84].mxu0 %vm744_vm3, %v2794_v40  ;;  %2697 = vmatmul.mubr.msk.bf16.gmra.mrb[84].mxu1 %vm744_vm3, %v2795_v41 }
  0xee   : > { %2638 = vmatprep.mubr.msk.bf16.mxu0 %vm2830_vm2, %v2828_v53  ;;  %2700 = vmatprep.mubr.msk.bf16.mxu1 %vm2830_vm2, %v2828_v53 }
  0xf5   : > { %2639 = vmatmul.mubr.msk.bf16.gmra.mrb[88].mxu0 %vm744_vm3, %v2796_v42  ;;  %2701 = vmatmul.mubr.msk.bf16.gmra.mrb[88].mxu1 %vm744_vm3, %v2797_v43 }
  0xf6   : > { %2642 = vmatprep.mubr.msk.bf16.mxu0 %vm2830_vm2, %v2828_v53  ;;  %2704 = vmatprep.mubr.msk.bf16.mxu1 %vm2830_vm2, %v2828_v53 }
  0xfd   : > { %2643 = vmatmul.mubr.msk.bf16.gmra.mrb[92].mxu0 %vm744_vm3, %v2798_v44  ;;  %2705 = vmatmul.mubr.msk.bf16.gmra.mrb[92].mxu1 %vm744_vm3, %v2799_v45 }
  0xfe   : > { %2646 = vmatprep.mubr.msk.bf16.mxu0 %vm2830_vm2, %v2828_v53  ;;  %2708 = vmatprep.mubr.msk.bf16.mxu1 %vm2830_vm2, %v2828_v53 }
 0x105   : > { %2647 = vmatmul.mubr.msk.bf16.gmra.mrb[96].mxu0 %vm744_vm3, %v2800_v46  ;;  %2709 = vmatmul.mubr.msk.bf16.gmra.mrb[96].mxu1 %vm744_vm3, %v2801_v47 }
 0x106   : > { %2650 = vmatprep.mubr.msk.bf16.mxu0 %vm2830_vm2, %v2828_v53  ;;  %2712 = vmatprep.mubr.msk.bf16.mxu1 %vm2830_vm2, %v2828_v53 }
 0x10d   : > { %2651 = vmatmul.mubr.msk.bf16.gmra.mrb[100].mxu0 %vm744_vm3, %v2802_v48  ;;  %2713 = vmatmul.mubr.msk.bf16.gmra.mrb[100].mxu1 %vm744_vm3, %v2803_v49 }
 0x118   : > { %v825_v51 = vpop.f32.mrb[0].mxu0  ;;  %v1114_v52 = vpop.f32.mrb[0].mxu1 }
 0x119   : > { %v826_v54 = vadd.f32 %v3244_v50, %v825_v51  ;;  %v1115_v55 = vadd.f32 %v3244_v50, %v1114_v52  ;;  %v2480_v56 = vpop.f32.mrb[1].mxu0  ;;  %v2542_v57 = vpop.f32.mrb[1].mxu1 }
 0x11a   : > { %v828_v53 = vpop.f32.mrb[2].mxu0  ;;  %v1117_v58 = vpop.f32.mrb[2].mxu1 }
 0x11b   : > { %v927_v59 = vmax.f32 %v826_v54, 0.0  ;;  %v1216_v60 = vmax.f32 %v1115_v55, 0.0  ;;  %v829_v61 = vadd.f32 %v3244_v50, %v828_v53  ;;  %v1118_v62 = vadd.f32 %v3244_v50, %v1117_v58  ;;  %v2481_v63 = vpop.f32.mrb[3].mxu0  ;;  %v2543_v0 = vpop.f32.mrb[3].mxu1 }
 0x11d   : > { %v3250_v1 = vmax.f32 %v927_v59, %v1216_v60  ;;  %v928_v2 = vmax.f32 %v829_v61, 0.0  ;;  %v1217_v3 = vmax.f32 %v1118_v62, 0.0 }
 0x11f   : > { %v3252_v4 = vmax.f32 %v928_v2, %v1217_v3 }
 0x120   : > { %v833_v5 = vpop.f32.mrb[4].mxu0  ;;  %v1122_v6 = vpop.f32.mrb[4].mxu1 }
 0x121   : > { %v834_v7 = vadd.f32 %v3244_v50, %v833_v5  ;;  %v1123_v8 = vadd.f32 %v3244_v50, %v1122_v6  ;;  %v2484_v9 = vpop.f32.mrb[5].mxu0  ;;  %v2546_v10 = vpop.f32.mrb[5].mxu1 }
 0x122   : > { %v836_v11 = vpop.f32.mrb[6].mxu0  ;;  %v1125_v12 = vpop.f32.mrb[6].mxu1 }
 0x123   : > { %v929_v13 = vmax.f32 %v834_v7, 0.0  ;;  %v1218_v14 = vmax.f32 %v1123_v8, 0.0  ;;  %v837_v15 = vadd.f32 %v3244_v50, %v836_v11  ;;  %v1126_v16 = vadd.f32 %v3244_v50, %v1125_v12  ;;  %v2485_v17 = vpop.f32.mrb[7].mxu0  ;;  %v2547_v18 = vpop.f32.mrb[7].mxu1 }
 0x125   : > { %v3258_v19 = vmax.f32 %v929_v13, %v1218_v14  ;;  %v930_v20 = vmax.f32 %v837_v15, 0.0  ;;  %v1219_v21 = vmax.f32 %v1126_v16, 0.0 }
 0x127   : > { %v3260_v22 = vmax.f32 %v930_v20, %v1219_v21 }
 0x128   : > { %v841_v23 = vpop.f32.mrb[8].mxu0  ;;  %v1130_v24 = vpop.f32.mrb[8].mxu1 }
 0x129   : > { %v842_v25 = vadd.f32 %v3244_v50, %v841_v23  ;;  %v1131_v26 = vadd.f32 %v3244_v50, %v1130_v24  ;;  %v2488_v27 = vpop.f32.mrb[9].mxu0  ;;  %v2550_v28 = vpop.f32.mrb[9].mxu1 }
 0x12a   : > { %v844_v29 = vpop.f32.mrb[10].mxu0  ;;  %v1133_v30 = vpop.f32.mrb[10].mxu1 }
 0x12b   : > { %v931_v31 = vmax.f32 %v842_v25, 0.0  ;;  %v1220_v32 = vmax.f32 %v1131_v26, 0.0  ;;  %v845_v33 = vadd.f32 %v3244_v50, %v844_v29  ;;  %v1134_v34 = vadd.f32 %v3244_v50, %v1133_v30  ;;  %v2489_v35 = vpop.f32.mrb[11].mxu0  ;;  %v2551_v36 = vpop.f32.mrb[11].mxu1 }
 0x12d   : > { %v3266_v37 = vmax.f32 %v931_v31, %v1220_v32  ;;  %v932_v38 = vmax.f32 %v845_v33, 0.0  ;;  %v1221_v39 = vmax.f32 %v1134_v34, 0.0 }
 0x12f   : > { %v3268_v40 = vmax.f32 %v932_v38, %v1221_v39 }
 0x130   : > { %v849_v41 = vpop.f32.mrb[12].mxu0  ;;  %v1138_v42 = vpop.f32.mrb[12].mxu1 }
 0x131   : > { %v850_v43 = vadd.f32 %v3244_v50, %v849_v41  ;;  %v1139_v44 = vadd.f32 %v3244_v50, %v1138_v42  ;;  %v2492_v45 = vpop.f32.mrb[13].mxu0  ;;  %v2554_v46 = vpop.f32.mrb[13].mxu1 }
 0x132   : > { %v852_v47 = vpop.f32.mrb[14].mxu0  ;;  %v1141_v48 = vpop.f32.mrb[14].mxu1 }
 0x133   : > { %v933_v49 = vmax.f32 %v850_v43, 0.0  ;;  %v1222_v51 = vmax.f32 %v1139_v44, 0.0  ;;  %v853_v52 = vadd.f32 %v3244_v50, %v852_v47  ;;  %v1142_v54 = vadd.f32 %v3244_v50, %v1141_v48  ;;  %v2493_v55 = vpop.f32.mrb[15].mxu0  ;;  %v2555_v56 = vpop.f32.mrb[15].mxu1 }
 0x135   : > { %v3274_v57 = vmax.f32 %v933_v49, %v1222_v51  ;;  %v934_v53 = vmax.f32 %v853_v52, 0.0  ;;  %v1223_v58 = vmax.f32 %v1142_v54, 0.0 }
 0x137   : > { %v3276_v59 = vmax.f32 %v934_v53, %v1223_v58 }
 0x138   : > { %v857_v60 = vpop.f32.mrb[16].mxu0  ;;  %v1146_v61 = vpop.f32.mrb[16].mxu1 }
 0x139   : > { %v858_v62 = vadd.f32 %v3244_v50, %v857_v60  ;;  %v1147_v63 = vadd.f32 %v3244_v50, %v1146_v61  ;;  %v2496_v0 = vpop.f32.mrb[17].mxu0  ;;  %v2558_v2 = vpop.f32.mrb[17].mxu1 }
 0x13a   : > { %v860_v3 = vpop.f32.mrb[18].mxu0  ;;  %v1149_v5 = vpop.f32.mrb[18].mxu1 }
 0x13b   : > { %v935_v6 = vmax.f32 %v858_v62, 0.0  ;;  %v1224_v7 = vmax.f32 %v1147_v63, 0.0  ;;  %v861_v8 = vadd.f32 %v3244_v50, %v860_v3  ;;  %v1150_v9 = vadd.f32 %v3244_v50, %v1149_v5  ;;  %v2497_v10 = vpop.f32.mrb[19].mxu0  ;;  %v2559_v11 = vpop.f32.mrb[19].mxu1 }
 0x13d   : > { %v3282_v12 = vmax.f32 %v935_v6, %v1224_v7  ;;  %v936_v13 = vmax.f32 %v861_v8, 0.0  ;;  %v1225_v14 = vmax.f32 %v1150_v9, 0.0 }
 0x13f   : > { %v3284_v15 = vmax.f32 %v936_v13, %v1225_v14 }
 0x140   : > { %v865_v16 = vpop.f32.mrb[20].mxu0  ;;  %v1154_v17 = vpop.f32.mrb[20].mxu1 }
 0x141   : > { %v866_v18 = vadd.f32 %v3244_v50, %v865_v16  ;;  %v1155_v20 = vadd.f32 %v3244_v50, %v1154_v17  ;;  %v2500_v21 = vpop.f32.mrb[21].mxu0  ;;  %v2562_v23 = vpop.f32.mrb[21].mxu1 }
 0x142   : > { %v868_v24 = vpop.f32.mrb[22].mxu0  ;;  %v1157_v25 = vpop.f32.mrb[22].mxu1 }
 0x143   : > { %v937_v26 = vmax.f32 %v866_v18, 0.0  ;;  %v1226_v27 = vmax.f32 %v1155_v20, 0.0  ;;  %v869_v28 = vadd.f32 %v3244_v50, %v868_v24  ;;  %v1158_v29 = vadd.f32 %v3244_v50, %v1157_v25  ;;  %v2501_v30 = vpop.f32.mrb[23].mxu0  ;;  %v2563_v31 = vpop.f32.mrb[23].mxu1 }
 0x145   : > { %v3290_v32 = vmax.f32 %v937_v26, %v1226_v27  ;;  %v938_v33 = vmax.f32 %v869_v28, 0.0  ;;  %v1227_v34 = vmax.f32 %v1158_v29, 0.0 }
 0x147   : > { %v3292_v35 = vmax.f32 %v938_v33, %v1227_v34 }
 0x148   : > { %v873_v36 = vpop.f32.mrb[24].mxu0  ;;  %v1162_v38 = vpop.f32.mrb[24].mxu1 }
 0x149   : > { %v874_v39 = vadd.f32 %v3244_v50, %v873_v36  ;;  %v1163_v41 = vadd.f32 %v3244_v50, %v1162_v38  ;;  %v2504_v42 = vpop.f32.mrb[25].mxu0  ;;  %v2566_v43 = vpop.f32.mrb[25].mxu1 }
 0x14a   : > { %v876_v44 = vpop.f32.mrb[26].mxu0  ;;  %v1165_v45 = vpop.f32.mrb[26].mxu1 }
 0x14b   : > { %v939_v46 = vmax.f32 %v874_v39, 0.0  ;;  %v1228_v47 = vmax.f32 %v1163_v41, 0.0  ;;  %v877_v48 = vadd.f32 %v3244_v50, %v876_v44  ;;  %v1166_v49 = vadd.f32 %v3244_v50, %v1165_v45  ;;  %v2505_v51 = vpop.f32.mrb[27].mxu0  ;;  %v2567_v52 = vpop.f32.mrb[27].mxu1 }
 0x14d   : > { %v3298_v54 = vmax.f32 %v939_v46, %v1228_v47  ;;  %v940_v55 = vmax.f32 %v877_v48, 0.0  ;;  %v1229_v56 = vmax.f32 %v1166_v49, 0.0 }
 0x14f   : > { %v3300_v53 = vmax.f32 %v940_v55, %v1229_v56 }
 0x150   : > { %v881_v58 = vpop.f32.mrb[28].mxu0  ;;  %v1170_v60 = vpop.f32.mrb[28].mxu1 }
 0x151   : > { %v882_v61 = vadd.f32 %v3244_v50, %v881_v58  ;;  %v1171_v62 = vadd.f32 %v3244_v50, %v1170_v60  ;;  %v2508_v63 = vpop.f32.mrb[29].mxu0  ;;  %v2570_v0 = vpop.f32.mrb[29].mxu1 }
 0x152   : > { %v884_v2 = vpop.f32.mrb[30].mxu0  ;;  %v1173_v3 = vpop.f32.mrb[30].mxu1 }
 0x153   : > { %v941_v5 = vmax.f32 %v882_v61, 0.0  ;;  %v1230_v6 = vmax.f32 %v1171_v62, 0.0  ;;  %v885_v7 = vadd.f32 %v3244_v50, %v884_v2  ;;  %v1174_v8 = vadd.f32 %v3244_v50, %v1173_v3  ;;  %v2509_v9 = vpop.f32.mrb[31].mxu0  ;;  %v2571_v10 = vpop.f32.mrb[31].mxu1 }
 0x155   : > { %v3306_v11 = vmax.f32 %v941_v5, %v1230_v6  ;;  %v942_v13 = vmax.f32 %v885_v7, 0.0  ;;  %v1231_v14 = vmax.f32 %v1174_v8, 0.0 }
 0x157   : > { %v3308_v16 = vmax.f32 %v942_v13, %v1231_v14 }
 0x158   : > { %v889_v17 = vpop.f32.mrb[32].mxu0  ;;  %v1178_v18 = vpop.f32.mrb[32].mxu1 }
 0x159   : > { %v890_v20 = vadd.f32 %v3244_v50, %v889_v17  ;;  %v1179_v21 = vadd.f32 %v3244_v50, %v1178_v18  ;;  %v2512_v23 = vpop.f32.mrb[33].mxu0  ;;  %v2574_v24 = vpop.f32.mrb[33].mxu1 }
 0x15a   : > { %v892_v25 = vpop.f32.mrb[34].mxu0  ;;  %v1181_v26 = vpop.f32.mrb[34].mxu1 }
 0x15b   : > { %v943_v27 = vmax.f32 %v890_v20, 0.0  ;;  %v1232_v28 = vmax.f32 %v1179_v21, 0.0  ;;  %v893_v29 = vadd.f32 %v3244_v50, %v892_v25  ;;  %v1182_v30 = vadd.f32 %v3244_v50, %v1181_v26  ;;  %v2513_v31 = vpop.f32.mrb[35].mxu0  ;;  %v2575_v33 = vpop.f32.mrb[35].mxu1 }
 0x15d   : > { %v3314_v34 = vmax.f32 %v943_v27, %v1232_v28  ;;  %v944_v36 = vmax.f32 %v893_v29, 0.0  ;;  %v1233_v38 = vmax.f32 %v1182_v30, 0.0 }
 0x15f   : > { %v3316_v39 = vmax.f32 %v944_v36, %v1233_v38 }
 0x160   : > { %v897_v41 = vpop.f32.mrb[36].mxu0  ;;  %v1186_v42 = vpop.f32.mrb[36].mxu1 }
 0x161   : > { %v898_v43 = vadd.f32 %v3244_v50, %v897_v41  ;;  %v1187_v44 = vadd.f32 %v3244_v50, %v1186_v42  ;;  %v2516_v45 = vpop.f32.mrb[37].mxu0  ;;  %v2578_v46 = vpop.f32.mrb[37].mxu1 }
 0x162   : > { %v900_v47 = vpop.f32.mrb[38].mxu0  ;;  %v1189_v48 = vpop.f32.mrb[38].mxu1 }
 0x163   : > { %v945_v49 = vmax.f32 %v898_v43, 0.0  ;;  %v1234_v51 = vmax.f32 %v1187_v44, 0.0  ;;  %v901_v52 = vadd.f32 %v3244_v50, %v900_v47  ;;  %v1190_v55 = vadd.f32 %v3244_v50, %v1189_v48  ;;  %v2517_v56 = vpop.f32.mrb[39].mxu0  ;;  %v2579_v58 = vpop.f32.mrb[39].mxu1 }
 0x165   : > { %v3322_v60 = vmax.f32 %v945_v49, %v1234_v51  ;;  %v946_v61 = vmax.f32 %v901_v52, 0.0  ;;  %v1235_v62 = vmax.f32 %v1190_v55, 0.0 }
 0x167   : > { %v3324_v63 = vmax.f32 %v946_v61, %v1235_v62 }
 0x168   : > { %v905_v0 = vpop.f32.mrb[40].mxu0  ;;  %v1194_v2 = vpop.f32.mrb[40].mxu1 }
 0x169   : > { %v906_v3 = vadd.f32 %v3244_v50, %v905_v0  ;;  %v1195_v5 = vadd.f32 %v3244_v50, %v1194_v2  ;;  %v2520_v6 = vpop.f32.mrb[41].mxu0  ;;  %v2582_v7 = vpop.f32.mrb[41].mxu1 }
 0x16a   : > { %v908_v8 = vpop.f32.mrb[42].mxu0  ;;  %v1197_v9 = vpop.f32.mrb[42].mxu1 }
 0x16b   : > { %v947_v10 = vmax.f32 %v906_v3, 0.0  ;;  %v1236_v13 = vmax.f32 %v1195_v5, 0.0  ;;  %v909_v14 = vadd.f32 %v3244_v50, %v908_v8  ;;  %v1198_v17 = vadd.f32 %v3244_v50, %v1197_v9  ;;  %v2521_v18 = vpop.f32.mrb[43].mxu0  ;;  %v2583_v20 = vpop.f32.mrb[43].mxu1 }
 0x16d   : > { %v3330_v21 = vmax.f32 %v947_v10, %v1236_v13  ;;  %v948_v23 = vmax.f32 %v909_v14, 0.0  ;;  %v1237_v24 = vmax.f32 %v1198_v17, 0.0 }
 0x16f   : > { %v3332_v25 = vmax.f32 %v948_v23, %v1237_v24 }
 0x170   : > { %v913_v26 = vpop.f32.mrb[44].mxu0  ;;  %v1202_v27 = vpop.f32.mrb[44].mxu1 }
 0x171   : > { %v914_v28 = vadd.f32 %v3244_v50, %v913_v26  ;;  %v1203_v29 = vadd.f32 %v3244_v50, %v1202_v27  ;;  %v2524_v30 = vpop.f32.mrb[45].mxu0  ;;  %v2586_v31 = vpop.f32.mrb[45].mxu1 }
 0x172   : > { %v916_v33 = vpop.f32.mrb[46].mxu0  ;;  %v1205_v36 = vpop.f32.mrb[46].mxu1 }
 0x173   : > { %v949_v38 = vmax.f32 %v914_v28, 0.0  ;;  %v1238_v41 = vmax.f32 %v1203_v29, 0.0  ;;  %v917_v42 = vadd.f32 %v3244_v50, %v916_v33  ;;  %v1206_v43 = vadd.f32 %v3244_v50, %v1205_v36  ;;  %v2525_v44 = vpop.f32.mrb[47].mxu0  ;;  %v2587_v45 = vpop.f32.mrb[47].mxu1 }
 0x175   : > { %v3338_v46 = vmax.f32 %v949_v38, %v1238_v41  ;;  %v950_v47 = vmax.f32 %v917_v42, 0.0  ;;  %v1239_v48 = vmax.f32 %v1206_v43, 0.0 }
 0x177   : > { %v3340_v49 = vmax.f32 %v950_v47, %v1239_v48 }
 0x178   : > { %v921_v51 = vpop.f32.mrb[48].mxu0  ;;  %v1210_v52 = vpop.f32.mrb[48].mxu1 }
 0x179   : > { %v922_v55 = vadd.f32 %v3244_v50, %v921_v51  ;;  %v1211_v56 = vadd.f32 %v3244_v50, %v1210_v52  ;;  %v2528_v58 = vpop.f32.mrb[49].mxu0  ;;  %v2590_v61 = vpop.f32.mrb[49].mxu1 }
 0x17a   : > { %v924_v62 = vpop.f32.mrb[50].mxu0  ;;  %v1213_v0 = vpop.f32.mrb[50].mxu1 }
 0x17b   : > { %v951_v2 = vmax.f32 %v922_v55, 0.0  ;;  %v1240_v3 = vmax.f32 %v1211_v56, 0.0  ;;  %v2529_v5 = vpop.f32.mrb[51].mxu0  ;;  %v2591_v6 = vpop.f32.mrb[51].mxu1 }
 0x17d   : > { %v3344_v7 = vmax.f32 %v951_v2, %v1240_v3 }
 0x180   : > { %v1428_v8 = vpop.f32.mrb[52].mxu0  ;;  %v1742_v9 = vpop.f32.mrb[52].mxu1 }
 0x181   : > { %v1429_v10 = vadd.f32 %v3244_v50, %v1428_v8  ;;  %v1743_v13 = vadd.f32 %v3244_v50, %v1742_v9  ;;  %v2604_v14 = vpop.f32.mrb[53].mxu0  ;;  %v2666_v17 = vpop.f32.mrb[53].mxu1 }
 0x182   : > { %v1431_v18 = vpop.f32.mrb[54].mxu0  ;;  %v1745_v20 = vpop.f32.mrb[54].mxu1 }
 0x183   : > { %v1530_v23 = vmax.f32 %v1429_v10, 0.0  ;;  %v1844_v24 = vmax.f32 %v1743_v13, 0.0  ;;  %v1432_v26 = vadd.f32 %v3244_v50, %v1431_v18  ;;  %v1746_v27 = vadd.f32 %v3244_v50, %v1745_v20  ;;  %v2605_v28 = vpop.f32.mrb[55].mxu0  ;;  %v2667_v29 = vpop.f32.mrb[55].mxu1 }
 0x185   : > { %v1555_v30 = vmax.f32 %v3250_v1, %v1530_v23  ;;  %v1531_v31 = vmax.f32 %v1432_v26, 0.0  ;;  %v1845_v38 = vmax.f32 %v1746_v27, 0.0 }
 0x187   : > { %v1869_v33 = vmax.f32 %v1555_v30, %v1844_v24  ;;  %v1556_v36 = vmax.f32 %v3252_v4, %v1531_v31 }
 0x188   : > { %v1436_v41 = vpop.f32.mrb[56].mxu0  ;;  %v1750_v42 = vpop.f32.mrb[56].mxu1 }
 0x189   : > { %v1870_v43 = vmax.f32 %v1556_v36, %v1845_v38  ;;  %v1437_v44 = vadd.f32 %v3244_v50, %v1436_v41  ;;  %v1751_v45 = vadd.f32 %v3244_v50, %v1750_v42  ;;  %v2608_v47 = vpop.f32.mrb[57].mxu0  ;;  %v2670_v48 = vpop.f32.mrb[57].mxu1 }
 0x18a   : > { %v1439_v1 = vpop.f32.mrb[58].mxu0  ;;  %v1753_v51 = vpop.f32.mrb[58].mxu1 }
 0x18b   : > { %v2328_v52 = vpack.c.bf16 %v1870_v43, %v1869_v33  ;;  %v1532_v4 = vmax.f32 %v1437_v44, 0.0  ;;  %v1846_v55 = vmax.f32 %v1751_v45, 0.0  ;;  %v1440_v56 = vadd.f32 %v3244_v50, %v1439_v1  ;;  %v2609_v58 = vpop.f32.mrb[59].mxu0  ;;  %v2671_v61 = vpop.f32.mrb[59].mxu1 }
 0x18c   : > { %v1754_v62 = vadd.f32 %v3244_v50, %v1753_v51 }
 0x18d   : > { %2329 = vst [vmem:[%s3361_s22] sm:$0xff] %v2328_v52   ;;  %v1557_v0 = vmax.f32 %v3258_v19, %v1532_v4  ;;  %v1533_v2 = vmax.f32 %v1440_v56, 0.0 }
 0x18e   : > { %v1847_v6 = vmax.f32 %v1754_v62, 0.0 }
 0x18f   : > { %v1871_v3 = vmax.f32 %v1557_v0, %v1846_v55  ;;  %v1558_v5 = vmax.f32 %v3260_v22, %v1533_v2 }
 0x190   : > { %v1444_v8 = vpop.f32.mrb[60].mxu0  ;;  %v1758_v9 = vpop.f32.mrb[60].mxu1 }
 0x191   : > { %v1872_v10 = vmax.f32 %v1558_v5, %v1847_v6  ;;  %v1445_v13 = vadd.f32 %v3244_v50, %v1444_v8  ;;  %v1759_v14 = vadd.f32 %v3244_v50, %v1758_v9  ;;  %v2612_v17 = vpop.f32.mrb[61].mxu0  ;;  %v2674_v18 = vpop.f32.mrb[61].mxu1 }
 0x192   : > { %v1447_v20 = vpop.f32.mrb[62].mxu0  ;;  %v1761_v23 = vpop.f32.mrb[62].mxu1 }
 0x193   : > { %v2333_v24 = vpack.c.bf16 %v1872_v10, %v1871_v3  ;;  %v1534_v26 = vmax.f32 %v1445_v13, 0.0  ;;  %v1848_v19 = vmax.f32 %v1759_v14, 0.0  ;;  %v1448_v27 = vadd.f32 %v3244_v50, %v1447_v20  ;;  %v2613_v28 = vpop.f32.mrb[63].mxu0  ;;  %v2675_v22 = vpop.f32.mrb[63].mxu1 }
 0x194   : > { %v1762_v29 = vadd.f32 %v3244_v50, %v1761_v23 }
 0x195   : > { %2385 = vst [vmem:[%s3361_s22 + $0x8] sm:$0xff] %v2333_v24   ;;  %v1559_v30 = vmax.f32 %v3266_v37, %v1534_v26  ;;  %v1535_v31 = vmax.f32 %v1448_v27, 0.0 }
 0x196   : > { %v1849_v38 = vmax.f32 %v1762_v29, 0.0 }
 0x197   : > { %v1873_v33 = vmax.f32 %v1559_v30, %v1848_v19  ;;  %v1560_v36 = vmax.f32 %v3268_v40, %v1535_v31 }
 0x198   : > { %v1452_v41 = vpop.f32.mrb[64].mxu0  ;;  %v1766_v42 = vpop.f32.mrb[64].mxu1 }
 0x199   : > { %v1874_v43 = vmax.f32 %v1560_v36, %v1849_v38  ;;  %v1453_v44 = vadd.f32 %v3244_v50, %v1452_v41  ;;  %v1767_v45 = vadd.f32 %v3244_v50, %v1766_v42  ;;  %v2616_v47 = vpop.f32.mrb[65].mxu0  ;;  %v2678_v48 = vpop.f32.mrb[65].mxu1 }
 0x19a   : > { %v1455_v1 = vpop.f32.mrb[66].mxu0  ;;  %v1769_v51 = vpop.f32.mrb[66].mxu1 }
 0x19b   : > { %v2338_v52 = vpack.c.bf16 %v1874_v43, %v1873_v33  ;;  %v1536_v4 = vmax.f32 %v1453_v44, 0.0  ;;  %v1850_v37 = vmax.f32 %v1767_v45, 0.0  ;;  %v1456_v55 = vadd.f32 %v3244_v50, %v1455_v1  ;;  %v2617_v56 = vpop.f32.mrb[67].mxu0  ;;  %v2679_v40 = vpop.f32.mrb[67].mxu1 }
 0x19c   : > { %v1770_v58 = vadd.f32 %v3244_v50, %v1769_v51 }
 0x19d   : > { %2386 = vst [vmem:[%s3361_s22 + $0x10] sm:$0xff] %v2338_v52   ;;  %v1561_v61 = vmax.f32 %v3274_v57, %v1536_v4  ;;  %v1537_v62 = vmax.f32 %v1456_v55, 0.0 }
 0x19e   : > { %v1851_v3 = vmax.f32 %v1770_v58, 0.0 }
 0x19f   : > { %v1875_v0 = vmax.f32 %v1561_v61, %v1850_v37  ;;  %v1562_v2 = vmax.f32 %v3276_v59, %v1537_v62 }
 0x1a0   : > { %v1460_v5 = vpop.f32.mrb[68].mxu0  ;;  %v1774_v6 = vpop.f32.mrb[68].mxu1 }
 0x1a1   : > { %v1876_v8 = vmax.f32 %v1562_v2, %v1851_v3  ;;  %v1461_v9 = vadd.f32 %v3244_v50, %v1460_v5  ;;  %v1775_v10 = vadd.f32 %v3244_v50, %v1774_v6  ;;  %v2620_v13 = vpop.f32.mrb[69].mxu0  ;;  %v2682_v14 = vpop.f32.mrb[69].mxu1 }
 0x1a2   : > { %v1463_v17 = vpop.f32.mrb[70].mxu0  ;;  %v1777_v18 = vpop.f32.mrb[70].mxu1 }
 0x1a3   : > { %v2343_v20 = vpack.c.bf16 %v1876_v8, %v1875_v0  ;;  %v1538_v23 = vmax.f32 %v1461_v9, 0.0  ;;  %v1852_v57 = vmax.f32 %v1775_v10, 0.0  ;;  %v1464_v24 = vadd.f32 %v3244_v50, %v1463_v17  ;;  %v2621_v26 = vpop.f32.mrb[71].mxu0  ;;  %v2683_v59 = vpop.f32.mrb[71].mxu1 }
 0x1a4   : > { %v1778_v19 = vadd.f32 %v3244_v50, %v1777_v18 }
 0x1a5   : > { %2387 = vst [vmem:[%s3361_s22 + $0x18] sm:$0xff] %v2343_v20   ;;  %v1563_v27 = vmax.f32 %v3282_v12, %v1538_v23  ;;  %v1539_v28 = vmax.f32 %v1464_v24, 0.0 }
 0x1a6   : > { %v1853_v30 = vmax.f32 %v1778_v19, 0.0 }
 0x1a7   : > { %v1877_v22 = vmax.f32 %v1563_v27, %v1852_v57  ;;  %v1564_v29 = vmax.f32 %v3284_v15, %v1539_v28 }
 0x1a8   : > { %v1468_v31 = vpop.f32.mrb[72].mxu0  ;;  %v1782_v33 = vpop.f32.mrb[72].mxu1 }
 0x1a9   : > { %v1878_v36 = vmax.f32 %v1564_v29, %v1853_v30  ;;  %v1469_v38 = vadd.f32 %v3244_v50, %v1468_v31  ;;  %v1783_v41 = vadd.f32 %v3244_v50, %v1782_v33  ;;  %v2624_v42 = vpop.f32.mrb[73].mxu0  ;;  %v2686_v43 = vpop.f32.mrb[73].mxu1 }
 0x1aa   : > { %v1471_v44 = vpop.f32.mrb[74].mxu0  ;;  %v1785_v45 = vpop.f32.mrb[74].mxu1 }
 0x1ab   : > { %v2348_v47 = vpack.c.bf16 %v1878_v36, %v1877_v22  ;;  %v1540_v48 = vmax.f32 %v1469_v38, 0.0  ;;  %v1854_v12 = vmax.f32 %v1783_v41, 0.0  ;;  %v1472_v1 = vadd.f32 %v3244_v50, %v1471_v44  ;;  %v2625_v51 = vpop.f32.mrb[75].mxu0  ;;  %v2687_v15 = vpop.f32.mrb[75].mxu1 }
 0x1ac   : > { %v1786_v52 = vadd.f32 %v3244_v50, %v1785_v45 }
 0x1ad   : > { %2388 = vst [vmem:[%s3361_s22 + $0x20] sm:$0xff] %v2348_v47   ;;  %v1565_v4 = vmax.f32 %v3290_v32, %v1540_v48  ;;  %v1541_v37 = vmax.f32 %v1472_v1, 0.0 }
 0x1ae   : > { %v1855_v40 = vmax.f32 %v1786_v52, 0.0 }
 0x1af   : > { %v1879_v55 = vmax.f32 %v1565_v4, %v1854_v12  ;;  %v1566_v56 = vmax.f32 %v3292_v35, %v1541_v37 }
 0x1b0   : > { %v1476_v58 = vpop.f32.mrb[76].mxu0  ;;  %v1790_v61 = vpop.f32.mrb[76].mxu1 }
 0x1b1   : > { %v1880_v62 = vmax.f32 %v1566_v56, %v1855_v40  ;;  %v1477_v0 = vadd.f32 %v3244_v50, %v1476_v58  ;;  %v1791_v2 = vadd.f32 %v3244_v50, %v1790_v61  ;;  %v2628_v3 = vpop.f32.mrb[77].mxu0  ;;  %v2690_v5 = vpop.f32.mrb[77].mxu1 }
 0x1b2   : > { %v1479_v6 = vpop.f32.mrb[78].mxu0  ;;  %v1793_v8 = vpop.f32.mrb[78].mxu1 }
 0x1b3   : > { %v2353_v9 = vpack.c.bf16 %v1880_v62, %v1879_v55  ;;  %v1542_v10 = vmax.f32 %v1477_v0, 0.0  ;;  %v1856_v32 = vmax.f32 %v1791_v2, 0.0  ;;  %v1480_v13 = vadd.f32 %v3244_v50, %v1479_v6  ;;  %v2629_v14 = vpop.f32.mrb[79].mxu0  ;;  %v2691_v35 = vpop.f32.mrb[79].mxu1 }
 0x1b4   : > { %v1794_v17 = vadd.f32 %v3244_v50, %v1793_v8 }
 0x1b5   : > { %2389 = vst [vmem:[%s3361_s22 + $0x28] sm:$0xff] %v2353_v9   ;;  %v1567_v18 = vmax.f32 %v3298_v54, %v1542_v10  ;;  %v1543_v20 = vmax.f32 %v1480_v13, 0.0 }
 0x1b6   : > { %v1857_v24 = vmax.f32 %v1794_v17, 0.0 }
 0x1b7   : > { %v1881_v23 = vmax.f32 %v1567_v18, %v1856_v32  ;;  %v1568_v57 = vmax.f32 %v3300_v53, %v1543_v20 }
 0x1b8   : > { %v1484_v26 = vpop.f32.mrb[80].mxu0  ;;  %v1798_v59 = vpop.f32.mrb[80].mxu1 }
 0x1b9   : > { %v1882_v19 = vmax.f32 %v1568_v57, %v1857_v24  ;;  %v1485_v27 = vadd.f32 %v3244_v50, %v1484_v26  ;;  %v1799_v28 = vadd.f32 %v3244_v50, %v1798_v59  ;;  %v2632_v22 = vpop.f32.mrb[81].mxu0  ;;  %v2694_v29 = vpop.f32.mrb[81].mxu1 }
 0x1ba   : > { %v1487_v30 = vpop.f32.mrb[82].mxu0  ;;  %v1801_v31 = vpop.f32.mrb[82].mxu1 }
 0x1bb   : > { %v2358_v33 = vpack.c.bf16 %v1882_v19, %v1881_v23  ;;  %v1544_v36 = vmax.f32 %v1485_v27, 0.0  ;;  %v1858_v54 = vmax.f32 %v1799_v28, 0.0  ;;  %v1488_v38 = vadd.f32 %v3244_v50, %v1487_v30  ;;  %v2633_v41 = vpop.f32.mrb[83].mxu0  ;;  %v2695_v53 = vpop.f32.mrb[83].mxu1 }
 0x1bc   : > { %v1802_v42 = vadd.f32 %v3244_v50, %v1801_v31 }
 0x1bd   : > { %2390 = vst [vmem:[%s3361_s22 + $0x30] sm:$0xff] %v2358_v33   ;;  %v1569_v43 = vmax.f32 %v3306_v11, %v1544_v36  ;;  %v1545_v44 = vmax.f32 %v1488_v38, 0.0 }
 0x1be   : > { %v1859_v48 = vmax.f32 %v1802_v42, 0.0 }
 0x1bf   : > { %v1883_v45 = vmax.f32 %v1569_v43, %v1858_v54  ;;  %v1570_v47 = vmax.f32 %v3308_v16, %v1545_v44 }
 0x1c0   : > { %v1492_v12 = vpop.f32.mrb[84].mxu0  ;;  %v1806_v1 = vpop.f32.mrb[84].mxu1 }
 0x1c1   : > { %v1884_v51 = vmax.f32 %v1570_v47, %v1859_v48  ;;  %v1493_v15 = vadd.f32 %v3244_v50, %v1492_v12  ;;  %v1807_v52 = vadd.f32 %v3244_v50, %v1806_v1  ;;  %v2636_v4 = vpop.f32.mrb[85].mxu0  ;;  %v2698_v37 = vpop.f32.mrb[85].mxu1 }
 0x1c2   : > { %v1495_v55 = vpop.f32.mrb[86].mxu0  ;;  %v1809_v56 = vpop.f32.mrb[86].mxu1 }
 0x1c3   : > { %v2363_v40 = vpack.c.bf16 %v1884_v51, %v1883_v45  ;;  %v1546_v58 = vmax.f32 %v1493_v15, 0.0  ;;  %v1860_v11 = vmax.f32 %v1807_v52, 0.0  ;;  %v1496_v61 = vadd.f32 %v3244_v50, %v1495_v55  ;;  %v2637_v62 = vpop.f32.mrb[87].mxu0  ;;  %v2699_v16 = vpop.f32.mrb[87].mxu1 }
 0x1c4   : > { %v1810_v0 = vadd.f32 %v3244_v50, %v1809_v56 }
 0x1c5   : > { %2391 = vst [vmem:[%s3361_s22 + $0x38] sm:$0xff] %v2363_v40   ;;  %v1571_v2 = vmax.f32 %v3314_v34, %v1546_v58  ;;  %v1547_v3 = vmax.f32 %v1496_v61, 0.0 }
 0x1c6   : > { %v1861_v8 = vmax.f32 %v1810_v0, 0.0 }
 0x1c7   : > { %v1885_v5 = vmax.f32 %v1571_v2, %v1860_v11  ;;  %v1572_v6 = vmax.f32 %v3316_v39, %v1547_v3 }
 0x1c8   : > { %v1500_v9 = vpop.f32.mrb[88].mxu0  ;;  %v1814_v10 = vpop.f32.mrb[88].mxu1 }
 0x1c9   : > { %v1886_v32 = vmax.f32 %v1572_v6, %v1861_v8  ;;  %v1501_v13 = vadd.f32 %v3244_v50, %v1500_v9  ;;  %v1815_v14 = vadd.f32 %v3244_v50, %v1814_v10  ;;  %v2640_v35 = vpop.f32.mrb[89].mxu0  ;;  %v2702_v17 = vpop.f32.mrb[89].mxu1 }
 0x1ca   : > { %v1503_v18 = vpop.f32.mrb[90].mxu0  ;;  %v1817_v20 = vpop.f32.mrb[90].mxu1 }
 0x1cb   : > { %v2368_v23 = vpack.c.bf16 %v1886_v32, %v1885_v5  ;;  %v1548_v57 = vmax.f32 %v1501_v13, 0.0  ;;  %v1862_v34 = vmax.f32 %v1815_v14, 0.0  ;;  %v1504_v24 = vadd.f32 %v3244_v50, %v1503_v18  ;;  %v2641_v26 = vpop.f32.mrb[91].mxu0  ;;  %v2703_v39 = vpop.f32.mrb[91].mxu1 }
 0x1cc   : > { %v1818_v59 = vadd.f32 %v3244_v50, %v1817_v20 }
 0x1cd   : > { %2392 = vst [vmem:[%s3361_s22 + $0x40] sm:$0xff] %v2368_v23   ;;  %v1573_v19 = vmax.f32 %v3322_v60, %v1548_v57  ;;  %v1549_v27 = vmax.f32 %v1504_v24, 0.0 }
 0x1ce   : > { %v1863_v29 = vmax.f32 %v1818_v59, 0.0 }
 0x1cf   : > { %v1887_v28 = vmax.f32 %v1573_v19, %v1862_v34  ;;  %v1574_v22 = vmax.f32 %v3324_v63, %v1549_v27 }
 0x1d0   : > { %v1508_v30 = vpop.f32.mrb[92].mxu0  ;;  %v1822_v31 = vpop.f32.mrb[92].mxu1 }
 0x1d1   : > { %v1888_v33 = vmax.f32 %v1574_v22, %v1863_v29  ;;  %v1509_v36 = vadd.f32 %v3244_v50, %v1508_v30  ;;  %v1823_v54 = vadd.f32 %v3244_v50, %v1822_v31  ;;  %v2644_v38 = vpop.f32.mrb[93].mxu0  ;;  %v2706_v41 = vpop.f32.mrb[93].mxu1 }
 0x1d2   : > { %v1511_v53 = vpop.f32.mrb[94].mxu0  ;;  %v1825_v42 = vpop.f32.mrb[94].mxu1 }
 0x1d3   : > { %v2373_v43 = vpack.c.bf16 %v1888_v33, %v1887_v28  ;;  %v1550_v44 = vmax.f32 %v1509_v36, 0.0  ;;  %v1864_v60 = vmax.f32 %v1823_v54, 0.0  ;;  %v1512_v45 = vadd.f32 %v3244_v50, %v1511_v53  ;;  %v2645_v47 = vpop.f32.mrb[95].mxu0  ;;  %v2707_v63 = vpop.f32.mrb[95].mxu1 }
 0x1d4   : > { %v1826_v48 = vadd.f32 %v3244_v50, %v1825_v42 }
 0x1d5   : > { %2393 = vst [vmem:[%s3361_s22 + $0x48] sm:$0xff] %v2373_v43   ;;  %v1575_v12 = vmax.f32 %v3330_v21, %v1550_v44  ;;  %v1551_v1 = vmax.f32 %v1512_v45, 0.0 }
 0x1d6   : > { %v1865_v52 = vmax.f32 %v1826_v48, 0.0 }
 0x1d7   : > { %v1889_v51 = vmax.f32 %v1575_v12, %v1864_v60  ;;  %v1576_v15 = vmax.f32 %v3332_v25, %v1551_v1 }
 0x1d8   : > { %v1516_v4 = vpop.f32.mrb[96].mxu0  ;;  %v1830_v37 = vpop.f32.mrb[96].mxu1 }
 0x1d9   : > { %v1890_v55 = vmax.f32 %v1576_v15, %v1865_v52  ;;  %v1517_v56 = vadd.f32 %v3244_v50, %v1516_v4  ;;  %v1831_v40 = vadd.f32 %v3244_v50, %v1830_v37  ;;  %v2648_v58 = vpop.f32.mrb[97].mxu0  ;;  %v2710_v11 = vpop.f32.mrb[97].mxu1 }
 0x1da   : > { %v1519_v61 = vpop.f32.mrb[98].mxu0  ;;  %v1833_v62 = vpop.f32.mrb[98].mxu1 }
 0x1db   : > { %v2378_v16 = vpack.c.bf16 %v1890_v55, %v1889_v51  ;;  %v1552_v0 = vmax.f32 %v1517_v56, 0.0  ;;  %v1866_v21 = vmax.f32 %v1831_v40, 0.0  ;;  %v1520_v2 = vadd.f32 %v3244_v50, %v1519_v61  ;;  %v2649_v3 = vpop.f32.mrb[99].mxu0  ;;  %v2711_v25 = vpop.f32.mrb[99].mxu1 }
 0x1dc   : > { %v1834_v5 = vadd.f32 %v3244_v50, %v1833_v62 }
 0x1dd   : > { %2394 = vst [vmem:[%s3361_s22 + $0x50] sm:$0xff] %v2378_v16   ;;  %v1577_v6 = vmax.f32 %v3338_v46, %v1552_v0  ;;  %v1553_v8 = vmax.f32 %v1520_v2, 0.0 }
 0x1de   : > { %v1867_v32 = vmax.f32 %v1834_v5, 0.0 }
 0x1df   : > { %v1891_v9 = vmax.f32 %v1577_v6, %v1866_v21  ;;  %v1578_v10 = vmax.f32 %v3340_v49, %v1553_v8 }
 0x1e0   : > { %v1524_v13 = vpop.f32.mrb[100].mxu0  ;;  %v1838_v14 = vpop.f32.mrb[100].mxu1 }
 0x1e1   : > { %v1892_v35 = vmax.f32 %v1578_v10, %v1867_v32  ;;  %v1525_v17 = vadd.f32 %v3244_v50, %v1524_v13  ;;  %v1839_v18 = vadd.f32 %v3244_v50, %v1838_v14  ;;  %v2652_v20 = vpop.f32.mrb[101].mxu0  ;;  %v2714_v23 = vpop.f32.mrb[101].mxu1 }
 0x1e2   : > { %v1527_v57 = vpop.f32.mrb[102].mxu0  ;;  %v1841_v34 = vpop.f32.mrb[102].mxu1 }
 0x1e3   : > { %v2383_v24 = vpack.c.bf16 %v1892_v35, %v1891_v9  ;;  %v1554_v46 = vmax.f32 %v1525_v17, 0.0  ;;  %v1868_v26 = vmax.f32 %v1839_v18, 0.0  ;;  %v2653_v39 = vpop.f32.mrb[103].mxu0  ;;  %v2715_v59 = vpop.f32.mrb[103].mxu1 }
 0x1e5   : > { %2395 = vst [vmem:[%s3361_s22 + $0x58] sm:$0xff] %v2383_v24   ;;  %v1579_v49 = vmax.f32 %v3344_v7, %v1554_v46 }
 0x1e7   : > { %v1893_v19 = vmax.f32 %v1579_v49, %v1868_v26 }
 0x1e9   : > { %v2324_v27 = vpack.c.bf16 %v1893_v19, %v1893_v19 }
 0x1eb   : > { %2019 = vst [vmem:[%s3361_s22 + $0x60] sm:$0x3] %v2324_v27 }
 0x1ec PF: > { %p10_p9 = scmp.ge.s32.totalorder %s2868_s16, 4   ;;  %s3457_s12 = smov %s2822_s13 }
 0x1ed   : > { %s3458_s13 = smov %s2877_s19  ;;  %s3459_s14 = smov %s2868_s16 }
 0x1ee   :  { %12 = sbr.rel (!%p10_p9) target bundleno = 2 (0x2), region = 111 }

// kernel: convnet_forward.5
= control target key start
LH: loop header
LB: loop body
LE: loop exit
PB: predicated region body
PF: predicated region fallthrough
CT: control target
= control target key end

     0   :  { %v447_v27 = vlaneseq  ;;  %v3408_v35 = vmov 1966171168   ;;  %vm3410_vm0 = vmmov 0   ;;  %s4199_s0 = inlined_call_operand.vmem [shape: bf16[2,3200], index: 0, kind: input, shape index: {}]   ;;  %s4200_s1 = inlined_call_operand.vmem [shape: bf16[3200,128], index: 1, kind: input, shape index: {}]   ;;  %s4201_s2 = inlined_call_operand.vmem [shape: f32[1,128], index: 2, kind: input, shape index: {}]   ;;  %s4202_s3 = inlined_call_operand.vmem [shape: bf16[128,128], index: 3, kind: input, shape index: {}]   ;;  %s4203_s4 = inlined_call_operand.vmem [shape: f32[1,128], index: 4, kind: input, shape index: {}]   ;;  %s4204_s5 = inlined_call_operand.vmem [shape: bf16[128,128], index: 5, kind: input, shape index: {}]   ;;  %s4205_s6 = inlined_call_operand.vmem [shape: f32[1,128], index: 6, kind: input, shape index: {}]   ;;  %s4206_s7 = inlined_call_operand.hbm [shape: f32[2,128], index: 7, kind: output, shape index: {}]  }
   0x1   :  { %v3165_v0 = vld [vmem:[%s4200_s1 + $0x40] sm:$0xff]   ;;  %v3169_v4 = vld [vmem:[%s4200_s1 + $0x48] sm:$0xff]   ;;  %v3173_v8 = vld [vmem:[%s4200_s1 + $0x50] sm:$0xff]   ;;  %v445_v36 = vunpack.c.l.s4 %v3408_v35 }
   0x2   :  { %v3166_v1 = vld [vmem:[%s4200_s1] sm:$0xff]   ;;  %2810 = vmatprep.subr.bf16.mxu0 %v3165_v0  ;;  %v3170_v5 = vld [vmem:[%s4200_s1 + $0x8] sm:$0xff]   ;;  %v3174_v9 = vld [vmem:[%s4200_s1 + $0x10] sm:$0xff]   ;;  %v448_v32 = vshrl.u32 %v447_v27, 7 }
   0x3   :  { %v3167_v2 = vld [vmem:[%s4200_s1 + $0xc0] sm:$0xff]   ;;  %2811 = vmatpush3.bf16.msra.mxu0 %v3166_v1  ;;  %v3171_v6 = vld [vmem:[%s4200_s1 + $0xc8] sm:$0xff]   ;;  %v3175_v10 = vld [vmem:[%s4200_s1 + $0xd0] sm:$0xff]   ;;  %v446_v39 = vunpack.c.0.s8 %v445_v36 }
   0x4   :  { %v3168_v3 = vld [vmem:[%s4200_s1 + $0x80] sm:$0xff]   ;;  %2832 = vmatprep.subr.bf16.mxu1 %v3167_v2  ;;  %2812 = vmatprep.subr.bf16.mxu0 %v3169_v4  ;;  %v3172_v7 = vld [vmem:[%s4200_s1 + $0x88] sm:$0xff]   ;;  %v3176_v11 = vld [vmem:[%s4200_s1 + $0x90] sm:$0xff]  }
   0x5   :  { %2833 = vmatpush3.bf16.msra.mxu1 %v3168_v3  ;;  %v3177_v12 = vld [vmem:[%s4200_s1 + $0x58] sm:$0xff]   ;;  %v3181_v16 = vld [vmem:[%s4200_s1 + $0x60] sm:$0xff]   ;;  %v3185_v20 = vld [vmem:[%s4200_s1 + $0x68] sm:$0xff]   ;;  %v3557_v41 = vsub.s32 %v446_v39, %v448_v32 }
   0x6   :  { %2834 = vmatprep.subr.bf16.mxu1 %v3171_v6  ;;  %v3178_v13 = vld [vmem:[%s4200_s1 + $0x18] sm:$0xff]   ;;  %v3182_v17 = vld [vmem:[%s4200_s1 + $0x20] sm:$0xff]   ;;  %v3186_v21 = vld [vmem:[%s4200_s1 + $0x28] sm:$0xff]  }
   0x7   :  { %2813 = vmatpush3.bf16.msra.mxu0 %v3170_v5  ;;  %v3179_v14 = vld [vmem:[%s4200_s1 + $0xd8] sm:$0xff]   ;;  %v3183_v18 = vld [vmem:[%s4200_s1 + $0xe0] sm:$0xff]   ;;  %v3187_v22 = vld [vmem:[%s4200_s1 + $0xe8] sm:$0xff]  }
   0x8   :  { %2814 = vmatprep.subr.bf16.mxu0 %v3173_v8  ;;  %v3180_v15 = vld [vmem:[%s4200_s1 + $0x98] sm:$0xff]   ;;  %v3184_v19 = vld [vmem:[%s4200_s1 + $0xa0] sm:$0xff]   ;;  %v3188_v23 = vld [vmem:[%s4200_s1 + $0xa8] sm:$0xff]  }
   0x9   :  { %2835 = vmatpush3.bf16.msra.mxu1 %v3172_v7  ;;  %v3189_v24 = vld [vmem:[%s4200_s1 + $0x70] sm:$0xff]   ;;  %v3193_v29 = vld [vmem:[%s4200_s1 + $0x78] sm:$0xff]   ;;  %v28_v33 = vld [vmem:[%s4199_s0] sm:$0xff] }
   0xa   :  { %2836 = vmatprep.subr.bf16.mxu1 %v3175_v10  ;;  %v3190_v25 = vld [vmem:[%s4200_s1 + $0x30] sm:$0xff]   ;;  %v3194_v30 = vld [vmem:[%s4200_s1 + $0x38] sm:$0xff]   ;;  %v3198_v37 = vld [vmem:[%s4200_s1 + $0x140] sm:$0xff]   ;;  %v443_v38 = vcombine.high %v28_v33, %v28_v33  ;;  %v450_v42 = vrot.slane %v28_v33, %v3557_v41 }
   0xb   :  { %2815 = vmatpush3.bf16.msra.mxu0 %v3174_v9  ;;  %v3191_v26 = vld [vmem:[%s4200_s1 + $0xf0] sm:$0xff]   ;;  %v3195_v31 = vld [vmem:[%s4200_s1 + $0xf8] sm:$0xff]   ;;  %v3200_v40 = vld [vmem:[%s4200_s1 + $0x1c0] sm:$0xff]  }
   0xc   :  { %2816 = vmatprep.subr.bf16.mxu0 %v3177_v12  ;;  %v3192_v28 = vld [vmem:[%s4200_s1 + $0xb0] sm:$0xff]   ;;  %v3197_v34 = vld [vmem:[%s4200_s1 + $0xb8] sm:$0xff]   ;;  %v3561_v43 = vrot.slane %v443_v38, %v3557_v41  ;;  %v458_v44 = vcombine.high %v450_v42, %v450_v42  ;;  %v466_v45 = vrot.slane %v450_v42, %v3557_v41  ;;  %v3199_v48 = vld [vmem:[%s4200_s1 + $0x100] sm:$0xff]  }
   0xd   :  { %2837 = vmatpush3.bf16.msra.mxu1 %v3176_v11  ;;  %v3202_v51 = vld [vmem:[%s4200_s1 + $0x148] sm:$0xff]   ;;  %v3201_v53 = vld [vmem:[%s4200_s1 + $0x180] sm:$0xff]   ;;  %v3206_v57 = vld [vmem:[%s4200_s1 + $0x150] sm:$0xff]  }
   0xe   :  { %2838 = vmatprep.subr.bf16.mxu1 %v3179_v14  ;;  %v459_v46 = vcombine.high %v3561_v43, %v3561_v43  ;;  %v480_v47 = vrot.slane %v458_v44, %v3557_v41  ;;  %v488_v50 = vcombine.high %v466_v45, %v466_v45  ;;  %v3204_v54 = vld [vmem:[%s4200_s1 + $0x1c8] sm:$0xff]   ;;  %v3208_v59 = vld [vmem:[%s4200_s1 + $0x1d0] sm:$0xff]   ;;  %v3210_v61 = vld [vmem:[%s4200_s1 + $0x158] sm:$0xff]  }
   0xf   :  { %2817 = vmatpush3.bf16.msra.mxu0 %v3178_v13  ;;  %v3203_v56 = vld [vmem:[%s4200_s1 + $0x108] sm:$0xff]   ;;  %v3207_v60 = vld [vmem:[%s4200_s1 + $0x110] sm:$0xff]   ;;  %v3212_v63 = vld [vmem:[%s4200_s1 + $0x1d8] sm:$0xff]  }
  0x10   :  { %2818 = vmatprep.subr.bf16.mxu0 %v3181_v16  ;;  %v487_v49 = vrot.slane %v459_v46, %v3557_v41  ;;  %1861 = vmatprep.mubr.bf16.mxu0 %v480_v47  ;;  %v490_v52 = vcombine.high %v480_v47, %v480_v47  ;;  %v3205_v58 = vld [vmem:[%s4200_s1 + $0x188] sm:$0xff]   ;;  %v3209_v62 = vld [vmem:[%s4200_s1 + $0x190] sm:$0xff]   ;;  %v3211_v0 = vld [vmem:[%s4200_s1 + $0x118] sm:$0xff]  }
  0x11   :  { %2839 = vmatpush3.bf16.msra.mxu1 %v3180_v15  ;;  %v3214_v1 = vld [vmem:[%s4200_s1 + $0x160] sm:$0xff]   ;;  %v3213_v2 = vld [vmem:[%s4200_s1 + $0x198] sm:$0xff]   ;;  %v3218_v5 = vld [vmem:[%s4200_s1 + $0x168] sm:$0xff]  }
  0x12   :  { %2840 = vmatprep.subr.bf16.mxu1 %v3183_v18  ;;  %v491_v55 = vcombine.high %v487_v49, %v487_v49  ;;  %1901 = vmatprep.mubr.bf16.mxu1 %v490_v52  ;;  %v3216_v3 = vld [vmem:[%s4200_s1 + $0x1e0] sm:$0xff]   ;;  %v3220_v7 = vld [vmem:[%s4200_s1 + $0x1e8] sm:$0xff]   ;;  %v3222_v9 = vld [vmem:[%s4200_s1 + $0x170] sm:$0xff]  }
  0x13   :  { %2819 = vmatpush3.bf16.msra.mxu0 %v3182_v17  ;;  %v3215_v4 = vld [vmem:[%s4200_s1 + $0x120] sm:$0xff]   ;;  %v3219_v8 = vld [vmem:[%s4200_s1 + $0x128] sm:$0xff]   ;;  %v3224_v11 = vld [vmem:[%s4200_s1 + $0x1f0] sm:$0xff]   ;;  %v473_v17 = vrot.slane %v3561_v43, %v3557_v41 }
  0x14   :  { %2820 = vmatprep.subr.bf16.mxu0 %v3185_v20  ;;  %v3217_v6 = vld [vmem:[%s4200_s1 + $0x1a0] sm:$0xff]   ;;  %v3221_v10 = vld [vmem:[%s4200_s1 + $0x1a8] sm:$0xff]   ;;  %v3223_v12 = vld [vmem:[%s4200_s1 + $0x130] sm:$0xff]  }
  0x15   :  { %2841 = vmatpush3.bf16.msra.mxu1 %v3184_v19  ;;  %v3226_v13 = vld [vmem:[%s4200_s1 + $0x178] sm:$0xff]   ;;  %v3225_v14 = vld [vmem:[%s4200_s1 + $0x1b0] sm:$0xff]   ;;  %v3230_v18 = vld [vmem:[%s4200_s1 + $0x240] sm:$0xff]  }
  0x16   :  { %2842 = vmatprep.subr.bf16.mxu1 %v3187_v22  ;;  %v3228_v15 = vld [vmem:[%s4200_s1 + $0x1f8] sm:$0xff]   ;;  %v3232_v20 = vld [vmem:[%s4200_s1 + $0x2c0] sm:$0xff]   ;;  %v489_v22 = vcombine.high %v473_v17, %v473_v17  ;;  %v3238_v27 = vld [vmem:[%s4200_s1 + $0x250] sm:$0xff]  }
  0x17   :  { %2821 = vmatpush3.bf16.msra.mxu0 %v3186_v21  ;;  %v3227_v16 = vld [vmem:[%s4200_s1 + $0x138] sm:$0xff]   ;;  %v3231_v21 = vld [vmem:[%s4200_s1 + $0x200] sm:$0xff]   ;;  %v3241_v32 = vld [vmem:[%s4200_s1 + $0x290] sm:$0xff]  }
  0x18   :  { %2822 = vmatprep.subr.bf16.mxu0 %v3189_v24  ;;  %v3229_v19 = vld [vmem:[%s4200_s1 + $0x1b8] sm:$0xff]   ;;  %v3233_v24 = vld [vmem:[%s4200_s1 + $0x280] sm:$0xff]   ;;  %v3250_v39 = vld [vmem:[%s4200_s1 + $0x268] sm:$0xff]  }
  0x19   :  { %2843 = vmatpush3.bf16.msra.mxu1 %v3188_v23  ;;  %v3234_v23 = vld [vmem:[%s4200_s1 + $0x248] sm:$0xff]   ;;  %v3244_v33 = vld [vmem:[%s4200_s1 + $0x2d8] sm:$0xff]   ;;  %v3246_v35 = vld [vmem:[%s4200_s1 + $0x260] sm:$0xff]  }
  0x1a   :  { %2844 = vmatprep.subr.bf16.mxu1 %v3191_v26  ;;  %v3235_v26 = vld [vmem:[%s4200_s1 + $0x208] sm:$0xff]   ;;  %v3245_v36 = vld [vmem:[%s4200_s1 + $0x298] sm:$0xff]   ;;  %v3247_v38 = vld [vmem:[%s4200_s1 + $0x220] sm:$0xff]  }
  0x1b   :  { %2823 = vmatpush3.bf16.msra.mxu0 %v3190_v25  ;;  %v3236_v25 = vld [vmem:[%s4200_s1 + $0x2c8] sm:$0xff]   ;;  %v3254_v44 = vld [vmem:[%s4200_s1 + $0x270] sm:$0xff]  }
  0x1c   :  { %2824 = vmatprep.subr.bf16.mxu0 %v3193_v29  ;;  %v3240_v29 = vld [vmem:[%s4200_s1 + $0x2d0] sm:$0xff]   ;;  %v3252_v42 = vld [vmem:[%s4200_s1 + $0x2e8] sm:$0xff]  }
  0x1d   :  { %2845 = vmatpush3.bf16.msra.mxu1 %v3192_v28  ;;  %v3237_v28 = vld [vmem:[%s4200_s1 + $0x288] sm:$0xff]  }
  0x1e   :  { %2846 = vmatprep.subr.bf16.mxu1 %v3195_v31  ;;  %v3242_v31 = vld [vmem:[%s4200_s1 + $0x258] sm:$0xff]   ;;  %v3251_v43 = vld [vmem:[%s4200_s1 + $0x228] sm:$0xff]  }
  0x1f   :  { %2825 = vmatpush3.bf16.msra.mxu0 %v3194_v30  ;;  %v3239_v30 = vld [vmem:[%s4200_s1 + $0x210] sm:$0xff]   ;;  %v3253_v46 = vld [vmem:[%s4200_s1 + $0x2a8] sm:$0xff]  }
  0x20   :  { %2854 = vmatprep.subr.bf16.mxu0 %v3198_v37  ;;  %v3248_v37 = vld [vmem:[%s4200_s1 + $0x2e0] sm:$0xff]  }
  0x21   :  { %2847 = vmatpush3.bf16.msra.mxu1 %v3197_v34  ;;  %v3243_v34 = vld [vmem:[%s4200_s1 + $0x218] sm:$0xff]  }
  0x22   :  { %2876 = vmatprep.subr.bf16.mxu1 %v3200_v40  ;;  %1862 = vmatmul.mubr.bf16.vlgmr.msra.gmra.mrb[0].mxu0 %v466_v45  ;;  %v3249_v40 = vld [vmem:[%s4200_s1 + $0x2a0] sm:$0xff]   ;;  %v29_v45 = vld [vmem:[%s4199_s0 + $0x8] sm:$0xff] }
  0x23   :  { %2855 = vmatpush3.bf16.msra.mxu0 %v3199_v48  ;;  %1941 = vmatprep.mubr.bf16.mxu0 %v487_v49  ;;  %v499_v47 = vrot.slane %v29_v45, %v3557_v41  ;;  %v492_v48 = vcombine.high %v29_v45, %v29_v45  ;;  %v3256_v49 = vld [vmem:[%s4200_s1 + $0x2f0] sm:$0xff]  }
  0x24   :  { %1902 = vmatmul.mubr.bf16.vlgmr.msra.gmra.mrb[0].mxu1 %v488_v50  ;;  %2856 = vmatprep.subr.bf16.mxu0 %v3202_v51  ;;  %v3255_v50 = vld [vmem:[%s4200_s1 + $0x230] sm:$0xff]  }
  0x25   :  { %2877 = vmatpush3.bf16.msra.mxu1 %v3201_v53  ;;  %1981 = vmatprep.mubr.bf16.mxu1 %v491_v55  ;;  %v507_v51 = vcombine.high %v499_v47, %v499_v47  ;;  %v3746_v52 = vrot.slane %v492_v48, %v3557_v41  ;;  %v3258_v53 = vld [vmem:[%s4200_s1 + $0x278] sm:$0xff]   ;;  %v3305_v45 = vld [vmem:[%s4200_s1 + $0x4d0] sm:$0xff]  }
  0x26   :  { %2878 = vmatprep.subr.bf16.mxu1 %v3204_v54  ;;  %v3257_v54 = vld [vmem:[%s4200_s1 + $0x2b0] sm:$0xff]  }
  0x27   :  { %2857 = vmatpush3.bf16.msra.mxu0 %v3203_v56  ;;  %v529_v55 = vrot.slane %v507_v51, %v3557_v41  ;;  %v508_v56 = vcombine.high %v3746_v52, %v3746_v52  ;;  %v3306_v48 = vld [vmem:[%s4200_s1 + $0x490] sm:$0xff]   ;;  %v3311_v51 = vld [vmem:[%s4200_s1 + $0x460] sm:$0xff]  }
  0x28   :  { %2858 = vmatprep.subr.bf16.mxu0 %v3206_v57  ;;  %v3260_v57 = vld [vmem:[%s4200_s1 + $0x2f8] sm:$0xff]  }
  0x29   :  { %2879 = vmatpush3.bf16.msra.mxu1 %v3205_v58  ;;  %v3259_v58 = vld [vmem:[%s4200_s1 + $0x238] sm:$0xff]  }
  0x2a   :  { %2880 = vmatprep.subr.bf16.mxu1 %v3208_v59  ;;  %v539_v59 = vcombine.high %v529_v55, %v529_v55 }
  0x2b   :  { %2859 = vmatpush3.bf16.msra.mxu0 %v3207_v60  ;;  %v515_v60 = vrot.slane %v499_v47, %v3557_v41  ;;  %v3307_v47 = vld [vmem:[%s4200_s1 + $0x458] sm:$0xff]  }
  0x2c   :  { %2860 = vmatprep.subr.bf16.mxu0 %v3210_v61  ;;  %v3262_v61 = vld [vmem:[%s4200_s1 + $0x340] sm:$0xff]  }
  0x2d   :  { %2881 = vmatpush3.bf16.msra.mxu1 %v3209_v62  ;;  %v3261_v62 = vld [vmem:[%s4200_s1 + $0x2b8] sm:$0xff]  }
  0x2e   :  { %2882 = vmatprep.subr.bf16.mxu1 %v3212_v63  ;;  %v536_v63 = vrot.slane %v508_v56, %v3557_v41  ;;  %v3314_v56 = vld [vmem:[%s4200_s1 + $0x4a0] sm:$0xff]  }
  0x2f   :  { %2861 = vmatpush3.bf16.msra.mxu0 %v3211_v0  ;;  %v3264_v0 = vld [vmem:[%s4200_s1 + $0x3c0] sm:$0xff]  }
  0x30   :  { %2862 = vmatprep.subr.bf16.mxu0 %v3214_v1  ;;  %v3263_v1 = vld [vmem:[%s4200_s1 + $0x300] sm:$0xff]  }
  0x31   :  { %2883 = vmatpush3.bf16.msra.mxu1 %v3213_v2  ;;  %v537_v2 = vcombine.high %v515_v60, %v515_v60 }
  0x32   :  { %2884 = vmatprep.subr.bf16.mxu1 %v3216_v3  ;;  %v3266_v3 = vld [vmem:[%s4200_s1 + $0x348] sm:$0xff]  }
  0x33   :  { %2863 = vmatpush3.bf16.msra.mxu0 %v3215_v4  ;;  %v3265_v4 = vld [vmem:[%s4200_s1 + $0x380] sm:$0xff]  }
  0x34   :  { %2864 = vmatprep.subr.bf16.mxu0 %v3218_v5  ;;  %v540_v5 = vcombine.high %v536_v63, %v536_v63 }
  0x35   :  { %2885 = vmatpush3.bf16.msra.mxu1 %v3217_v6  ;;  %v3268_v6 = vld [vmem:[%s4200_s1 + $0x3c8] sm:$0xff]  }
  0x36   :  { %2886 = vmatprep.subr.bf16.mxu1 %v3220_v7  ;;  %v3267_v7 = vld [vmem:[%s4200_s1 + $0x308] sm:$0xff]  }
  0x37   :  { %2865 = vmatpush3.bf16.msra.mxu0 %v3219_v8  ;;  %v3270_v8 = vld [vmem:[%s4200_s1 + $0x350] sm:$0xff]  }
  0x38   :  { %2866 = vmatprep.subr.bf16.mxu0 %v3222_v9  ;;  %v3269_v9 = vld [vmem:[%s4200_s1 + $0x388] sm:$0xff]  }
  0x39   :  { %2887 = vmatpush3.bf16.msra.mxu1 %v3221_v10  ;;  %v3272_v10 = vld [vmem:[%s4200_s1 + $0x3d0] sm:$0xff]  }
  0x3a   :  { %2888 = vmatprep.subr.bf16.mxu1 %v3224_v11  ;;  %v3271_v11 = vld [vmem:[%s4200_s1 + $0x310] sm:$0xff]  }
  0x3b   :  { %2867 = vmatpush3.bf16.msra.mxu0 %v3223_v12  ;;  %v3274_v12 = vld [vmem:[%s4200_s1 + $0x358] sm:$0xff]  }
  0x3c   :  { %2868 = vmatprep.subr.bf16.mxu0 %v3226_v13  ;;  %v3273_v13 = vld [vmem:[%s4200_s1 + $0x390] sm:$0xff]  }
  0x3d   :  { %2889 = vmatpush3.bf16.msra.mxu1 %v3225_v14  ;;  %v3276_v14 = vld [vmem:[%s4200_s1 + $0x3d8] sm:$0xff]  }
  0x3e   :  { %2890 = vmatprep.subr.bf16.mxu1 %v3228_v15  ;;  %v3275_v15 = vld [vmem:[%s4200_s1 + $0x318] sm:$0xff]  }
  0x3f   :  { %2869 = vmatpush3.bf16.msra.mxu0 %v3227_v16  ;;  %v3278_v16 = vld [vmem:[%s4200_s1 + $0x360] sm:$0xff]  }
  0x40   :  { %2898 = vmatprep.subr.bf16.mxu0 %v3230_v18  ;;  %v3280_v18 = vld [vmem:[%s4200_s1 + $0x3e0] sm:$0xff]  }
  0x41   :  { %2891 = vmatpush3.bf16.msra.mxu1 %v3229_v19  ;;  %v3279_v19 = vld [vmem:[%s4200_s1 + $0x320] sm:$0xff]  }
  0x42   :  { %1942 = vmatmul.mubr.bf16.vlgmr.msra.gmra.mrb[4].mxu0 %v473_v17  ;;  %2920 = vmatprep.subr.bf16.mxu1 %v3232_v20  ;;  %v3277_v17 = vld [vmem:[%s4200_s1 + $0x398] sm:$0xff]   ;;  %v3282_v20 = vld [vmem:[%s4200_s1 + $0x368] sm:$0xff]  }
  0x43   :  { %2899 = vmatpush3.bf16.msra.mxu0 %v3231_v21  ;;  %2021 = vmatprep.mubr.bf16.mxu0 %v529_v55  ;;  %v3281_v21 = vld [vmem:[%s4200_s1 + $0x3a0] sm:$0xff]   ;;  %v3315_v55 = vld [vmem:[%s4200_s1 + $0x468] sm:$0xff]  }
  0x44   :  { %1982 = vmatmul.mubr.bf16.vlgmr.msra.gmra.mrb[4].mxu1 %v489_v22  ;;  %2900 = vmatprep.subr.bf16.mxu0 %v3234_v23  ;;  %v3284_v22 = vld [vmem:[%s4200_s1 + $0x3e8] sm:$0xff]  }
  0x45   :  { %2921 = vmatpush3.bf16.msra.mxu1 %v3233_v24  ;;  %2061 = vmatprep.mubr.bf16.mxu1 %v539_v59  ;;  %v3283_v23 = vld [vmem:[%s4200_s1 + $0x328] sm:$0xff]   ;;  %v3286_v24 = vld [vmem:[%s4200_s1 + $0x370] sm:$0xff]  }
  0x46   :  { %2922 = vmatprep.subr.bf16.mxu1 %v3236_v25  ;;  %v3285_v25 = vld [vmem:[%s4200_s1 + $0x3a8] sm:$0xff]   ;;  %v3319_v59 = vld [vmem:[%s4200_s1 + $0x470] sm:$0xff]  }
  0x47   :  { %2901 = vmatpush3.bf16.msra.mxu0 %v3235_v26  ;;  %v3288_v26 = vld [vmem:[%s4200_s1 + $0x3f0] sm:$0xff]  }
  0x48   :  { %2902 = vmatprep.subr.bf16.mxu0 %v3238_v27  ;;  %v3287_v27 = vld [vmem:[%s4200_s1 + $0x330] sm:$0xff]  }
  0x49   :  { %2923 = vmatpush3.bf16.msra.mxu1 %v3237_v28  ;;  %v3290_v28 = vld [vmem:[%s4200_s1 + $0x378] sm:$0xff]  }
  0x4a   :  { %2924 = vmatprep.subr.bf16.mxu1 %v3240_v29  ;;  %v3289_v29 = vld [vmem:[%s4200_s1 + $0x3b0] sm:$0xff]  }
  0x4b   :  { %2903 = vmatpush3.bf16.msra.mxu0 %v3239_v30  ;;  %v3292_v30 = vld [vmem:[%s4200_s1 + $0x3f8] sm:$0xff]  }
  0x4c   :  { %2904 = vmatprep.subr.bf16.mxu0 %v3242_v31  ;;  %v3291_v31 = vld [vmem:[%s4200_s1 + $0x338] sm:$0xff]  }
  0x4d   :  { %2925 = vmatpush3.bf16.msra.mxu1 %v3241_v32  ;;  %v522_v32 = vrot.slane %v3746_v52, %v3557_v41  ;;  %v3310_v52 = vld [vmem:[%s4200_s1 + $0x498] sm:$0xff]  }
  0x4e   :  { %2926 = vmatprep.subr.bf16.mxu1 %v3244_v33  ;;  %v3295_v33 = vld [vmem:[%s4200_s1 + $0x440] sm:$0xff]  }
  0x4f   :  { %2905 = vmatpush3.bf16.msra.mxu0 %v3243_v34  ;;  %v3294_v34 = vld [vmem:[%s4200_s1 + $0x3b8] sm:$0xff]  }
  0x50   :  { %2906 = vmatprep.subr.bf16.mxu0 %v3246_v35  ;;  %v3297_v35 = vld [vmem:[%s4200_s1 + $0x4c0] sm:$0xff]  }
  0x51   :  { %2927 = vmatpush3.bf16.msra.mxu1 %v3245_v36  ;;  %v3296_v36 = vld [vmem:[%s4200_s1 + $0x400] sm:$0xff]  }
  0x52   :  { %2928 = vmatprep.subr.bf16.mxu1 %v3248_v37  ;;  %v538_v37 = vcombine.high %v522_v32, %v522_v32 }
  0x53   :  { %2907 = vmatpush3.bf16.msra.mxu0 %v3247_v38  ;;  %v3299_v38 = vld [vmem:[%s4200_s1 + $0x448] sm:$0xff]  }
  0x54   :  { %2908 = vmatprep.subr.bf16.mxu0 %v3250_v39  ;;  %v3298_v39 = vld [vmem:[%s4200_s1 + $0x480] sm:$0xff]  }
  0x55   :  { %2929 = vmatpush3.bf16.msra.mxu1 %v3249_v40  ;;  %v3301_v40 = vld [vmem:[%s4200_s1 + $0x4c8] sm:$0xff]  }
  0x56   :  { %2930 = vmatprep.subr.bf16.mxu1 %v3252_v42  ;;  %v3300_v42 = vld [vmem:[%s4200_s1 + $0x408] sm:$0xff]  }
  0x57   :  { %2909 = vmatpush3.bf16.msra.mxu0 %v3251_v43  ;;  %v3303_v43 = vld [vmem:[%s4200_s1 + $0x450] sm:$0xff]  }
  0x58   :  { %2910 = vmatprep.subr.bf16.mxu0 %v3254_v44  ;;  %v3302_v44 = vld [vmem:[%s4200_s1 + $0x488] sm:$0xff]  }
  0x59   :  { %2931 = vmatpush3.bf16.msra.mxu1 %v3253_v46  ;;  %v3304_v46 = vld [vmem:[%s4200_s1 + $0x410] sm:$0xff]  }
  0x5a   :  { %2932 = vmatprep.subr.bf16.mxu1 %v3256_v49  ;;  %v3309_v49 = vld [vmem:[%s4200_s1 + $0x4d8] sm:$0xff]  }
  0x5b   :  { %2911 = vmatpush3.bf16.msra.mxu0 %v3255_v50  ;;  %v3308_v50 = vld [vmem:[%s4200_s1 + $0x418] sm:$0xff]  }
  0x5c   :  { %2912 = vmatprep.subr.bf16.mxu0 %v3258_v53  ;;  %v3313_v53 = vld [vmem:[%s4200_s1 + $0x4e0] sm:$0xff]  }
  0x5d   :  { %2933 = vmatpush3.bf16.msra.mxu1 %v3257_v54  ;;  %v3312_v54 = vld [vmem:[%s4200_s1 + $0x420] sm:$0xff]  }
  0x5e   :  { %2934 = vmatprep.subr.bf16.mxu1 %v3260_v57  ;;  %v3317_v57 = vld [vmem:[%s4200_s1 + $0x4e8] sm:$0xff]  }
  0x5f   :  { %2913 = vmatpush3.bf16.msra.mxu0 %v3259_v58  ;;  %v3316_v58 = vld [vmem:[%s4200_s1 + $0x428] sm:$0xff]  }
  0x60   :  { %2942 = vmatprep.subr.bf16.mxu0 %v3262_v61  ;;  %v3318_v61 = vld [vmem:[%s4200_s1 + $0x4a8] sm:$0xff]  }
  0x61   :  { %2935 = vmatpush3.bf16.msra.mxu1 %v3261_v62 }
  0x62   :  { %2022 = vmatmul.mubr.bf16.vlgmr.msra.gmra.mrb[8].mxu0 %v515_v60  ;;  %2964 = vmatprep.subr.bf16.mxu1 %v3264_v0  ;;  %v30_v60 = vld [vmem:[%s4199_s0 + $0x10] sm:$0xff] }
  0x63   :  { %2943 = vmatpush3.bf16.msra.mxu0 %v3263_v1  ;;  %2101 = vmatprep.mubr.bf16.mxu0 %v536_v63  ;;  %v548_v62 = vrot.slane %v30_v60, %v3557_v41  ;;  %v541_v63 = vcombine.high %v30_v60, %v30_v60  ;;  %v3321_v0 = vld [vmem:[%s4200_s1 + $0x4f0] sm:$0xff]  }
  0x64   :  { %2062 = vmatmul.mubr.bf16.vlgmr.msra.gmra.mrb[8].mxu1 %v537_v2  ;;  %2944 = vmatprep.subr.bf16.mxu0 %v3266_v3  ;;  %v3320_v1 = vld [vmem:[%s4200_s1 + $0x430] sm:$0xff]  }
  0x65   :  { %2965 = vmatpush3.bf16.msra.mxu1 %v3265_v4  ;;  %2141 = vmatprep.mubr.bf16.mxu1 %v540_v5  ;;  %v556_v2 = vcombine.high %v548_v62, %v548_v62  ;;  %v3952_v3 = vrot.slane %v541_v63, %v3557_v41  ;;  %v3323_v4 = vld [vmem:[%s4200_s1 + $0x478] sm:$0xff]   ;;  %v3322_v5 = vld [vmem:[%s4200_s1 + $0x4b0] sm:$0xff]  }
  0x66   :  { %2966 = vmatprep.subr.bf16.mxu1 %v3268_v6 }
  0x67   :  { %2945 = vmatpush3.bf16.msra.mxu0 %v3267_v7  ;;  %v578_v6 = vrot.slane %v556_v2, %v3557_v41  ;;  %v557_v7 = vcombine.high %v3952_v3, %v3952_v3 }
  0x68   :  { %2946 = vmatprep.subr.bf16.mxu0 %v3270_v8  ;;  %v3325_v8 = vld [vmem:[%s4200_s1 + $0x4f8] sm:$0xff]  }
  0x69   :  { %2967 = vmatpush3.bf16.msra.mxu1 %v3269_v9  ;;  %v3324_v9 = vld [vmem:[%s4200_s1 + $0x438] sm:$0xff]  }
  0x6a   :  { %2968 = vmatprep.subr.bf16.mxu1 %v3272_v10  ;;  %v588_v10 = vcombine.high %v578_v6, %v578_v6 }
  0x6b   :  { %2947 = vmatpush3.bf16.msra.mxu0 %v3271_v11  ;;  %v564_v11 = vrot.slane %v548_v62, %v3557_v41 }
  0x6c   :  { %2948 = vmatprep.subr.bf16.mxu0 %v3274_v12  ;;  %v3327_v12 = vld [vmem:[%s4200_s1 + $0x540] sm:$0xff]  }
  0x6d   :  { %2969 = vmatpush3.bf16.msra.mxu1 %v3273_v13  ;;  %v3326_v13 = vld [vmem:[%s4200_s1 + $0x4b8] sm:$0xff]  }
  0x6e   :  { %2970 = vmatprep.subr.bf16.mxu1 %v3276_v14  ;;  %v585_v14 = vrot.slane %v557_v7, %v3557_v41 }
  0x6f   :  { %2949 = vmatpush3.bf16.msra.mxu0 %v3275_v15  ;;  %v3329_v15 = vld [vmem:[%s4200_s1 + $0x5c0] sm:$0xff]  }
  0x70   :  { %2950 = vmatprep.subr.bf16.mxu0 %v3278_v16  ;;  %v3328_v16 = vld [vmem:[%s4200_s1 + $0x500] sm:$0xff]  }
  0x71   :  { %2971 = vmatpush3.bf16.msra.mxu1 %v3277_v17  ;;  %v586_v17 = vcombine.high %v564_v11, %v564_v11 }
  0x72   :  { %2972 = vmatprep.subr.bf16.mxu1 %v3280_v18  ;;  %v3331_v18 = vld [vmem:[%s4200_s1 + $0x548] sm:$0xff]  }
  0x73   :  { %2951 = vmatpush3.bf16.msra.mxu0 %v3279_v19  ;;  %v3330_v19 = vld [vmem:[%s4200_s1 + $0x580] sm:$0xff]  }
  0x74   :  { %2952 = vmatprep.subr.bf16.mxu0 %v3282_v20  ;;  %v589_v20 = vcombine.high %v585_v14, %v585_v14 }
  0x75   :  { %2973 = vmatpush3.bf16.msra.mxu1 %v3281_v21  ;;  %v3333_v21 = vld [vmem:[%s4200_s1 + $0x5c8] sm:$0xff]  }
  0x76   :  { %2974 = vmatprep.subr.bf16.mxu1 %v3284_v22  ;;  %v3332_v22 = vld [vmem:[%s4200_s1 + $0x508] sm:$0xff]  }
  0x77   :  { %2953 = vmatpush3.bf16.msra.mxu0 %v3283_v23  ;;  %v3335_v23 = vld [vmem:[%s4200_s1 + $0x550] sm:$0xff]  }
  0x78   :  { %2954 = vmatprep.subr.bf16.mxu0 %v3286_v24  ;;  %v3334_v24 = vld [vmem:[%s4200_s1 + $0x588] sm:$0xff]  }
  0x79   :  { %2975 = vmatpush3.bf16.msra.mxu1 %v3285_v25  ;;  %v3337_v25 = vld [vmem:[%s4200_s1 + $0x5d0] sm:$0xff]  }
  0x7a   :  { %2976 = vmatprep.subr.bf16.mxu1 %v3288_v26  ;;  %v3336_v26 = vld [vmem:[%s4200_s1 + $0x510] sm:$0xff]  }
  0x7b   :  { %2955 = vmatpush3.bf16.msra.mxu0 %v3287_v27  ;;  %v3339_v27 = vld [vmem:[%s4200_s1 + $0x558] sm:$0xff]  }
  0x7c   :  { %2956 = vmatprep.subr.bf16.mxu0 %v3290_v28  ;;  %v3338_v28 = vld [vmem:[%s4200_s1 + $0x590] sm:$0xff]  }
  0x7d   :  { %2977 = vmatpush3.bf16.msra.mxu1 %v3289_v29  ;;  %v3341_v29 = vld [vmem:[%s4200_s1 + $0x5d8] sm:$0xff]  }
  0x7e   :  { %2978 = vmatprep.subr.bf16.mxu1 %v3292_v30  ;;  %v3340_v30 = vld [vmem:[%s4200_s1 + $0x518] sm:$0xff]  }
  0x7f   :  { %2957 = vmatpush3.bf16.msra.mxu0 %v3291_v31  ;;  %v3343_v31 = vld [vmem:[%s4200_s1 + $0x560] sm:$0xff]  }
  0x80   :  { %2986 = vmatprep.subr.bf16.mxu0 %v3295_v33  ;;  %v3345_v33 = vld [vmem:[%s4200_s1 + $0x5e0] sm:$0xff]  }
  0x81   :  { %2979 = vmatpush3.bf16.msra.mxu1 %v3294_v34  ;;  %v3344_v34 = vld [vmem:[%s4200_s1 + $0x520] sm:$0xff]  }
  0x82   :  { %2102 = vmatmul.mubr.bf16.vlgmr.msra.gmra.mrb[12].mxu0 %v522_v32  ;;  %3008 = vmatprep.subr.bf16.mxu1 %v3297_v35  ;;  %v3342_v32 = vld [vmem:[%s4200_s1 + $0x598] sm:$0xff]   ;;  %v3347_v35 = vld [vmem:[%s4200_s1 + $0x568] sm:$0xff]  }
  0x83   :  { %2987 = vmatpush3.bf16.msra.mxu0 %v3296_v36  ;;  %2181 = vmatprep.mubr.bf16.mxu0 %v578_v6  ;;  %v3346_v36 = vld [vmem:[%s4200_s1 + $0x5a0] sm:$0xff]  }
  0x84   :  { %2142 = vmatmul.mubr.bf16.vlgmr.msra.gmra.mrb[12].mxu1 %v538_v37  ;;  %2988 = vmatprep.subr.bf16.mxu0 %v3299_v38  ;;  %v3349_v37 = vld [vmem:[%s4200_s1 + $0x5e8] sm:$0xff]  }
  0x85   :  { %3009 = vmatpush3.bf16.msra.mxu1 %v3298_v39  ;;  %2221 = vmatprep.mubr.bf16.mxu1 %v588_v10  ;;  %v3348_v38 = vld [vmem:[%s4200_s1 + $0x528] sm:$0xff]   ;;  %v3351_v39 = vld [vmem:[%s4200_s1 + $0x570] sm:$0xff]  }
  0x86   :  { %3010 = vmatprep.subr.bf16.mxu1 %v3301_v40  ;;  %v3350_v40 = vld [vmem:[%s4200_s1 + $0x5a8] sm:$0xff]  }
  0x87   :  { %2989 = vmatpush3.bf16.msra.mxu0 %v3300_v42  ;;  %v3353_v42 = vld [vmem:[%s4200_s1 + $0x5f0] sm:$0xff]  }
  0x88   :  { %2990 = vmatprep.subr.bf16.mxu0 %v3303_v43  ;;  %v3352_v43 = vld [vmem:[%s4200_s1 + $0x530] sm:$0xff]  }
  0x89   :  { %3011 = vmatpush3.bf16.msra.mxu1 %v3302_v44  ;;  %v3355_v44 = vld [vmem:[%s4200_s1 + $0x578] sm:$0xff]  }
  0x8a   :  { %3012 = vmatprep.subr.bf16.mxu1 %v3305_v45  ;;  %v3354_v45 = vld [vmem:[%s4200_s1 + $0x5b0] sm:$0xff]  }
  0x8b   :  { %2991 = vmatpush3.bf16.msra.mxu0 %v3304_v46  ;;  %v3357_v46 = vld [vmem:[%s4200_s1 + $0x5f8] sm:$0xff]  }
  0x8c   :  { %2992 = vmatprep.subr.bf16.mxu0 %v3307_v47  ;;  %v3356_v47 = vld [vmem:[%s4200_s1 + $0x538] sm:$0xff]  }
  0x8d   :  { %3013 = vmatpush3.bf16.msra.mxu1 %v3306_v48  ;;  %v571_v48 = vrot.slane %v3952_v3, %v3557_v41 }
  0x8e   :  { %3014 = vmatprep.subr.bf16.mxu1 %v3309_v49  ;;  %v3359_v49 = vld [vmem:[%s4200_s1 + $0x5b8] sm:$0xff]  }
  0x8f   :  { %2993 = vmatpush3.bf16.msra.mxu0 %v3308_v50  ;;  %v3360_v50 = vld [vmem:[%s4200_s1 + $0x600] sm:$0xff]  }
  0x90   :  { %2994 = vmatprep.subr.bf16.mxu0 %v3311_v51  ;;  %v3409_v51 = vmov 0.0  }
  0x91   :  { %3015 = vmatpush3.bf16.msra.mxu1 %v3310_v52  ;;  %v587_v52 = vcombine.high %v571_v48, %v571_v48 }
  0x92   :  { %3016 = vmatprep.subr.bf16.mxu1 %v3313_v53  ;;  %v3361_v53 = vld [vmem:[%s4200_s1 + $0x608] sm:$0xff]  }
  0x93   :  { %2995 = vmatpush3.bf16.msra.mxu0 %v3312_v54  ;;  %v3362_v54 = vld [vmem:[%s4200_s1 + $0x610] sm:$0xff]  }
  0x94   :  { %2996 = vmatprep.subr.bf16.mxu0 %v3315_v55 }
  0x95   :  { %3017 = vmatpush3.bf16.msra.mxu1 %v3314_v56 }
  0x96   :  { %3018 = vmatprep.subr.bf16.mxu1 %v3317_v57 }
  0x97   :  { %2997 = vmatpush3.bf16.msra.mxu0 %v3316_v58 }
  0x98   :  { %2998 = vmatprep.subr.bf16.mxu0 %v3319_v59 }
  0x99   :  { %3019 = vmatpush3.bf16.msra.mxu1 %v3318_v61 }
  0x9a   :  { %3020 = vmatprep.subr.bf16.mxu1 %v3321_v0 }
  0x9b   :  { %2999 = vmatpush3.bf16.msra.mxu0 %v3320_v1 }
  0x9c   :  { %3000 = vmatprep.subr.bf16.mxu0 %v3323_v4 }
  0x9d   :  { %3021 = vmatpush3.bf16.msra.mxu1 %v3322_v5 }
  0x9e   :  { %3022 = vmatprep.subr.bf16.mxu1 %v3325_v8 }
  0x9f   :  { %3001 = vmatpush3.bf16.msra.mxu0 %v3324_v9 }
  0xa0   :  { %3030 = vmatprep.subr.bf16.mxu0 %v3327_v12 }
  0xa1   :  { %3023 = vmatpush3.bf16.msra.mxu1 %v3326_v13 }
  0xa2   :  { %2182 = vmatmul.mubr.bf16.vlgmr.msra.gmra.mrb[16].mxu0 %v564_v11  ;;  %3052 = vmatprep.subr.bf16.mxu1 %v3329_v15 }
  0xa3   :  { %3031 = vmatpush3.bf16.msra.mxu0 %v3328_v16  ;;  %2261 = vmatprep.mubr.bf16.mxu0 %v585_v14 }
  0xa4   :  { %2222 = vmatmul.mubr.bf16.vlgmr.msra.gmra.mrb[16].mxu1 %v586_v17  ;;  %3032 = vmatprep.subr.bf16.mxu0 %v3331_v18 }
  0xa5   :  { %3053 = vmatpush3.bf16.msra.mxu1 %v3330_v19  ;;  %2301 = vmatprep.mubr.bf16.mxu1 %v589_v20 }
  0xa6   :  { %3054 = vmatprep.subr.bf16.mxu1 %v3333_v21 }
  0xa7   :  { %3033 = vmatpush3.bf16.msra.mxu0 %v3332_v22 }
  0xa8   :  { %3034 = vmatprep.subr.bf16.mxu0 %v3335_v23 }
  0xa9   :  { %3055 = vmatpush3.bf16.msra.mxu1 %v3334_v24 }
  0xaa   :  { %3056 = vmatprep.subr.bf16.mxu1 %v3337_v25 }
  0xab   :  { %3035 = vmatpush3.bf16.msra.mxu0 %v3336_v26 }
  0xac   :  { %3036 = vmatprep.subr.bf16.mxu0 %v3339_v27 }
  0xad   :  { %3057 = vmatpush3.bf16.msra.mxu1 %v3338_v28 }
  0xae   :  { %3058 = vmatprep.subr.bf16.mxu1 %v3341_v29 }
  0xaf   :  { %3037 = vmatpush3.bf16.msra.mxu0 %v3340_v30 }
  0xb0   :  { %3038 = vmatprep.subr.bf16.mxu0 %v3343_v31 }
  0xb1   :  { %3059 = vmatpush3.bf16.msra.mxu1 %v3342_v32 }
  0xb2   :  { %3060 = vmatprep.subr.bf16.mxu1 %v3345_v33 }
  0xb3   :  { %3039 = vmatpush3.bf16.msra.mxu0 %v3344_v34 }
  0xb4   :  { %3040 = vmatprep.subr.bf16.mxu0 %v3347_v35 }
  0xb5   :  { %3061 = vmatpush3.bf16.msra.mxu1 %v3346_v36 }
  0xb6   :  { %3062 = vmatprep.subr.bf16.mxu1 %v3349_v37 }
  0xb7   :  { %3041 = vmatpush3.bf16.msra.mxu0 %v3348_v38 }
  0xb8   :  { %3042 = vmatprep.subr.bf16.mxu0 %v3351_v39 }
  0xb9   :  { %3063 = vmatpush3.bf16.msra.mxu1 %v3350_v40 }
  0xba   :  { %3064 = vmatprep.subr.bf16.mxu1 %v3353_v42 }
  0xbb   :  { %3043 = vmatpush3.bf16.msra.mxu0 %v3352_v43 }
  0xbc   :  { %3044 = vmatprep.subr.bf16.mxu0 %v3355_v44 }
  0xbd   :  { %3065 = vmatpush3.bf16.msra.mxu1 %v3354_v45 }
  0xbe   :  { %3066 = vmatprep.subr.bf16.mxu1 %v3357_v46 }
  0xbf   :  { %3045 = vmatpush3.bf16.msra.mxu0 %v3356_v47 }
  0xc0   :  { %3101 = vmatprep.subr.bf16.mxu0 %v3409_v51 }
  0xc1   :  { %3067 = vmatpush3.bf16.msra.mxu1 %v3359_v49 }
  0xc2   :  { %2262 = vmatmul.mubr.bf16.vlgmr.msra.gmra.mrb[20].mxu0 %v571_v48  ;;  %3121 = vmatprep.subr.bf16.mxu1 %v3409_v51 }
  0xc3   :  { %3102 = vmatpush3.bf16.msra.mxu0 %v3360_v50  ;;  %3117 = vmatprep.mubr.msk.bf16.mxu0 %vm3410_vm0, %v3409_v51 }
  0xc4   :  { %2302 = vmatmul.mubr.bf16.vlgmr.msra.gmra.mrb[20].mxu1 %v587_v52  ;;  %3103 = vmatprep.subr.bf16.mxu0 %v3409_v51 }
  0xc5   :  { %3137 = vmatprep.mubr.msk.bf16.mxu1 %vm3410_vm0, %v3409_v51 }
  0xc7   :  { %3104 = vmatpush3.bf16.msra.mxu0 %v3361_v53 }
  0xc8   :  { %3105 = vmatprep.subr.bf16.mxu0 %v3409_v51 }
  0xc9   :  { %12 = vsyncpa [#allocation3], 0  ;;  %v3363_v55 = vld [vmem:[%s4200_s1 + $0x618] sm:$0xff]   ;;  %v3364_v56 = vld [vmem:[%s4200_s1 + $0x620] sm:$0xff]   ;;  %s3411_s26 = smov [#allocation2]  }
  0xca   :  { %v3365_v57 = vld [vmem:[%s4200_s1 + $0x628] sm:$0xff]   ;;  %v3366_v58 = vld [vmem:[%s4200_s1 + $0x630] sm:$0xff]   ;;  %v3367_v59 = vld [vmem:[%s4200_s1 + $0x638] sm:$0xff]   ;;  %s2582_s27 = sshll.u32 %s3411_s26, 4  ;;  %s2583_s27 = int_to_ptr.vmem [resolvable:$true] %s2582_s27 }
  0xcb   :  { %3106 = vmatpush3.bf16.msra.mxu0 %v3362_v54  ;;  %v2591_v60 = vld.sshfl [vmem:[%s4199_s0 + $0x18] sm:$0x1 pattern:$0x75316420]  ;;  %v2590_v63 = vld [vmem:[%s4201_s2] ss:$0 sm:$0xff]  ;;  %p3389_p1 = scmp.lt.s32.totalorder %s2583_s27, %s2583_s27 }
  0xcc   :  { %3107 = vmatprep.subr.bf16.mxu0 %v3409_v51  ;;  %v603_v61 = vrot.slane %v2591_v60, %v3557_v41  ;;  %v3368_v20 = vld [vmem:[%s4202_s3] sm:$0xff]   ;;  %v3369_v23 = vld [vmem:[%s4202_s3 + $0x8] sm:$0xff]   ;;  %v3370_v24 = vld [vmem:[%s4202_s3 + $0x10] sm:$0xff]  }
  0xcd   :  { %3122 = vmatpush3.bf16.msra.mxu1 %v3368_v20  ;;  %v3371_v25 = vld [vmem:[%s4202_s3 + $0x18] sm:$0xff]   ;;  %v3372_v26 = vld [vmem:[%s4202_s3 + $0x20] sm:$0xff]   ;;  %v3373_v27 = vld [vmem:[%s4202_s3 + $0x28] sm:$0xff]  }
  0xce   :  { %3123 = vmatprep.subr.bf16.mxu1 %v3409_v51  ;;  %v3374_v28 = vld [vmem:[%s4202_s3 + $0x30] sm:$0xff]   ;;  %v3375_v34 = vld [vmem:[%s4202_s3 + $0x38] sm:$0xff]   ;;  %v3376_v43 = vld [vmem:[%s4204_s5] sm:$0xff]  }
  0xcf   :  { %3108 = vmatpush3.bf16.msra.mxu0 %v3363_v55  ;;  %v3377_v44 = vld [vmem:[%s4204_s5 + $0x8] sm:$0xff]   ;;  %v3378_v45 = vld [vmem:[%s4204_s5 + $0x10] sm:$0xff]   ;;  %v3379_v46 = vld [vmem:[%s4204_s5 + $0x18] sm:$0xff]  }
  0xd0   :  { %3109 = vmatprep.subr.bf16.mxu0 %v3409_v51  ;;  %v3380_v47 = vld [vmem:[%s4204_s5 + $0x20] sm:$0xff]   ;;  %v3381_v48 = vld [vmem:[%s4204_s5 + $0x28] sm:$0xff]  }
  0xd1   :  { %3124 = vmatpush3.bf16.msra.mxu1 %v3369_v23 }
  0xd2   :  { %3125 = vmatprep.subr.bf16.mxu1 %v3409_v51 }
  0xd3   :  { %3110 = vmatpush3.bf16.msra.mxu0 %v3364_v56 }
  0xd4   :  { %3111 = vmatprep.subr.bf16.mxu0 %v3409_v51 }
  0xd5   :  { %3126 = vmatpush3.bf16.msra.mxu1 %v3370_v24 }
  0xd6   :  { %3127 = vmatprep.subr.bf16.mxu1 %v3409_v51 }
  0xd7   :  { %3112 = vmatpush3.bf16.msra.mxu0 %v3365_v57 }
  0xd8   :  { %3113 = vmatprep.subr.bf16.mxu0 %v3409_v51 }
  0xd9   :  { %3128 = vmatpush3.bf16.msra.mxu1 %v3371_v25 }
  0xda   :  { %3129 = vmatprep.subr.bf16.mxu1 %v3409_v51 }
  0xdb   :  { %3114 = vmatpush3.bf16.msra.mxu0 %v3366_v58 }
  0xdc   :  { %3115 = vmatprep.subr.bf16.mxu0 %v3409_v51 }
  0xdd   :  { %3130 = vmatpush3.bf16.msra.mxu1 %v3372_v26 }
  0xde   :  { %3131 = vmatprep.subr.bf16.mxu1 %v3409_v51 }
  0xdf   :  { %3116 = vmatpush3.bf16.msra.mxu0 %v3367_v59 }
  0xe0   :  { %3141 = vmatprep.subr.bf16.mxu0 %v3409_v51 }
  0xe1   :  { %3132 = vmatpush3.bf16.msra.mxu1 %v3373_v27 }
  0xe2   :  { %3118 = vmatmul.mubr.bf16.vlgmr.msra.gmra.mrb[24].mxu0 %v603_v61  ;;  %3133 = vmatprep.subr.bf16.mxu1 %v3409_v51 }
  0xe3   :  { %3157 = vmatprep.mubr.msk.bf16.mxu0 %vm3410_vm0, %v3409_v51  ;;  %3142 = vmatpush3.bf16.msra.mxu0 %v3376_v43 }
  0xe4   :  { %3143 = vmatprep.subr.bf16.mxu0 %v3409_v51 }
  0xe5   :  { %3134 = vmatpush3.bf16.msra.mxu1 %v3374_v28  ;;  %v3382_v28 = vld [vmem:[%s4204_s5 + $0x30] sm:$0xff]  }
  0xe6   :  { %3135 = vmatprep.subr.bf16.mxu1 %v3409_v51 }
  0xe7   :  { %3144 = vmatpush3.bf16.msra.mxu0 %v3377_v44 }
  0xe8   :  { %3145 = vmatprep.subr.bf16.mxu0 %v3409_v51 }
  0xe9   :  { %3136 = vmatpush3.bf16.msra.mxu1 %v3375_v34 }
  0xeb   :  { %3146 = vmatpush3.bf16.msra.mxu0 %v3378_v45 }
  0xec   :  { %3147 = vmatprep.subr.bf16.mxu0 %v3409_v51 }
  0xef   :  { %3148 = vmatpush3.bf16.msra.mxu0 %v3379_v46 }
  0xf0   :  { %3149 = vmatprep.subr.bf16.mxu0 %v3409_v51 }
  0xf3   :  { %3150 = vmatpush3.bf16.msra.mxu0 %v3380_v47 }
  0xf4   :  { %3151 = vmatprep.subr.bf16.mxu0 %v3409_v51 }
  0xf5   :  { %v2826_v62 = vpop.f32.mrb[0].mxu0 }
  0xf6   :  { %v2827_v0 = vpop.f32.mrb[1].mxu0 }
  0xf7   :  { %v2828_v1 = vadd.f32 %v2827_v0, %v2826_v62  ;;  %v2829_v2 = vpop.f32.mrb[2].mxu0  ;;  %v2848_v3 = vpop.f32.mrb[0].mxu1  ;;  %3152 = vmatpush3.bf16.msra.mxu0 %v3381_v48 }
  0xf8   :  { %v2830_v4 = vpop.f32.mrb[3].mxu0  ;;  %v2849_v5 = vpop.f32.mrb[1].mxu1  ;;  %3153 = vmatprep.subr.bf16.mxu0 %v3409_v51 }
  0xf9   :  { %v1864_v6 = vadd.f32 %v2828_v1, %v2590_v63  ;;  %v2850_v41 = vadd.f32 %v2849_v5, %v2848_v3  ;;  %v2851_v7 = vpop.f32.mrb[2].mxu1 }
  0xfa   :  { %v2852_v8 = vpop.f32.mrb[3].mxu1 }
  0xfb   :  { %v1904_v9 = vadd.f32 %v2850_v41, %v1864_v6  ;;  %3154 = vmatpush3.bf16.msra.mxu0 %v3382_v28 }
  0xfc   :  { %3155 = vmatprep.subr.bf16.mxu0 %v3409_v51  ;;  %v2801_v51 = vld [vmem:[%s4205_s6] ss:$0 sm:$0xff] }
 0x115   :  { %v2870_v10 = vpop.f32.mrb[4].mxu0 }
 0x116   :  { %v2871_v11 = vpop.f32.mrb[5].mxu0 }
 0x117   :  { %v2872_v12 = vadd.f32 %v2871_v11, %v2870_v10  ;;  %v2873_v13 = vpop.f32.mrb[6].mxu0  ;;  %v2892_v14 = vpop.f32.mrb[4].mxu1 }
 0x118   :  { %v2874_v15 = vpop.f32.mrb[7].mxu0  ;;  %v2893_v16 = vpop.f32.mrb[5].mxu1 }
 0x119   :  { %v1944_v17 = vadd.f32 %v2872_v12, %v1904_v9  ;;  %v2894_v18 = vadd.f32 %v2893_v16, %v2892_v14  ;;  %v2895_v19 = vpop.f32.mrb[6].mxu1 }
 0x11a   :  { %v2896_v21 = vpop.f32.mrb[7].mxu1 }
 0x11b   :  { %v1984_v22 = vadd.f32 %v2894_v18, %v1944_v17 }
 0x135   :  { %v2914_v29 = vpop.f32.mrb[8].mxu0 }
 0x136   :  { %v2915_v30 = vpop.f32.mrb[9].mxu0 }
 0x137   :  { %v2916_v31 = vadd.f32 %v2915_v30, %v2914_v29  ;;  %v2917_v32 = vpop.f32.mrb[10].mxu0  ;;  %v2936_v33 = vpop.f32.mrb[8].mxu1  ;;  %v3383_v29 = vld [vmem:[%s4204_s5 + $0x38] sm:$0xff]   ;;  %v2792_v30 = vld [vmem:[%s4203_s4] ss:$0 sm:$0xff]  ;;  %s3384_s4 = scalar_lea.vmem %s2583_s27, 32 }
 0x138   :  { %v2918_v35 = vpop.f32.mrb[11].mxu0  ;;  %v2937_v36 = vpop.f32.mrb[9].mxu1  ;;  %3156 = vmatpush3.bf16.msra.mxu0 %v3383_v29  ;;  %p3385_p0 = scmp.ne.s32.totalorder %s2583_s27, %s3384_s4  ;;  %p3390_p2 = scmp.lt.s32.totalorder %s3384_s4, %s3384_s4 }
 0x139   :  { %v2024_v37 = vadd.f32 %v2916_v31, %v1984_v22  ;;  %v2938_v38 = vadd.f32 %v2937_v36, %v2936_v33  ;;  %v2939_v39 = vpop.f32.mrb[10].mxu1 }
 0x13a   :  { %v2940_v40 = vpop.f32.mrb[11].mxu1  ;;  %p3391_p3 = por %p3390_p2, %p3389_p1 }
 0x13b   :  { %v2064_v42 = vadd.f32 %v2938_v38, %v2024_v37 }
 0x13c   :  { %p3392_p4 = pnand %p3391_p3, %p3385_p0 }
 0x155   :  { %v2958_v49 = vpop.f32.mrb[12].mxu0 }
 0x156   :  { %v2959_v50 = vpop.f32.mrb[13].mxu0 }
 0x157   :  { %v2960_v52 = vadd.f32 %v2959_v50, %v2958_v49  ;;  %v2961_v53 = vpop.f32.mrb[14].mxu0  ;;  %v2980_v54 = vpop.f32.mrb[12].mxu1 }
 0x158   :  { %v2962_v55 = vpop.f32.mrb[15].mxu0  ;;  %v2981_v56 = vpop.f32.mrb[13].mxu1 }
 0x159   :  { %v2104_v57 = vadd.f32 %v2960_v52, %v2064_v42  ;;  %v2982_v58 = vadd.f32 %v2981_v56, %v2980_v54  ;;  %v2983_v59 = vpop.f32.mrb[14].mxu1 }
 0x15a   :  { %v2984_v60 = vpop.f32.mrb[15].mxu1 }
 0x15b   :  { %v2144_v61 = vadd.f32 %v2982_v58, %v2104_v57 }
 0x175   :  { %v3002_v62 = vpop.f32.mrb[16].mxu0 }
 0x176   :  { %v3003_v63 = vpop.f32.mrb[17].mxu0 }
 0x177   :  { %v3004_v0 = vadd.f32 %v3003_v63, %v3002_v62  ;;  %v3005_v1 = vpop.f32.mrb[18].mxu0  ;;  %v3024_v2 = vpop.f32.mrb[16].mxu1 }
 0x178   :  { %v3006_v3 = vpop.f32.mrb[19].mxu0  ;;  %v3025_v4 = vpop.f32.mrb[17].mxu1 }
 0x179   :  { %v2184_v5 = vadd.f32 %v3004_v0, %v2144_v61  ;;  %v3026_v6 = vadd.f32 %v3025_v4, %v3024_v2  ;;  %v3027_v41 = vpop.f32.mrb[18].mxu1 }
 0x17a   :  { %v3028_v7 = vpop.f32.mrb[19].mxu1 }
 0x17b   :  { %v2224_v8 = vadd.f32 %v3026_v6, %v2184_v5 }
 0x195   :  { %v3046_v9 = vpop.f32.mrb[20].mxu0 }
 0x196   :  { %v3047_v10 = vpop.f32.mrb[21].mxu0 }
 0x197   :  { %v3048_v11 = vadd.f32 %v3047_v10, %v3046_v9  ;;  %v3049_v12 = vpop.f32.mrb[22].mxu0  ;;  %v3068_v13 = vpop.f32.mrb[20].mxu1 }
 0x198   :  { %v3050_v14 = vpop.f32.mrb[23].mxu0  ;;  %v3069_v15 = vpop.f32.mrb[21].mxu1 }
 0x199   :  { %v2264_v16 = vadd.f32 %v3048_v11, %v2224_v8  ;;  %v3070_v17 = vadd.f32 %v3069_v15, %v3068_v13  ;;  %v3071_v18 = vpop.f32.mrb[22].mxu1 }
 0x19a   :  { %v3072_v19 = vpop.f32.mrb[23].mxu1 }
 0x19b   :  { %v2304_v20 = vadd.f32 %v3070_v17, %v2264_v16 }
 0x1b5   :  { %v2343_v21 = vpop.f32.mrb[24].mxu0 }
 0x1b6   :  { %v2344_v22 = vadd.f32 %v2343_v21, %v2304_v20  ;;  %v3119_v23 = vpop.f32.mrb[25].mxu0 }
 0x1b7   :  { %v2346_v24 = vpop.f32.mrb[26].mxu0 }
 0x1b8   :  { %v2349_v25 = vmax.f32 %v2344_v22, 0.0  ;;  %v3120_v26 = vpop.f32.mrb[27].mxu0 }
 0x1ba   :  { %v2350_v27 = vpack.c.bf16 %v2349_v25, %v2349_v25 }
 0x1bc   :  { %3138 = vmatmul.mubr.bf16.vlgmr.msra.gmra.mrb[24].mxu1 %v2350_v27 }
 0x28f   :  { %v2456_v31 = vpop.f32.mrb[24].mxu1 }
 0x290   :  { %v2457_v32 = vadd.f32 %v2792_v30, %v2456_v31  ;;  %v3139_v33 = vpop.f32.mrb[25].mxu1 }
 0x291   :  { %v2459_v34 = vpop.f32.mrb[26].mxu1 }
 0x292   :  { %v2462_v35 = vmax.f32 %v2457_v32, 0.0  ;;  %v3140_v36 = vpop.f32.mrb[27].mxu1 }
 0x294   :  { %v2463_v37 = vpack.c.bf16 %v2462_v35, %v2462_v35 }
 0x296   :  { %3158 = vmatmul.mubr.bf16.vlgmr.msra.gmra.mrb[28].mxu0 %v2463_v37 }
 0x369   :  { %v2569_v38 = vpop.f32.mrb[28].mxu0 }
 0x36a   :  { %v2570_v39 = vadd.f32 %v2801_v51, %v2569_v38  ;;  %v3159_v40 = vpop.f32.mrb[29].mxu0 }
 0x36b   :  { %v2572_v42 = vpop.f32.mrb[30].mxu0 }
 0x36c   :  { %2575 = vst [vmem:[#allocation2] sm:$0x3] %v2570_v39  ;;  %v3160_v43 = vpop.f32.mrb[31].mxu0 }
 0x36d   :  { %3395 = shalt.err (!%p3392_p4)
}
 0x36e   :  { %s3396_s6 = scalar_lea.hbm %s4206_s7, 32 }
 0x36f   :  { %p3397_p5 = scmp.ne.s32.totalorder %s4206_s7, %s3396_s6  ;;  %p3400_p6 = scmp.lt.u32.totalorder %s3396_s6, %s4206_s7 }
 0x371   :  { %p3402_p7 = pnand %p3400_p6, %p3397_p5 }
 0x373   :  { %3405 = shalt.err (!%p3402_p7)
}
 0x374   :  { %2585 = dma.vmem_to_hbm [thread:$0]  %s2583_s27, 32, %s4206_s7, [#allocation3]  }
 0x375   :  { %3406 = dma.done.wait [#allocation3], 32  }
 0x376   :  { %3407 = vsyncadd [#allocation3], 4294967264 }
 0x377   :  { %2589 = vsyncpa [#allocation3], 1 }

// kernel: convnet_forward.4
= control target key start
LH: loop header
LB: loop body
LE: loop exit
PB: predicated region body
PF: predicated region fallthrough
CT: control target
= control target key end

     0   :  { %s9170_s12 = smov 0   ;;  %s9172_s13 = smov 0   ;;  %s12710_s0 = inlined_call_operand.vmem [shape: bf16[4,2,25,3200], index: 0, kind: input, shape index: {}]   ;;  %s12711_s1 = inlined_call_operand.vmem [shape: bf16[3200,128], index: 1, kind: input, shape index: {}]   ;;  %s12712_s2 = inlined_call_operand.vmem [shape: f32[1,128], index: 2, kind: input, shape index: {}]   ;;  %s12713_s3 = inlined_call_operand.vmem [shape: bf16[2,25,128], index: 3, kind: output, shape index: {}]  }
   0x1   :  { %s9174_s14 = smov 0  }
   0x2 LB: > { %s6107_s15 = sadd.s32 4294967295, %s9148_s14   ;;  %s9187_s16 = sadd.s32 1, %s9148_s14   ;;  %s9148_s14 = sphi %s9174_s14, %s12998_s14   ;;  %s9144_s13 = sphi %s9172_s13, %s12997_s13   ;;  %s9140_s12 = sphi %s9170_s12, %s12996_s12  }
   0x3   : > { %s17_s17 = ssub.s32 %s9148_s14, %s9187_s16  ;;  %s20_s18 = sadd.s32 1, %s9144_s13 }
   0x4   : > { %p18_p0 = scmp.eq.s32.totalorder %s17_s17, 0  ;;  %p27_p1 = scmp.ne.s32.totalorder %s9144_s13, %s9140_s12 }
   0x5   : > { %p28_p2 = scmp.eq.s32.totalorder %s9148_s14, 0  ;;  %p6110_p4 = scmp.ge.s32.totalorder %s9148_s14, 2 }
   0x6   : > { %s9196_s19 = scalar_select %p18_p0, %s9144_s13, %s20_s18  }
   0x7   : > { %p29_p3 = por %p28_p2, %p27_p1  ;;  %127 = sbr.rel (%p6110_p4) target bundleno = 125 (0x7d), region = 24 }
   0xe   : > { %130 = sbr.rel (!%p29_p3) target bundleno = 125 (0x7d), region = 28  ;;  %s132_s20 = sand.u32 (%p29_p3), 1, %s9144_s13  }
   0xf   : > { %s8185_s21 = smul.u32 (%p29_p3), 400, %s9148_s14 }
  0x10   : > { %s8184_s22 = smul.u32 (%p29_p3), 1600, %s132_s20 }
  0x11   : > { %s9204_s25 = scalar_lea.vmem (%p29_p3), %s12710_s0, %s8185_s21 }
  0x12   : > { %v152_v0 = vld [vmem:[%s9204_s25] sm:$0xff] (%p29_p3)  ;;  %v154_v1 = vld [vmem:[%s9204_s25 + $0x8] sm:$0xff] (%p29_p3)  ;;  %v156_v2 = vld [vmem:[%s9204_s25 + $0x10] sm:$0xff] (%p29_p3)  ;;  %s9209_s26 = scalar_lea.vmem (%p29_p3), [#allocation2], %s8184_s22 }
  0x13   : > { %153 = vst [vmem:[%s9209_s26] sm:$0xff] (%p29_p3), %v152_v0  ;;  %155 = vst [vmem:[%s9209_s26 + $0x8] sm:$0xff] (%p29_p3), %v154_v1  ;;  %v158_v3 = vld [vmem:[%s9204_s25 + $0x18] sm:$0xff] (%p29_p3)  ;;  %v160_v4 = vld [vmem:[%s9204_s25 + $0x20] sm:$0xff] (%p29_p3) }
  0x14   : > { %157 = vst [vmem:[%s9209_s26 + $0x10] sm:$0xff] (%p29_p3), %v156_v2  ;;  %v162_v5 = vld [vmem:[%s9204_s25 + $0x28] sm:$0xff] (%p29_p3)  ;;  %159 = vst [vmem:[%s9209_s26 + $0x18] sm:$0xff] (%p29_p3), %v158_v3  ;;  %v164_v6 = vld [vmem:[%s9204_s25 + $0x30] sm:$0xff] (%p29_p3) }
  0x15   : > { %161 = vst [vmem:[%s9209_s26 + $0x20] sm:$0xff] %v160_v4  ;;  %163 = vst [vmem:[%s9209_s26 + $0x28] sm:$0xff] %v162_v5  ;;  %v166_v7 = vld [vmem:[%s9204_s25 + $0x38] sm:$0xff]  ;;  %v168_v8 = vld [vmem:[%s9204_s25 + $0x40] sm:$0xff] }
  0x16   : > { %165 = vst [vmem:[%s9209_s26 + $0x30] sm:$0xff] %v164_v6  ;;  %167 = vst [vmem:[%s9209_s26 + $0x38] sm:$0xff] %v166_v7  ;;  %v170_v9 = vld [vmem:[%s9204_s25 + $0x48] sm:$0xff]  ;;  %v172_v10 = vld [vmem:[%s9204_s25 + $0x50] sm:$0xff] }
  0x17   : > { %169 = vst [vmem:[%s9209_s26 + $0x40] sm:$0xff] %v168_v8  ;;  %v174_v11 = vld [vmem:[%s9204_s25 + $0x58] sm:$0xff]  ;;  %171 = vst [vmem:[%s9209_s26 + $0x48] sm:$0xff] %v170_v9  ;;  %v176_v12 = vld [vmem:[%s9204_s25 + $0x64] sm:$0xff] }
  0x18   : > { %173 = vst [vmem:[%s9209_s26 + $0x50] sm:$0xff] %v172_v10  ;;  %175 = vst [vmem:[%s9209_s26 + $0x58] sm:$0xff] %v174_v11  ;;  %v178_v13 = vld [vmem:[%s9204_s25 + $0x6c] sm:$0xff]  ;;  %v180_v14 = vld [vmem:[%s9204_s25 + $0x74] sm:$0xff] }
  0x19   : > { %177 = vst [vmem:[%s9209_s26 + $0x64] sm:$0xff] %v176_v12  ;;  %179 = vst [vmem:[%s9209_s26 + $0x6c] sm:$0xff] %v178_v13  ;;  %v182_v15 = vld [vmem:[%s9204_s25 + $0x7c] sm:$0xff]  ;;  %v184_v16 = vld [vmem:[%s9204_s25 + $0x84] sm:$0xff] }
  0x1a   : > { %181 = vst [vmem:[%s9209_s26 + $0x74] sm:$0xff] %v180_v14  ;;  %v186_v17 = vld [vmem:[%s9204_s25 + $0x8c] sm:$0xff]  ;;  %183 = vst [vmem:[%s9209_s26 + $0x7c] sm:$0xff] %v182_v15  ;;  %v188_v18 = vld [vmem:[%s9204_s25 + $0x94] sm:$0xff] }
  0x1b   : > { %185 = vst [vmem:[%s9209_s26 + $0x84] sm:$0xff] %v184_v16  ;;  %187 = vst [vmem:[%s9209_s26 + $0x8c] sm:$0xff] %v186_v17  ;;  %v190_v19 = vld [vmem:[%s9204_s25 + $0x9c] sm:$0xff]  ;;  %v192_v20 = vld [vmem:[%s9204_s25 + $0xa4] sm:$0xff] }
  0x1c   : > { %189 = vst [vmem:[%s9209_s26 + $0x94] sm:$0xff] %v188_v18  ;;  %191 = vst [vmem:[%s9209_s26 + $0x9c] sm:$0xff] %v190_v19  ;;  %v194_v21 = vld [vmem:[%s9204_s25 + $0xac] sm:$0xff]  ;;  %v196_v22 = vld [vmem:[%s9204_s25 + $0xb4] sm:$0xff] }
  0x1d   : > { %193 = vst [vmem:[%s9209_s26 + $0xa4] sm:$0xff] %v192_v20  ;;  %v198_v23 = vld [vmem:[%s9204_s25 + $0xbc] sm:$0xff]  ;;  %195 = vst [vmem:[%s9209_s26 + $0xac] sm:$0xff] %v194_v21  ;;  %v200_v24 = vld [vmem:[%s9204_s25 + $0xc8] sm:$0xff] }
  0x1e   : > { %197 = vst [vmem:[%s9209_s26 + $0xb4] sm:$0xff] %v196_v22  ;;  %199 = vst [vmem:[%s9209_s26 + $0xbc] sm:$0xff] %v198_v23  ;;  %v202_v25 = vld [vmem:[%s9204_s25 + $0xd0] sm:$0xff]  ;;  %v204_v26 = vld [vmem:[%s9204_s25 + $0xd8] sm:$0xff] }
  0x1f   : > { %201 = vst [vmem:[%s9209_s26 + $0xc8] sm:$0xff] %v200_v24  ;;  %203 = vst [vmem:[%s9209_s26 + $0xd0] sm:$0xff] %v202_v25  ;;  %v206_v27 = vld [vmem:[%s9204_s25 + $0xe0] sm:$0xff]  ;;  %v208_v28 = vld [vmem:[%s9204_s25 + $0xe8] sm:$0xff] }
  0x20   : > { %205 = vst [vmem:[%s9209_s26 + $0xd8] sm:$0xff] %v204_v26  ;;  %v210_v29 = vld [vmem:[%s9204_s25 + $0xf0] sm:$0xff]  ;;  %207 = vst [vmem:[%s9209_s26 + $0xe0] sm:$0xff] %v206_v27  ;;  %v212_v30 = vld [vmem:[%s9204_s25 + $0xf8] sm:$0xff] }
  0x21   : > { %209 = vst [vmem:[%s9209_s26 + $0xe8] sm:$0xff] %v208_v28  ;;  %211 = vst [vmem:[%s9209_s26 + $0xf0] sm:$0xff] %v210_v29  ;;  %v214_v31 = vld [vmem:[%s9204_s25 + $0x100] sm:$0xff]  ;;  %v216_v32 = vld [vmem:[%s9204_s25 + $0x108] sm:$0xff] }
  0x22   : > { %213 = vst [vmem:[%s9209_s26 + $0xf8] sm:$0xff] %v212_v30  ;;  %215 = vst [vmem:[%s9209_s26 + $0x100] sm:$0xff] %v214_v31  ;;  %v218_v33 = vld [vmem:[%s9204_s25 + $0x110] sm:$0xff]  ;;  %v220_v34 = vld [vmem:[%s9204_s25 + $0x118] sm:$0xff] }
  0x23   : > { %217 = vst [vmem:[%s9209_s26 + $0x108] sm:$0xff] %v216_v32  ;;  %v222_v35 = vld [vmem:[%s9204_s25 + $0x120] sm:$0xff]  ;;  %219 = vst [vmem:[%s9209_s26 + $0x110] sm:$0xff] %v218_v33  ;;  %v224_v36 = vld [vmem:[%s9204_s25 + $0x12c] sm:$0xff] }
  0x24   : > { %221 = vst [vmem:[%s9209_s26 + $0x118] sm:$0xff] %v220_v34  ;;  %223 = vst [vmem:[%s9209_s26 + $0x120] sm:$0xff] %v222_v35  ;;  %v226_v37 = vld [vmem:[%s9204_s25 + $0x134] sm:$0xff]  ;;  %v228_v38 = vld [vmem:[%s9204_s25 + $0x13c] sm:$0xff] }
  0x25   : > { %225 = vst [vmem:[%s9209_s26 + $0x12c] sm:$0xff] %v224_v36  ;;  %227 = vst [vmem:[%s9209_s26 + $0x134] sm:$0xff] %v226_v37  ;;  %v230_v39 = vld [vmem:[%s9204_s25 + $0x144] sm:$0xff]  ;;  %v232_v40 = vld [vmem:[%s9204_s25 + $0x14c] sm:$0xff] }
  0x26   : > { %229 = vst [vmem:[%s9209_s26 + $0x13c] sm:$0xff] %v228_v38  ;;  %v234_v41 = vld [vmem:[%s9204_s25 + $0x154] sm:$0xff]  ;;  %231 = vst [vmem:[%s9209_s26 + $0x144] sm:$0xff] %v230_v39  ;;  %v236_v42 = vld [vmem:[%s9204_s25 + $0x15c] sm:$0xff] }
  0x27   : > { %233 = vst [vmem:[%s9209_s26 + $0x14c] sm:$0xff] %v232_v40  ;;  %235 = vst [vmem:[%s9209_s26 + $0x154] sm:$0xff] %v234_v41  ;;  %v238_v43 = vld [vmem:[%s9204_s25 + $0x164] sm:$0xff]  ;;  %v240_v44 = vld [vmem:[%s9204_s25 + $0x16c] sm:$0xff] }
  0x28   : > { %237 = vst [vmem:[%s9209_s26 + $0x15c] sm:$0xff] %v236_v42  ;;  %239 = vst [vmem:[%s9209_s26 + $0x164] sm:$0xff] %v238_v43  ;;  %v242_v45 = vld [vmem:[%s9204_s25 + $0x174] sm:$0xff]  ;;  %v244_v46 = vld [vmem:[%s9204_s25 + $0x17c] sm:$0xff] }
  0x29   : > { %241 = vst [vmem:[%s9209_s26 + $0x16c] sm:$0xff] %v240_v44  ;;  %v246_v47 = vld [vmem:[%s9204_s25 + $0x184] sm:$0xff]  ;;  %243 = vst [vmem:[%s9209_s26 + $0x174] sm:$0xff] %v242_v45  ;;  %v252_v50 = vld [vmem:[%s9204_s25 + $0x330] sm:$0xff] }
  0x2a   : > { %245 = vst [vmem:[%s9209_s26 + $0x17c] sm:$0xff] %v244_v46  ;;  %247 = vst [vmem:[%s9209_s26 + $0x184] sm:$0xff] %v246_v47  ;;  %v248_v48 = vld [vmem:[%s9204_s25 + $0x320] sm:$0xff]  ;;  %v250_v49 = vld [vmem:[%s9204_s25 + $0x328] sm:$0xff] }
  0x2b   : > { %249 = vst [vmem:[%s9209_s26 + $0x190] sm:$0xff] %v248_v48  ;;  %251 = vst [vmem:[%s9209_s26 + $0x198] sm:$0xff] %v250_v49  ;;  %v254_v51 = vld [vmem:[%s9204_s25 + $0x338] sm:$0xff]  ;;  %v256_v52 = vld [vmem:[%s9204_s25 + $0x340] sm:$0xff] }
  0x2c   : > { %253 = vst [vmem:[%s9209_s26 + $0x1a0] sm:$0xff] %v252_v50  ;;  %v258_v53 = vld [vmem:[%s9204_s25 + $0x348] sm:$0xff]  ;;  %255 = vst [vmem:[%s9209_s26 + $0x1a8] sm:$0xff] %v254_v51  ;;  %v260_v54 = vld [vmem:[%s9204_s25 + $0x350] sm:$0xff] }
  0x2d   : > { %257 = vst [vmem:[%s9209_s26 + $0x1b0] sm:$0xff] %v256_v52  ;;  %259 = vst [vmem:[%s9209_s26 + $0x1b8] sm:$0xff] %v258_v53  ;;  %v262_v55 = vld [vmem:[%s9204_s25 + $0x358] sm:$0xff]  ;;  %v264_v56 = vld [vmem:[%s9204_s25 + $0x360] sm:$0xff] }
  0x2e   : > { %261 = vst [vmem:[%s9209_s26 + $0x1c0] sm:$0xff] %v260_v54  ;;  %263 = vst [vmem:[%s9209_s26 + $0x1c8] sm:$0xff] %v262_v55  ;;  %v266_v57 = vld [vmem:[%s9204_s25 + $0x368] sm:$0xff]  ;;  %v268_v58 = vld [vmem:[%s9204_s25 + $0x370] sm:$0xff] }
  0x2f   : > { %265 = vst [vmem:[%s9209_s26 + $0x1d0] sm:$0xff] %v264_v56  ;;  %v270_v59 = vld [vmem:[%s9204_s25 + $0x378] sm:$0xff]  ;;  %267 = vst [vmem:[%s9209_s26 + $0x1d8] sm:$0xff] %v266_v57  ;;  %v272_v60 = vld [vmem:[%s9204_s25 + $0x384] sm:$0xff] }
  0x30   : > { %269 = vst [vmem:[%s9209_s26 + $0x1e0] sm:$0xff] %v268_v58  ;;  %271 = vst [vmem:[%s9209_s26 + $0x1e8] sm:$0xff] %v270_v59  ;;  %v274_v61 = vld [vmem:[%s9204_s25 + $0x38c] sm:$0xff]  ;;  %v276_v62 = vld [vmem:[%s9204_s25 + $0x394] sm:$0xff] }
  0x31   : > { %273 = vst [vmem:[%s9209_s26 + $0x1f4] sm:$0xff] %v272_v60  ;;  %275 = vst [vmem:[%s9209_s26 + $0x1fc] sm:$0xff] %v274_v61  ;;  %v278_v63 = vld [vmem:[%s9204_s25 + $0x39c] sm:$0xff]  ;;  %v280_v0 = vld [vmem:[%s9204_s25 + $0x3a4] sm:$0xff] }
  0x32   : > { %277 = vst [vmem:[%s9209_s26 + $0x204] sm:$0xff] %v276_v62  ;;  %v282_v1 = vld [vmem:[%s9204_s25 + $0x3ac] sm:$0xff]  ;;  %279 = vst [vmem:[%s9209_s26 + $0x20c] sm:$0xff] %v278_v63  ;;  %v284_v2 = vld [vmem:[%s9204_s25 + $0x3b4] sm:$0xff] }
  0x33   : > { %281 = vst [vmem:[%s9209_s26 + $0x214] sm:$0xff] %v280_v0  ;;  %283 = vst [vmem:[%s9209_s26 + $0x21c] sm:$0xff] %v282_v1  ;;  %v286_v3 = vld [vmem:[%s9204_s25 + $0x3bc] sm:$0xff]  ;;  %v288_v4 = vld [vmem:[%s9204_s25 + $0x3c4] sm:$0xff] }
  0x34   : > { %285 = vst [vmem:[%s9209_s26 + $0x224] sm:$0xff] %v284_v2  ;;  %287 = vst [vmem:[%s9209_s26 + $0x22c] sm:$0xff] %v286_v3  ;;  %v290_v5 = vld [vmem:[%s9204_s25 + $0x3cc] sm:$0xff]  ;;  %v292_v6 = vld [vmem:[%s9204_s25 + $0x3d4] sm:$0xff] }
  0x35   : > { %289 = vst [vmem:[%s9209_s26 + $0x234] sm:$0xff] %v288_v4  ;;  %v294_v7 = vld [vmem:[%s9204_s25 + $0x3dc] sm:$0xff]  ;;  %291 = vst [vmem:[%s9209_s26 + $0x23c] sm:$0xff] %v290_v5  ;;  %v296_v8 = vld [vmem:[%s9204_s25 + $0x3e8] sm:$0xff] }
  0x36   : > { %293 = vst [vmem:[%s9209_s26 + $0x244] sm:$0xff] %v292_v6  ;;  %295 = vst [vmem:[%s9209_s26 + $0x24c] sm:$0xff] %v294_v7  ;;  %v298_v9 = vld [vmem:[%s9204_s25 + $0x3f0] sm:$0xff]  ;;  %v300_v10 = vld [vmem:[%s9204_s25 + $0x3f8] sm:$0xff] }
  0x37   : > { %297 = vst [vmem:[%s9209_s26 + $0x258] sm:$0xff] %v296_v8  ;;  %299 = vst [vmem:[%s9209_s26 + $0x260] sm:$0xff] %v298_v9  ;;  %v302_v11 = vld [vmem:[%s9204_s25 + $0x400] sm:$0xff]  ;;  %v304_v12 = vld [vmem:[%s9204_s25 + $0x408] sm:$0xff] }
  0x38   : > { %301 = vst [vmem:[%s9209_s26 + $0x268] sm:$0xff] %v300_v10  ;;  %v306_v13 = vld [vmem:[%s9204_s25 + $0x410] sm:$0xff]  ;;  %303 = vst [vmem:[%s9209_s26 + $0x270] sm:$0xff] %v302_v11  ;;  %v308_v14 = vld [vmem:[%s9204_s25 + $0x418] sm:$0xff] }
  0x39   : > { %305 = vst [vmem:[%s9209_s26 + $0x278] sm:$0xff] %v304_v12  ;;  %307 = vst [vmem:[%s9209_s26 + $0x280] sm:$0xff] %v306_v13  ;;  %v310_v15 = vld [vmem:[%s9204_s25 + $0x420] sm:$0xff]  ;;  %v312_v16 = vld [vmem:[%s9204_s25 + $0x428] sm:$0xff] }
  0x3a   : > { %309 = vst [vmem:[%s9209_s26 + $0x288] sm:$0xff] %v308_v14  ;;  %311 = vst [vmem:[%s9209_s26 + $0x290] sm:$0xff] %v310_v15  ;;  %v314_v17 = vld [vmem:[%s9204_s25 + $0x430] sm:$0xff]  ;;  %v316_v18 = vld [vmem:[%s9204_s25 + $0x438] sm:$0xff] }
  0x3b   : > { %313 = vst [vmem:[%s9209_s26 + $0x298] sm:$0xff] %v312_v16  ;;  %v318_v19 = vld [vmem:[%s9204_s25 + $0x440] sm:$0xff]  ;;  %315 = vst [vmem:[%s9209_s26 + $0x2a0] sm:$0xff] %v314_v17  ;;  %v320_v20 = vld [vmem:[%s9204_s25 + $0x44c] sm:$0xff] }
  0x3c   : > { %317 = vst [vmem:[%s9209_s26 + $0x2a8] sm:$0xff] %v316_v18  ;;  %319 = vst [vmem:[%s9209_s26 + $0x2b0] sm:$0xff] %v318_v19  ;;  %v322_v21 = vld [vmem:[%s9204_s25 + $0x454] sm:$0xff]  ;;  %v324_v22 = vld [vmem:[%s9204_s25 + $0x45c] sm:$0xff] }
  0x3d   : > { %321 = vst [vmem:[%s9209_s26 + $0x2bc] sm:$0xff] %v320_v20  ;;  %323 = vst [vmem:[%s9209_s26 + $0x2c4] sm:$0xff] %v322_v21  ;;  %v326_v23 = vld [vmem:[%s9204_s25 + $0x464] sm:$0xff]  ;;  %v328_v24 = vld [vmem:[%s9204_s25 + $0x46c] sm:$0xff] }
  0x3e   : > { %325 = vst [vmem:[%s9209_s26 + $0x2cc] sm:$0xff] %v324_v22  ;;  %v330_v25 = vld [vmem:[%s9204_s25 + $0x474] sm:$0xff]  ;;  %327 = vst [vmem:[%s9209_s26 + $0x2d4] sm:$0xff] %v326_v23  ;;  %v332_v26 = vld [vmem:[%s9204_s25 + $0x47c] sm:$0xff] }
  0x3f   : > { %329 = vst [vmem:[%s9209_s26 + $0x2dc] sm:$0xff] %v328_v24  ;;  %331 = vst [vmem:[%s9209_s26 + $0x2e4] sm:$0xff] %v330_v25  ;;  %v334_v27 = vld [vmem:[%s9204_s25 + $0x484] sm:$0xff]  ;;  %v336_v28 = vld [vmem:[%s9204_s25 + $0x48c] sm:$0xff] }
  0x40   : > { %333 = vst [vmem:[%s9209_s26 + $0x2ec] sm:$0xff] %v332_v26  ;;  %335 = vst [vmem:[%s9209_s26 + $0x2f4] sm:$0xff] %v334_v27  ;;  %v338_v29 = vld [vmem:[%s9204_s25 + $0x494] sm:$0xff]  ;;  %v340_v30 = vld [vmem:[%s9204_s25 + $0x49c] sm:$0xff] }
  0x41   : > { %337 = vst [vmem:[%s9209_s26 + $0x2fc] sm:$0xff] %v336_v28  ;;  %v342_v31 = vld [vmem:[%s9204_s25 + $0x4a4] sm:$0xff]  ;;  %339 = vst [vmem:[%s9209_s26 + $0x304] sm:$0xff] %v338_v29  ;;  %v348_v34 = vld [vmem:[%s9204_s25 + $0x650] sm:$0xff] }
  0x42   : > { %341 = vst [vmem:[%s9209_s26 + $0x30c] sm:$0xff] %v340_v30  ;;  %343 = vst [vmem:[%s9209_s26 + $0x314] sm:$0xff] %v342_v31  ;;  %v344_v32 = vld [vmem:[%s9204_s25 + $0x640] sm:$0xff]  ;;  %v346_v33 = vld [vmem:[%s9204_s25 + $0x648] sm:$0xff] }
  0x43   : > { %345 = vst [vmem:[%s9209_s26 + $0x320] sm:$0xff] %v344_v32  ;;  %347 = vst [vmem:[%s9209_s26 + $0x328] sm:$0xff] %v346_v33  ;;  %v350_v35 = vld [vmem:[%s9204_s25 + $0x658] sm:$0xff]  ;;  %v352_v36 = vld [vmem:[%s9204_s25 + $0x660] sm:$0xff] }
  0x44   : > { %349 = vst [vmem:[%s9209_s26 + $0x330] sm:$0xff] %v348_v34  ;;  %v354_v37 = vld [vmem:[%s9204_s25 + $0x668] sm:$0xff]  ;;  %351 = vst [vmem:[%s9209_s26 + $0x338] sm:$0xff] %v350_v35  ;;  %v356_v38 = vld [vmem:[%s9204_s25 + $0x670] sm:$0xff] }
  0x45   : > { %353 = vst [vmem:[%s9209_s26 + $0x340] sm:$0xff] %v352_v36  ;;  %355 = vst [vmem:[%s9209_s26 + $0x348] sm:$0xff] %v354_v37  ;;  %v358_v39 = vld [vmem:[%s9204_s25 + $0x678] sm:$0xff]  ;;  %v360_v40 = vld [vmem:[%s9204_s25 + $0x680] sm:$0xff] }
  0x46   : > { %357 = vst [vmem:[%s9209_s26 + $0x350] sm:$0xff] %v356_v38  ;;  %359 = vst [vmem:[%s9209_s26 + $0x358] sm:$0xff] %v358_v39  ;;  %v362_v41 = vld [vmem:[%s9204_s25 + $0x688] sm:$0xff]  ;;  %v364_v42 = vld [vmem:[%s9204_s25 + $0x690] sm:$0xff] }
  0x47   : > { %361 = vst [vmem:[%s9209_s26 + $0x360] sm:$0xff] %v360_v40  ;;  %v366_v43 = vld [vmem:[%s9204_s25 + $0x698] sm:$0xff]  ;;  %363 = vst [vmem:[%s9209_s26 + $0x368] sm:$0xff] %v362_v41  ;;  %v368_v44 = vld [vmem:[%s9204_s25 + $0x6a4] sm:$0xff] }
  0x48   : > { %365 = vst [vmem:[%s9209_s26 + $0x370] sm:$0xff] %v364_v42  ;;  %367 = vst [vmem:[%s9209_s26 + $0x378] sm:$0xff] %v366_v43  ;;  %v370_v45 = vld [vmem:[%s9204_s25 + $0x6ac] sm:$0xff]  ;;  %v372_v46 = vld [vmem:[%s9204_s25 + $0x6b4] sm:$0xff] }
  0x49   : > { %369 = vst [vmem:[%s9209_s26 + $0x384] sm:$0xff] %v368_v44  ;;  %371 = vst [vmem:[%s9209_s26 + $0x38c] sm:$0xff] %v370_v45  ;;  %v374_v47 = vld [vmem:[%s9204_s25 + $0x6bc] sm:$0xff]  ;;  %v376_v48 = vld [vmem:[%s9204_s25 + $0x6c4] sm:$0xff] }
  0x4a   : > { %373 = vst [vmem:[%s9209_s26 + $0x394] sm:$0xff] %v372_v46  ;;  %v378_v49 = vld [vmem:[%s9204_s25 + $0x6cc] sm:$0xff]  ;;  %375 = vst [vmem:[%s9209_s26 + $0x39c] sm:$0xff] %v374_v47  ;;  %v380_v50 = vld [vmem:[%s9204_s25 + $0x6d4] sm:$0xff] }
  0x4b   : > { %377 = vst [vmem:[%s9209_s26 + $0x3a4] sm:$0xff] %v376_v48  ;;  %379 = vst [vmem:[%s9209_s26 + $0x3ac] sm:$0xff] %v378_v49  ;;  %v382_v51 = vld [vmem:[%s9204_s25 + $0x6dc] sm:$0xff]  ;;  %v384_v52 = vld [vmem:[%s9204_s25 + $0x6e4] sm:$0xff] }
  0x4c   : > { %381 = vst [vmem:[%s9209_s26 + $0x3b4] sm:$0xff] %v380_v50  ;;  %383 = vst [vmem:[%s9209_s26 + $0x3bc] sm:$0xff] %v382_v51  ;;  %v386_v53 = vld [vmem:[%s9204_s25 + $0x6ec] sm:$0xff]  ;;  %v388_v54 = vld [vmem:[%s9204_s25 + $0x6f4] sm:$0xff] }
  0x4d   : > { %385 = vst [vmem:[%s9209_s26 + $0x3c4] sm:$0xff] %v384_v52  ;;  %v390_v55 = vld [vmem:[%s9204_s25 + $0x6fc] sm:$0xff]  ;;  %387 = vst [vmem:[%s9209_s26 + $0x3cc] sm:$0xff] %v386_v53  ;;  %v392_v56 = vld [vmem:[%s9204_s25 + $0x708] sm:$0xff] }
  0x4e   : > { %389 = vst [vmem:[%s9209_s26 + $0x3d4] sm:$0xff] %v388_v54  ;;  %391 = vst [vmem:[%s9209_s26 + $0x3dc] sm:$0xff] %v390_v55  ;;  %v394_v57 = vld [vmem:[%s9204_s25 + $0x710] sm:$0xff]  ;;  %v396_v58 = vld [vmem:[%s9204_s25 + $0x718] sm:$0xff] }
  0x4f   : > { %393 = vst [vmem:[%s9209_s26 + $0x3e8] sm:$0xff] %v392_v56  ;;  %395 = vst [vmem:[%s9209_s26 + $0x3f0] sm:$0xff] %v394_v57  ;;  %v398_v59 = vld [vmem:[%s9204_s25 + $0x720] sm:$0xff]  ;;  %v400_v60 = vld [vmem:[%s9204_s25 + $0x728] sm:$0xff] }
  0x50   : > { %397 = vst [vmem:[%s9209_s26 + $0x3f8] sm:$0xff] %v396_v58  ;;  %v402_v61 = vld [vmem:[%s9204_s25 + $0x730] sm:$0xff]  ;;  %399 = vst [vmem:[%s9209_s26 + $0x400] sm:$0xff] %v398_v59  ;;  %v404_v62 = vld [vmem:[%s9204_s25 + $0x738] sm:$0xff] }
  0x51   : > { %401 = vst [vmem:[%s9209_s26 + $0x408] sm:$0xff] %v400_v60  ;;  %403 = vst [vmem:[%s9209_s26 + $0x410] sm:$0xff] %v402_v61  ;;  %v406_v63 = vld [vmem:[%s9204_s25 + $0x740] sm:$0xff]  ;;  %v408_v0 = vld [vmem:[%s9204_s25 + $0x748] sm:$0xff] }
  0x52   : > { %405 = vst [vmem:[%s9209_s26 + $0x418] sm:$0xff] %v404_v62  ;;  %407 = vst [vmem:[%s9209_s26 + $0x420] sm:$0xff] %v406_v63  ;;  %v410_v1 = vld [vmem:[%s9204_s25 + $0x750] sm:$0xff]  ;;  %v412_v2 = vld [vmem:[%s9204_s25 + $0x758] sm:$0xff] }
  0x53   : > { %409 = vst [vmem:[%s9209_s26 + $0x428] sm:$0xff] %v408_v0  ;;  %v414_v3 = vld [vmem:[%s9204_s25 + $0x760] sm:$0xff]  ;;  %411 = vst [vmem:[%s9209_s26 + $0x430] sm:$0xff] %v410_v1  ;;  %v416_v4 = vld [vmem:[%s9204_s25 + $0x76c] sm:$0xff] }
  0x54   : > { %413 = vst [vmem:[%s9209_s26 + $0x438] sm:$0xff] %v412_v2  ;;  %415 = vst [vmem:[%s9209_s26 + $0x440] sm:$0xff] %v414_v3  ;;  %v418_v5 = vld [vmem:[%s9204_s25 + $0x774] sm:$0xff]  ;;  %v420_v6 = vld [vmem:[%s9204_s25 + $0x77c] sm:$0xff] }
  0x55   : > { %417 = vst [vmem:[%s9209_s26 + $0x44c] sm:$0xff] %v416_v4  ;;  %419 = vst [vmem:[%s9209_s26 + $0x454] sm:$0xff] %v418_v5  ;;  %v422_v7 = vld [vmem:[%s9204_s25 + $0x784] sm:$0xff]  ;;  %v424_v8 = vld [vmem:[%s9204_s25 + $0x78c] sm:$0xff] }
  0x56   : > { %421 = vst [vmem:[%s9209_s26 + $0x45c] sm:$0xff] %v420_v6  ;;  %v426_v9 = vld [vmem:[%s9204_s25 + $0x794] sm:$0xff]  ;;  %423 = vst [vmem:[%s9209_s26 + $0x464] sm:$0xff] %v422_v7  ;;  %v428_v10 = vld [vmem:[%s9204_s25 + $0x79c] sm:$0xff] }
  0x57   : > { %425 = vst [vmem:[%s9209_s26 + $0x46c] sm:$0xff] %v424_v8  ;;  %427 = vst [vmem:[%s9209_s26 + $0x474] sm:$0xff] %v426_v9  ;;  %v430_v11 = vld [vmem:[%s9204_s25 + $0x7a4] sm:$0xff]  ;;  %v432_v12 = vld [vmem:[%s9204_s25 + $0x7ac] sm:$0xff] }
  0x58   : > { %429 = vst [vmem:[%s9209_s26 + $0x47c] sm:$0xff] %v428_v10  ;;  %431 = vst [vmem:[%s9209_s26 + $0x484] sm:$0xff] %v430_v11  ;;  %v434_v13 = vld [vmem:[%s9204_s25 + $0x7b4] sm:$0xff]  ;;  %v436_v14 = vld [vmem:[%s9204_s25 + $0x7bc] sm:$0xff] }
  0x59   : > { %433 = vst [vmem:[%s9209_s26 + $0x48c] sm:$0xff] %v432_v12  ;;  %v438_v15 = vld [vmem:[%s9204_s25 + $0x7c4] sm:$0xff]  ;;  %435 = vst [vmem:[%s9209_s26 + $0x494] sm:$0xff] %v434_v13  ;;  %v444_v18 = vld [vmem:[%s9204_s25 + $0x970] sm:$0xff] }
  0x5a   : > { %437 = vst [vmem:[%s9209_s26 + $0x49c] sm:$0xff] %v436_v14  ;;  %439 = vst [vmem:[%s9209_s26 + $0x4a4] sm:$0xff] %v438_v15  ;;  %v440_v16 = vld [vmem:[%s9204_s25 + $0x960] sm:$0xff]  ;;  %v442_v17 = vld [vmem:[%s9204_s25 + $0x968] sm:$0xff] }
  0x5b   : > { %441 = vst [vmem:[%s9209_s26 + $0x4b0] sm:$0xff] %v440_v16  ;;  %443 = vst [vmem:[%s9209_s26 + $0x4b8] sm:$0xff] %v442_v17  ;;  %v446_v19 = vld [vmem:[%s9204_s25 + $0x978] sm:$0xff]  ;;  %v448_v20 = vld [vmem:[%s9204_s25 + $0x980] sm:$0xff] }
  0x5c   : > { %445 = vst [vmem:[%s9209_s26 + $0x4c0] sm:$0xff] %v444_v18  ;;  %v450_v21 = vld [vmem:[%s9204_s25 + $0x988] sm:$0xff]  ;;  %447 = vst [vmem:[%s9209_s26 + $0x4c8] sm:$0xff] %v446_v19  ;;  %v452_v22 = vld [vmem:[%s9204_s25 + $0x990] sm:$0xff] }
  0x5d   : > { %449 = vst [vmem:[%s9209_s26 + $0x4d0] sm:$0xff] %v448_v20  ;;  %451 = vst [vmem:[%s9209_s26 + $0x4d8] sm:$0xff] %v450_v21  ;;  %v454_v23 = vld [vmem:[%s9204_s25 + $0x998] sm:$0xff]  ;;  %v456_v24 = vld [vmem:[%s9204_s25 + $0x9a0] sm:$0xff] }
  0x5e   : > { %453 = vst [vmem:[%s9209_s26 + $0x4e0] sm:$0xff] %v452_v22  ;;  %455 = vst [vmem:[%s9209_s26 + $0x4e8] sm:$0xff] %v454_v23  ;;  %v458_v25 = vld [vmem:[%s9204_s25 + $0x9a8] sm:$0xff]  ;;  %v460_v26 = vld [vmem:[%s9204_s25 + $0x9b0] sm:$0xff] }
  0x5f   : > { %457 = vst [vmem:[%s9209_s26 + $0x4f0] sm:$0xff] %v456_v24  ;;  %v462_v27 = vld [vmem:[%s9204_s25 + $0x9b8] sm:$0xff]  ;;  %459 = vst [vmem:[%s9209_s26 + $0x4f8] sm:$0xff] %v458_v25  ;;  %v464_v28 = vld [vmem:[%s9204_s25 + $0x9c4] sm:$0xff] }
  0x60   : > { %461 = vst [vmem:[%s9209_s26 + $0x500] sm:$0xff] %v460_v26  ;;  %463 = vst [vmem:[%s9209_s26 + $0x508] sm:$0xff] %v462_v27  ;;  %v466_v29 = vld [vmem:[%s9204_s25 + $0x9cc] sm:$0xff]  ;;  %v468_v30 = vld [vmem:[%s9204_s25 + $0x9d4] sm:$0xff] }
  0x61   : > { %465 = vst [vmem:[%s9209_s26 + $0x514] sm:$0xff] %v464_v28  ;;  %467 = vst [vmem:[%s9209_s26 + $0x51c] sm:$0xff] %v466_v29  ;;  %v470_v31 = vld [vmem:[%s9204_s25 + $0x9dc] sm:$0xff]  ;;  %v472_v32 = vld [vmem:[%s9204_s25 + $0x9e4] sm:$0xff] }
  0x62   : > { %469 = vst [vmem:[%s9209_s26 + $0x524] sm:$0xff] %v468_v30  ;;  %v474_v33 = vld [vmem:[%s9204_s25 + $0x9ec] sm:$0xff]  ;;  %471 = vst [vmem:[%s9209_s26 + $0x52c] sm:$0xff] %v470_v31  ;;  %v476_v34 = vld [vmem:[%s9204_s25 + $0x9f4] sm:$0xff] }
  0x63   : > { %473 = vst [vmem:[%s9209_s26 + $0x534] sm:$0xff] %v472_v32  ;;  %475 = vst [vmem:[%s9209_s26 + $0x53c] sm:$0xff] %v474_v33  ;;  %v478_v35 = vld [vmem:[%s9204_s25 + $0x9fc] sm:$0xff]  ;;  %v480_v36 = vld [vmem:[%s9204_s25 + $0xa04] sm:$0xff] }
  0x64   : > { %477 = vst [vmem:[%s9209_s26 + $0x544] sm:$0xff] %v476_v34  ;;  %479 = vst [vmem:[%s9209_s26 + $0x54c] sm:$0xff] %v478_v35  ;;  %v482_v37 = vld [vmem:[%s9204_s25 + $0xa0c] sm:$0xff]  ;;  %v484_v38 = vld [vmem:[%s9204_s25 + $0xa14] sm:$0xff] }
  0x65   : > { %481 = vst [vmem:[%s9209_s26 + $0x554] sm:$0xff] %v480_v36  ;;  %v486_v39 = vld [vmem:[%s9204_s25 + $0xa1c] sm:$0xff]  ;;  %483 = vst [vmem:[%s9209_s26 + $0x55c] sm:$0xff] %v482_v37  ;;  %v488_v40 = vld [vmem:[%s9204_s25 + $0xa28] sm:$0xff] }
  0x66   : > { %485 = vst [vmem:[%s9209_s26 + $0x564] sm:$0xff] %v484_v38  ;;  %487 = vst [vmem:[%s9209_s26 + $0x56c] sm:$0xff] %v486_v39  ;;  %v490_v41 = vld [vmem:[%s9204_s25 + $0xa30] sm:$0xff]  ;;  %v492_v42 = vld [vmem:[%s9204_s25 + $0xa38] sm:$0xff] }
  0x67   : > { %489 = vst [vmem:[%s9209_s26 + $0x578] sm:$0xff] %v488_v40  ;;  %491 = vst [vmem:[%s9209_s26 + $0x580] sm:$0xff] %v490_v41  ;;  %v494_v43 = vld [vmem:[%s9204_s25 + $0xa40] sm:$0xff]  ;;  %v496_v44 = vld [vmem:[%s9204_s25 + $0xa48] sm:$0xff] }
  0x68   : > { %493 = vst [vmem:[%s9209_s26 + $0x588] sm:$0xff] %v492_v42  ;;  %v498_v45 = vld [vmem:[%s9204_s25 + $0xa50] sm:$0xff]  ;;  %495 = vst [vmem:[%s9209_s26 + $0x590] sm:$0xff] %v494_v43  ;;  %v500_v46 = vld [vmem:[%s9204_s25 + $0xa58] sm:$0xff] }
  0x69   : > { %497 = vst [vmem:[%s9209_s26 + $0x598] sm:$0xff] %v496_v44  ;;  %499 = vst [vmem:[%s9209_s26 + $0x5a0] sm:$0xff] %v498_v45  ;;  %v502_v47 = vld [vmem:[%s9204_s25 + $0xa60] sm:$0xff]  ;;  %v504_v48 = vld [vmem:[%s9204_s25 + $0xa68] sm:$0xff] }
  0x6a   : > { %501 = vst [vmem:[%s9209_s26 + $0x5a8] sm:$0xff] %v500_v46  ;;  %503 = vst [vmem:[%s9209_s26 + $0x5b0] sm:$0xff] %v502_v47  ;;  %v506_v49 = vld [vmem:[%s9204_s25 + $0xa70] sm:$0xff]  ;;  %v508_v50 = vld [vmem:[%s9204_s25 + $0xa78] sm:$0xff] }
  0x6b   : > { %505 = vst [vmem:[%s9209_s26 + $0x5b8] sm:$0xff] %v504_v48  ;;  %v510_v51 = vld [vmem:[%s9204_s25 + $0xa80] sm:$0xff]  ;;  %507 = vst [vmem:[%s9209_s26 + $0x5c0] sm:$0xff] %v506_v49  ;;  %v512_v52 = vld [vmem:[%s9204_s25 + $0xa8c] sm:$0xff] }
  0x6c   : > { %509 = vst [vmem:[%s9209_s26 + $0x5c8] sm:$0xff] %v508_v50  ;;  %511 = vst [vmem:[%s9209_s26 + $0x5d0] sm:$0xff] %v510_v51  ;;  %v514_v53 = vld [vmem:[%s9204_s25 + $0xa94] sm:$0xff]  ;;  %v516_v54 = vld [vmem:[%s9204_s25 + $0xa9c] sm:$0xff] }
  0x6d   : > { %513 = vst [vmem:[%s9209_s26 + $0x5dc] sm:$0xff] %v512_v52  ;;  %515 = vst [vmem:[%s9209_s26 + $0x5e4] sm:$0xff] %v514_v53  ;;  %v518_v55 = vld [vmem:[%s9204_s25 + $0xaa4] sm:$0xff]  ;;  %v520_v56 = vld [vmem:[%s9204_s25 + $0xaac] sm:$0xff] }
  0x6e   : > { %517 = vst [vmem:[%s9209_s26 + $0x5ec] sm:$0xff] %v516_v54  ;;  %v522_v57 = vld [vmem:[%s9204_s25 + $0xab4] sm:$0xff]  ;;  %519 = vst [vmem:[%s9209_s26 + $0x5f4] sm:$0xff] %v518_v55  ;;  %v524_v58 = vld [vmem:[%s9204_s25 + $0xabc] sm:$0xff] }
  0x6f   : > { %521 = vst [vmem:[%s9209_s26 + $0x5fc] sm:$0xff] %v520_v56  ;;  %523 = vst [vmem:[%s9209_s26 + $0x604] sm:$0xff] %v522_v57  ;;  %v526_v59 = vld [vmem:[%s9204_s25 + $0xac4] sm:$0xff]  ;;  %v528_v60 = vld [vmem:[%s9204_s25 + $0xacc] sm:$0xff] }
  0x70   : > { %525 = vst [vmem:[%s9209_s26 + $0x60c] sm:$0xff] %v524_v58  ;;  %527 = vst [vmem:[%s9209_s26 + $0x614] sm:$0xff] %v526_v59  ;;  %v530_v61 = vld [vmem:[%s9204_s25 + $0xad4] sm:$0xff]  ;;  %v532_v62 = vld [vmem:[%s9204_s25 + $0xadc] sm:$0xff] }
  0x71   : > { %529 = vst [vmem:[%s9209_s26 + $0x61c] sm:$0xff] %v528_v60  ;;  %v534_v63 = vld [vmem:[%s9204_s25 + $0xae4] sm:$0xff]  ;;  %531 = vst [vmem:[%s9209_s26 + $0x624] sm:$0xff] %v530_v61  ;;  %v6112_v0 = vld [vmem:[%s9204_s25 + $0x60] sm:$0xf] }
  0x72   : > { %533 = vst [vmem:[%s9209_s26 + $0x62c] sm:$0xff] %v532_v62  ;;  %535 = vst [vmem:[%s9209_s26 + $0x634] sm:$0xff] %v534_v63  ;;  %v6114_v1 = vld [vmem:[%s9204_s25 + $0xc4] sm:$0xf]  ;;  %v6116_v2 = vld [vmem:[%s9204_s25 + $0x128] sm:$0xf] }
  0x73   : > { %6113 = vst [vmem:[%s9209_s26 + $0x60] sm:$0xf] %v6112_v0  ;;  %6115 = vst [vmem:[%s9209_s26 + $0xc4] sm:$0xf] %v6114_v1  ;;  %v6118_v3 = vld [vmem:[%s9204_s25 + $0x18c] sm:$0xf] }
  0x74   : > { %6117 = vst [vmem:[%s9209_s26 + $0x128] sm:$0xf] %v6116_v2  ;;  %v6120_v4 = vld [vmem:[%s9204_s25 + $0x380] sm:$0xf]  ;;  %v6122_v5 = vld [vmem:[%s9204_s25 + $0x3e4] sm:$0xf] }
  0x75   : > { %6119 = vst [vmem:[%s9209_s26 + $0x18c] sm:$0xf] %v6118_v3  ;;  %6121 = vst [vmem:[%s9209_s26 + $0x1f0] sm:$0xf] %v6120_v4  ;;  %v6124_v6 = vld [vmem:[%s9204_s25 + $0x448] sm:$0xf] }
  0x76   : > { %6123 = vst [vmem:[%s9209_s26 + $0x254] sm:$0xf] %v6122_v5  ;;  %v6126_v7 = vld [vmem:[%s9204_s25 + $0x4ac] sm:$0xf]  ;;  %v6128_v8 = vld [vmem:[%s9204_s25 + $0x6a0] sm:$0xf] }
  0x77   : > { %6125 = vst [vmem:[%s9209_s26 + $0x2b8] sm:$0xf] %v6124_v6  ;;  %6127 = vst [vmem:[%s9209_s26 + $0x31c] sm:$0xf] %v6126_v7  ;;  %v6130_v9 = vld [vmem:[%s9204_s25 + $0x704] sm:$0xf] }
  0x78   : > { %6129 = vst [vmem:[%s9209_s26 + $0x380] sm:$0xf] %v6128_v8  ;;  %v6132_v10 = vld [vmem:[%s9204_s25 + $0x768] sm:$0xf]  ;;  %v6134_v11 = vld [vmem:[%s9204_s25 + $0x7cc] sm:$0xf] }
  0x79   : > { %6131 = vst [vmem:[%s9209_s26 + $0x3e4] sm:$0xf] %v6130_v9  ;;  %6133 = vst [vmem:[%s9209_s26 + $0x448] sm:$0xf] %v6132_v10  ;;  %v6136_v12 = vld [vmem:[%s9204_s25 + $0x9c0] sm:$0xf] }
  0x7a   : > { %6135 = vst [vmem:[%s9209_s26 + $0x4ac] sm:$0xf] %v6134_v11  ;;  %v6138_v13 = vld [vmem:[%s9204_s25 + $0xa24] sm:$0xf]  ;;  %v6140_v14 = vld [vmem:[%s9204_s25 + $0xa88] sm:$0xf] }
  0x7b   : > { %6137 = vst [vmem:[%s9209_s26 + $0x510] sm:$0xf] %v6136_v12  ;;  %6139 = vst [vmem:[%s9209_s26 + $0x574] sm:$0xf] %v6138_v13  ;;  %v6142_v15 = vld [vmem:[%s9204_s25 + $0xaec] sm:$0xf] }
  0x7c   : > { %6141 = vst [vmem:[%s9209_s26 + $0x5d8] sm:$0xf] %v6140_v14  ;;  %6143 = vst [vmem:[%s9209_s26 + $0x63c] sm:$0xf] %v6142_v15 }
  0x7d PF: > { %p6144_p5 = scmp.ge.s32.totalorder %s9148_s14, 1  ;;  %p579_p6 = scmp.lt.s32.totalorder %s9148_s14, 3 }
  0x7f   : > { %p580_p7 = pnand %p6144_p5, %p579_p6 }
  0x81   : > { %583 = sbr.rel (%p580_p7) target bundleno = 1224 (0x4c8), region = 54 }
  0x88   : > { %v8211_v16 = vld [vmem:[%s12711_s1 + $0x40] sm:$0xff]   ;;  %v8215_v20 = vld [vmem:[%s12711_s1 + $0x48] sm:$0xff]   ;;  %v8219_v24 = vld [vmem:[%s12711_s1 + $0x50] sm:$0xff]   ;;  %s586_s29 = sand.u32 1, %s9140_s12   ;;  %p609_p8 = scmp.lt.s32.totalorder %s6107_s15, 1  ;;  %vm6036_vm0 = vcmask 1040384  }
  0x89   : > { %v8212_v17 = vld [vmem:[%s12711_s1] sm:$0xff]   ;;  %6720 = vmatprep.subr.bf16.mxu0 %v8211_v16  ;;  %v8216_v21 = vld [vmem:[%s12711_s1 + $0x8] sm:$0xff]   ;;  %v8220_v25 = vld [vmem:[%s12711_s1 + $0x10] sm:$0xff]   ;;  %s8186_s9 = smul.u32 1600, %s586_s29  ;;  %vm6037_vm1 = vsmask.f32 256 }
  0x8a   : > { %v8213_v18 = vld [vmem:[%s12711_s1 + $0xc0] sm:$0xff]   ;;  %6721 = vmatpush3.bf16.msra.mxu0 %v8212_v17  ;;  %v8217_v22 = vld [vmem:[%s12711_s1 + $0xc8] sm:$0xff]   ;;  %v8221_v26 = vld [vmem:[%s12711_s1 + $0xd0] sm:$0xff]   ;;  %s13000_s15 = smov (!%p609_p8, %s6107_s15), 1 }
  0x8b   : > { %v8214_v19 = vld [vmem:[%s12711_s1 + $0x80] sm:$0xff]   ;;  %6748 = vmatprep.subr.bf16.mxu1 %v8213_v18  ;;  %6722 = vmatprep.subr.bf16.mxu0 %v8215_v20  ;;  %v8218_v23 = vld [vmem:[%s12711_s1 + $0x88] sm:$0xff]   ;;  %v8222_v27 = vld [vmem:[%s12711_s1 + $0x90] sm:$0xff]   ;;  %s9720_s27 = scalar_lea.vmem [#allocation2], %s8186_s9 }
  0x8c   : > { %6749 = vmatpush3.bf16.msra.mxu1 %v8214_v19  ;;  %v8223_v28 = vld [vmem:[%s12711_s1 + $0x58] sm:$0xff]   ;;  %v8227_v32 = vld [vmem:[%s12711_s1 + $0x60] sm:$0xff]   ;;  %v8231_v36 = vld [vmem:[%s12711_s1 + $0x68] sm:$0xff]  }
  0x8d   : > { %6750 = vmatprep.subr.bf16.mxu1 %v8217_v22  ;;  %v8224_v29 = vld [vmem:[%s12711_s1 + $0x18] sm:$0xff]   ;;  %v8228_v33 = vld [vmem:[%s12711_s1 + $0x20] sm:$0xff]   ;;  %v8232_v37 = vld [vmem:[%s12711_s1 + $0x28] sm:$0xff]  }
  0x8e   : > { %6723 = vmatpush3.bf16.msra.mxu0 %v8216_v21  ;;  %v8225_v30 = vld [vmem:[%s12711_s1 + $0xd8] sm:$0xff]   ;;  %v8229_v34 = vld [vmem:[%s12711_s1 + $0xe0] sm:$0xff]   ;;  %v8233_v38 = vld [vmem:[%s12711_s1 + $0xe8] sm:$0xff]  }
  0x8f   : > { %6724 = vmatprep.subr.bf16.mxu0 %v8219_v24  ;;  %v8226_v31 = vld [vmem:[%s12711_s1 + $0x98] sm:$0xff]   ;;  %v8230_v35 = vld [vmem:[%s12711_s1 + $0xa0] sm:$0xff]   ;;  %v8234_v39 = vld [vmem:[%s12711_s1 + $0xa8] sm:$0xff]  }
  0x90   : > { %6751 = vmatpush3.bf16.msra.mxu1 %v8218_v23  ;;  %v8235_v40 = vld [vmem:[%s12711_s1 + $0x70] sm:$0xff]   ;;  %v8239_v44 = vld [vmem:[%s12711_s1 + $0x78] sm:$0xff]   ;;  %v8242_v47 = vld [vmem:[%s9720_s27] ss:$100 sps:$4 sm:$0xff]  }
  0x91   : > { %6752 = vmatprep.subr.bf16.mxu1 %v8221_v26  ;;  %v8236_v41 = vld [vmem:[%s12711_s1 + $0x30] sm:$0xff]   ;;  %v8240_v45 = vld [vmem:[%s12711_s1 + $0x38] sm:$0xff]   ;;  %v8244_v48 = vld [vmem:[%s9720_s27 + $0x4] ss:$100 sps:$4 sm:$0xff]  }
  0x92   : > { %6725 = vmatpush3.bf16.msra.mxu0 %v8220_v25  ;;  %v8237_v42 = vld [vmem:[%s12711_s1 + $0xf0] sm:$0xff]   ;;  %v8241_v46 = vld [vmem:[%s12711_s1 + $0xf8] sm:$0xff]   ;;  %2558 = vmatprep.mubr.bf16.mxu0 %v8244_v48  ;;  %v8246_v50 = vld [vmem:[%s12711_s1 + $0x140] sm:$0xff]  }
  0x93   : > { %6726 = vmatprep.subr.bf16.mxu0 %v8223_v28  ;;  %v8238_v43 = vld [vmem:[%s12711_s1 + $0xb0] sm:$0xff]   ;;  %v8245_v49 = vld [vmem:[%s12711_s1 + $0xb8] sm:$0xff]   ;;  %v8247_v51 = vld [vmem:[%s9720_s27 + $0x8] ss:$100 sps:$4 sm:$0xff]  }
  0x94   : > { %6753 = vmatpush3.bf16.msra.mxu1 %v8222_v27  ;;  %v8249_v52 = vld [vmem:[%s9720_s27 + $0xc] ss:$100 sps:$4 sm:$0xff]   ;;  %v8250_v53 = vld [vmem:[%s12711_s1 + $0x100] sm:$0xff]   ;;  %v8261_v0 = vld [vmem:[%s12711_s1 + $0x158] sm:$0xff]  }
  0x95   : > { %6754 = vmatprep.subr.bf16.mxu1 %v8225_v30  ;;  %2607 = vmatprep.mubr.bf16.mxu1 %v8249_v52  ;;  %v8251_v54 = vld [vmem:[%s12711_s1 + $0x1c0] sm:$0xff]   ;;  %v8253_v56 = vld [vmem:[%s12711_s1 + $0x148] sm:$0xff]   ;;  %v8257_v60 = vld [vmem:[%s12711_s1 + $0x150] sm:$0xff]  }
  0x96   : > { %6727 = vmatpush3.bf16.msra.mxu0 %v8224_v29  ;;  %v8252_v55 = vld [vmem:[%s12711_s1 + $0x180] sm:$0xff]   ;;  %v8254_v57 = vld [vmem:[%s12711_s1 + $0x108] sm:$0xff]   ;;  %v8258_v61 = vld [vmem:[%s12711_s1 + $0x110] sm:$0xff]  }
  0x97   : > { %6728 = vmatprep.subr.bf16.mxu0 %v8227_v32  ;;  %v8255_v58 = vld [vmem:[%s12711_s1 + $0x1c8] sm:$0xff]   ;;  %v8259_v62 = vld [vmem:[%s12711_s1 + $0x1d0] sm:$0xff]   ;;  %v8262_v1 = vld [vmem:[%s12711_s1 + $0x118] sm:$0xff]  }
  0x98   : > { %6755 = vmatpush3.bf16.msra.mxu1 %v8226_v31  ;;  %v8256_v59 = vld [vmem:[%s12711_s1 + $0x188] sm:$0xff]   ;;  %v8260_v63 = vld [vmem:[%s12711_s1 + $0x190] sm:$0xff]   ;;  %v8263_v2 = vld [vmem:[%s12711_s1 + $0x1d8] sm:$0xff]  }
  0x99   : > { %6756 = vmatprep.subr.bf16.mxu1 %v8229_v34  ;;  %v8264_v3 = vld [vmem:[%s12711_s1 + $0x198] sm:$0xff]   ;;  %v8265_v4 = vld [vmem:[%s12711_s1 + $0x160] sm:$0xff]   ;;  %v8269_v8 = vld [vmem:[%s12711_s1 + $0x168] sm:$0xff]  }
  0x9a   : > { %6729 = vmatpush3.bf16.msra.mxu0 %v8228_v33  ;;  %v8266_v5 = vld [vmem:[%s12711_s1 + $0x120] sm:$0xff]   ;;  %v8270_v9 = vld [vmem:[%s9720_s27 + $0xcc] ss:$100 sps:$4 sm:$0x1f]   ;;  %v8283_v20 = vld [vmem:[%s12711_s1 + $0x178] sm:$0xff]  }
  0x9b   : > { %6730 = vmatprep.subr.bf16.mxu0 %v8231_v36  ;;  %v8267_v6 = vld [vmem:[%s12711_s1 + $0x1e0] sm:$0xff]   ;;  %v8272_v10 = vld [vmem:[%s12711_s1 + $0x128] sm:$0xff]   ;;  %v8275_v13 = vld [vmem:[%s9720_s27 + $0xd4] ss:$100 sps:$4 sm:$0x1f]  }
  0x9c   : > { %6757 = vmatpush3.bf16.msra.mxu1 %v8230_v35  ;;  %v8268_v7 = vld [vmem:[%s12711_s1 + $0x1a0] sm:$0xff]   ;;  %v8273_v11 = vld [vmem:[%s9720_s27 + $0xc8] ss:$100 sps:$4 sm:$0x1f]   ;;  %v8279_v16 = vld [vmem:[%s12711_s1 + $0x170] sm:$0xff]  }
  0x9d   : > { %6758 = vmatprep.subr.bf16.mxu1 %v8233_v38  ;;  %v8274_v12 = vld [vmem:[%s12711_s1 + $0x1e8] sm:$0xff]   ;;  %v8278_v15 = vld [vmem:[%s9720_s27 + $0xd0] ss:$100 sps:$4 sm:$0x1f]   ;;  %v8284_v21 = vld [vmem:[%s12711_s1 + $0x138] sm:$0xff]  }
  0x9e   : > { %6731 = vmatpush3.bf16.msra.mxu0 %v8232_v37  ;;  %v8277_v14 = vld [vmem:[%s12711_s1 + $0x1a8] sm:$0xff]   ;;  %v8280_v17 = vld [vmem:[%s12711_s1 + $0x130] sm:$0xff]   ;;  %v8285_v22 = vld [vmem:[%s12711_s1 + $0x1f8] sm:$0xff]  }
  0x9f   : > { %6732 = vmatprep.subr.bf16.mxu0 %v8235_v40  ;;  %v8281_v18 = vld [vmem:[%s12711_s1 + $0x1f0] sm:$0xff]   ;;  %v8289_v25 = vld [vmem:[%s12711_s1 + $0x1b8] sm:$0xff]   ;;  %v8290_v26 = vld [vmem:[%s12711_s1 + $0x240] sm:$0xff]  }
  0xa0   : > { %6759 = vmatpush3.bf16.msra.mxu1 %v8234_v39  ;;  %v8282_v19 = vld [vmem:[%s12711_s1 + $0x1b0] sm:$0xff]   ;;  %v8291_v27 = vld [vmem:[%s9720_s27 + $0x18] ss:$100 sps:$4 sm:$0xff]   ;;  %v8294_v29 = vld [vmem:[%s12711_s1 + $0x200] sm:$0xff]  }
  0xa1   : > { %6760 = vmatprep.subr.bf16.mxu1 %v8237_v42  ;;  %v8286_v23 = vld [vmem:[%s9720_s27 + $0x10] ss:$100 sps:$4 sm:$0xff]   ;;  %v8293_v28 = vld [vmem:[%s9720_s27 + $0x1c] ss:$100 sps:$4 sm:$0xff]   ;;  %v8297_v32 = vld [vmem:[%s12711_s1 + $0x248] sm:$0xff]  }
  0xa2   : > { %6733 = vmatpush3.bf16.msra.mxu0 %v8236_v41  ;;  %v8288_v24 = vld [vmem:[%s9720_s27 + $0x14] ss:$100 sps:$4 sm:$0xff]   ;;  %v8295_v30 = vld [vmem:[%s12711_s1 + $0x2c0] sm:$0xff]   ;;  %v8298_v33 = vld [vmem:[%s12711_s1 + $0x208] sm:$0xff]  }
  0xa3   : > { %6734 = vmatprep.subr.bf16.mxu0 %v8239_v44  ;;  %v8296_v31 = vld [vmem:[%s12711_s1 + $0x280] sm:$0xff]   ;;  %v8299_v34 = vld [vmem:[%s12711_s1 + $0x2c8] sm:$0xff]   ;;  %v8303_v37 = vld [vmem:[%s9720_s27 + $0xd8] ss:$100 sps:$4 sm:$0x1f]  }
  0xa4   : > { %6761 = vmatpush3.bf16.msra.mxu1 %v8238_v43  ;;  %v8300_v35 = vld [vmem:[%s9720_s27 + $0xdc] ss:$100 sps:$4 sm:$0x1f]   ;;  %v8302_v36 = vld [vmem:[%s12711_s1 + $0x288] sm:$0xff]   ;;  %v8304_v38 = vld [vmem:[%s12711_s1 + $0x250] sm:$0xff]  }
  0xa5   : > { %6762 = vmatprep.subr.bf16.mxu1 %v8241_v46  ;;  %v8305_v39 = vld [vmem:[%s9720_s27 + $0xe4] ss:$100 sps:$4 sm:$0x1f]   ;;  %v8307_v40 = vld [vmem:[%s12711_s1 + $0x210] sm:$0xff]   ;;  %v8311_v44 = vld [vmem:[%s12711_s1 + $0x258] sm:$0xff]  }
  0xa6   : > { %6735 = vmatpush3.bf16.msra.mxu0 %v8240_v45  ;;  %v8308_v41 = vld [vmem:[%s9720_s27 + $0xe0] ss:$100 sps:$4 sm:$0x1f]   ;;  %v8309_v42 = vld [vmem:[%s12711_s1 + $0x2d0] sm:$0xff]   ;;  %v8312_v45 = vld [vmem:[%s12711_s1 + $0x218] sm:$0xff]  }
  0xa7   : > { %6776 = vmatprep.subr.bf16.mxu0 %v8246_v50  ;;  %v8310_v43 = vld [vmem:[%s12711_s1 + $0x290] sm:$0xff]   ;;  %v8313_v46 = vld [vmem:[%s12711_s1 + $0x2d8] sm:$0xff]   ;;  %v8315_v48 = vld [vmem:[%s12711_s1 + $0x260] sm:$0xff]  }
  0xa8   : > { %6763 = vmatpush3.bf16.msra.mxu1 %v8245_v49  ;;  %v8316_v49 = vld [vmem:[%s12711_s1 + $0x220] sm:$0xff]   ;;  %v8319_v52 = vld [vmem:[%s12711_s1 + $0x268] sm:$0xff]   ;;  %vm6038_vm2 = vmand %vm6036_vm0, %vm6037_vm1 }
  0xa9   : > { %2559 = vmatmul.mubr.bf16.vlgmr.msra.gmra.mrb[0].mxu0 %v8242_v47  ;;  %6804 = vmatprep.subr.bf16.mxu1 %v8251_v54  ;;  %v8314_v47 = vld [vmem:[%s12711_s1 + $0x298] sm:$0xff]   ;;  %v8317_v50 = vld [vmem:[%s12711_s1 + $0x2e0] sm:$0xff]   ;;  %v8321_v54 = vld [vmem:[%s12711_s1 + $0x2e8] sm:$0xff]  }
  0xaa   : > { %6777 = vmatpush3.bf16.msra.mxu0 %v8250_v53  ;;  %2566 = vmatprep.mubr.bf16.mxu0 %v8270_v9  ;;  %v8320_v53 = vld [vmem:[%s12711_s1 + $0x228] sm:$0xff]  }
  0xab   : > { %2608 = vmatmul.mubr.bf16.vlgmr.msra.gmra.mrb[0].mxu1 %v8247_v51  ;;  %6778 = vmatprep.subr.bf16.mxu0 %v8253_v56  ;;  %v8318_v51 = vld [vmem:[%s12711_s1 + $0x2a0] sm:$0xff]   ;;  %v8323_v56 = vld [vmem:[%s12711_s1 + $0x270] sm:$0xff]   ;;  %v8342_v9 = vld [vmem:[%s12711_s1 + $0x308] sm:$0xff]  }
  0xac   : > { %6805 = vmatpush3.bf16.msra.mxu1 %v8252_v55  ;;  %2615 = vmatprep.mubr.bf16.mxu1 %v8275_v13  ;;  %v8322_v55 = vld [vmem:[%s12711_s1 + $0x2a8] sm:$0xff]  }
  0xad   : > { %6806 = vmatprep.subr.bf16.mxu1 %v8255_v58  ;;  %v8325_v58 = vld [vmem:[%s12711_s1 + $0x2f0] sm:$0xff]   ;;  %v8347_v13 = vld [vmem:[%s9720_s27 + $0xe8] ss:$100 sps:$4 sm:$0x1f]  }
  0xae   : > { %6779 = vmatpush3.bf16.msra.mxu0 %v8254_v57  ;;  %v8324_v57 = vld [vmem:[%s12711_s1 + $0x230] sm:$0xff]  }
  0xaf   : > { %6780 = vmatprep.subr.bf16.mxu0 %v8257_v60  ;;  %v8327_v60 = vld [vmem:[%s12711_s1 + $0x278] sm:$0xff]  }
  0xb0   : > { %6807 = vmatpush3.bf16.msra.mxu1 %v8256_v59  ;;  %v8326_v59 = vld [vmem:[%s12711_s1 + $0x2b0] sm:$0xff]  }
  0xb1   : > { %6808 = vmatprep.subr.bf16.mxu1 %v8259_v62  ;;  %2567 = vmatmul.mubr.bf16.gmra.mrb[4].mxu0 %v8273_v11  ;;  %v8329_v62 = vld [vmem:[%s12711_s1 + $0x2f8] sm:$0xff]   ;;  %v8344_v11 = vld [vmem:[%s9720_s27 + $0xec] ss:$100 sps:$4 sm:$0x1f]  }
  0xb2   : > { %6781 = vmatpush3.bf16.msra.mxu0 %v8258_v61  ;;  %2656 = vmatprep.mubr.bf16.mxu0 %v8288_v24  ;;  %v8328_v61 = vld [vmem:[%s12711_s1 + $0x238] sm:$0xff]   ;;  %v8359_v24 = vld [vmem:[%s12711_s1 + $0x360] sm:$0xff]  }
  0xb3   : > { %6782 = vmatprep.subr.bf16.mxu0 %v8261_v0  ;;  %2616 = vmatmul.mubr.bf16.gmra.mrb[4].mxu1 %v8278_v15  ;;  %v8332_v0 = vld [vmem:[%s9720_s27 + $0x24] ss:$100 sps:$4 sm:$0xff]   ;;  %v8349_v15 = vld [vmem:[%s9720_s27 + $0xf4] ss:$100 sps:$4 sm:$0x1f]  }
  0xb4   : > { %6809 = vmatpush3.bf16.msra.mxu1 %v8260_v63  ;;  %2705 = vmatprep.mubr.bf16.mxu1 %v8293_v28  ;;  %v8330_v63 = vld [vmem:[%s9720_s27 + $0x20] ss:$100 sps:$4 sm:$0xff]   ;;  %v8363_v28 = vld [vmem:[%s12711_s1 + $0x368] sm:$0xff]  }
  0xb5   : > { %6810 = vmatprep.subr.bf16.mxu1 %v8263_v2  ;;  %v8334_v2 = vld [vmem:[%s12711_s1 + $0x340] sm:$0xff]  }
  0xb6   : > { %6783 = vmatpush3.bf16.msra.mxu0 %v8262_v1  ;;  %v8333_v1 = vld [vmem:[%s12711_s1 + $0x2b8] sm:$0xff]  }
  0xb7   : > { %6784 = vmatprep.subr.bf16.mxu0 %v8265_v4  ;;  %v8337_v4 = vld [vmem:[%s9720_s27 + $0x2c] ss:$100 sps:$4 sm:$0xff]  }
  0xb8   : > { %6811 = vmatpush3.bf16.msra.mxu1 %v8264_v3  ;;  %v8335_v3 = vld [vmem:[%s9720_s27 + $0x28] ss:$100 sps:$4 sm:$0xff]  }
  0xb9   : > { %6812 = vmatprep.subr.bf16.mxu1 %v8267_v6  ;;  %v8339_v6 = vld [vmem:[%s12711_s1 + $0x3c0] sm:$0xff]  }
  0xba   : > { %6785 = vmatpush3.bf16.msra.mxu0 %v8266_v5  ;;  %v8338_v5 = vld [vmem:[%s12711_s1 + $0x300] sm:$0xff]  }
  0xbb   : > { %6786 = vmatprep.subr.bf16.mxu0 %v8269_v8  ;;  %v8341_v8 = vld [vmem:[%s12711_s1 + $0x348] sm:$0xff]  }
  0xbc   : > { %6813 = vmatpush3.bf16.msra.mxu1 %v8268_v7  ;;  %v8340_v7 = vld [vmem:[%s12711_s1 + $0x380] sm:$0xff]  }
  0xbd   : > { %6814 = vmatprep.subr.bf16.mxu1 %v8274_v12  ;;  %v8346_v12 = vld [vmem:[%s12711_s1 + $0x388] sm:$0xff]  }
  0xbe   : > { %6787 = vmatpush3.bf16.msra.mxu0 %v8272_v10  ;;  %v8343_v10 = vld [vmem:[%s12711_s1 + $0x3c8] sm:$0xff]  }
  0xbf   : > { %6788 = vmatprep.subr.bf16.mxu0 %v8279_v16  ;;  %v8351_v16 = vld [vmem:[%s12711_s1 + $0x310] sm:$0xff]  }
  0xc0   : > { %6815 = vmatpush3.bf16.msra.mxu1 %v8277_v14  ;;  %v8348_v14 = vld [vmem:[%s12711_s1 + $0x350] sm:$0xff]  }
  0xc1   : > { %6816 = vmatprep.subr.bf16.mxu1 %v8281_v18  ;;  %v8353_v18 = vld [vmem:[%s12711_s1 + $0x3d0] sm:$0xff]  }
  0xc2   : > { %6789 = vmatpush3.bf16.msra.mxu0 %v8280_v17  ;;  %v8352_v17 = vld [vmem:[%s9720_s27 + $0xf0] ss:$100 sps:$4 sm:$0x1f]  }
  0xc3   : > { %6790 = vmatprep.subr.bf16.mxu0 %v8283_v20  ;;  %v8355_v20 = vld [vmem:[%s12711_s1 + $0x358] sm:$0xff]  }
  0xc4   : > { %6817 = vmatpush3.bf16.msra.mxu1 %v8282_v19  ;;  %v8354_v19 = vld [vmem:[%s12711_s1 + $0x390] sm:$0xff]  }
  0xc5   : > { %6818 = vmatprep.subr.bf16.mxu1 %v8285_v22  ;;  %v8357_v22 = vld [vmem:[%s12711_s1 + $0x3d8] sm:$0xff]  }
  0xc6   : > { %6791 = vmatpush3.bf16.msra.mxu0 %v8284_v21  ;;  %v8356_v21 = vld [vmem:[%s12711_s1 + $0x318] sm:$0xff]  }
  0xc7   : > { %6832 = vmatprep.subr.bf16.mxu0 %v8290_v26  ;;  %v8361_v26 = vld [vmem:[%s12711_s1 + $0x3e0] sm:$0xff]  }
  0xc8   : > { %6819 = vmatpush3.bf16.msra.mxu1 %v8289_v25  ;;  %v8360_v25 = vld [vmem:[%s12711_s1 + $0x320] sm:$0xff]  }
  0xc9   : > { %2657 = vmatmul.mubr.bf16.vlgmr.msra.gmra.mrb[8].mxu0 %v8286_v23  ;;  %6860 = vmatprep.subr.bf16.mxu1 %v8295_v30  ;;  %v8358_v23 = vld [vmem:[%s12711_s1 + $0x398] sm:$0xff]   ;;  %v8365_v30 = vld [vmem:[%s12711_s1 + $0x3e8] sm:$0xff]  }
  0xca   : > { %6833 = vmatpush3.bf16.msra.mxu0 %v8294_v29  ;;  %2664 = vmatprep.mubr.bf16.mxu0 %v8300_v35  ;;  %v8364_v29 = vld [vmem:[%s12711_s1 + $0x328] sm:$0xff]   ;;  %v8370_v35 = vld [vmem:[%s12711_s1 + $0x3b0] sm:$0xff]  }
  0xcb   : > { %2706 = vmatmul.mubr.bf16.vlgmr.msra.gmra.mrb[8].mxu1 %v8291_v27  ;;  %6834 = vmatprep.subr.bf16.mxu0 %v8297_v32  ;;  %v8362_v27 = vld [vmem:[%s12711_s1 + $0x3a0] sm:$0xff]   ;;  %v8367_v32 = vld [vmem:[%s12711_s1 + $0x370] sm:$0xff]  }
  0xcc   : > { %6861 = vmatpush3.bf16.msra.mxu1 %v8296_v31  ;;  %2713 = vmatprep.mubr.bf16.mxu1 %v8305_v39  ;;  %v8366_v31 = vld [vmem:[%s12711_s1 + $0x3a8] sm:$0xff]   ;;  %v8374_v39 = vld [vmem:[%s9720_s27 + $0x30] ss:$100 sps:$4 sm:$0xff]  }
  0xcd   : > { %6862 = vmatprep.subr.bf16.mxu1 %v8299_v34  ;;  %v8369_v34 = vld [vmem:[%s12711_s1 + $0x3f0] sm:$0xff]  }
  0xce   : > { %6835 = vmatpush3.bf16.msra.mxu0 %v8298_v33  ;;  %v8368_v33 = vld [vmem:[%s12711_s1 + $0x330] sm:$0xff]  }
  0xcf   : > { %6836 = vmatprep.subr.bf16.mxu0 %v8304_v38  ;;  %v8373_v38 = vld [vmem:[%s12711_s1 + $0x3f8] sm:$0xff]  }
  0xd0   : > { %6863 = vmatpush3.bf16.msra.mxu1 %v8302_v36  ;;  %v8371_v36 = vld [vmem:[%s12711_s1 + $0x378] sm:$0xff]  }
  0xd1   : > { %2665 = vmatmul.mubr.bf16.gmra.mrb[12].mxu0 %v8303_v37  ;;  %6864 = vmatprep.subr.bf16.mxu1 %v8309_v42  ;;  %v8372_v37 = vld [vmem:[%s12711_s1 + $0x338] sm:$0xff]   ;;  %v8378_v42 = vld [vmem:[%s12711_s1 + $0x440] sm:$0xff]  }
  0xd2   : > { %6837 = vmatpush3.bf16.msra.mxu0 %v8307_v40  ;;  %2754 = vmatprep.mubr.bf16.mxu0 %v8332_v0  ;;  %v8376_v40 = vld [vmem:[%s9720_s27 + $0x34] ss:$100 sps:$4 sm:$0xff]   ;;  %v8403_v0 = vld [vmem:[%s12711_s1 + $0x460] sm:$0xff]  }
  0xd3   : > { %2714 = vmatmul.mubr.bf16.gmra.mrb[12].mxu1 %v8308_v41  ;;  %6838 = vmatprep.subr.bf16.mxu0 %v8311_v44  ;;  %v8377_v41 = vld [vmem:[%s12711_s1 + $0x3b8] sm:$0xff]  }
  0xd4   : > { %6865 = vmatpush3.bf16.msra.mxu1 %v8310_v43  ;;  %2803 = vmatprep.mubr.bf16.mxu1 %v8337_v4  ;;  %v8379_v43 = vld [vmem:[%s9720_s27 + $0x38] ss:$100 sps:$4 sm:$0xff]   ;;  %v8407_v4 = vld [vmem:[%s12711_s1 + $0x468] sm:$0xff]  }
  0xd5   : > { %6866 = vmatprep.subr.bf16.mxu1 %v8313_v46  ;;  %v8381_v44 = vld [vmem:[%s9720_s27 + $0x3c] ss:$100 sps:$4 sm:$0xff]  }
  0xd6   : > { %6839 = vmatpush3.bf16.msra.mxu0 %v8312_v45  ;;  %v8382_v45 = vld [vmem:[%s12711_s1 + $0x400] sm:$0xff]  }
  0xd7   : > { %6840 = vmatprep.subr.bf16.mxu0 %v8315_v48  ;;  %v8383_v46 = vld [vmem:[%s12711_s1 + $0x4c0] sm:$0xff]   ;;  %v8385_v48 = vld [vmem:[%s12711_s1 + $0x448] sm:$0xff]  }
  0xd8   : > { %6867 = vmatpush3.bf16.msra.mxu1 %v8314_v47  ;;  %v8384_v47 = vld [vmem:[%s12711_s1 + $0x480] sm:$0xff]  }
  0xd9   : > { %6868 = vmatprep.subr.bf16.mxu1 %v8317_v50  ;;  %v8387_v50 = vld [vmem:[%s12711_s1 + $0x4c8] sm:$0xff]  }
  0xda   : > { %6841 = vmatpush3.bf16.msra.mxu0 %v8316_v49  ;;  %v8386_v49 = vld [vmem:[%s12711_s1 + $0x408] sm:$0xff]  }
  0xdb   : > { %6842 = vmatprep.subr.bf16.mxu0 %v8319_v52  ;;  %v8390_v52 = vld [vmem:[%s12711_s1 + $0x488] sm:$0xff]  }
  0xdc   : > { %6869 = vmatpush3.bf16.msra.mxu1 %v8318_v51  ;;  %v8388_v51 = vld [vmem:[%s9720_s27 + $0xfc] ss:$100 sps:$4 sm:$0x1f]  }
  0xdd   : > { %6870 = vmatprep.subr.bf16.mxu1 %v8321_v54  ;;  %v8392_v54 = vld [vmem:[%s12711_s1 + $0x450] sm:$0xff]  }
  0xde   : > { %6843 = vmatpush3.bf16.msra.mxu0 %v8320_v53  ;;  %v8391_v53 = vld [vmem:[%s9720_s27 + $0xf8] ss:$100 sps:$4 sm:$0x1f]  }
  0xdf   : > { %6844 = vmatprep.subr.bf16.mxu0 %v8323_v56  ;;  %v8395_v56 = vld [vmem:[%s12711_s1 + $0x410] sm:$0xff]  }
  0xe0   : > { %6871 = vmatpush3.bf16.msra.mxu1 %v8322_v55  ;;  %v8393_v55 = vld [vmem:[%s9720_s27 + $0x104] ss:$100 sps:$4 sm:$0x1f]  }
  0xe1   : > { %6872 = vmatprep.subr.bf16.mxu1 %v8325_v58  ;;  %v8397_v58 = vld [vmem:[%s12711_s1 + $0x4d0] sm:$0xff]  }
  0xe2   : > { %6845 = vmatpush3.bf16.msra.mxu0 %v8324_v57  ;;  %v8396_v57 = vld [vmem:[%s9720_s27 + $0x100] ss:$100 sps:$4 sm:$0x1f]  }
  0xe3   : > { %6846 = vmatprep.subr.bf16.mxu0 %v8327_v60  ;;  %v8399_v60 = vld [vmem:[%s12711_s1 + $0x458] sm:$0xff]  }
  0xe4   : > { %6873 = vmatpush3.bf16.msra.mxu1 %v8326_v59  ;;  %v8398_v59 = vld [vmem:[%s12711_s1 + $0x490] sm:$0xff]  }
  0xe5   : > { %6874 = vmatprep.subr.bf16.mxu1 %v8329_v62  ;;  %v8401_v62 = vld [vmem:[%s12711_s1 + $0x4d8] sm:$0xff]  }
  0xe6   : > { %6847 = vmatpush3.bf16.msra.mxu0 %v8328_v61  ;;  %v8400_v61 = vld [vmem:[%s12711_s1 + $0x418] sm:$0xff]  }
  0xe7   : > { %6888 = vmatprep.subr.bf16.mxu0 %v8334_v2  ;;  %v8405_v2 = vld [vmem:[%s12711_s1 + $0x4e0] sm:$0xff]  }
  0xe8   : > { %6875 = vmatpush3.bf16.msra.mxu1 %v8333_v1  ;;  %v8404_v1 = vld [vmem:[%s12711_s1 + $0x420] sm:$0xff]  }
  0xe9   : > { %2755 = vmatmul.mubr.bf16.vlgmr.msra.gmra.mrb[16].mxu0 %v8330_v63  ;;  %6916 = vmatprep.subr.bf16.mxu1 %v8339_v6  ;;  %v8402_v63 = vld [vmem:[%s12711_s1 + $0x498] sm:$0xff]   ;;  %v8409_v6 = vld [vmem:[%s12711_s1 + $0x4e8] sm:$0xff]  }
  0xea   : > { %6889 = vmatpush3.bf16.msra.mxu0 %v8338_v5  ;;  %2762 = vmatprep.mubr.bf16.mxu0 %v8344_v11  ;;  %v8408_v5 = vld [vmem:[%s12711_s1 + $0x428] sm:$0xff]   ;;  %v8414_v11 = vld [vmem:[%s12711_s1 + $0x4b0] sm:$0xff]  }
  0xeb   : > { %2804 = vmatmul.mubr.bf16.vlgmr.msra.gmra.mrb[16].mxu1 %v8335_v3  ;;  %6890 = vmatprep.subr.bf16.mxu0 %v8341_v8  ;;  %v8406_v3 = vld [vmem:[%s12711_s1 + $0x4a0] sm:$0xff]   ;;  %v8411_v8 = vld [vmem:[%s12711_s1 + $0x470] sm:$0xff]  }
  0xec   : > { %6917 = vmatpush3.bf16.msra.mxu1 %v8340_v7  ;;  %2811 = vmatprep.mubr.bf16.mxu1 %v8349_v15  ;;  %v8410_v7 = vld [vmem:[%s12711_s1 + $0x4a8] sm:$0xff]   ;;  %v8418_v15 = vld [vmem:[%s9720_s27 + $0x40] ss:$100 sps:$4 sm:$0xff]  }
  0xed   : > { %6918 = vmatprep.subr.bf16.mxu1 %v8343_v10  ;;  %v8413_v10 = vld [vmem:[%s12711_s1 + $0x4f0] sm:$0xff]  }
  0xee   : > { %6891 = vmatpush3.bf16.msra.mxu0 %v8342_v9  ;;  %v8412_v9 = vld [vmem:[%s12711_s1 + $0x430] sm:$0xff]  }
  0xef   : > { %6892 = vmatprep.subr.bf16.mxu0 %v8348_v14  ;;  %v8417_v14 = vld [vmem:[%s12711_s1 + $0x4f8] sm:$0xff]  }
  0xf0   : > { %6919 = vmatpush3.bf16.msra.mxu1 %v8346_v12  ;;  %v8415_v12 = vld [vmem:[%s12711_s1 + $0x478] sm:$0xff]  }
  0xf1   : > { %2763 = vmatmul.mubr.bf16.gmra.mrb[20].mxu0 %v8347_v13  ;;  %6920 = vmatprep.subr.bf16.mxu1 %v8353_v18  ;;  %v8416_v13 = vld [vmem:[%s12711_s1 + $0x438] sm:$0xff]   ;;  %v8422_v18 = vld [vmem:[%s12711_s1 + $0x540] sm:$0xff]  }
  0xf2   : > { %6893 = vmatpush3.bf16.msra.mxu0 %v8351_v16  ;;  %2852 = vmatprep.mubr.bf16.mxu0 %v8376_v40  ;;  %v8420_v16 = vld [vmem:[%s9720_s27 + $0x44] ss:$100 sps:$4 sm:$0xff]  }
  0xf3   : > { %2812 = vmatmul.mubr.bf16.gmra.mrb[20].mxu1 %v8352_v17  ;;  %6894 = vmatprep.subr.bf16.mxu0 %v8355_v20  ;;  %v8421_v17 = vld [vmem:[%s12711_s1 + $0x4b8] sm:$0xff]   ;;  %v8425_v20 = vld [vmem:[%s9720_s27 + $0x4c] ss:$100 sps:$4 sm:$0xff]   ;;  %v8447_v40 = vld [vmem:[%s12711_s1 + $0x560] sm:$0xff]  }
  0xf4   : > { %6921 = vmatpush3.bf16.msra.mxu1 %v8354_v19  ;;  %2901 = vmatprep.mubr.bf16.mxu1 %v8381_v44  ;;  %v8423_v19 = vld [vmem:[%s9720_s27 + $0x48] ss:$100 sps:$4 sm:$0xff]  }
  0xf5   : > { %6922 = vmatprep.subr.bf16.mxu1 %v8357_v22  ;;  %v8427_v22 = vld [vmem:[%s12711_s1 + $0x5c0] sm:$0xff]   ;;  %v8451_v44 = vld [vmem:[%s12711_s1 + $0x568] sm:$0xff]  }
  0xf6   : > { %6895 = vmatpush3.bf16.msra.mxu0 %v8356_v21  ;;  %v8426_v21 = vld [vmem:[%s12711_s1 + $0x500] sm:$0xff]  }
  0xf7   : > { %6896 = vmatprep.subr.bf16.mxu0 %v8359_v24  ;;  %v8429_v24 = vld [vmem:[%s12711_s1 + $0x548] sm:$0xff]  }
  0xf8   : > { %6923 = vmatpush3.bf16.msra.mxu1 %v8358_v23  ;;  %v8428_v23 = vld [vmem:[%s12711_s1 + $0x580] sm:$0xff]  }
  0xf9   : > { %6924 = vmatprep.subr.bf16.mxu1 %v8361_v26  ;;  %v8431_v26 = vld [vmem:[%s12711_s1 + $0x5c8] sm:$0xff]  }
  0xfa   : > { %6897 = vmatpush3.bf16.msra.mxu0 %v8360_v25  ;;  %v8430_v25 = vld [vmem:[%s12711_s1 + $0x508] sm:$0xff]  }
  0xfb   : > { %6898 = vmatprep.subr.bf16.mxu0 %v8363_v28  ;;  %v8434_v28 = vld [vmem:[%s12711_s1 + $0x588] sm:$0xff]  }
  0xfc   : > { %6925 = vmatpush3.bf16.msra.mxu1 %v8362_v27  ;;  %v8432_v27 = vld [vmem:[%s9720_s27 + $0x10c] ss:$100 sps:$4 sm:$0x1f]  }
  0xfd   : > { %6926 = vmatprep.subr.bf16.mxu1 %v8365_v30  ;;  %v8436_v30 = vld [vmem:[%s12711_s1 + $0x550] sm:$0xff]  }
  0xfe   : > { %6899 = vmatpush3.bf16.msra.mxu0 %v8364_v29  ;;  %v8435_v29 = vld [vmem:[%s9720_s27 + $0x108] ss:$100 sps:$4 sm:$0x1f]  }
  0xff   : > { %6900 = vmatprep.subr.bf16.mxu0 %v8367_v32  ;;  %v8439_v32 = vld [vmem:[%s12711_s1 + $0x510] sm:$0xff]  }
 0x100   : > { %6927 = vmatpush3.bf16.msra.mxu1 %v8366_v31  ;;  %v8437_v31 = vld [vmem:[%s9720_s27 + $0x114] ss:$100 sps:$4 sm:$0x1f]  }
 0x101   : > { %6928 = vmatprep.subr.bf16.mxu1 %v8369_v34  ;;  %v8441_v34 = vld [vmem:[%s12711_s1 + $0x5d0] sm:$0xff]  }
 0x102   : > { %6901 = vmatpush3.bf16.msra.mxu0 %v8368_v33  ;;  %v8440_v33 = vld [vmem:[%s9720_s27 + $0x110] ss:$100 sps:$4 sm:$0x1f]  }
 0x103   : > { %6902 = vmatprep.subr.bf16.mxu0 %v8371_v36  ;;  %v8443_v36 = vld [vmem:[%s12711_s1 + $0x558] sm:$0xff]  }
 0x104   : > { %6929 = vmatpush3.bf16.msra.mxu1 %v8370_v35  ;;  %v8442_v35 = vld [vmem:[%s12711_s1 + $0x590] sm:$0xff]  }
 0x105   : > { %6930 = vmatprep.subr.bf16.mxu1 %v8373_v38  ;;  %v8445_v38 = vld [vmem:[%s12711_s1 + $0x5d8] sm:$0xff]  }
 0x106   : > { %6903 = vmatpush3.bf16.msra.mxu0 %v8372_v37  ;;  %v8444_v37 = vld [vmem:[%s12711_s1 + $0x518] sm:$0xff]  }
 0x107   : > { %6944 = vmatprep.subr.bf16.mxu0 %v8378_v42  ;;  %v8449_v42 = vld [vmem:[%s12711_s1 + $0x5e0] sm:$0xff]  }
 0x108   : > { %6931 = vmatpush3.bf16.msra.mxu1 %v8377_v41  ;;  %v8448_v41 = vld [vmem:[%s12711_s1 + $0x520] sm:$0xff]  }
 0x109   : > { %2853 = vmatmul.mubr.bf16.vlgmr.msra.gmra.mrb[24].mxu0 %v8374_v39  ;;  %6972 = vmatprep.subr.bf16.mxu1 %v8383_v46  ;;  %v8446_v39 = vld [vmem:[%s12711_s1 + $0x598] sm:$0xff]   ;;  %v8453_v46 = vld [vmem:[%s12711_s1 + $0x5e8] sm:$0xff]  }
 0x10a   : > { %6945 = vmatpush3.bf16.msra.mxu0 %v8382_v45  ;;  %2860 = vmatprep.mubr.bf16.mxu0 %v8388_v51  ;;  %v8452_v45 = vld [vmem:[%s12711_s1 + $0x528] sm:$0xff]   ;;  %v8458_v51 = vld [vmem:[%s12711_s1 + $0x5b0] sm:$0xff]  }
 0x10b   : > { %2902 = vmatmul.mubr.bf16.vlgmr.msra.gmra.mrb[24].mxu1 %v8379_v43  ;;  %6946 = vmatprep.subr.bf16.mxu0 %v8385_v48  ;;  %v8450_v43 = vld [vmem:[%s12711_s1 + $0x5a0] sm:$0xff]   ;;  %v8455_v48 = vld [vmem:[%s12711_s1 + $0x570] sm:$0xff]  }
 0x10c   : > { %6973 = vmatpush3.bf16.msra.mxu1 %v8384_v47  ;;  %2909 = vmatprep.mubr.bf16.mxu1 %v8393_v55  ;;  %v8454_v47 = vld [vmem:[%s12711_s1 + $0x5a8] sm:$0xff]   ;;  %v8462_v55 = vld [vmem:[%s9720_s27 + $0x50] ss:$100 sps:$4 sm:$0xff]  }
 0x10d   : > { %6974 = vmatprep.subr.bf16.mxu1 %v8387_v50  ;;  %v8457_v50 = vld [vmem:[%s12711_s1 + $0x5f0] sm:$0xff]  }
 0x10e   : > { %6947 = vmatpush3.bf16.msra.mxu0 %v8386_v49  ;;  %v8456_v49 = vld [vmem:[%s12711_s1 + $0x530] sm:$0xff]  }
 0x10f   : > { %6948 = vmatprep.subr.bf16.mxu0 %v8392_v54  ;;  %v8461_v54 = vld [vmem:[%s12711_s1 + $0x5f8] sm:$0xff]  }
 0x110   : > { %6975 = vmatpush3.bf16.msra.mxu1 %v8390_v52  ;;  %v8459_v52 = vld [vmem:[%s12711_s1 + $0x578] sm:$0xff]  }
 0x111   : > { %2861 = vmatmul.mubr.bf16.gmra.mrb[28].mxu0 %v8391_v53  ;;  %6976 = vmatprep.subr.bf16.mxu1 %v8397_v58  ;;  %v8460_v53 = vld [vmem:[%s12711_s1 + $0x538] sm:$0xff]   ;;  %v8466_v58 = vld [vmem:[%s12711_s1 + $0x600] sm:$0xff]  }
 0x112   : > { %6949 = vmatpush3.bf16.msra.mxu0 %v8395_v56  ;;  %2950 = vmatprep.mubr.bf16.mxu0 %v8420_v16  ;;  %v8464_v56 = vld [vmem:[%s9720_s27 + $0x54] ss:$100 sps:$4 sm:$0xff]   ;;  %v8715_v16 = vld [vmem:[%s12711_s1 + $0x60] sm:$0xff]  }
 0x113   : > { %2910 = vmatmul.mubr.bf16.gmra.mrb[28].mxu1 %v8396_v57  ;;  %6950 = vmatprep.subr.bf16.mxu0 %v8399_v60  ;;  %v8465_v57 = vld [vmem:[%s12711_s1 + $0x5b8] sm:$0xff]  }
 0x114   : > { %6977 = vmatpush3.bf16.msra.mxu1 %v8398_v59  ;;  %2999 = vmatprep.mubr.bf16.mxu1 %v8425_v20  ;;  %v8467_v59 = vld [vmem:[%s9720_s27 + $0x58] ss:$100 sps:$4 sm:$0xff]  }
 0x115   : > { %6978 = vmatprep.subr.bf16.mxu1 %v8401_v62  ;;  %v8469_v60 = vld [vmem:[%s9720_s27 + $0x5c] ss:$100 sps:$4 sm:$0xff]   ;;  %v8470_v62 = vld [vmem:[%s12711_s1 + $0x608] sm:$0xff]  }
 0x116   : > { %6951 = vmatpush3.bf16.msra.mxu0 %v8400_v61  ;;  %v8707_v61 = vld [vmem:[%s12711_s1 + $0x40] sm:$0xff]   ;;  %v8482_v20 = vld [vmem:[%s12711_s1 + $0x638] sm:$0xff]  }
 0x117   : > { %6952 = vmatprep.subr.bf16.mxu0 %v8403_v0  ;;  %v8473_v0 = vld [vmem:[%s9720_s27 + $0x118] ss:$100 sps:$4 sm:$0x1f]  }
 0x118   : > { %6979 = vmatpush3.bf16.msra.mxu1 %v8402_v63  ;;  %v8471_v63 = vld [vmem:[%s9720_s27 + $0x11c] ss:$100 sps:$4 sm:$0x1f]  }
 0x119   : > { %6980 = vmatprep.subr.bf16.mxu1 %v8405_v2  ;;  %v8708_v2 = vld [vmem:[%s12711_s1] sm:$0xff]  }
 0x11a   : > { %6953 = vmatpush3.bf16.msra.mxu0 %v8404_v1  ;;  %v8474_v1 = vld [vmem:[%s12711_s1 + $0x610] sm:$0xff]  }
 0x11b   : > { %6954 = vmatprep.subr.bf16.mxu0 %v8407_v4  ;;  %v8709_v4 = vld [vmem:[%s12711_s1 + $0x48] sm:$0xff]  }
 0x11c   : > { %6981 = vmatpush3.bf16.msra.mxu1 %v8406_v3  ;;  %v8475_v3 = vld [vmem:[%s9720_s27 + $0x124] ss:$100 sps:$4 sm:$0x1f]  }
 0x11d   : > { %6982 = vmatprep.subr.bf16.mxu1 %v8409_v6  ;;  %v8478_v6 = vld [vmem:[%s12711_s1 + $0x618] sm:$0xff]  }
 0x11e   : > { %6955 = vmatpush3.bf16.msra.mxu0 %v8408_v5  ;;  %v8477_v5 = vld [vmem:[%s9720_s27 + $0x120] ss:$100 sps:$4 sm:$0x1f]  }
 0x11f   : > { %6956 = vmatprep.subr.bf16.mxu0 %v8411_v8  ;;  %v8711_v8 = vld [vmem:[%s12711_s1 + $0x50] sm:$0xff]  }
 0x120   : > { %6983 = vmatpush3.bf16.msra.mxu1 %v8410_v7  ;;  %v8710_v7 = vld [vmem:[%s12711_s1 + $0x8] sm:$0xff]  }
 0x121   : > { %6984 = vmatprep.subr.bf16.mxu1 %v8413_v10  ;;  %v8483_v10 = vld [vmem:[%s9720_s27 + $0x60] ss:$100 sps:$4 sm:$0xff]  }
 0x122   : > { %6957 = vmatpush3.bf16.msra.mxu0 %v8412_v9  ;;  %v8479_v9 = vld [vmem:[%s12711_s1 + $0x620] sm:$0xff]  }
 0x123   : > { %6958 = vmatprep.subr.bf16.mxu0 %v8415_v12  ;;  %v8713_v12 = vld [vmem:[%s12711_s1 + $0x58] sm:$0xff]  }
 0x124   : > { %6985 = vmatpush3.bf16.msra.mxu1 %v8414_v11  ;;  %v8712_v11 = vld [vmem:[%s12711_s1 + $0x10] sm:$0xff]  }
 0x125   : > { %6986 = vmatprep.subr.bf16.mxu1 %v8417_v14  ;;  %v8480_v14 = vld [vmem:[%s12711_s1 + $0x628] sm:$0xff]  }
 0x126   : > { %6959 = vmatpush3.bf16.msra.mxu0 %v8416_v13  ;;  %v8487_v13 = vld [vmem:[%s9720_s27 + $0x194] ss:$100 sps:$4 sm:$0xff]  }
 0x127   : > { %7000 = vmatprep.subr.bf16.mxu0 %v8422_v18  ;;  %v8716_v18 = vld [vmem:[%s12711_s1 + $0x20] sm:$0xff]  }
 0x128   : > { %6987 = vmatpush3.bf16.msra.mxu1 %v8421_v17  ;;  %v8481_v17 = vld [vmem:[%s12711_s1 + $0x630] sm:$0xff]  }
 0x129   : > { %2951 = vmatmul.mubr.bf16.vlgmr.msra.gmra.mrb[32].mxu0 %v8418_v15  ;;  %7028 = vmatprep.subr.bf16.mxu1 %v8427_v22  ;;  %v8714_v15 = vld [vmem:[%s12711_s1 + $0x18] sm:$0xff]  }
 0x12a   : > { %7001 = vmatpush3.bf16.msra.mxu0 %v8426_v21  ;;  %2958 = vmatprep.mubr.bf16.mxu0 %v8432_v27  ;;  %v8718_v21 = vld [vmem:[%s12711_s1 + $0x28] sm:$0xff]  }
 0x12b   : > { %3000 = vmatmul.mubr.bf16.vlgmr.msra.gmra.mrb[32].mxu1 %v8423_v19  ;;  %7002 = vmatprep.subr.bf16.mxu0 %v8429_v24  ;;  %v8717_v19 = vld [vmem:[%s12711_s1 + $0x68] sm:$0xff]   ;;  %v10321_v24 = vld [vmem:[%s12712_s2] ss:$0 sm:$0xff] }
 0x12c   : > { %7029 = vmatpush3.bf16.msra.mxu1 %v8428_v23  ;;  %3007 = vmatprep.mubr.bf16.mxu1 %v8437_v31  ;;  %v8719_v23 = vld [vmem:[%s12711_s1 + $0x70] sm:$0xff]   ;;  %v8484_v31 = vld [vmem:[%s9720_s27 + $0x128] ss:$100 sps:$4 sm:$0x1f]  }
 0x12d   : > { %7030 = vmatprep.subr.bf16.mxu1 %v8431_v26 }
 0x12e   : > { %7003 = vmatpush3.bf16.msra.mxu0 %v8430_v25 }
 0x12f   : > { %7004 = vmatprep.subr.bf16.mxu0 %v8436_v30  ;;  %v8720_v30 = vld [vmem:[%s12711_s1 + $0x30] sm:$0xff]  }
 0x130   : > { %7031 = vmatpush3.bf16.msra.mxu1 %v8434_v28 }
 0x131   : > { %2959 = vmatmul.mubr.bf16.gmra.mrb[36].mxu0 %v8435_v29  ;;  %7032 = vmatprep.subr.bf16.mxu1 %v8441_v34 }
 0x132   : > { %7005 = vmatpush3.bf16.msra.mxu0 %v8439_v32  ;;  %3048 = vmatprep.mubr.bf16.mxu0 %v8464_v56  ;;  %v8731_v56 = vld [vmem:[%s12711_s1 + $0x108] sm:$0xff]  }
 0x133   : > { %3008 = vmatmul.mubr.bf16.gmra.mrb[36].mxu1 %v8440_v33  ;;  %7006 = vmatprep.subr.bf16.mxu0 %v8443_v36 }
 0x134   : > { %7033 = vmatpush3.bf16.msra.mxu1 %v8442_v35  ;;  %3097 = vmatprep.mubr.bf16.mxu1 %v8469_v60  ;;  %v8721_v35 = vld [vmem:[%s12711_s1 + $0x78] sm:$0xff]  }
 0x135   : > { %7034 = vmatprep.subr.bf16.mxu1 %v8445_v38  ;;  %v8493_v38 = vld [vmem:[%s9720_s27 + $0x19c] ss:$100 sps:$4 sm:$0xff]  }
 0x136   : > { %7007 = vmatpush3.bf16.msra.mxu0 %v8444_v37  ;;  %v8734_v60 = vld [vmem:[%s12711_s1 + $0xd8] sm:$0xff]  }
 0x137   : > { %7008 = vmatprep.subr.bf16.mxu0 %v8447_v40 }
 0x138   : > { %7035 = vmatpush3.bf16.msra.mxu1 %v8446_v39  ;;  %v8722_v39 = vld [vmem:[%s12711_s1 + $0xc0] sm:$0xff]  }
 0x139   : > { %7036 = vmatprep.subr.bf16.mxu1 %v8449_v42  ;;  %v8485_v42 = vld [vmem:[%s9720_s27 + $0x190] ss:$100 sps:$4 sm:$0xff]  }
 0x13a   : > { %7009 = vmatpush3.bf16.msra.mxu0 %v8448_v41 }
 0x13b   : > { %7010 = vmatprep.subr.bf16.mxu0 %v8451_v44 }
 0x13c   : > { %7037 = vmatpush3.bf16.msra.mxu1 %v8450_v43 }
 0x13d   : > { %7038 = vmatprep.subr.bf16.mxu1 %v8453_v46  ;;  %v8488_v46 = vld [vmem:[%s9720_s27 + $0x25c] ss:$100 sps:$4 sm:$0x1f]  }
 0x13e   : > { %7011 = vmatpush3.bf16.msra.mxu0 %v8452_v45  ;;  %v8723_v45 = vld [vmem:[%s12711_s1 + $0x38] sm:$0xff]  }
 0x13f   : > { %7012 = vmatprep.subr.bf16.mxu0 %v8455_v48  ;;  %v8725_v48 = vld [vmem:[%s12711_s1 + $0x140] sm:$0xff]  }
 0x140   : > { %7039 = vmatpush3.bf16.msra.mxu1 %v8454_v47  ;;  %v8724_v47 = vld [vmem:[%s12711_s1 + $0x80] sm:$0xff]  }
 0x141   : > { %7040 = vmatprep.subr.bf16.mxu1 %v8457_v50  ;;  %v8726_v50 = vld [vmem:[%s12711_s1 + $0xc8] sm:$0xff]  }
 0x142   : > { %7013 = vmatpush3.bf16.msra.mxu0 %v8456_v49 }
 0x143   : > { %7014 = vmatprep.subr.bf16.mxu0 %v8459_v52  ;;  %v8728_v52 = vld [vmem:[%s12711_s1 + $0x88] sm:$0xff]  }
 0x144   : > { %7041 = vmatpush3.bf16.msra.mxu1 %v8458_v51  ;;  %v8727_v51 = vld [vmem:[%s12711_s1 + $0x100] sm:$0xff]  }
 0x145   : > { %7042 = vmatprep.subr.bf16.mxu1 %v8461_v54  ;;  %v8730_v54 = vld [vmem:[%s12711_s1 + $0xd0] sm:$0xff]  }
 0x146   : > { %7015 = vmatpush3.bf16.msra.mxu0 %v8460_v53  ;;  %v8729_v53 = vld [vmem:[%s12711_s1 + $0x148] sm:$0xff]  }
 0x147   : > { %8104 = vmatprep.subr.bf16.mxu0 %v8466_v58 }
 0x148   : > { %7043 = vmatpush3.bf16.msra.mxu1 %v8465_v57  ;;  %v8496_v57 = vld [vmem:[%s9720_s27 + $0x1a4] ss:$100 sps:$4 sm:$0xff]  }
 0x149   : > { %3049 = vmatmul.mubr.bf16.vlgmr.msra.gmra.mrb[40].mxu0 %v8462_v55  ;;  %7066 = vmatprep.subr.bf16.mxu1 %v8707_v61  ;;  %v8490_v55 = vld [vmem:[%s9720_s27 + $0x258] ss:$100 sps:$4 sm:$0x1f]   ;;  %v8735_v61 = vld [vmem:[%s12711_s1 + $0x110] sm:$0xff]  }
 0x14a   : > { %8105 = vmatpush3.bf16.msra.mxu0 %v8466_v58  ;;  %3056 = vmatprep.mubr.bf16.mxu0 %v8471_v63  ;;  %v8732_v58 = vld [vmem:[%s12711_s1 + $0x90] sm:$0xff]   ;;  %v8737_v63 = vld [vmem:[%s12711_s1 + $0x158] sm:$0xff]  }
 0x14b   : > { %3098 = vmatmul.mubr.bf16.vlgmr.msra.gmra.mrb[40].mxu1 %v8467_v59  ;;  %8106 = vmatprep.subr.bf16.mxu0 %v8470_v62  ;;  %v8733_v59 = vld [vmem:[%s12711_s1 + $0x150] sm:$0xff]  }
 0x14c   : > { %7067 = vmatpush3.bf16.msra.mxu1 %v8708_v2  ;;  %3105 = vmatprep.mubr.bf16.mxu1 %v8475_v3  ;;  %v8740_v2 = vld [vmem:[%s12711_s1 + $0xa0] sm:$0xff]  }
 0x14d   : > { %7068 = vmatprep.subr.bf16.mxu1 %v8709_v4  ;;  %v8741_v3 = vld [vmem:[%s12711_s1 + $0x160] sm:$0xff]  }
 0x14e   : > { %8107 = vmatpush3.bf16.msra.mxu0 %v8470_v62  ;;  %v8736_v62 = vld [vmem:[%s12711_s1 + $0x98] sm:$0xff]  }
 0x14f   : > { %8108 = vmatprep.subr.bf16.mxu0 %v8474_v1 }
 0x150   : > { %7069 = vmatpush3.bf16.msra.mxu1 %v8710_v7 }
 0x151   : > { %3057 = vmatmul.mubr.bf16.gmra.mrb[44].mxu0 %v8473_v0  ;;  %7070 = vmatprep.subr.bf16.mxu1 %v8711_v8  ;;  %v8738_v0 = vld [vmem:[%s12711_s1 + $0xe0] sm:$0xff]  }
 0x152   : > { %8109 = vmatpush3.bf16.msra.mxu0 %v8474_v1  ;;  %8120 = vmatprep.mubr.bf16.mxu0 %v8483_v10  ;;  %v8739_v1 = vld [vmem:[%s12711_s1 + $0x118] sm:$0xff]  }
 0x153   : > { %8110 = vmatprep.subr.bf16.mxu0 %v8478_v6  ;;  %3106 = vmatmul.mubr.bf16.gmra.mrb[44].mxu1 %v8477_v5  ;;  %v8742_v5 = vld [vmem:[%s12711_s1 + $0xe8] sm:$0xff]  }
 0x154   : > { %7071 = vmatpush3.bf16.msra.mxu1 %v8712_v11  ;;  %3504 = vmatprep.mubr.bf16.mxu1 %v8487_v13  ;;  %v8745_v13 = vld [vmem:[%s12711_s1 + $0x168] sm:$0xff]  }
 0x155   : > { %7072 = vmatprep.subr.bf16.mxu1 %v8713_v12  ;;  %v8744_v12 = vld [vmem:[%s12711_s1 + $0xa8] sm:$0xff]  }
 0x156   : > { %8111 = vmatpush3.bf16.msra.mxu0 %v8478_v6 }
 0x157   : > { %8112 = vmatprep.subr.bf16.mxu0 %v8479_v9 }
 0x158   : > { %7073 = vmatpush3.bf16.msra.mxu1 %v8714_v15 }
 0x159   : > { %7074 = vmatprep.subr.bf16.mxu1 %v8715_v16 }
 0x15a   : > { %8113 = vmatpush3.bf16.msra.mxu0 %v8479_v9  ;;  %v8743_v9 = vld [vmem:[%s12711_s1 + $0x120] sm:$0xff]  }
 0x15b   : > { %8114 = vmatprep.subr.bf16.mxu0 %v8480_v14 }
 0x15c   : > { %7075 = vmatpush3.bf16.msra.mxu1 %v8716_v18 }
 0x15d   : > { %7076 = vmatprep.subr.bf16.mxu1 %v8717_v19 }
 0x15e   : > { %8115 = vmatpush3.bf16.msra.mxu0 %v8480_v14 }
 0x15f   : > { %8116 = vmatprep.subr.bf16.mxu0 %v8481_v17 }
 0x160   : > { %7077 = vmatpush3.bf16.msra.mxu1 %v8718_v21 }
 0x161   : > { %7078 = vmatprep.subr.bf16.mxu1 %v8719_v23 }
 0x162   : > { %8117 = vmatpush3.bf16.msra.mxu0 %v8481_v17  ;;  %v8746_v17 = vld [vmem:[%s12711_s1 + $0xf0] sm:$0xff]  }
 0x163   : > { %8118 = vmatprep.subr.bf16.mxu0 %v8482_v20 }
 0x164   : > { %7079 = vmatpush3.bf16.msra.mxu1 %v8720_v30  ;;  %v8751_v30 = vld [vmem:[%s12711_s1 + $0x130] sm:$0xff]  }
 0x165   : > { %7080 = vmatprep.subr.bf16.mxu1 %v8721_v35  ;;  %v8754_v35 = vld [vmem:[%s12711_s1 + $0x1c0] sm:$0xff]  }
 0x166   : > { %8119 = vmatpush3.bf16.msra.mxu0 %v8482_v20 }
 0x167   : > { %7094 = vmatprep.subr.bf16.mxu0 %v8722_v39 }
 0x168   : > { %7081 = vmatpush3.bf16.msra.mxu1 %v8723_v45  ;;  %v10456_v45 = vld [vmem:[%s12711_s1 + $0x180] sm:$0xff]  }
 0x169   : > { %8121 = vmatmul.mubr.bf16.vlgmr.msra.gmra.mrb[48].mxu0 %v8484_v31  ;;  %7122 = vmatprep.subr.bf16.mxu1 %v8725_v48  ;;  %v8497_v31 = vld [vmem:[%s9720_s27 + $0x264] ss:$100 sps:$4 sm:$0x1f]  }
 0x16a   : > { %7095 = vmatpush3.bf16.msra.mxu0 %v8724_v47  ;;  %3553 = vmatprep.mubr.bf16.mxu0 %v8493_v38  ;;  %v8500_v38 = vld [vmem:[%s9720_s27 + $0x26c] ss:$100 sps:$4 sm:$0x1f]  }
 0x16b   : > { %7096 = vmatprep.subr.bf16.mxu0 %v8726_v50  ;;  %3505 = vmatmul.mubr.bf16.vlgmr.msra.gmra.mrb[48].mxu1 %v8485_v42 }
 0x16c   : > { %7123 = vmatpush3.bf16.msra.mxu1 %v8727_v51  ;;  %3512 = vmatprep.mubr.bf16.mxu1 %v8488_v46  ;;  %v8757_v46 = vld [vmem:[%s12711_s1 + $0x240] sm:$0xff]   ;;  %v10466_v51 = vld [vmem:[%s12711_s1 + $0x1c8] sm:$0xff]  }
 0x16d   : > { %7124 = vmatprep.subr.bf16.mxu1 %v8729_v53 }
 0x16e   : > { %7097 = vmatpush3.bf16.msra.mxu0 %v8728_v52  ;;  %v8499_v52 = vld [vmem:[%s9720_s27 + $0x260] ss:$100 sps:$4 sm:$0x1f]  }
 0x16f   : > { %7098 = vmatprep.subr.bf16.mxu0 %v8730_v54 }
 0x170   : > { %7125 = vmatpush3.bf16.msra.mxu1 %v8731_v56 }
 0x171   : > { %7126 = vmatprep.subr.bf16.mxu1 %v8733_v59  ;;  %v10479_v59 = vld [vmem:[%s12711_s1 + $0x188] sm:$0xff]  }
 0x172   : > { %7099 = vmatpush3.bf16.msra.mxu0 %v8732_v58 }
 0x173   : > { %7100 = vmatprep.subr.bf16.mxu0 %v8734_v60  ;;  %3513 = vmatmul.mubr.bf16.gmra.mrb[52].mxu1 %v8490_v55  ;;  %v8505_v60 = vld [vmem:[%s9720_s27 + $0x1ac] ss:$100 sps:$4 sm:$0xff]  }
 0x174   : > { %7127 = vmatpush3.bf16.msra.mxu1 %v8735_v61  ;;  %3602 = vmatprep.mubr.bf16.mxu1 %v8496_v57  ;;  %v10489_v61 = vld [vmem:[%s12711_s1 + $0x1d0] sm:$0xff]  }
 0x175   : > { %7128 = vmatprep.subr.bf16.mxu1 %v8737_v63  ;;  %v8502_v63 = vld [vmem:[%s9720_s27 + $0x268] ss:$100 sps:$4 sm:$0x1f]  }
 0x176   : > { %7101 = vmatpush3.bf16.msra.mxu0 %v8736_v62 }
 0x177   : > { %7102 = vmatprep.subr.bf16.mxu0 %v8738_v0  ;;  %v8763_v0 = vld [vmem:[%s12711_s1 + $0x208] sm:$0xff]  }
 0x178   : > { %7129 = vmatpush3.bf16.msra.mxu1 %v8739_v1 }
 0x179   : > { %7130 = vmatprep.subr.bf16.mxu1 %v8741_v3  ;;  %v10502_v3 = vld [vmem:[%s12711_s1 + $0x190] sm:$0xff]  }
 0x17a   : > { %7103 = vmatpush3.bf16.msra.mxu0 %v8740_v2  ;;  %v8508_v2 = vld [vmem:[%s9720_s27 + $0x1b4] ss:$100 sps:$4 sm:$0xff]  }
 0x17b   : > { %7104 = vmatprep.subr.bf16.mxu0 %v8742_v5 }
 0x17c   : > { %v6736_v22 = vpop.f32.mrb[0].mxu0  ;;  %7131 = vmatpush3.bf16.msra.mxu1 %v8743_v9 }
 0x17d   : > { %v6737_v25 = vpop.f32.mrb[1].mxu0  ;;  %7132 = vmatprep.subr.bf16.mxu1 %v8745_v13 }
 0x17e   : > { %v6738_v26 = vadd.f32 %v6737_v25, %v6736_v22  ;;  %v6739_v27 = vpop.f32.mrb[2].mxu0  ;;  %v6764_v28 = vpop.f32.mrb[0].mxu1  ;;  %7105 = vmatpush3.bf16.msra.mxu0 %v8744_v12  ;;  %v8747_v22 = vld [vmem:[%s12711_s1 + $0x128] sm:$0xff]  }
 0x17f   : > { %v6740_v29 = vpop.f32.mrb[3].mxu0  ;;  %v6765_v34 = vpop.f32.mrb[1].mxu1  ;;  %7106 = vmatprep.subr.bf16.mxu0 %v8746_v17 }
 0x180   : > { %v2561_v32 = vadd.f32 %v6738_v26, %v10321_v24  ;;  %v6741_v33 = vadd.f32 %v6740_v29, %v6739_v27  ;;  %v6766_v36 = vadd.f32 %v6765_v34, %v6764_v28  ;;  %v6767_v37 = vpop.f32.mrb[2].mxu1  ;;  %7133 = vmatpush3.bf16.msra.mxu1 %v8747_v22  ;;  %v8748_v26 = vld [vmem:[%s12711_s1 + $0xb0] sm:$0xff]   ;;  %v8491_v28 = vld [vmem:[%s9720_s27 + $0x198] ss:$100 sps:$4 sm:$0xff]  }
 0x181   : > { %v6768_v41 = vpop.f32.mrb[3].mxu1  ;;  %v8749_v27 = vld [vmem:[%s12711_s1 + $0x170] sm:$0xff]  }
 0x182   : > { %v2564_v40 = vadd.f32 %v6741_v33, %v10321_v24  ;;  %v10337_v43 = vadd.f32 %v6766_v36, %v2561_v32  ;;  %v6769_v44 = vadd.f32 %v6768_v41, %v6767_v37  ;;  %7107 = vmatpush3.bf16.msra.mxu0 %v8748_v26  ;;  %7134 = vmatprep.subr.bf16.mxu1 %v8749_v27  ;;  %v8752_v32 = vld [vmem:[%s12711_s1 + $0xb8] sm:$0xff]   ;;  %v8494_v36 = vld [vmem:[%s9720_s27 + $0x1a0] ss:$100 sps:$4 sm:$0xff]  }
 0x183   : > { %v8753_v33 = vld [vmem:[%s12711_s1 + $0x178] sm:$0xff]   ;;  %v10542_v26 = vld [vmem:[%s12711_s1 + $0x1a0] sm:$0xff]  }
 0x184   : > { %v10349_v49 = vadd.f32 %v6769_v44, %v2564_v40  ;;  %v6742_v4 = vpop.f32.mrb[4].mxu0  ;;  %7135 = vmatpush3.bf16.msra.mxu1 %v8751_v30  ;;  %v8755_v41 = vld [vmem:[%s12711_s1 + $0x138] sm:$0xff]   ;;  %v8773_v27 = vld [vmem:[%s12711_s1 + $0x260] sm:$0xff]   ;;  %v10562_v30 = vld [vmem:[%s12711_s1 + $0x1a8] sm:$0xff]  }
 0x185   : > { %v6743_v6 = vpop.f32.mrb[5].mxu0  ;;  %7136 = vmatprep.subr.bf16.mxu1 %v8753_v33  ;;  %v8779_v33 = vld [vmem:[%s12711_s1 + $0x228] sm:$0xff]  }
 0x186   : > { %v6744_v7 = vadd.f32 %v6743_v6, %v6742_v4  ;;  %v6745_v8 = vpop.f32.mrb[6].mxu0  ;;  %v6770_v10 = vpop.f32.mrb[4].mxu1  ;;  %v8765_v4 = vld [vmem:[%s12711_s1 + $0x250] sm:$0xff]   ;;  %v10511_v6 = vld [vmem:[%s12711_s1 + $0x1d8] sm:$0xff]  }
 0x187   : > { %v6746_v11 = vpop.f32.mrb[7].mxu0  ;;  %v6771_v16 = vpop.f32.mrb[5].mxu1 }
 0x188   : > { %v2569_v14 = vadd.f32 %v6744_v7, %v10321_v24  ;;  %v6747_v15 = vadd.f32 %v6746_v11, %v6745_v8  ;;  %v6772_v18 = vadd.f32 %v6771_v16, %v6770_v10  ;;  %v6773_v19 = vpop.f32.mrb[6].mxu1  ;;  %7137 = vmatpush3.bf16.msra.mxu1 %v8755_v41  ;;  %v8767_v11 = vld [vmem:[%s12711_s1 + $0x210] sm:$0xff]   ;;  %v8769_v16 = vld [vmem:[%s12711_s1 + $0x258] sm:$0xff]   ;;  %v10608_v41 = vld [vmem:[%s12711_s1 + $0x2c0] sm:$0xff]  }
 0x189   : > { %v6774_v21 = vpop.f32.mrb[7].mxu1  ;;  %7178 = vmatprep.subr.bf16.mxu1 %v8757_v46  ;;  %v8787_v46 = vld [vmem:[%s12711_s1 + $0x238] sm:$0xff]  }
 0x18a   : > { %v2572_v20 = vadd.f32 %v6747_v15, %v10321_v24  ;;  %v10421_v23 = vadd.f32 %v6772_v18, %v2569_v14  ;;  %v6775_v25 = vadd.f32 %v6774_v21, %v6773_v19  ;;  %v8750_v24 = vld [vmem:[%s12711_s1 + $0xf8] sm:$0xff]   ;;  %v10530_v19 = vld [vmem:[%s12711_s1 + $0x1e0] sm:$0xff]  }
 0x18b   : > { %7108 = vmatprep.subr.bf16.mxu0 %v8750_v24  ;;  %3603 = vmatmul.mubr.bf16.vlgmr.msra.gmra.mrb[56].mxu1 %v8494_v36  ;;  %v10521_v15 = vld [vmem:[%s12711_s1 + $0x198] sm:$0xff]  }
 0x18c   : > { %v10433_v29 = vadd.f32 %v6775_v25, %v2572_v20  ;;  %7109 = vmatpush3.bf16.msra.mxu0 %v8752_v32  ;;  %3610 = vmatprep.mubr.bf16.mxu1 %v8500_v38  ;;  %v8771_v25 = vld [vmem:[%s12711_s1 + $0x218] sm:$0xff]   ;;  %v10571_v32 = vld [vmem:[%s12711_s1 + $0x1f0] sm:$0xff]   ;;  %v8503_v38 = vld [vmem:[%s9720_s27 + $0x1a8] ss:$100 sps:$4 sm:$0xff]  }
 0x18d   : > { %7150 = vmatprep.subr.bf16.mxu0 %v8754_v35  ;;  %v8781_v35 = vld [vmem:[%s12711_s1 + $0x270] sm:$0xff]   ;;  %v10589_v36 = vld [vmem:[%s12711_s1 + $0x1f8] sm:$0xff]  }
 0x18f   : > { %3554 = vmatmul.mubr.bf16.vlgmr.msra.gmra.mrb[52].mxu0 %v8491_v28  ;;  %v10553_v28 = vld [vmem:[%s12711_s1 + $0x1e8] sm:$0xff]  }
 0x190   : > { %7151 = vmatpush3.bf16.msra.mxu0 %v10456_v45  ;;  %3561 = vmatprep.mubr.bf16.mxu0 %v8497_v31  ;;  %v8777_v31 = vld [vmem:[%s12711_s1 + $0x268] sm:$0xff]  }
 0x191   : > { %7152 = vmatprep.subr.bf16.mxu0 %v10466_v51 }
 0x193   : > { %3611 = vmatmul.mubr.bf16.gmra.mrb[60].mxu1 %v8502_v63 }
 0x194   : > { %7153 = vmatpush3.bf16.msra.mxu0 %v10479_v59  ;;  %3700 = vmatprep.mubr.bf16.mxu1 %v8508_v2 }
 0x195   : > { %7154 = vmatprep.subr.bf16.mxu0 %v10489_v61 }
 0x197   : > { %3562 = vmatmul.mubr.bf16.gmra.mrb[56].mxu0 %v8499_v52  ;;  %v10629_v52 = vld [vmem:[%s12711_s1 + $0x2c8] sm:$0xff]  }
 0x198   : > { %7155 = vmatpush3.bf16.msra.mxu0 %v10502_v3  ;;  %3651 = vmatprep.mubr.bf16.mxu0 %v8505_v60  ;;  %v8793_v60 = vld [vmem:[%s12711_s1 + $0x348] sm:$0xff]  }
 0x199   : > { %7156 = vmatprep.subr.bf16.mxu0 %v10511_v6 }
 0x19c   : > { %v6792_v34 = vpop.f32.mrb[8].mxu0  ;;  %7157 = vmatpush3.bf16.msra.mxu0 %v10521_v15 }
 0x19d   : > { %v6793_v37 = vpop.f32.mrb[9].mxu0  ;;  %7158 = vmatprep.subr.bf16.mxu0 %v10530_v19 }
 0x19e   : > { %v6794_v39 = vadd.f32 %v6793_v37, %v6792_v34  ;;  %v6795_v40 = vpop.f32.mrb[10].mxu0  ;;  %v6820_v42 = vpop.f32.mrb[8].mxu1  ;;  %v10580_v34 = vld [vmem:[%s12711_s1 + $0x1b0] sm:$0xff]  }
 0x19f   : > { %v6796_v44 = vpop.f32.mrb[11].mxu0  ;;  %v6821_v50 = vpop.f32.mrb[9].mxu1  ;;  %v8783_v37 = vld [vmem:[%s12711_s1 + $0x230] sm:$0xff]  }
 0x1a0   : > { %v2659_v47 = vadd.f32 %v6794_v39, %v10337_v43  ;;  %v6797_v48 = vadd.f32 %v6796_v44, %v6795_v40  ;;  %v6822_v53 = vadd.f32 %v6821_v50, %v6820_v42  ;;  %v6823_v54 = vpop.f32.mrb[10].mxu1  ;;  %v8759_v43 = vld [vmem:[%s12711_s1 + $0x200] sm:$0xff]   ;;  %7159 = vmatpush3.bf16.msra.mxu0 %v10542_v26  ;;  %v10599_v39 = vld [vmem:[%s12711_s1 + $0x1b8] sm:$0xff]   ;;  %v8506_v44 = vld [vmem:[%s9720_s27 + $0x1b0] ss:$100 sps:$4 sm:$0xff]  }
 0x1a1   : > { %v6824_v56 = vpop.f32.mrb[11].mxu1  ;;  %7179 = vmatpush3.bf16.msra.mxu1 %v8759_v43  ;;  %7160 = vmatprep.subr.bf16.mxu0 %v10553_v28  ;;  %v8785_v40 = vld [vmem:[%s12711_s1 + $0x278] sm:$0xff]   ;;  %v8789_v50 = vld [vmem:[%s12711_s1 + $0x340] sm:$0xff]  }
 0x1a2   : > { %v2662_v55 = vadd.f32 %v6797_v48, %v10349_v49  ;;  %v10474_v57 = vadd.f32 %v6822_v53, %v2659_v47  ;;  %v6825_v58 = vadd.f32 %v6824_v56, %v6823_v54  ;;  %v8761_v49 = vld [vmem:[%s12711_s1 + $0x248] sm:$0xff]   ;;  %v8509_v42 = vld [vmem:[%s9720_s27 + $0x274] ss:$100 sps:$4 sm:$0x1f]   ;;  %v10620_v48 = vld [vmem:[%s12711_s1 + $0x280] sm:$0xff]  }
 0x1a3   : > { %7180 = vmatprep.subr.bf16.mxu1 %v8761_v49  ;;  %v8512_v47 = vld [vmem:[%s9720_s27 + $0x27c] ss:$100 sps:$4 sm:$0x1f]   ;;  %v8511_v56 = vld [vmem:[%s9720_s27 + $0x270] ss:$100 sps:$4 sm:$0x1f]  }
 0x1a4   : > { %v10492_v62 = vadd.f32 %v6825_v58, %v2662_v55  ;;  %v6798_v1 = vpop.f32.mrb[12].mxu0  ;;  %7161 = vmatpush3.bf16.msra.mxu0 %v10562_v30  ;;  %v8791_v55 = vld [vmem:[%s12711_s1 + $0x300] sm:$0xff]   ;;  %v10639_v49 = vld [vmem:[%s12711_s1 + $0x288] sm:$0xff]  }
 0x1a5   : > { %7181 = vmatpush3.bf16.msra.mxu1 %v8763_v0  ;;  %v6799_v5 = vpop.f32.mrb[13].mxu0  ;;  %7162 = vmatprep.subr.bf16.mxu0 %v10571_v32  ;;  %v10648_v0 = vld [vmem:[%s12711_s1 + $0x2d0] sm:$0xff]  }
 0x1a6   : > { %7182 = vmatprep.subr.bf16.mxu1 %v8765_v4  ;;  %v6800_v7 = vadd.f32 %v6799_v5, %v6798_v1  ;;  %v6801_v8 = vpop.f32.mrb[14].mxu0  ;;  %v6826_v9 = vpop.f32.mrb[12].mxu1  ;;  %v8517_v5 = vld [vmem:[%s9720_s27 + $0x1bc] ss:$100 sps:$4 sm:$0xff]  }
 0x1a7   : > { %v6802_v10 = vpop.f32.mrb[15].mxu0  ;;  %v6827_v14 = vpop.f32.mrb[13].mxu1 }
 0x1a8   : > { %v2667_v12 = vadd.f32 %v6800_v7, %v10421_v23  ;;  %v6803_v13 = vadd.f32 %v6802_v10, %v6801_v8  ;;  %v6828_v17 = vadd.f32 %v6827_v14, %v6826_v9  ;;  %v6829_v18 = vpop.f32.mrb[14].mxu1  ;;  %7163 = vmatpush3.bf16.msra.mxu0 %v10580_v34  ;;  %v8514_v7 = vld [vmem:[%s9720_s27 + $0x278] ss:$100 sps:$4 sm:$0x1f]   ;;  %v8795_v9 = vld [vmem:[%s12711_s1 + $0x308] sm:$0xff]   ;;  %v8797_v14 = vld [vmem:[%s12711_s1 + $0x350] sm:$0xff]  }
 0x1a9   : > { %7183 = vmatpush3.bf16.msra.mxu1 %v8767_v11  ;;  %v6830_v21 = vpop.f32.mrb[15].mxu1  ;;  %7164 = vmatprep.subr.bf16.mxu0 %v10589_v36 }
 0x1aa   : > { %7184 = vmatprep.subr.bf16.mxu1 %v8769_v16  ;;  %v2670_v20 = vadd.f32 %v6803_v13, %v10433_v29  ;;  %v10534_v22 = vadd.f32 %v6828_v17, %v2667_v12  ;;  %v6831_v23 = vadd.f32 %v6830_v21, %v6829_v18  ;;  %v8775_v29 = vld [vmem:[%s12711_s1 + $0x220] sm:$0xff]  }
 0x1ab   : > { %v8520_v13 = vld [vmem:[%s9720_s27 + $0x1c4] ss:$100 sps:$4 sm:$0xff]  }
 0x1ac   : > { %v10548_v24 = vadd.f32 %v6831_v23, %v2670_v20  ;;  %7165 = vmatpush3.bf16.msra.mxu0 %v10599_v39  ;;  %v8799_v20 = vld [vmem:[%s12711_s1 + $0x310] sm:$0xff]   ;;  %v10684_v23 = vld [vmem:[%s12711_s1 + $0x298] sm:$0xff]  }
 0x1ad   : > { %7185 = vmatpush3.bf16.msra.mxu1 %v8771_v25  ;;  %7206 = vmatprep.subr.bf16.mxu0 %v10608_v41  ;;  %v8801_v25 = vld [vmem:[%s12711_s1 + $0x358] sm:$0xff]  }
 0x1ae   : > { %7186 = vmatprep.subr.bf16.mxu1 %v8773_v27 }
 0x1af   : > { %3652 = vmatmul.mubr.bf16.vlgmr.msra.gmra.mrb[60].mxu0 %v8503_v38 }
 0x1b0   : > { %7207 = vmatpush3.bf16.msra.mxu0 %v10620_v48  ;;  %3659 = vmatprep.mubr.bf16.mxu0 %v8509_v42  ;;  %v8805_v42 = vld [vmem:[%s12711_s1 + $0x360] sm:$0xff]  }
 0x1b1   : > { %7187 = vmatpush3.bf16.msra.mxu1 %v8775_v29  ;;  %7208 = vmatprep.subr.bf16.mxu0 %v10629_v52  ;;  %v10693_v29 = vld [vmem:[%s12711_s1 + $0x2e0] sm:$0xff]  }
 0x1b2   : > { %7188 = vmatprep.subr.bf16.mxu1 %v8777_v31 }
 0x1b4   : > { %7209 = vmatpush3.bf16.msra.mxu0 %v10639_v49 }
 0x1b5   : > { %7189 = vmatpush3.bf16.msra.mxu1 %v8779_v33  ;;  %7210 = vmatprep.subr.bf16.mxu0 %v10648_v0 }
 0x1b6   : > { %7190 = vmatprep.subr.bf16.mxu1 %v8781_v35 }
 0x1b7   : > { %3660 = vmatmul.mubr.bf16.gmra.mrb[64].mxu0 %v8511_v56 }
 0x1b8   : > { %3749 = vmatprep.mubr.bf16.mxu0 %v8517_v5  ;;  %v10744_v5 = vld [vmem:[%s12711_s1 + $0x2b0] sm:$0xff]  }
 0x1b9   : > { %7191 = vmatpush3.bf16.msra.mxu1 %v8783_v37  ;;  %v8803_v37 = vld [vmem:[%s12711_s1 + $0x318] sm:$0xff]  }
 0x1ba   : > { %7192 = vmatprep.subr.bf16.mxu1 %v8785_v40  ;;  %v10702_v40 = vld [vmem:[%s12711_s1 + $0x2a0] sm:$0xff]  }
 0x1bc   : > { %v6848_v53 = vpop.f32.mrb[16].mxu0 }
 0x1bd   : > { %7193 = vmatpush3.bf16.msra.mxu1 %v8787_v46  ;;  %v6849_v54 = vpop.f32.mrb[17].mxu0 }
 0x1be   : > { %7234 = vmatprep.subr.bf16.mxu1 %v8789_v50  ;;  %v6850_v43 = vadd.f32 %v6849_v54, %v6848_v53  ;;  %v6851_v58 = vpop.f32.mrb[18].mxu0  ;;  %v6876_v2 = vpop.f32.mrb[16].mxu1  ;;  %v10712_v50 = vld [vmem:[%s12711_s1 + $0x2e8] sm:$0xff]  }
 0x1bf   : > { %v6852_v63 = vpop.f32.mrb[19].mxu0  ;;  %v6877_v8 = vpop.f32.mrb[17].mxu1 }
 0x1c0   : > { %3701 = vmatmul.mubr.bf16.vlgmr.msra.gmra.mrb[64].mxu1 %v8506_v44  ;;  %v2757_v1 = vadd.f32 %v6850_v43, %v10474_v57  ;;  %v6853_v4 = vadd.f32 %v6852_v63, %v6851_v58  ;;  %v6878_v11 = vadd.f32 %v6877_v8, %v6876_v2  ;;  %v6879_v12 = vpop.f32.mrb[18].mxu1  ;;  %v10662_v57 = vld [vmem:[%s12711_s1 + $0x290] sm:$0xff]   ;;  %v8807_v43 = vld [vmem:[%s12711_s1 + $0x320] sm:$0xff]   ;;  %v10722_v58 = vld [vmem:[%s12711_s1 + $0x2a8] sm:$0xff]  }
 0x1c1   : > { %7235 = vmatpush3.bf16.msra.mxu1 %v8791_v55  ;;  %3708 = vmatprep.mubr.bf16.mxu1 %v8512_v47  ;;  %v6880_v16 = vpop.f32.mrb[19].mxu1  ;;  %v10753_v8 = vld [vmem:[%s12711_s1 + $0x2f8] sm:$0xff]  }
 0x1c2   : > { %7236 = vmatprep.subr.bf16.mxu1 %v8793_v60  ;;  %v2760_v10 = vadd.f32 %v6853_v4, %v10492_v62  ;;  %7211 = vmatpush3.bf16.msra.mxu0 %v10662_v57  ;;  %v10671_v62 = vld [vmem:[%s12711_s1 + $0x2d8] sm:$0xff]   ;;  %v10674_v17 = vadd.f32 %v6878_v11, %v2757_v1  ;;  %v6881_v18 = vadd.f32 %v6880_v16, %v6879_v12  ;;  %v8809_v60 = vld [vmem:[%s12711_s1 + $0x368] sm:$0xff]   ;;  %v10733_v1 = vld [vmem:[%s12711_s1 + $0x2f0] sm:$0xff]  }
 0x1c3   : > { %7212 = vmatprep.subr.bf16.mxu0 %v10671_v62  ;;  %v8811_v4 = vld [vmem:[%s12711_s1 + $0x328] sm:$0xff]   ;;  %v10763_v11 = vld [vmem:[%s12711_s1 + $0x2b8] sm:$0xff]   ;;  %v8518_v16 = vld [vmem:[%s9720_s27 + $0x1c0] ss:$100 sps:$4 sm:$0xff]  }
 0x1c4   : > { %v10679_v21 = vadd.f32 %v6881_v18, %v2760_v10  ;;  %v6854_v27 = vpop.f32.mrb[20].mxu0  ;;  %v8515_v10 = vld [vmem:[%s9720_s27 + $0x1b8] ss:$100 sps:$4 sm:$0xff]  }
 0x1c5   : > { %7237 = vmatpush3.bf16.msra.mxu1 %v8795_v9  ;;  %v6855_v31 = vpop.f32.mrb[21].mxu0  ;;  %v8815_v9 = vld [vmem:[%s12711_s1 + $0x330] sm:$0xff]   ;;  %v8817_v12 = vld [vmem:[%s12711_s1 + $0x378] sm:$0xff]  }
 0x1c6   : > { %7238 = vmatprep.subr.bf16.mxu1 %v8797_v14  ;;  %7213 = vmatpush3.bf16.msra.mxu0 %v10684_v23  ;;  %v6856_v33 = vadd.f32 %v6855_v31, %v6854_v27  ;;  %v6857_v35 = vpop.f32.mrb[22].mxu0  ;;  %v6882_v46 = vpop.f32.mrb[20].mxu1  ;;  %v8521_v14 = vld [vmem:[%s9720_s27 + $0x284] ss:$100 sps:$4 sm:$0x1f]   ;;  %v8819_v18 = vld [vmem:[%s12711_s1 + $0x338] sm:$0xff]  }
 0x1c7   : > { %7214 = vmatprep.subr.bf16.mxu0 %v10693_v29  ;;  %v6858_v38 = vpop.f32.mrb[23].mxu0  ;;  %v6883_v53 = vpop.f32.mrb[21].mxu1  ;;  %v8821_v27 = vld [vmem:[%s12711_s1 + $0x440] sm:$0xff]   ;;  %v10793_v31 = vld [vmem:[%s12711_s1 + $0x3c8] sm:$0xff]  }
 0x1c8   : > { %3709 = vmatmul.mubr.bf16.gmra.mrb[68].mxu1 %v8514_v7  ;;  %v2765_v44 = vadd.f32 %v6856_v33, %v10534_v22  ;;  %v6859_v47 = vadd.f32 %v6858_v38, %v6857_v35  ;;  %v6884_v55 = vadd.f32 %v6883_v53, %v6882_v46  ;;  %v6885_v56 = vpop.f32.mrb[22].mxu1  ;;  %v8813_v7 = vld [vmem:[%s12711_s1 + $0x370] sm:$0xff]   ;;  %v8823_v33 = vld [vmem:[%s12711_s1 + $0x400] sm:$0xff]   ;;  %v8825_v38 = vld [vmem:[%s12711_s1 + $0x448] sm:$0xff]  }
 0x1c9   : > { %7239 = vmatpush3.bf16.msra.mxu1 %v8799_v20  ;;  %3798 = vmatprep.mubr.bf16.mxu1 %v8520_v13  ;;  %v6886_v22 = vpop.f32.mrb[23].mxu1  ;;  %v10772_v13 = vld [vmem:[%s12711_s1 + $0x3c0] sm:$0xff]   ;;  %v8524_v20 = vld [vmem:[%s9720_s27 + $0x28c] ss:$100 sps:$4 sm:$0x1f]  }
 0x1ca   : > { %7240 = vmatprep.subr.bf16.mxu1 %v8801_v25  ;;  %7215 = vmatpush3.bf16.msra.mxu0 %v10702_v40  ;;  %v2768_v54 = vadd.f32 %v6859_v47, %v10548_v24  ;;  %v10728_v24 = vadd.f32 %v6884_v55, %v2765_v44  ;;  %v6887_v63 = vadd.f32 %v6886_v22, %v6885_v56  ;;  %v10784_v25 = vld [vmem:[%s12711_s1 + $0x380] sm:$0xff]   ;;  %v8529_v44 = vld [vmem:[%s9720_s27 + $0x1cc] ss:$100 sps:$4 sm:$0xff]   ;;  %v10833_v22 = vld [vmem:[%s12711_s1 + $0x3d8] sm:$0xff]  }
 0x1cb   : > { %7216 = vmatprep.subr.bf16.mxu0 %v10712_v50  ;;  %v8523_v35 = vld [vmem:[%s9720_s27 + $0x280] ss:$100 sps:$4 sm:$0x1f]   ;;  %v8526_v46 = vld [vmem:[%s9720_s27 + $0x288] ss:$100 sps:$4 sm:$0x1f]  }
 0x1cc   : > { %v10736_v2 = vadd.f32 %v6887_v63, %v2768_v54  ;;  %v8827_v47 = vld [vmem:[%s12711_s1 + $0x408] sm:$0xff]   ;;  %v8532_v54 = vld [vmem:[%s9720_s27 + $0x1d4] ss:$100 sps:$4 sm:$0xff]  }
 0x1cd   : > { %7241 = vmatpush3.bf16.msra.mxu1 %v8803_v37  ;;  %v10803_v37 = vld [vmem:[%s12711_s1 + $0x388] sm:$0xff]   ;;  %v10824_v55 = vld [vmem:[%s12711_s1 + $0x390] sm:$0xff]  }
 0x1ce   : > { %7242 = vmatprep.subr.bf16.mxu1 %v8805_v42  ;;  %7217 = vmatpush3.bf16.msra.mxu0 %v10722_v58  ;;  %v10812_v42 = vld [vmem:[%s12711_s1 + $0x3d0] sm:$0xff]  }
 0x1cf   : > { %7218 = vmatprep.subr.bf16.mxu0 %v10733_v1  ;;  %v8829_v56 = vld [vmem:[%s12711_s1 + $0x450] sm:$0xff]  }
 0x1d1   : > { %7243 = vmatpush3.bf16.msra.mxu1 %v8807_v43 }
 0x1d2   : > { %7244 = vmatprep.subr.bf16.mxu1 %v8809_v60  ;;  %7219 = vmatpush3.bf16.msra.mxu0 %v10744_v5 }
 0x1d3   : > { %7220 = vmatprep.subr.bf16.mxu0 %v10753_v8 }
 0x1d5   : > { %7245 = vmatpush3.bf16.msra.mxu1 %v8811_v4 }
 0x1d6   : > { %7246 = vmatprep.subr.bf16.mxu1 %v8813_v7  ;;  %7221 = vmatpush3.bf16.msra.mxu0 %v10763_v11 }
 0x1d7   : > { %7262 = vmatprep.subr.bf16.mxu0 %v10772_v13 }
 0x1d9   : > { %7247 = vmatpush3.bf16.msra.mxu1 %v8815_v9  ;;  %3750 = vmatmul.mubr.bf16.vlgmr.msra.gmra.mrb[68].mxu0 %v8515_v10  ;;  %v8831_v9 = vld [vmem:[%s12711_s1 + $0x410] sm:$0xff]  }
 0x1da   : > { %7248 = vmatprep.subr.bf16.mxu1 %v8817_v12  ;;  %7263 = vmatpush3.bf16.msra.mxu0 %v10784_v25 }
 0x1db   : > { %7264 = vmatprep.subr.bf16.mxu0 %v10793_v31  ;;  %3757 = vmatprep.mubr.bf16.mxu0 %v8521_v14 }
 0x1dc   : > { %v6904_v53 = vpop.f32.mrb[24].mxu0 }
 0x1dd   : > { %7249 = vmatpush3.bf16.msra.mxu1 %v8819_v18  ;;  %v6905_v43 = vpop.f32.mrb[25].mxu0  ;;  %v8833_v18 = vld [vmem:[%s12711_s1 + $0x458] sm:$0xff]  }
 0x1de   : > { %7290 = vmatprep.subr.bf16.mxu1 %v8821_v27  ;;  %7265 = vmatpush3.bf16.msra.mxu0 %v10803_v37  ;;  %v6906_v60 = vadd.f32 %v6905_v43, %v6904_v53  ;;  %v6907_v63 = vpop.f32.mrb[26].mxu0  ;;  %v6932_v4 = vpop.f32.mrb[24].mxu1  ;;  %v8839_v43 = vld [vmem:[%s12711_s1 + $0x420] sm:$0xff]  }
 0x1df   : > { %7266 = vmatprep.subr.bf16.mxu0 %v10812_v42  ;;  %v6908_v7 = vpop.f32.mrb[27].mxu0  ;;  %v6933_v14 = vpop.f32.mrb[25].mxu1 }
 0x1e0   : > { %3799 = vmatmul.mubr.bf16.vlgmr.msra.gmra.mrb[72].mxu1 %v8518_v16  ;;  %v2855_v10 = vadd.f32 %v6906_v60, %v10674_v17  ;;  %v6909_v12 = vadd.f32 %v6908_v7, %v6907_v63  ;;  %v10843_v16 = vld [vmem:[%s12711_s1 + $0x398] sm:$0xff]   ;;  %v6935_v27 = vpop.f32.mrb[26].mxu1  ;;  %v10852_v17 = vld [vmem:[%s12711_s1 + $0x3e0] sm:$0xff]   ;;  %v10884_v63 = vld [vmem:[%s12711_s1 + $0x3a8] sm:$0xff]  }
 0x1e1   : > { %7291 = vmatpush3.bf16.msra.mxu1 %v8823_v33  ;;  %3806 = vmatprep.mubr.bf16.mxu1 %v8524_v20  ;;  %v6934_v20 = vadd.f32 %v6933_v14, %v6932_v4  ;;  %v8841_v4 = vld [vmem:[%s12711_s1 + $0x468] sm:$0xff]  }
 0x1e2   : > { %7292 = vmatprep.subr.bf16.mxu1 %v8825_v38  ;;  %3758 = vmatmul.mubr.bf16.gmra.mrb[72].mxu0 %v8523_v35  ;;  %v2858_v33 = vadd.f32 %v6909_v12, %v10679_v21  ;;  %v6936_v35 = vpop.f32.mrb[27].mxu1  ;;  %v8837_v21 = vld [vmem:[%s12711_s1 + $0x460] sm:$0xff]  }
 0x1e3   : > { %7267 = vmatpush3.bf16.msra.mxu0 %v10824_v55  ;;  %3847 = vmatprep.mubr.bf16.mxu0 %v8529_v44  ;;  %v10856_v38 = vadd.f32 %v6934_v20, %v2855_v10  ;;  %v6937_v44 = vadd.f32 %v6936_v35, %v6935_v27  ;;  %v10893_v10 = vld [vmem:[%s12711_s1 + $0x3f0] sm:$0xff]  }
 0x1e4   : > { %7268 = vmatprep.subr.bf16.mxu0 %v10833_v22 }
 0x1e5   : > { %7293 = vmatpush3.bf16.msra.mxu1 %v8827_v47  ;;  %v10864_v47 = vld [vmem:[%s12711_s1 + $0x3a0] sm:$0xff]   ;;  %v10870_v53 = vadd.f32 %v6937_v44, %v2858_v33  ;;  %v8843_v33 = vld [vmem:[%s12711_s1 + $0x428] sm:$0xff]  }
 0x1e6   : > { %7294 = vmatprep.subr.bf16.mxu1 %v8829_v56  ;;  %v6910_v56 = vpop.f32.mrb[28].mxu0  ;;  %v6938_v12 = vpop.f32.mrb[28].mxu1 }
 0x1e7   : > { %7269 = vmatpush3.bf16.msra.mxu0 %v10843_v16  ;;  %v6911_v60 = vpop.f32.mrb[29].mxu0  ;;  %v6939_v27 = vpop.f32.mrb[29].mxu1 }
 0x1e8   : > { %3807 = vmatmul.mubr.bf16.gmra.mrb[76].mxu1 %v8526_v46  ;;  %7270 = vmatprep.subr.bf16.mxu0 %v10852_v17  ;;  %v8835_v46 = vld [vmem:[%s12711_s1 + $0x418] sm:$0xff]   ;;  %v6912_v7 = vadd.f32 %v6911_v60, %v6910_v56  ;;  %v6940_v35 = vadd.f32 %v6939_v27, %v6938_v12  ;;  %v6941_v44 = vpop.f32.mrb[30].mxu1  ;;  %v8530_v27 = vld [vmem:[%s9720_s27 + $0x1d0] ss:$100 sps:$4 sm:$0xff]  }
 0x1e9   : > { %7295 = vmatpush3.bf16.msra.mxu1 %v8831_v9  ;;  %3896 = vmatprep.mubr.bf16.mxu1 %v8532_v54  ;;  %v10875_v54 = vld [vmem:[%s12711_s1 + $0x3e8] sm:$0xff]   ;;  %v6913_v9 = vpop.f32.mrb[30].mxu0  ;;  %v6942_v56 = vpop.f32.mrb[31].mxu1  ;;  %v10927_v12 = vld [vmem:[%s12711_s1 + $0x3b8] sm:$0xff]  }
 0x1ea   : > { %7296 = vmatprep.subr.bf16.mxu1 %v8833_v18  ;;  %v6914_v14 = vpop.f32.mrb[31].mxu0  ;;  %v2863_v18 = vadd.f32 %v6912_v7, %v10728_v24  ;;  %v8845_v24 = vld [vmem:[%s12711_s1 + $0x470] sm:$0xff]   ;;  %12807 = vst [vmem:[#allocation4_spill] sm:$0xff] %v10927_v12 }
 0x1eb   : > { %7271 = vmatpush3.bf16.msra.mxu0 %v10864_v47  ;;  %v6915_v20 = vadd.f32 %v6914_v14, %v6913_v9  ;;  %v8847_v7 = vld [vmem:[%s12711_s1 + $0x430] sm:$0xff]   ;;  %v8849_v14 = vld [vmem:[%s12711_s1 + $0x478] sm:$0xff]  }
 0x1ec   : > { %7272 = vmatprep.subr.bf16.mxu0 %v10875_v54  ;;  %v10916_v60 = vadd.f32 %v6940_v35, %v2863_v18  ;;  %v10936_v18 = vld [vmem:[%s12711_s1 + $0x4c0] sm:$0xff]  }
 0x1ed   : > { %7297 = vmatpush3.bf16.msra.mxu1 %v8835_v46  ;;  %v10903_v46 = vld [vmem:[%s12711_s1 + $0x3b0] sm:$0xff]   ;;  %12808 = vst [vmem:[#allocation5_spill] sm:$0xff] %v10936_v18  ;;  %v8536_v35 = vld [vmem:[%s9720_s27 + $0x29c] ss:$100 sps:$4 sm:$0x1f]  }
 0x1ee   : > { %7298 = vmatprep.subr.bf16.mxu1 %v8837_v21  ;;  %v2866_v21 = vadd.f32 %v6915_v20, %v10736_v2  ;;  %v8527_v2 = vld [vmem:[%s9720_s27 + $0x1c8] ss:$100 sps:$4 sm:$0xff]   ;;  %v8533_v20 = vld [vmem:[%s9720_s27 + $0x294] ss:$100 sps:$4 sm:$0x1f]  }
 0x1ef   : > { %7273 = vmatpush3.bf16.msra.mxu0 %v10884_v63 }
 0x1f0   : > { %7274 = vmatprep.subr.bf16.mxu0 %v10893_v10 }
 0x1f1   : > { %7299 = vmatpush3.bf16.msra.mxu1 %v8839_v43  ;;  %v10913_v43 = vld [vmem:[%s12711_s1 + $0x3f8] sm:$0xff]  }
 0x1f2   : > { %7300 = vmatprep.subr.bf16.mxu1 %v8841_v4  ;;  %12806 = vst [vmem:[#allocation3_spill] sm:$0xff] %v10913_v43  ;;  %v6943_v4 = vadd.f32 %v6942_v56, %v6941_v44  ;;  %v10948_v44 = vld [vmem:[%s12711_s1 + $0x480] sm:$0xff]  }
 0x1f3   : > { %7275 = vmatpush3.bf16.msra.mxu0 %v10903_v46  ;;  %12809 = vst [vmem:[#allocation6_spill] sm:$0xff] %v10948_v44  ;;  %v8855_v56 = vld [vmem:[%s12711_s1 + $0x500] sm:$0xff]  }
 0x1f4   : > { %7276 = vmatprep.subr.bf16.mxu0 %v10913_v43  ;;  %v10922_v9 = vadd.f32 %v6943_v4, %v2866_v21  ;;  %v10957_v21 = vld [vmem:[%s12711_s1 + $0x4c8] sm:$0xff]   ;;  %v8535_v4 = vld [vmem:[%s9720_s27 + $0x290] ss:$100 sps:$4 sm:$0x1f]  }
 0x1f5   : > { %7301 = vmatpush3.bf16.msra.mxu1 %v8843_v33  ;;  %v8851_v33 = vld [vmem:[%s12711_s1 + $0x438] sm:$0xff]   ;;  %12810 = vst [vmem:[#allocation7_spill] sm:$0xff] %v10957_v21 }
 0x1f6   : > { %7302 = vmatprep.subr.bf16.mxu1 %v8845_v24  ;;  %v8853_v24 = vld [vmem:[%s12711_s1 + $0x540] sm:$0xff]  }
 0x1f7   : > { %7277 = vmatpush3.bf16.msra.mxu0 %v10927_v12 }
 0x1f8   : > { %7318 = vmatprep.subr.bf16.mxu0 %v10936_v18 }
 0x1f9   : > { %7303 = vmatpush3.bf16.msra.mxu1 %v8847_v7  ;;  %v10967_v7 = vld [vmem:[%s12711_s1 + $0x488] sm:$0xff]  }
 0x1fa   : > { %7304 = vmatprep.subr.bf16.mxu1 %v8849_v14  ;;  %3848 = vmatmul.mubr.bf16.vlgmr.msra.gmra.mrb[76].mxu0 %v8527_v2  ;;  %12811 = vst [vmem:[#allocation8_spill] sm:$0xff] %v10967_v7  ;;  %v8857_v2 = vld [vmem:[%s12711_s1 + $0x548] sm:$0xff]   ;;  %v10976_v14 = vld [vmem:[%s12711_s1 + $0x4d0] sm:$0xff]  }
 0x1fb   : > { %7319 = vmatpush3.bf16.msra.mxu0 %v10948_v44  ;;  %3855 = vmatprep.mubr.bf16.mxu0 %v8533_v20  ;;  %12812 = vst [vmem:[#allocation9_spill] sm:$0xff] %v10976_v14  ;;  %v8541_v20 = vld [vmem:[%s9720_s27 + $0x1dc] ss:$100 sps:$4 sm:$0xff]  }
 0x1fc   : > { %7320 = vmatprep.subr.bf16.mxu0 %v10957_v21 }
 0x1fd   : > { %7305 = vmatpush3.bf16.msra.mxu1 %v8851_v33  ;;  %v8859_v33 = vld [vmem:[%s12711_s1 + $0x508] sm:$0xff]  }
 0x1fe   : > { %7346 = vmatprep.subr.bf16.mxu1 %v8853_v24  ;;  %v10988_v24 = vld [vmem:[%s12711_s1 + $0x490] sm:$0xff]  }
 0x1ff   : > { %7321 = vmatpush3.bf16.msra.mxu0 %v10967_v7  ;;  %12813 = vst [vmem:[#allocation10_spill] sm:$0xff] %v10988_v24 }
 0x200   : > { %3897 = vmatmul.mubr.bf16.vlgmr.msra.gmra.mrb[80].mxu1 %v8530_v27  ;;  %7322 = vmatprep.subr.bf16.mxu0 %v10976_v14  ;;  %v8538_v27 = vld [vmem:[%s9720_s27 + $0x298] ss:$100 sps:$4 sm:$0x1f]  }
 0x201   : > { %7347 = vmatpush3.bf16.msra.mxu1 %v8855_v56  ;;  %3904 = vmatprep.mubr.bf16.mxu1 %v8536_v35  ;;  %v8544_v35 = vld [vmem:[%s9720_s27 + $0x1e4] ss:$100 sps:$4 sm:$0xff]   ;;  %v8861_v56 = vld [vmem:[%s12711_s1 + $0x550] sm:$0xff]  }
 0x202   : > { %7348 = vmatprep.subr.bf16.mxu1 %v8857_v2  ;;  %3856 = vmatmul.mubr.bf16.gmra.mrb[80].mxu0 %v8535_v4  ;;  %v10997_v2 = vld [vmem:[%s12711_s1 + $0x4d8] sm:$0xff]   ;;  %v8863_v4 = vld [vmem:[%s12711_s1 + $0x510] sm:$0xff]  }
 0x203   : > { %7323 = vmatpush3.bf16.msra.mxu0 %v10988_v24  ;;  %12814 = vst [vmem:[#allocation11_spill] sm:$0xff] %v10997_v2  ;;  %3945 = vmatprep.mubr.bf16.mxu0 %v8541_v20  ;;  %v6960_v20 = vpop.f32.mrb[32].mxu0  ;;  %v6988_v24 = vpop.f32.mrb[32].mxu1 }
 0x204   : > { %7324 = vmatprep.subr.bf16.mxu0 %v10997_v2  ;;  %v6989_v7 = vpop.f32.mrb[33].mxu1 }
 0x205   : > { %7349 = vmatpush3.bf16.msra.mxu1 %v8859_v33  ;;  %v11006_v33 = vld [vmem:[%s12711_s1 + $0x498] sm:$0xff]   ;;  %v6990_v21 = vadd.f32 %v6989_v7, %v6988_v24  ;;  %v6991_v44 = vpop.f32.mrb[34].mxu1  ;;  %v11066_v24 = vld [vmem:[%s12711_s1 + $0x4b0] sm:$0xff]  }
 0x206   : > { %7350 = vmatprep.subr.bf16.mxu1 %v8861_v56  ;;  %12815 = vst [vmem:[#allocation12_spill] sm:$0xff] %v11006_v33  ;;  %v8865_v56 = vld [vmem:[%s12711_s1 + $0x558] sm:$0xff]   ;;  %v6992_v18 = vpop.f32.mrb[35].mxu1  ;;  %12821 = vst [vmem:[#allocation18_spill] sm:$0xff] %v11066_v24 }
 0x207   : > { %7325 = vmatpush3.bf16.msra.mxu0 %v11006_v33  ;;  %v8867_v33 = vld [vmem:[%s12711_s1 + $0x518] sm:$0xff]  }
 0x208   : > { %3905 = vmatmul.mubr.bf16.gmra.mrb[84].mxu1 %v8538_v27  ;;  %v11015_v27 = vld [vmem:[%s12711_s1 + $0x4e0] sm:$0xff]  }
 0x209   : > { %7351 = vmatpush3.bf16.msra.mxu1 %v8863_v4  ;;  %3994 = vmatprep.mubr.bf16.mxu1 %v8544_v35  ;;  %12816 = vst [vmem:[#allocation13_spill] sm:$0xff] %v11015_v27  ;;  %v6961_v35 = vpop.f32.mrb[33].mxu0 }
 0x20a   : > { %7352 = vmatprep.subr.bf16.mxu1 %v8865_v56  ;;  %7326 = vmatprep.subr.bf16.mxu0 %v11015_v27  ;;  %v6962_v4 = vadd.f32 %v6961_v35, %v6960_v20  ;;  %v6963_v2 = vpop.f32.mrb[34].mxu0  ;;  %v11024_v56 = vld [vmem:[%s12711_s1 + $0x4a0] sm:$0xff]  }
 0x20b   : > { %v6964_v14 = vpop.f32.mrb[35].mxu0  ;;  %12817 = vst [vmem:[#allocation14_spill] sm:$0xff] %v11024_v56  ;;  %7327 = vmatpush3.bf16.msra.mxu0 %v11024_v56  ;;  %v8869_v27 = vld [vmem:[%s12711_s1 + $0x560] sm:$0xff]  }
 0x20c   : > { %v2953_v20 = vadd.f32 %v6962_v4, %v10856_v38  ;;  %v6965_v35 = vadd.f32 %v6964_v14, %v6963_v2  ;;  %v6993_v14 = vadd.f32 %v6992_v18, %v6991_v44  ;;  %v11046_v2 = vld [vmem:[%s12711_s1 + $0x4a8] sm:$0xff]   ;;  %v6966_v44 = vpop.f32.mrb[36].mxu0  ;;  %v8877_v4 = vld [vmem:[%s12711_s1 + $0x570] sm:$0xff]  }
 0x20d   : > { %7353 = vmatpush3.bf16.msra.mxu1 %v8867_v33  ;;  %v11034_v33 = vld [vmem:[%s12711_s1 + $0x4e8] sm:$0xff]   ;;  %12819 = vst [vmem:[#allocation16_spill] sm:$0xff] %v11046_v2 }
 0x20e   : > { %7354 = vmatprep.subr.bf16.mxu1 %v8869_v27  ;;  %12818 = vst [vmem:[#allocation15_spill] sm:$0xff] %v11034_v33  ;;  %7328 = vmatprep.subr.bf16.mxu0 %v11034_v33  ;;  %v2956_v56 = vadd.f32 %v6965_v35, %v10870_v53  ;;  %v8871_v27 = vld [vmem:[%s12711_s1 + $0x520] sm:$0xff]   ;;  %v11041_v38 = vadd.f32 %v6990_v21, %v2953_v20  ;;  %v8873_v53 = vld [vmem:[%s12711_s1 + $0x568] sm:$0xff]   ;;  %v11057_v21 = vld [vmem:[%s12711_s1 + $0x4f0] sm:$0xff]  }
 0x20f   : > { %7329 = vmatpush3.bf16.msra.mxu0 %v11046_v2  ;;  %12820 = vst [vmem:[#allocation17_spill] sm:$0xff] %v11057_v21  ;;  %v8875_v18 = vld [vmem:[%s12711_s1 + $0x528] sm:$0xff]   ;;  %v11075_v35 = vld [vmem:[%s12711_s1 + $0x4f8] sm:$0xff]   ;;  %v11112_v33 = vld [vmem:[%s12711_s1 + $0x580] sm:$0xff]  }
 0x210   : > { %v11052_v7 = vadd.f32 %v6993_v14, %v2956_v56  ;;  %7330 = vmatprep.subr.bf16.mxu0 %v11057_v21  ;;  %v6967_v56 = vpop.f32.mrb[37].mxu0  ;;  %12822 = vst [vmem:[#allocation19_spill] sm:$0xff] %v11075_v35  ;;  %v6994_v14 = vpop.f32.mrb[36].mxu1  ;;  %v11086_v21 = vld [vmem:[%s12711_s1 + $0x4b8] sm:$0xff]   ;;  %12825 = vst [vmem:[#allocation22_spill] sm:$0xff] %v11112_v33 }
 0x211   : > { %7355 = vmatpush3.bf16.msra.mxu1 %v8871_v27  ;;  %v6968_v20 = vadd.f32 %v6967_v56, %v6966_v44  ;;  %v6969_v27 = vpop.f32.mrb[38].mxu0  ;;  %v6995_v44 = vpop.f32.mrb[37].mxu1  ;;  %v8539_v56 = vld [vmem:[%s9720_s27 + $0x1d8] ss:$100 sps:$4 sm:$0xff]   ;;  %12823 = vst [vmem:[#allocation20_spill] sm:$0xff] %v11086_v21 }
 0x212   : > { %7356 = vmatprep.subr.bf16.mxu1 %v8873_v53  ;;  %v6970_v53 = vpop.f32.mrb[39].mxu0  ;;  %v8881_v2 = vld [vmem:[%s12711_s1 + $0x578] sm:$0xff]  }
 0x213   : > { %7331 = vmatpush3.bf16.msra.mxu0 %v11066_v24  ;;  %v6971_v24 = vadd.f32 %v6970_v53, %v6969_v27  ;;  %v11096_v27 = vld [vmem:[%s12711_s1 + $0x5c0] sm:$0xff]  }
 0x214   : > { %7332 = vmatprep.subr.bf16.mxu0 %v11075_v35  ;;  %v6996_v35 = vadd.f32 %v6995_v44, %v6994_v14  ;;  %12824 = vst [vmem:[#allocation21_spill] sm:$0xff] %v11096_v27  ;;  %v8545_v53 = vld [vmem:[%s9720_s27 + $0x2a4] ss:$100 sps:$4 sm:$0x1f]  }
 0x215   : > { %7357 = vmatpush3.bf16.msra.mxu1 %v8875_v18  ;;  %v8879_v18 = vld [vmem:[%s12711_s1 + $0x530] sm:$0xff]   ;;  %v8542_v44 = vld [vmem:[%s9720_s27 + $0x1e0] ss:$100 sps:$4 sm:$0xff]  }
 0x216   : > { %7358 = vmatprep.subr.bf16.mxu1 %v8877_v4  ;;  %v2961_v4 = vadd.f32 %v6968_v20, %v10916_v60  ;;  %v2964_v60 = vadd.f32 %v6971_v24, %v10922_v9  ;;  %v8548_v9 = vld [vmem:[%s9720_s27 + $0x2ac] ss:$100 sps:$4 sm:$0x1f]  }
 0x217   : > { %7333 = vmatpush3.bf16.msra.mxu0 %v11086_v21 }
 0x218   : > { %7374 = vmatprep.subr.bf16.mxu0 %v11096_v27  ;;  %v11100_v21 = vadd.f32 %v6996_v35, %v2961_v4  ;;  %v8885_v35 = vld [vmem:[%s12711_s1 + $0x600] sm:$0xff]   ;;  %v11121_v4 = vld [vmem:[%s12711_s1 + $0x5c8] sm:$0xff]  }
 0x219   : > { %7359 = vmatpush3.bf16.msra.mxu1 %v8879_v18  ;;  %v6997_v18 = vpop.f32.mrb[38].mxu1  ;;  %12826 = vst [vmem:[#allocation23_spill] sm:$0xff] %v11121_v4 }
 0x21a   : > { %7360 = vmatprep.subr.bf16.mxu1 %v8881_v2  ;;  %v6998_v20 = vpop.f32.mrb[39].mxu1  ;;  %v8883_v2 = vld [vmem:[%s12711_s1 + $0x538] sm:$0xff]   ;;  %3946 = vmatmul.mubr.bf16.vlgmr.msra.gmra.mrb[84].mxu0 %v8539_v56  ;;  %v8547_v56 = vld [vmem:[%s9720_s27 + $0x2a0] ss:$100 sps:$4 sm:$0x1f]  }
 0x21b   : > { %v6999_v14 = vadd.f32 %v6998_v20, %v6997_v18  ;;  %7375 = vmatpush3.bf16.msra.mxu0 %v11112_v33  ;;  %3953 = vmatprep.mubr.bf16.mxu0 %v8545_v53  ;;  %v11128_v18 = vld [vmem:[%s12711_s1 + $0x588] sm:$0xff]   ;;  %v11137_v20 = vld [vmem:[%s12711_s1 + $0x5d0] sm:$0xff]  }
 0x21c   : > { %7376 = vmatprep.subr.bf16.mxu0 %v11121_v4  ;;  %12827 = vst [vmem:[#allocation24_spill] sm:$0xff] %v11128_v18  ;;  %12828 = vst [vmem:[#allocation25_spill] sm:$0xff] %v11137_v20  ;;  %v8553_v53 = vld [vmem:[%s9720_s27 + $0x1ec] ss:$100 sps:$4 sm:$0xff]  }
 0x21d   : > { %7361 = vmatpush3.bf16.msra.mxu1 %v8883_v2  ;;  %v11107_v24 = vadd.f32 %v6999_v14, %v2964_v60  ;;  %v8888_v60 = vld [vmem:[%s12711_s1 + $0x608] sm:$0xff]   ;;  %v11146_v2 = vld [vmem:[%s12711_s1 + $0x590] sm:$0xff]  }
 0x21e   : > { %8124 = vmatprep.subr.bf16.mxu1 %v8885_v35  ;;  %v8550_v14 = vld [vmem:[%s9720_s27 + $0x2a8] ss:$100 sps:$4 sm:$0x1f]   ;;  %12829 = vst [vmem:[#allocation26_spill] sm:$0xff] %v11146_v2 }
 0x21f   : > { %7377 = vmatpush3.bf16.msra.mxu0 %v11128_v18 }
 0x220   : > { %3995 = vmatmul.mubr.bf16.vlgmr.msra.gmra.mrb[88].mxu1 %v8542_v44  ;;  %7378 = vmatprep.subr.bf16.mxu0 %v11137_v20  ;;  %v8554_v44 = vld [vmem:[%s9720_s27 + $0x1f0] ss:$100 sps:$4 sm:$0xff]   ;;  %v8900_v20 = vld [vmem:[%s12711_s1 + $0x628] sm:$0xff]  }
 0x221   : > { %8125 = vmatpush3.bf16.msra.mxu1 %v8885_v35  ;;  %4002 = vmatprep.mubr.bf16.mxu1 %v8548_v9  ;;  %v8891_v9 = vld [vmem:[%s12711_s1 + $0x610] sm:$0xff]   ;;  %v11155_v35 = vld [vmem:[%s12711_s1 + $0x5d8] sm:$0xff]  }
 0x222   : > { %8126 = vmatprep.subr.bf16.mxu1 %v8888_v60  ;;  %3954 = vmatmul.mubr.bf16.gmra.mrb[88].mxu0 %v8547_v56  ;;  %12830 = vst [vmem:[#allocation27_spill] sm:$0xff] %v11155_v35  ;;  %v11161_v56 = vld [vmem:[%s12711_s1 + $0x598] sm:$0xff]  }
 0x223   : > { %7379 = vmatpush3.bf16.msra.mxu0 %v11146_v2  ;;  %4043 = vmatprep.mubr.bf16.mxu0 %v8553_v53  ;;  %12831 = vst [vmem:[#allocation28_spill] sm:$0xff] %v11161_v56  ;;  %v11176_v53 = vld [vmem:[%s12711_s1 + $0x5a0] sm:$0xff]  }
 0x224   : > { %7380 = vmatprep.subr.bf16.mxu0 %v11155_v35  ;;  %v11170_v35 = vld [vmem:[%s12711_s1 + $0x5e0] sm:$0xff]   ;;  %12833 = vst [vmem:[#allocation30_spill] sm:$0xff] %v11176_v53 }
 0x225   : > { %8127 = vmatpush3.bf16.msra.mxu1 %v8888_v60  ;;  %v8894_v60 = vld [vmem:[%s12711_s1 + $0x618] sm:$0xff]   ;;  %12832 = vst [vmem:[#allocation29_spill] sm:$0xff] %v11170_v35 }
 0x226   : > { %8128 = vmatprep.subr.bf16.mxu1 %v8891_v9 }
 0x227   : > { %7381 = vmatpush3.bf16.msra.mxu0 %v11161_v56 }
 0x228   : > { %4003 = vmatmul.mubr.bf16.gmra.mrb[92].mxu1 %v8550_v14  ;;  %7382 = vmatprep.subr.bf16.mxu0 %v11170_v35  ;;  %v8897_v14 = vld [vmem:[%s12711_s1 + $0x620] sm:$0xff]  }
 0x229   : > { %8129 = vmatpush3.bf16.msra.mxu1 %v8891_v9  ;;  %8140 = vmatprep.mubr.bf16.mxu1 %v8554_v44  ;;  %v7016_v44 = vpop.f32.mrb[40].mxu0  ;;  %v11185_v9 = vld [vmem:[%s12711_s1 + $0x5e8] sm:$0xff]  }
 0x22a   : > { %8130 = vmatprep.subr.bf16.mxu1 %v8894_v60  ;;  %12834 = vst [vmem:[#allocation31_spill] sm:$0xff] %v11185_v9 }
 0x22b   : > { %7383 = vmatpush3.bf16.msra.mxu0 %v11176_v53  ;;  %v11191_v53 = vld [vmem:[%s12711_s1 + $0x5a8] sm:$0xff]  }
 0x22c   : > { %7384 = vmatprep.subr.bf16.mxu0 %v11185_v9  ;;  %12835 = vst [vmem:[#allocation32_spill] sm:$0xff] %v11191_v53  ;;  %v7044_v9 = vpop.f32.mrb[40].mxu1 }
 0x22d   : > { %8131 = vmatpush3.bf16.msra.mxu1 %v8894_v60  ;;  %v7017_v60 = vpop.f32.mrb[41].mxu0 }
 0x22e   : > { %8132 = vmatprep.subr.bf16.mxu1 %v8897_v14  ;;  %v7018_v35 = vadd.f32 %v7017_v60, %v7016_v44  ;;  %v7019_v56 = vpop.f32.mrb[42].mxu0  ;;  %v7045_v44 = vpop.f32.mrb[41].mxu1 }
 0x22f   : > { %7385 = vmatpush3.bf16.msra.mxu0 %v11191_v53  ;;  %v7020_v2 = vpop.f32.mrb[43].mxu0  ;;  %v7046_v53 = vadd.f32 %v7045_v44, %v7044_v9  ;;  %v7047_v33 = vpop.f32.mrb[42].mxu1 }
 0x230   : > { %v3051_v18 = vadd.f32 %v7018_v35, %v11041_v38  ;;  %v7021_v4 = vadd.f32 %v7020_v2, %v7019_v56  ;;  %v7048_v27 = vpop.f32.mrb[43].mxu1  ;;  %v11208_v38 = vld [vmem:[%s12711_s1 + $0x5b0] sm:$0xff]   ;;  %v7022_v56 = vpop.f32.mrb[44].mxu0 }
 0x231   : > { %8133 = vmatpush3.bf16.msra.mxu1 %v8897_v14  ;;  %v11201_v14 = vld [vmem:[%s12711_s1 + $0x5f0] sm:$0xff]   ;;  %12837 = vst [vmem:[#allocation34_spill] sm:$0xff] %v11208_v38  ;;  %v7049_v35 = vadd.f32 %v7048_v27, %v7047_v33  ;;  %v11228_v33 = vld [vmem:[%s12711_s1 + $0x5b8] sm:$0xff]  }
 0x232   : > { %8134 = vmatprep.subr.bf16.mxu1 %v8900_v20  ;;  %12836 = vst [vmem:[#allocation33_spill] sm:$0xff] %v11201_v14  ;;  %7386 = vmatprep.subr.bf16.mxu0 %v11201_v14  ;;  %v3054_v60 = vadd.f32 %v7021_v4, %v11052_v7  ;;  %v8903_v2 = vld [vmem:[%s12711_s1 + $0x630] sm:$0xff]   ;;  %v11217_v7 = vld [vmem:[%s12711_s1 + $0x5f8] sm:$0xff]   ;;  %v11220_v4 = vadd.f32 %v7046_v53, %v3051_v18  ;;  %12839 = vst [vmem:[#allocation36_spill] sm:$0xff] %v11228_v33 }
 0x233   : > { %7387 = vmatpush3.bf16.msra.mxu0 %v11208_v38  ;;  %12838 = vst [vmem:[#allocation35_spill] sm:$0xff] %v11217_v7  ;;  %v8551_v38 = vld [vmem:[%s9720_s27 + $0x1e8] ss:$100 sps:$4 sm:$0xff]   ;;  %v8906_v18 = vld [vmem:[%s12711_s1 + $0x638] sm:$0xff]  }
 0x234   : > { %7388 = vmatprep.subr.bf16.mxu0 %v11217_v7  ;;  %v11223_v14 = vadd.f32 %v7049_v35, %v3054_v60  ;;  %v11238_v60 = vld [vmem:[%s12711_s1 + $0x40] sm:$0xff]   ;;  %v8556_v35 = vld [vmem:[%s9720_s27 + $0x2b4] ss:$100 sps:$4 sm:$0x1f]  }
 0x235   : > { %8135 = vmatpush3.bf16.msra.mxu1 %v8900_v20  ;;  %v7023_v20 = vpop.f32.mrb[45].mxu0 }
 0x236   : > { %8136 = vmatprep.subr.bf16.mxu1 %v8903_v2  ;;  %v7024_v9 = vadd.f32 %v7023_v20, %v7022_v56  ;;  %v7025_v44 = vpop.f32.mrb[46].mxu0 }
 0x237   : > { %7389 = vmatpush3.bf16.msra.mxu0 %v11228_v33  ;;  %v7026_v27 = vpop.f32.mrb[47].mxu0  ;;  %v8555_v33 = vld [vmem:[%s9720_s27 + $0x2b8] ss:$100 sps:$4 sm:$0x1f]  }
 0x238   : > { %v3059_v53 = vadd.f32 %v7024_v9, %v11100_v21  ;;  %v7027_v56 = vadd.f32 %v7026_v27, %v7025_v44  ;;  %7412 = vmatprep.subr.bf16.mxu0 %v11238_v60  ;;  %v8564_v21 = vld [vmem:[%s9720_s27 + $0x32c] ss:$100 sps:$4 sm:$0xff]   ;;  %v11248_v44 = vld [vmem:[%s12711_s1] sm:$0xff]  }
 0x239   : > { %8137 = vmatpush3.bf16.msra.mxu1 %v8903_v2  ;;  %v7050_v2 = vpop.f32.mrb[44].mxu1  ;;  %v8909_v27 = vld [vmem:[%s12711_s1 + $0xc0] sm:$0xff]  }
 0x23a   : > { %8138 = vmatprep.subr.bf16.mxu1 %v8906_v18  ;;  %v7051_v20 = vpop.f32.mrb[45].mxu1  ;;  %v3062_v7 = vadd.f32 %v7027_v56, %v11107_v24  ;;  %4044 = vmatmul.mubr.bf16.vlgmr.msra.gmra.mrb[92].mxu0 %v8551_v38  ;;  %v8558_v56 = vld [vmem:[%s9720_s27 + $0x2b0] ss:$100 sps:$4 sm:$0x1f]  }
 0x23b   : > { %v7052_v12 = vadd.f32 %v7051_v20, %v7050_v2  ;;  %v7053_v43 = vpop.f32.mrb[46].mxu1  ;;  %7413 = vmatpush3.bf16.msra.mxu0 %v11248_v44  ;;  %4051 = vmatprep.mubr.bf16.mxu0 %v8556_v35  ;;  %v8911_v2 = vld [vmem:[%s12711_s1 + $0x80] sm:$0xff]   ;;  %v11286_v35 = vld [vmem:[%s12711_s1 + $0x10] sm:$0xff]  }
 0x23c   : > { %v7054_v9 = vpop.f32.mrb[47].mxu1 }
 0x23d   : > { %8139 = vmatpush3.bf16.msra.mxu1 %v8906_v18  ;;  %v7055_v24 = vadd.f32 %v7054_v9, %v7053_v43  ;;  %v11257_v18 = vld [vmem:[%s12711_s1 + $0x48] sm:$0xff]   ;;  %v3108_v38 = vadd.f32 %v7052_v12, %v3059_v53  ;;  %v11295_v9 = vld [vmem:[%s12711_s1 + $0x58] sm:$0xff]  }
 0x23e   : > { %7440 = vmatprep.subr.bf16.mxu1 %v8909_v27  ;;  %7414 = vmatprep.subr.bf16.mxu0 %v11257_v18  ;;  %v11267_v43 = vld [vmem:[%s12711_s1 + $0x8] sm:$0xff]   ;;  %12840 = vst [vmem:[#allocation37_spill] sm:$0xff] %v11295_v9  ;;  %v8919_v27 = vld [vmem:[%s12711_s1 + $0x90] sm:$0xff]  }
 0x23f   : > { %v3111_v20 = vadd.f32 %v7055_v24, %v3062_v7  ;;  %7415 = vmatpush3.bf16.msra.mxu0 %v11267_v43  ;;  %v8913_v12 = vld [vmem:[%s12711_s1 + $0xc8] sm:$0xff]   ;;  %v11304_v24 = vld [vmem:[%s12711_s1 + $0x18] sm:$0xff]  }
 0x240   : > { %8141 = vmatmul.mubr.bf16.vlgmr.msra.gmra.mrb[96].mxu1 %v8555_v33  ;;  %v11276_v33 = vld [vmem:[%s12711_s1 + $0x50] sm:$0xff]   ;;  %v8561_v7 = vld [vmem:[%s9720_s27 + $0x324] ss:$100 sps:$4 sm:$0xff]   ;;  %12841 = vst [vmem:[#allocation38_spill] sm:$0xff] %v11304_v24 }
 0x241   : > { %7441 = vmatpush3.bf16.msra.mxu1 %v8911_v2  ;;  %4503 = vmatprep.mubr.bf16.mxu1 %v8564_v21  ;;  %v8915_v53 = vld [vmem:[%s12711_s1 + $0x88] sm:$0xff]   ;;  %v8917_v21 = vld [vmem:[%s12711_s1 + $0xd0] sm:$0xff]   ;;  %v8921_v2 = vld [vmem:[%s12711_s1 + $0xd8] sm:$0xff]  }
 0x242   : > { %7442 = vmatprep.subr.bf16.mxu1 %v8913_v12  ;;  %7416 = vmatprep.subr.bf16.mxu0 %v11276_v33  ;;  %v8923_v12 = vld [vmem:[%s12711_s1 + $0x98] sm:$0xff]  }
 0x243   : > { %4052 = vmatmul.mubr.bf16.gmra.mrb[96].mxu0 %v8558_v56  ;;  %v11313_v56 = vld [vmem:[%s12711_s1 + $0x60] sm:$0xff]  }
 0x244   : > { %7417 = vmatpush3.bf16.msra.mxu0 %v11286_v35  ;;  %4454 = vmatprep.mubr.bf16.mxu0 %v8561_v7  ;;  %12842 = vst [vmem:[#allocation39_spill] sm:$0xff] %v11313_v56  ;;  %v11322_v7 = vld [vmem:[%s12711_s1 + $0x20] sm:$0xff]  }
 0x245   : > { %7443 = vmatpush3.bf16.msra.mxu1 %v8915_v53  ;;  %7418 = vmatprep.subr.bf16.mxu0 %v11295_v9  ;;  %12843 = vst [vmem:[#allocation40_spill] sm:$0xff] %v11322_v7  ;;  %v8925_v53 = vld [vmem:[%s12711_s1 + $0xe0] sm:$0xff]  }
 0x246   : > { %7444 = vmatprep.subr.bf16.mxu1 %v8917_v21  ;;  %v11331_v21 = vld [vmem:[%s12711_s1 + $0x68] sm:$0xff]   ;;  %v11414_v9 = vld [vmem:[%s12711_s1 + $0x100] sm:$0xff]  }
 0x247   : > { %12844 = vst [vmem:[#allocation41_spill] sm:$0xff] %v11331_v21 }
 0x248   : > { %7419 = vmatpush3.bf16.msra.mxu0 %v11304_v24  ;;  %v11345_v24 = vld [vmem:[%s12711_s1 + $0x28] sm:$0xff]  }
 0x249   : > { %7445 = vmatpush3.bf16.msra.mxu1 %v8919_v27  ;;  %7420 = vmatprep.subr.bf16.mxu0 %v11313_v56  ;;  %v8122_v27 = vpop.f32.mrb[48].mxu0  ;;  %12847 = vst [vmem:[#allocation44_spill] sm:$0xff] %v11345_v24 }
 0x24a   : > { %7446 = vmatprep.subr.bf16.mxu1 %v8921_v2  ;;  %v11334_v2 = vadd.f32 %v8122_v27, %v3108_v38  ;;  %v8929_v38 = vld [vmem:[%s12711_s1 + $0xe8] sm:$0xff]  }
 0x24c   : > { %7421 = vmatpush3.bf16.msra.mxu0 %v11322_v7  ;;  %12845 = vst [vmem:[#allocation42_spill] sm:$0xff] %v11334_v2  ;;  %v3148_v7 = vpop.f32.mrb[49].mxu0 }
 0x24d   : > { %7447 = vmatpush3.bf16.msra.mxu1 %v8923_v12  ;;  %7422 = vmatprep.subr.bf16.mxu0 %v11331_v21  ;;  %v8927_v12 = vld [vmem:[%s12711_s1 + $0xa0] sm:$0xff]   ;;  %v11340_v56 = vadd.f32 %v3148_v7, %v11220_v4  ;;  %v11356_v4 = vld [vmem:[%s12711_s1 + $0x70] sm:$0xff]   ;;  %v7082_v7 = vpop.f32.mrb[48].mxu1 }
 0x24e   : > { %7448 = vmatprep.subr.bf16.mxu1 %v8925_v53  ;;  %v8123_v53 = vpop.f32.mrb[50].mxu0  ;;  %12849 = vst [vmem:[#allocation46_spill] sm:$0xff] %v11356_v4  ;;  %v8568_v21 = vld [vmem:[%s9720_s27 + $0x3f4] ss:$100 sps:$4 sm:$0x1f]  }
 0x24f   : > { %12846 = vst [vmem:[#allocation43_spill] sm:$0xff] %v11340_v56  ;;  %v11351_v27 = vadd.f32 %v8123_v53, %v3111_v20  ;;  %v7083_v56 = vpop.f32.mrb[49].mxu1 }
 0x250   : > { %7423 = vmatpush3.bf16.msra.mxu0 %v11345_v24  ;;  %v11365_v20 = vadd.f32 %v7083_v56, %v7082_v7  ;;  %v7085_v53 = vpop.f32.mrb[50].mxu1  ;;  %v11379_v56 = vld [vmem:[%s12711_s1 + $0x78] sm:$0xff]  }
 0x251   : > { %7449 = vmatpush3.bf16.msra.mxu1 %v8927_v12  ;;  %12848 = vst [vmem:[#allocation45_spill] sm:$0xff] %v11351_v27  ;;  %v3151_v12 = vpop.f32.mrb[51].mxu0  ;;  %7424 = vmatprep.subr.bf16.mxu0 %v11356_v4  ;;  %v11370_v27 = vld [vmem:[%s12711_s1 + $0x30] sm:$0xff]   ;;  %12852 = vst [vmem:[#allocation49_spill] sm:$0xff] %v11379_v56 }
 0x252   : > { %7450 = vmatprep.subr.bf16.mxu1 %v8929_v38  ;;  %v11360_v2 = vadd.f32 %v3151_v12, %v11223_v14  ;;  %v8931_v38 = vld [vmem:[%s12711_s1 + $0xa8] sm:$0xff]   ;;  %12851 = vst [vmem:[#allocation48_spill] sm:$0xff] %v11370_v27  ;;  %v8933_v14 = vld [vmem:[%s12711_s1 + $0xf0] sm:$0xff]   ;;  %v7086_v12 = vpop.f32.mrb[51].mxu1 }
 0x253   : > { %v11382_v7 = vadd.f32 %v7086_v12, %v7085_v53  ;;  %v11400_v53 = vld [vmem:[%s12711_s1 + $0x140] sm:$0xff]   ;;  %v7088_v12 = vpop.f32.mrb[52].mxu1 }
 0x254   : > { %12850 = vst [vmem:[#allocation47_spill] sm:$0xff] %v11360_v2  ;;  %7425 = vmatpush3.bf16.msra.mxu0 %v11370_v27  ;;  %v8559_v2 = vld [vmem:[%s9720_s27 + $0x320] ss:$100 sps:$4 sm:$0xff]   ;;  %12854 = vst [vmem:[#allocation51_spill] sm:$0xff] %v11400_v53  ;;  %v8562_v27 = vld [vmem:[%s9720_s27 + $0x328] ss:$100 sps:$4 sm:$0xff]  }
 0x255   : > { %7451 = vmatpush3.bf16.msra.mxu1 %v8931_v38  ;;  %7426 = vmatprep.subr.bf16.mxu0 %v11379_v56  ;;  %v8935_v38 = vld [vmem:[%s12711_s1 + $0xb0] sm:$0xff]   ;;  %v8937_v56 = vld [vmem:[%s12711_s1 + $0xf8] sm:$0xff]   ;;  %v7089_v4 = vpop.f32.mrb[53].mxu1 }
 0x256   : > { %7452 = vmatprep.subr.bf16.mxu1 %v8933_v14  ;;  %v11391_v14 = vld [vmem:[%s12711_s1 + $0x38] sm:$0xff]   ;;  %v11408_v24 = vadd.f32 %v7089_v4, %v7088_v12  ;;  %v8567_v12 = vld [vmem:[%s9720_s27 + $0x3e8] ss:$100 sps:$4 sm:$0x1f]  }
 0x257   : > { %12853 = vst [vmem:[#allocation50_spill] sm:$0xff] %v11391_v14 }
 0x258   : > { %7427 = vmatpush3.bf16.msra.mxu0 %v11391_v14  ;;  %v8939_v14 = vld [vmem:[%s12711_s1 + $0xb8] sm:$0xff]  }
 0x259   : > { %7453 = vmatpush3.bf16.msra.mxu1 %v8935_v38  ;;  %7468 = vmatprep.subr.bf16.mxu0 %v11400_v53  ;;  %v8565_v38 = vld [vmem:[%s9720_s27 + $0x3ec] ss:$100 sps:$4 sm:$0x1f]   ;;  %v8941_v53 = vld [vmem:[%s12711_s1 + $0x1c0] sm:$0xff]  }
 0x25a   : > { %7454 = vmatprep.subr.bf16.mxu1 %v8937_v56  ;;  %v7091_v56 = vpop.f32.mrb[54].mxu1 }
 0x25b   : > { %4455 = vmatmul.mubr.bf16.vlgmr.msra.gmra.mrb[100].mxu0 %v8559_v2  ;;  %v11423_v2 = vld [vmem:[%s12711_s1 + $0x148] sm:$0xff]  }
 0x25c   : > { %7469 = vmatpush3.bf16.msra.mxu0 %v11414_v9  ;;  %4462 = vmatprep.mubr.bf16.mxu0 %v8565_v38  ;;  %v11450_v38 = vld [vmem:[%s12711_s1 + $0x110] sm:$0xff]  }
 0x25d   : > { %7455 = vmatpush3.bf16.msra.mxu1 %v8939_v14  ;;  %v7092_v14 = vpop.f32.mrb[55].mxu1  ;;  %7470 = vmatprep.subr.bf16.mxu0 %v11423_v2  ;;  %12855 = vst [vmem:[#allocation52_spill] sm:$0xff] %v11450_v38 }
 0x25e   : > { %7496 = vmatprep.subr.bf16.mxu1 %v8941_v53  ;;  %v11426_v4 = vadd.f32 %v7092_v14, %v7091_v56  ;;  %v11433_v53 = vld [vmem:[%s12711_s1 + $0x108] sm:$0xff]   ;;  %v11440_v56 = vld [vmem:[%s12711_s1 + $0x150] sm:$0xff]  }
 0x260   : > { %4504 = vmatmul.mubr.bf16.vlgmr.msra.gmra.mrb[100].mxu1 %v8562_v27  ;;  %7471 = vmatpush3.bf16.msra.mxu0 %v11433_v53  ;;  %v8573_v27 = vld [vmem:[%s9720_s27 + $0x334] ss:$100 sps:$4 sm:$0xff]  }
 0x261   : > { %7497 = vmatpush3.bf16.msra.mxu1 %v10456_v45  ;;  %4511 = vmatprep.mubr.bf16.mxu1 %v8568_v21  ;;  %v8570_v45 = vld [vmem:[%s9720_s27 + $0x3f0] ss:$100 sps:$4 sm:$0x1f]   ;;  %v8576_v21 = vld [vmem:[%s9720_s27 + $0x33c] ss:$100 sps:$4 sm:$0xff]  }
 0x262   : > { %7498 = vmatprep.subr.bf16.mxu1 %v10466_v51  ;;  %7472 = vmatprep.subr.bf16.mxu0 %v11440_v56  ;;  %v11457_v51 = vld [vmem:[%s12711_s1 + $0x158] sm:$0xff]   ;;  %v7110_v14 = vpop.f32.mrb[52].mxu0 }
 0x263   : > { %4463 = vmatmul.mubr.bf16.gmra.mrb[104].mxu0 %v8567_v12  ;;  %12856 = vst [vmem:[#allocation53_spill] sm:$0xff] %v11457_v51  ;;  %v11492_v12 = vld [vmem:[%s12712_s2] ss:$0 sm:$0xff] }
 0x264   : > { %7473 = vmatpush3.bf16.msra.mxu0 %v11450_v38  ;;  %4552 = vmatprep.mubr.bf16.mxu0 %v8573_v27  ;;  %v3507_v27 = vadd.f32 %v11492_v12, %v11365_v20  ;;  %v3510_v20 = vadd.f32 %v11492_v12, %v11382_v7  ;;  %v11515_v38 = vld [vmem:[%s12711_s1 + $0x130] sm:$0xff]  }
 0x265   : > { %7499 = vmatpush3.bf16.msra.mxu1 %v10479_v59  ;;  %7474 = vmatprep.subr.bf16.mxu0 %v11457_v51  ;;  %v11464_v59 = vld [vmem:[%s12711_s1 + $0x118] sm:$0xff]   ;;  %12862 = vst [vmem:[#allocation59_spill] sm:$0xff] %v11515_v38 }
 0x266   : > { %7500 = vmatprep.subr.bf16.mxu1 %v10489_v61  ;;  %12857 = vst [vmem:[#allocation54_spill] sm:$0xff] %v11464_v59  ;;  %v11471_v61 = vld [vmem:[%s12711_s1 + $0x160] sm:$0xff]  }
 0x267   : > { %12858 = vst [vmem:[#allocation55_spill] sm:$0xff] %v11471_v61 }
 0x268   : > { %4512 = vmatmul.mubr.bf16.gmra.mrb[104].mxu1 %v8570_v45  ;;  %7475 = vmatpush3.bf16.msra.mxu0 %v11464_v59 }
 0x269   : > { %7501 = vmatpush3.bf16.msra.mxu1 %v10502_v3  ;;  %4601 = vmatprep.mubr.bf16.mxu1 %v8576_v21  ;;  %v11478_v3 = vld [vmem:[%s12711_s1 + $0x120] sm:$0xff]   ;;  %v11499_v21 = vld [vmem:[%s12711_s1 + $0x128] sm:$0xff]  }
 0x26a   : > { %7502 = vmatprep.subr.bf16.mxu1 %v10511_v6  ;;  %7476 = vmatprep.subr.bf16.mxu0 %v11471_v61  ;;  %12859 = vst [vmem:[#allocation56_spill] sm:$0xff] %v11478_v3  ;;  %v11485_v6 = vld [vmem:[%s12711_s1 + $0x168] sm:$0xff]   ;;  %12861 = vst [vmem:[#allocation58_spill] sm:$0xff] %v11499_v21 }
 0x26b   : > { %12860 = vst [vmem:[#allocation57_spill] sm:$0xff] %v11485_v6 }
 0x26c   : > { %7477 = vmatpush3.bf16.msra.mxu0 %v11478_v3  ;;  %v11506_v3 = vld [vmem:[%s12711_s1 + $0x170] sm:$0xff]  }
 0x26d   : > { %7503 = vmatpush3.bf16.msra.mxu1 %v10521_v15  ;;  %7478 = vmatprep.subr.bf16.mxu0 %v11485_v6  ;;  %v7111_v15 = vpop.f32.mrb[53].mxu0 }
 0x26e   : > { %7504 = vmatprep.subr.bf16.mxu1 %v10530_v19  ;;  %v7112_v19 = vadd.f32 %v7111_v15, %v7110_v14  ;;  %v7113_v45 = vpop.f32.mrb[54].mxu0 }
 0x26f   : > { %v7114_v6 = vpop.f32.mrb[55].mxu0 }
 0x270   : > { %7479 = vmatpush3.bf16.msra.mxu0 %v11499_v21  ;;  %v3556_v14 = vadd.f32 %v7112_v19, %v3507_v27  ;;  %v7115_v15 = vadd.f32 %v7114_v6, %v7113_v45  ;;  %v7116_v27 = vpop.f32.mrb[56].mxu0 }
 0x271   : > { %7505 = vmatpush3.bf16.msra.mxu1 %v10542_v26  ;;  %v7138_v26 = vpop.f32.mrb[56].mxu1  ;;  %7480 = vmatprep.subr.bf16.mxu0 %v11506_v3 }
 0x272   : > { %7506 = vmatprep.subr.bf16.mxu1 %v10553_v28  ;;  %v7139_v61 = vpop.f32.mrb[57].mxu1  ;;  %v3559_v28 = vadd.f32 %v7115_v15, %v3510_v20  ;;  %v8577_v20 = vld [vmem:[%s9720_s27 + $0x3fc] ss:$100 sps:$4 sm:$0x1f]  }
 0x273   : > { %v7140_v59 = vadd.f32 %v7139_v61, %v7138_v26  ;;  %v7141_v51 = vpop.f32.mrb[58].mxu1  ;;  %v11524_v61 = vld [vmem:[%s12711_s1 + $0x178] sm:$0xff]  }
 0x274   : > { %v7142_v21 = vpop.f32.mrb[59].mxu1  ;;  %7481 = vmatpush3.bf16.msra.mxu0 %v11515_v38  ;;  %12863 = vst [vmem:[#allocation60_spill] sm:$0xff] %v11524_v61 }
 0x275   : > { %7507 = vmatpush3.bf16.msra.mxu1 %v10562_v30  ;;  %v11519_v7 = vadd.f32 %v7140_v59, %v3556_v14  ;;  %v7143_v6 = vadd.f32 %v7142_v21, %v7141_v51  ;;  %7482 = vmatprep.subr.bf16.mxu0 %v11524_v61  ;;  %v3515_v30 = vadd.f32 %v11492_v12, %v11408_v24  ;;  %v8571_v59 = vld [vmem:[%s9720_s27 + $0x330] ss:$100 sps:$4 sm:$0xff]   ;;  %v11536_v21 = vld [vmem:[%s12711_s1 + $0x138] sm:$0xff]   ;;  %v7144_v24 = vpop.f32.mrb[60].mxu1 }
 0x276   : > { %7508 = vmatprep.subr.bf16.mxu1 %v10571_v32  ;;  %v7117_v32 = vpop.f32.mrb[57].mxu0  ;;  %12864 = vst [vmem:[#allocation61_spill] sm:$0xff] %v11536_v21  ;;  %v3518_v14 = vadd.f32 %v11492_v12, %v11426_v4 }
 0x277   : > { %v11529_v19 = vadd.f32 %v7143_v6, %v3559_v28  ;;  %v7118_v51 = vadd.f32 %v7117_v32, %v7116_v27  ;;  %v7119_v45 = vpop.f32.mrb[58].mxu0  ;;  %v7145_v6 = vpop.f32.mrb[61].mxu1  ;;  %v8574_v27 = vld [vmem:[%s9720_s27 + $0x338] ss:$100 sps:$4 sm:$0xff]  }
 0x278   : > { %7483 = vmatpush3.bf16.msra.mxu0 %v11536_v21  ;;  %v7120_v26 = vpop.f32.mrb[59].mxu0  ;;  %v7146_v32 = vadd.f32 %v7145_v6, %v7144_v24  ;;  %v7147_v21 = vpop.f32.mrb[62].mxu1 }
 0x279   : > { %7509 = vmatpush3.bf16.msra.mxu1 %v10580_v34  ;;  %v11543_v34 = vld [vmem:[%s12711_s1 + $0x240] sm:$0xff]   ;;  %v3564_v15 = vadd.f32 %v7118_v51, %v3515_v30  ;;  %v7121_v28 = vadd.f32 %v7120_v26, %v7119_v45  ;;  %v7148_v38 = vpop.f32.mrb[63].mxu1  ;;  %v11581_v51 = vld [vmem:[%s12711_s1 + $0x250] sm:$0xff]  }
 0x27a   : > { %7510 = vmatprep.subr.bf16.mxu1 %v10589_v36  ;;  %12865 = vst [vmem:[#allocation62_spill] sm:$0xff] %v11543_v34  ;;  %7524 = vmatprep.subr.bf16.mxu0 %v11543_v34  ;;  %v8580_v36 = vld [vmem:[%s9720_s27 + $0x404] ss:$100 sps:$4 sm:$0x1f]   ;;  %v7149_v30 = vadd.f32 %v7148_v38, %v7147_v21  ;;  %v8588_v45 = vld [vmem:[%s9720_s27 + $0x34c] ss:$100 sps:$4 sm:$0xff]  }
 0x27b   : > { %4553 = vmatmul.mubr.bf16.vlgmr.msra.gmra.mrb[108].mxu0 %v8571_v59  ;;  %v3567_v61 = vadd.f32 %v7121_v28, %v3518_v14  ;;  %v11555_v34 = vld [vmem:[%s12711_s1 + $0x200] sm:$0xff]   ;;  %v11559_v4 = vadd.f32 %v7146_v32, %v3564_v15  ;;  %v11574_v38 = vld [vmem:[%s12711_s1 + $0x208] sm:$0xff]   ;;  %v11591_v21 = vld [vmem:[%s12711_s1 + $0x210] sm:$0xff]  }
 0x27c   : > { %7525 = vmatpush3.bf16.msra.mxu0 %v11555_v34  ;;  %4560 = vmatprep.mubr.bf16.mxu0 %v8577_v20  ;;  %v11633_v14 = vld [vmem:[%s12711_s1 + $0x228] sm:$0xff]   ;;  %v11640_v28 = vld [vmem:[%s12711_s1 + $0x270] sm:$0xff]  }
 0x27d   : > { %7511 = vmatpush3.bf16.msra.mxu1 %v10599_v39  ;;  %v11564_v39 = vld [vmem:[%s12711_s1 + $0x248] sm:$0xff]   ;;  %v11567_v59 = vadd.f32 %v7149_v30, %v3567_v61 }
 0x27e   : > { %7552 = vmatprep.subr.bf16.mxu1 %v10608_v41  ;;  %7526 = vmatprep.subr.bf16.mxu0 %v11564_v39  ;;  %v8579_v41 = vld [vmem:[%s9720_s27 + $0x3f8] ss:$100 sps:$4 sm:$0x1f]   ;;  %v8585_v61 = vld [vmem:[%s9720_s27 + $0x344] ss:$100 sps:$4 sm:$0xff]  }
 0x280   : > { %4602 = vmatmul.mubr.bf16.vlgmr.msra.gmra.mrb[108].mxu1 %v8574_v27  ;;  %7527 = vmatpush3.bf16.msra.mxu0 %v11574_v38 }
 0x281   : > { %7553 = vmatpush3.bf16.msra.mxu1 %v10620_v48  ;;  %4609 = vmatprep.mubr.bf16.mxu1 %v8580_v36  ;;  %v8582_v48 = vld [vmem:[%s9720_s27 + $0x400] ss:$100 sps:$4 sm:$0x1f]  }
 0x282   : > { %7554 = vmatprep.subr.bf16.mxu1 %v10629_v52  ;;  %7528 = vmatprep.subr.bf16.mxu0 %v11581_v51  ;;  %v11598_v52 = vld [vmem:[%s12711_s1 + $0x258] sm:$0xff]   ;;  %v7166_v24 = vpop.f32.mrb[60].mxu0 }
 0x283   : > { %4561 = vmatmul.mubr.bf16.gmra.mrb[112].mxu0 %v8579_v41  ;;  %v11649_v41 = vld [vmem:[%s12711_s1 + $0x230] sm:$0xff]  }
 0x284   : > { %7529 = vmatpush3.bf16.msra.mxu0 %v11591_v21  ;;  %4650 = vmatprep.mubr.bf16.mxu0 %v8585_v61 }
 0x285   : > { %7555 = vmatpush3.bf16.msra.mxu1 %v10639_v49  ;;  %7530 = vmatprep.subr.bf16.mxu0 %v11598_v52  ;;  %v11605_v49 = vld [vmem:[%s12711_s1 + $0x218] sm:$0xff]  }
 0x286   : > { %7556 = vmatprep.subr.bf16.mxu1 %v10648_v0  ;;  %v11612_v0 = vld [vmem:[%s12711_s1 + $0x260] sm:$0xff]  }
 0x288   : > { %4610 = vmatmul.mubr.bf16.gmra.mrb[112].mxu1 %v8582_v48  ;;  %7531 = vmatpush3.bf16.msra.mxu0 %v11605_v49  ;;  %v11658_v48 = vld [vmem:[%s12711_s1 + $0x278] sm:$0xff]  }
 0x289   : > { %7557 = vmatpush3.bf16.msra.mxu1 %v10662_v57  ;;  %4699 = vmatprep.mubr.bf16.mxu1 %v8588_v45  ;;  %v11619_v57 = vld [vmem:[%s12711_s1 + $0x220] sm:$0xff]  }
 0x28a   : > { %7558 = vmatprep.subr.bf16.mxu1 %v10671_v62  ;;  %7532 = vmatprep.subr.bf16.mxu0 %v11612_v0  ;;  %v11626_v62 = vld [vmem:[%s12711_s1 + $0x268] sm:$0xff]  }
 0x28c   : > { %7533 = vmatpush3.bf16.msra.mxu0 %v11619_v57 }
 0x28d   : > { %7559 = vmatpush3.bf16.msra.mxu1 %v10684_v23  ;;  %7534 = vmatprep.subr.bf16.mxu0 %v11626_v62  ;;  %v7167_v23 = vpop.f32.mrb[61].mxu0 }
 0x28e   : > { %7560 = vmatprep.subr.bf16.mxu1 %v10693_v29  ;;  %v7168_v26 = vadd.f32 %v7167_v23, %v7166_v24  ;;  %v7169_v20 = vpop.f32.mrb[62].mxu0  ;;  %v8583_v24 = vld [vmem:[%s9720_s27 + $0x340] ss:$100 sps:$4 sm:$0xff]  }
 0x28f   : > { %v7170_v15 = vpop.f32.mrb[63].mxu0 }
 0x290   : > { %7535 = vmatpush3.bf16.msra.mxu0 %v11633_v14  ;;  %v7171_v6 = vadd.f32 %v7170_v15, %v7169_v20  ;;  %v8589_v15 = vld [vmem:[%s9720_s27 + $0x40c] ss:$100 sps:$4 sm:$0x1f]  }
 0x291   : > { %7561 = vmatpush3.bf16.msra.mxu1 %v10702_v40  ;;  %7536 = vmatprep.subr.bf16.mxu0 %v11640_v28  ;;  %v3654_v40 = vadd.f32 %v7168_v26, %v11519_v7  ;;  %v11668_v26 = vld [vmem:[%s12711_s1 + $0x238] sm:$0xff]  }
 0x292   : > { %7562 = vmatprep.subr.bf16.mxu1 %v10712_v50  ;;  %v3657_v50 = vadd.f32 %v7171_v6, %v11529_v19 }
 0x293   : > { %v7194_v29 = vpop.f32.mrb[64].mxu1 }
 0x294   : > { %v7195_v27 = vpop.f32.mrb[65].mxu1  ;;  %7537 = vmatpush3.bf16.msra.mxu0 %v11649_v41 }
 0x295   : > { %v7196_v32 = vadd.f32 %v7195_v27, %v7194_v29  ;;  %v7197_v36 = vpop.f32.mrb[66].mxu1  ;;  %7563 = vmatpush3.bf16.msra.mxu1 %v10722_v58  ;;  %7538 = vmatprep.subr.bf16.mxu0 %v11658_v48  ;;  %v7172_v58 = vpop.f32.mrb[64].mxu0 }
 0x296   : > { %v7198_v30 = vpop.f32.mrb[67].mxu1  ;;  %7564 = vmatprep.subr.bf16.mxu1 %v10733_v1  ;;  %v7173_v45 = vpop.f32.mrb[65].mxu0 }
 0x297   : > { %v11653_v7 = vadd.f32 %v7196_v32, %v3654_v40  ;;  %v7199_v61 = vadd.f32 %v7198_v30, %v7197_v36  ;;  %v7174_v1 = vadd.f32 %v7173_v45, %v7172_v58  ;;  %v7175_v23 = vpop.f32.mrb[66].mxu0  ;;  %v8586_v32 = vld [vmem:[%s9720_s27 + $0x348] ss:$100 sps:$4 sm:$0xff]   ;;  %v11687_v58 = vld [vmem:[%s12711_s1 + $0x300] sm:$0xff]  }
 0x298   : > { %7539 = vmatpush3.bf16.msra.mxu0 %v11668_v26  ;;  %v7176_v29 = vpop.f32.mrb[67].mxu0  ;;  %v11696_v45 = vld [vmem:[%s12711_s1 + $0x348] sm:$0xff]  }
 0x299   : > { %v11661_v19 = vadd.f32 %v7199_v61, %v3657_v50  ;;  %7565 = vmatpush3.bf16.msra.mxu1 %v10744_v5  ;;  %v11675_v5 = vld [vmem:[%s12711_s1 + $0x340] sm:$0xff]   ;;  %v3662_v40 = vadd.f32 %v7174_v1, %v11559_v4  ;;  %v7177_v6 = vadd.f32 %v7176_v29, %v7175_v23  ;;  %v11713_v1 = vld [vmem:[%s12711_s1 + $0x350] sm:$0xff]  }
 0x29a   : > { %7566 = vmatprep.subr.bf16.mxu1 %v10753_v8  ;;  %7580 = vmatprep.subr.bf16.mxu0 %v11675_v5  ;;  %v8592_v8 = vld [vmem:[%s9720_s27 + $0x414] ss:$100 sps:$4 sm:$0x1f]  }
 0x29b   : > { %v7200_v20 = vpop.f32.mrb[68].mxu1  ;;  %4651 = vmatmul.mubr.bf16.vlgmr.msra.gmra.mrb[116].mxu0 %v8583_v24  ;;  %v3665_v30 = vadd.f32 %v7177_v6, %v11567_v59  ;;  %v11706_v24 = vld [vmem:[%s12711_s1 + $0x308] sm:$0xff]   ;;  %v8597_v23 = vld [vmem:[%s9720_s27 + $0x354] ss:$100 sps:$4 sm:$0xff]  }
 0x29c   : > { %v7201_v27 = vpop.f32.mrb[69].mxu1  ;;  %7581 = vmatpush3.bf16.msra.mxu0 %v11687_v58  ;;  %4658 = vmatprep.mubr.bf16.mxu0 %v8589_v15  ;;  %v11723_v29 = vld [vmem:[%s12711_s1 + $0x310] sm:$0xff]  }
 0x29d   : > { %v7202_v36 = vadd.f32 %v7201_v27, %v7200_v20  ;;  %v7203_v50 = vpop.f32.mrb[70].mxu1  ;;  %7567 = vmatpush3.bf16.msra.mxu1 %v10763_v11  ;;  %7582 = vmatprep.subr.bf16.mxu0 %v11696_v45  ;;  %v8600_v20 = vld [vmem:[%s9720_s27 + $0x35c] ss:$100 sps:$4 sm:$0xff]   ;;  %v11765_v27 = vld [vmem:[%s12711_s1 + $0x328] sm:$0xff]  }
 0x29e   : > { %v7204_v61 = vpop.f32.mrb[71].mxu1  ;;  %7608 = vmatprep.subr.bf16.mxu1 %v10772_v13  ;;  %v8591_v13 = vld [vmem:[%s9720_s27 + $0x408] ss:$100 sps:$4 sm:$0x1f]  }
 0x29f   : > { %v11691_v4 = vadd.f32 %v7202_v36, %v3662_v40  ;;  %v7205_v11 = vadd.f32 %v7204_v61, %v7203_v50  ;;  %v11772_v36 = vld [vmem:[%s12711_s1 + $0x370] sm:$0xff]  }
 0x2a0   : > { %4700 = vmatmul.mubr.bf16.vlgmr.msra.gmra.mrb[116].mxu1 %v8586_v32  ;;  %7583 = vmatpush3.bf16.msra.mxu0 %v11706_v24 }
 0x2a1   : > { %v11699_v59 = vadd.f32 %v7205_v11, %v3665_v30  ;;  %7609 = vmatpush3.bf16.msra.mxu1 %v10784_v25  ;;  %4707 = vmatprep.mubr.bf16.mxu1 %v8592_v8  ;;  %v8594_v25 = vld [vmem:[%s9720_s27 + $0x410] ss:$100 sps:$4 sm:$0x1f]  }
 0x2a2   : > { %7610 = vmatprep.subr.bf16.mxu1 %v10793_v31  ;;  %7584 = vmatprep.subr.bf16.mxu0 %v11713_v1  ;;  %v11730_v31 = vld [vmem:[%s12711_s1 + $0x358] sm:$0xff]  }
 0x2a3   : > { %4659 = vmatmul.mubr.bf16.gmra.mrb[120].mxu0 %v8591_v13  ;;  %v11781_v13 = vld [vmem:[%s12711_s1 + $0x330] sm:$0xff]  }
 0x2a4   : > { %7585 = vmatpush3.bf16.msra.mxu0 %v11723_v29  ;;  %4748 = vmatprep.mubr.bf16.mxu0 %v8597_v23 }
 0x2a5   : > { %7611 = vmatpush3.bf16.msra.mxu1 %v10803_v37  ;;  %7586 = vmatprep.subr.bf16.mxu0 %v11730_v31  ;;  %v11737_v37 = vld [vmem:[%s12711_s1 + $0x318] sm:$0xff]  }
 0x2a6   : > { %7612 = vmatprep.subr.bf16.mxu1 %v10812_v42  ;;  %v11744_v42 = vld [vmem:[%s12711_s1 + $0x360] sm:$0xff]  }
 0x2a8   : > { %4708 = vmatmul.mubr.bf16.gmra.mrb[120].mxu1 %v8594_v25  ;;  %7587 = vmatpush3.bf16.msra.mxu0 %v11737_v37  ;;  %v11790_v25 = vld [vmem:[%s12711_s1 + $0x378] sm:$0xff]  }
 0x2a9   : > { %7613 = vmatpush3.bf16.msra.mxu1 %v10824_v55  ;;  %4797 = vmatprep.mubr.bf16.mxu1 %v8600_v20  ;;  %v11751_v55 = vld [vmem:[%s12711_s1 + $0x320] sm:$0xff]  }
 0x2aa   : > { %7614 = vmatprep.subr.bf16.mxu1 %v10833_v22  ;;  %7588 = vmatprep.subr.bf16.mxu0 %v11744_v42  ;;  %v11758_v22 = vld [vmem:[%s12711_s1 + $0x368] sm:$0xff]  }
 0x2ac   : > { %7589 = vmatpush3.bf16.msra.mxu0 %v11751_v55  ;;  %v7222_v15 = vpop.f32.mrb[68].mxu0 }
 0x2ad   : > { %7615 = vmatpush3.bf16.msra.mxu1 %v10843_v16  ;;  %7590 = vmatprep.subr.bf16.mxu0 %v11758_v22  ;;  %v7223_v16 = vpop.f32.mrb[69].mxu0 }
 0x2ae   : > { %7616 = vmatprep.subr.bf16.mxu1 %v10852_v17  ;;  %v7224_v40 = vadd.f32 %v7223_v16, %v7222_v15  ;;  %v7225_v6 = vpop.f32.mrb[70].mxu0  ;;  %v8595_v15 = vld [vmem:[%s9720_s27 + $0x350] ss:$100 sps:$4 sm:$0xff]  }
 0x2af   : > { %v7226_v32 = vpop.f32.mrb[71].mxu0 }
 0x2b0   : > { %7591 = vmatpush3.bf16.msra.mxu0 %v11765_v27  ;;  %v7227_v50 = vadd.f32 %v7226_v32, %v7225_v6  ;;  %v12866_v6 = vld [vmem:[#allocation3_spill] sm:$0xff] }
 0x2b1   : > { %7617 = vmatpush3.bf16.msra.mxu1 %v10864_v47  ;;  %7592 = vmatprep.subr.bf16.mxu0 %v11772_v36  ;;  %v3752_v47 = vadd.f32 %v7224_v40, %v11653_v7  ;;  %v11800_v40 = vld [vmem:[%s12711_s1 + $0x338] sm:$0xff]  }
 0x2b2   : > { %7618 = vmatprep.subr.bf16.mxu1 %v10875_v54  ;;  %v3755_v54 = vadd.f32 %v7227_v50, %v11661_v19 }
 0x2b3   : > { %v7250_v17 = vpop.f32.mrb[72].mxu1 }
 0x2b4   : > { %v7251_v8 = vpop.f32.mrb[73].mxu1  ;;  %7593 = vmatpush3.bf16.msra.mxu0 %v11781_v13 }
 0x2b5   : > { %v7252_v30 = vadd.f32 %v7251_v8, %v7250_v17  ;;  %v7253_v61 = vpop.f32.mrb[74].mxu1  ;;  %7619 = vmatpush3.bf16.msra.mxu1 %v10884_v63  ;;  %7594 = vmatprep.subr.bf16.mxu0 %v11790_v25  ;;  %v7228_v63 = vpop.f32.mrb[72].mxu0 }
 0x2b6   : > { %v7254_v11 = vpop.f32.mrb[75].mxu1  ;;  %7620 = vmatprep.subr.bf16.mxu1 %v10893_v10  ;;  %v7229_v20 = vpop.f32.mrb[73].mxu0 }
 0x2b7   : > { %v11785_v7 = vadd.f32 %v7252_v30, %v3752_v47  ;;  %v7255_v23 = vadd.f32 %v7254_v11, %v7253_v61  ;;  %v7230_v10 = vadd.f32 %v7229_v20, %v7228_v63  ;;  %v7231_v16 = vpop.f32.mrb[74].mxu0  ;;  %v8601_v47 = vld [vmem:[%s9720_s27 + $0x41c] ss:$100 sps:$4 sm:$0x1f]  }
 0x2b8   : > { %7595 = vmatpush3.bf16.msra.mxu0 %v11800_v40  ;;  %v7232_v32 = vpop.f32.mrb[75].mxu0  ;;  %v8598_v61 = vld [vmem:[%s9720_s27 + $0x358] ss:$100 sps:$4 sm:$0xff]   ;;  %v8604_v63 = vld [vmem:[%s9720_s27 + $0x424] ss:$100 sps:$4 sm:$0x1f]  }
 0x2b9   : > { %v11793_v19 = vadd.f32 %v7255_v23, %v3755_v54  ;;  %7621 = vmatpush3.bf16.msra.mxu1 %v10903_v46  ;;  %v11807_v46 = vld [vmem:[%s12711_s1 + $0x440] sm:$0xff]   ;;  %v3760_v50 = vadd.f32 %v7230_v10, %v11691_v4  ;;  %v7233_v8 = vadd.f32 %v7232_v32, %v7231_v16  ;;  %v12868_v23 = vld [vmem:[#allocation4_spill] sm:$0xff]  ;;  %v12870_v4 = vld [vmem:[#allocation5_spill] sm:$0xff] }
 0x2ba   : > { %7622 = vmatprep.subr.bf16.mxu1 %v12866_v6  ;;  %12867 = vst [vmem:[#allocation3_spill] sm:$0xff] %v11807_v46  ;;  %7636 = vmatprep.subr.bf16.mxu0 %v11807_v46  ;;  %v11819_v46 = vld [vmem:[%s12711_s1 + $0x400] sm:$0xff]   ;;  %v8603_v32 = vld [vmem:[%s9720_s27 + $0x418] ss:$100 sps:$4 sm:$0x1f]  }
 0x2bb   : > { %v7256_v17 = vpop.f32.mrb[76].mxu1  ;;  %4749 = vmatmul.mubr.bf16.vlgmr.msra.gmra.mrb[124].mxu0 %v8595_v15  ;;  %v3763_v20 = vadd.f32 %v7233_v8, %v11699_v59  ;;  %12869 = vst [vmem:[#allocation4_spill] sm:$0xff] %v11819_v46  ;;  %v11828_v15 = vld [vmem:[%s12711_s1 + $0x448] sm:$0xff]   ;;  %v12874_v8 = vld [vmem:[#allocation7_spill] sm:$0xff] }
 0x2bc   : > { %v7257_v30 = vpop.f32.mrb[77].mxu1  ;;  %7637 = vmatpush3.bf16.msra.mxu0 %v11819_v46  ;;  %12871 = vst [vmem:[#allocation5_spill] sm:$0xff] %v11828_v15  ;;  %4756 = vmatprep.mubr.bf16.mxu0 %v8601_v47  ;;  %v11845_v47 = vld [vmem:[%s12711_s1 + $0x450] sm:$0xff]  }
 0x2bd   : > { %v7258_v54 = vadd.f32 %v7257_v30, %v7256_v17  ;;  %v7259_v11 = vpop.f32.mrb[78].mxu1  ;;  %7623 = vmatpush3.bf16.msra.mxu1 %v12868_v23  ;;  %7638 = vmatprep.subr.bf16.mxu0 %v11828_v15  ;;  %v12872_v17 = vld [vmem:[#allocation6_spill] sm:$0xff]  ;;  %12875 = vst [vmem:[#allocation7_spill] sm:$0xff] %v11845_v47  ;;  %v8609_v30 = vld [vmem:[%s9720_s27 + $0x364] ss:$100 sps:$4 sm:$0xff]   ;;  %v11855_v23 = vld [vmem:[%s12711_s1 + $0x410] sm:$0xff]  }
 0x2be   : > { %v7260_v6 = vpop.f32.mrb[79].mxu1  ;;  %7664 = vmatprep.subr.bf16.mxu1 %v12870_v4  ;;  %v11869_v4 = vld [vmem:[%s12711_s1 + $0x418] sm:$0xff]  }
 0x2bf   : > { %v11823_v10 = vadd.f32 %v7258_v54, %v3760_v50  ;;  %v7261_v16 = vadd.f32 %v7260_v6, %v7259_v11  ;;  %v11838_v50 = vld [vmem:[%s12711_s1 + $0x408] sm:$0xff]   ;;  %v12880_v6 = vld [vmem:[#allocation10_spill] sm:$0xff] }
 0x2c0   : > { %4798 = vmatmul.mubr.bf16.vlgmr.msra.gmra.mrb[124].mxu1 %v8598_v61  ;;  %12873 = vst [vmem:[#allocation6_spill] sm:$0xff] %v11838_v50  ;;  %7639 = vmatpush3.bf16.msra.mxu0 %v11838_v50  ;;  %v8606_v61 = vld [vmem:[%s9720_s27 + $0x420] ss:$100 sps:$4 sm:$0x1f]   ;;  %v12876_v54 = vld [vmem:[#allocation8_spill] sm:$0xff]  ;;  %12881 = vst [vmem:[#allocation10_spill] sm:$0xff] %v11869_v4 }
 0x2c1   : > { %v11831_v59 = vadd.f32 %v7261_v16, %v3763_v20  ;;  %7665 = vmatpush3.bf16.msra.mxu1 %v12872_v17  ;;  %4805 = vmatprep.mubr.bf16.mxu1 %v8604_v63  ;;  %v8612_v11 = vld [vmem:[%s9720_s27 + $0x36c] ss:$100 sps:$4 sm:$0xff]   ;;  %12877 = vst [vmem:[#allocation8_spill] sm:$0xff] %v11855_v23  ;;  %v11862_v20 = vld [vmem:[%s12711_s1 + $0x458] sm:$0xff]   ;;  %v12882_v16 = vld [vmem:[#allocation11_spill] sm:$0xff] }
 0x2c2   : > { %7666 = vmatprep.subr.bf16.mxu1 %v12874_v8  ;;  %7640 = vmatprep.subr.bf16.mxu0 %v11845_v47  ;;  %v12878_v63 = vld [vmem:[#allocation9_spill] sm:$0xff]  ;;  %v11876_v17 = vld [vmem:[%s12711_s1 + $0x460] sm:$0xff]  }
 0x2c3   : > { %4757 = vmatmul.mubr.bf16.gmra.mrb[128].mxu0 %v8603_v32  ;;  %12879 = vst [vmem:[#allocation9_spill] sm:$0xff] %v11862_v20  ;;  %12883 = vst [vmem:[#allocation11_spill] sm:$0xff] %v11876_v17  ;;  %v12884_v32 = vld [vmem:[#allocation12_spill] sm:$0xff]  ;;  %v11883_v8 = vld [vmem:[%s12711_s1 + $0x420] sm:$0xff]  }
 0x2c4   : > { %7641 = vmatpush3.bf16.msra.mxu0 %v11855_v23  ;;  %4846 = vmatprep.mubr.bf16.mxu0 %v8609_v30  ;;  %12885 = vst [vmem:[#allocation12_spill] sm:$0xff] %v11883_v8  ;;  %v12886_v30 = vld [vmem:[#allocation13_spill] sm:$0xff]  ;;  %v12892_v23 = vld [vmem:[#allocation16_spill] sm:$0xff] }
 0x2c5   : > { %7667 = vmatpush3.bf16.msra.mxu1 %v12876_v54  ;;  %7642 = vmatprep.subr.bf16.mxu0 %v11862_v20  ;;  %v11913_v47 = vld [vmem:[%s12711_s1 + $0x430] sm:$0xff]  }
 0x2c6   : > { %7668 = vmatprep.subr.bf16.mxu1 %v12878_v63  ;;  %12893 = vst [vmem:[#allocation16_spill] sm:$0xff] %v11913_v47 }
 0x2c8   : > { %4806 = vmatmul.mubr.bf16.gmra.mrb[128].mxu1 %v8606_v61  ;;  %7643 = vmatpush3.bf16.msra.mxu0 %v11869_v4  ;;  %v11890_v61 = vld [vmem:[%s12711_s1 + $0x468] sm:$0xff]  }
 0x2c9   : > { %7669 = vmatpush3.bf16.msra.mxu1 %v12880_v6  ;;  %4895 = vmatprep.mubr.bf16.mxu1 %v8612_v11  ;;  %12887 = vst [vmem:[#allocation13_spill] sm:$0xff] %v11890_v61  ;;  %v12888_v11 = vld [vmem:[#allocation14_spill] sm:$0xff] }
 0x2ca   : > { %7670 = vmatprep.subr.bf16.mxu1 %v12882_v16  ;;  %7644 = vmatprep.subr.bf16.mxu0 %v11876_v17 }
 0x2cc   : > { %7645 = vmatpush3.bf16.msra.mxu0 %v11883_v8 }
 0x2cd   : > { %7671 = vmatpush3.bf16.msra.mxu1 %v12884_v32  ;;  %7646 = vmatprep.subr.bf16.mxu0 %v11890_v61  ;;  %v7278_v54 = vpop.f32.mrb[76].mxu0  ;;  %v11897_v32 = vld [vmem:[%s12711_s1 + $0x428] sm:$0xff]   ;;  %v11904_v61 = vld [vmem:[%s12711_s1 + $0x470] sm:$0xff]  }
 0x2ce   : > { %7672 = vmatprep.subr.bf16.mxu1 %v12886_v30  ;;  %v7279_v63 = vpop.f32.mrb[77].mxu0  ;;  %12889 = vst [vmem:[#allocation14_spill] sm:$0xff] %v11897_v32  ;;  %v12890_v30 = vld [vmem:[#allocation15_spill] sm:$0xff] }
 0x2cf   : > { %v7280_v6 = vadd.f32 %v7279_v63, %v7278_v54  ;;  %v7281_v16 = vpop.f32.mrb[78].mxu0  ;;  %12891 = vst [vmem:[#allocation15_spill] sm:$0xff] %v11904_v61 }
 0x2d0   : > { %7647 = vmatpush3.bf16.msra.mxu0 %v11897_v32  ;;  %v7282_v17 = vpop.f32.mrb[79].mxu0 }
 0x2d1   : > { %7673 = vmatpush3.bf16.msra.mxu1 %v12888_v11  ;;  %7648 = vmatprep.subr.bf16.mxu0 %v11904_v61  ;;  %v3850_v54 = vadd.f32 %v7280_v6, %v11785_v7  ;;  %v7283_v11 = vadd.f32 %v7282_v17, %v7281_v16  ;;  %v12894_v61 = vld [vmem:[#allocation17_spill] sm:$0xff]  ;;  %v12896_v6 = vld [vmem:[#allocation18_spill] sm:$0xff] }
 0x2d2   : > { %7674 = vmatprep.subr.bf16.mxu1 %v12890_v30 }
 0x2d3   : > { %v7306_v8 = vpop.f32.mrb[80].mxu1  ;;  %v3853_v30 = vadd.f32 %v7283_v11, %v11793_v19  ;;  %v8607_v11 = vld [vmem:[%s9720_s27 + $0x360] ss:$100 sps:$4 sm:$0xff]  }
 0x2d4   : > { %v7307_v63 = vpop.f32.mrb[81].mxu1  ;;  %7649 = vmatpush3.bf16.msra.mxu0 %v11913_v47 }
 0x2d5   : > { %v7308_v4 = vadd.f32 %v7307_v63, %v7306_v8  ;;  %v7309_v20 = vpop.f32.mrb[82].mxu1  ;;  %7675 = vmatpush3.bf16.msra.mxu1 %v12892_v23  ;;  %v11922_v8 = vld [vmem:[%s12711_s1 + $0x478] sm:$0xff]   ;;  %v7284_v19 = vpop.f32.mrb[80].mxu0 }
 0x2d6   : > { %v7310_v32 = vpop.f32.mrb[83].mxu1  ;;  %7676 = vmatprep.subr.bf16.mxu1 %v12894_v61  ;;  %12895 = vst [vmem:[#allocation17_spill] sm:$0xff] %v11922_v8  ;;  %7650 = vmatprep.subr.bf16.mxu0 %v11922_v8  ;;  %v7285_v16 = vpop.f32.mrb[81].mxu0  ;;  %v8610_v8 = vld [vmem:[%s9720_s27 + $0x368] ss:$100 sps:$4 sm:$0xff]  }
 0x2d7   : > { %v11917_v7 = vadd.f32 %v7308_v4, %v3850_v54  ;;  %v7311_v17 = vadd.f32 %v7310_v32, %v7309_v20  ;;  %v7286_v61 = vadd.f32 %v7285_v16, %v7284_v19  ;;  %v7287_v4 = vpop.f32.mrb[82].mxu0  ;;  %v11932_v20 = vld [vmem:[%s12711_s1 + $0x438] sm:$0xff]   ;;  %v12898_v32 = vld [vmem:[#allocation19_spill] sm:$0xff] }
 0x2d8   : > { %12897 = vst [vmem:[#allocation18_spill] sm:$0xff] %v11932_v20  ;;  %7651 = vmatpush3.bf16.msra.mxu0 %v11932_v20  ;;  %v7288_v63 = vpop.f32.mrb[83].mxu0  ;;  %v12900_v20 = vld [vmem:[#allocation20_spill] sm:$0xff] }
 0x2d9   : > { %v11925_v23 = vadd.f32 %v7311_v17, %v3853_v30  ;;  %7677 = vmatpush3.bf16.msra.mxu1 %v12896_v6  ;;  %v11939_v30 = vld [vmem:[%s12711_s1 + $0x540] sm:$0xff]   ;;  %v8613_v17 = vld [vmem:[%s9720_s27 + $0x42c] ss:$100 sps:$4 sm:$0x1f]   ;;  %v3858_v19 = vadd.f32 %v7286_v61, %v11823_v10  ;;  %v7289_v6 = vadd.f32 %v7288_v63, %v7287_v4 }
 0x2da   : > { %7678 = vmatprep.subr.bf16.mxu1 %v12898_v32  ;;  %12899 = vst [vmem:[#allocation19_spill] sm:$0xff] %v11939_v30  ;;  %7692 = vmatprep.subr.bf16.mxu0 %v11939_v30  ;;  %v8616_v32 = vld [vmem:[%s9720_s27 + $0x434] ss:$100 sps:$4 sm:$0x1f]   ;;  %v11951_v30 = vld [vmem:[%s12711_s1 + $0x500] sm:$0xff]   ;;  %v12908_v63 = vld [vmem:[#allocation24_spill] sm:$0xff] }
 0x2db   : > { %v7312_v54 = vpop.f32.mrb[84].mxu1  ;;  %4847 = vmatmul.mubr.bf16.vlgmr.msra.gmra.mrb[132].mxu0 %v8607_v11  ;;  %v3861_v15 = vadd.f32 %v7289_v6, %v11831_v59  ;;  %12901 = vst [vmem:[#allocation20_spill] sm:$0xff] %v11951_v30  ;;  %v12902_v10 = vld [vmem:[#allocation21_spill] sm:$0xff]  ;;  %v11960_v11 = vld [vmem:[%s12711_s1 + $0x548] sm:$0xff]  }
 0x2dc   : > { %v7313_v16 = vpop.f32.mrb[85].mxu1  ;;  %7693 = vmatpush3.bf16.msra.mxu0 %v11951_v30  ;;  %12903 = vst [vmem:[#allocation21_spill] sm:$0xff] %v11960_v11  ;;  %4854 = vmatprep.mubr.bf16.mxu0 %v8613_v17  ;;  %v8624_v17 = vld [vmem:[%s9720_s27 + $0x37c] ss:$100 sps:$4 sm:$0xff]   ;;  %v12910_v6 = vld [vmem:[#allocation25_spill] sm:$0xff] }
 0x2dd   : > { %v7314_v47 = vadd.f32 %v7313_v16, %v7312_v54  ;;  %v7315_v50 = vpop.f32.mrb[86].mxu1  ;;  %7679 = vmatpush3.bf16.msra.mxu1 %v12900_v20  ;;  %7694 = vmatprep.subr.bf16.mxu0 %v11960_v11  ;;  %v12904_v20 = vld [vmem:[#allocation22_spill] sm:$0xff]  ;;  %v8615_v54 = vld [vmem:[%s9720_s27 + $0x428] ss:$100 sps:$4 sm:$0x1f]  }
 0x2de   : > { %v7316_v46 = vpop.f32.mrb[87].mxu1  ;;  %7720 = vmatprep.subr.bf16.mxu1 %v12902_v10  ;;  %v11994_v16 = vld [vmem:[%s12711_s1 + $0x558] sm:$0xff]  }
 0x2df   : > { %v11955_v61 = vadd.f32 %v7314_v47, %v3858_v19  ;;  %v7317_v4 = vadd.f32 %v7316_v46, %v7315_v50  ;;  %v11970_v46 = vld [vmem:[%s12711_s1 + $0x508] sm:$0xff]   ;;  %v12906_v50 = vld [vmem:[#allocation23_spill] sm:$0xff]  ;;  %v11977_v47 = vld [vmem:[%s12711_s1 + $0x550] sm:$0xff]   ;;  %12911 = vst [vmem:[#allocation25_spill] sm:$0xff] %v11994_v16 }
 0x2e0   : > { %4896 = vmatmul.mubr.bf16.vlgmr.msra.gmra.mrb[132].mxu1 %v8610_v8  ;;  %12905 = vst [vmem:[#allocation22_spill] sm:$0xff] %v11970_v46  ;;  %7695 = vmatpush3.bf16.msra.mxu0 %v11970_v46  ;;  %12907 = vst [vmem:[#allocation23_spill] sm:$0xff] %v11977_v47  ;;  %v8618_v8 = vld [vmem:[%s9720_s27 + $0x430] ss:$100 sps:$4 sm:$0x1f]   ;;  %v12001_v10 = vld [vmem:[%s12711_s1 + $0x518] sm:$0xff]  }
 0x2e1   : > { %v11963_v59 = vadd.f32 %v7317_v4, %v3861_v15  ;;  %7721 = vmatpush3.bf16.msra.mxu1 %v12904_v20  ;;  %4903 = vmatprep.mubr.bf16.mxu1 %v8616_v32  ;;  %v8621_v15 = vld [vmem:[%s9720_s27 + $0x374] ss:$100 sps:$4 sm:$0xff]   ;;  %v12914_v4 = vld [vmem:[#allocation27_spill] sm:$0xff] }
 0x2e2   : > { %7722 = vmatprep.subr.bf16.mxu1 %v12906_v50  ;;  %7696 = vmatprep.subr.bf16.mxu0 %v11977_v47  ;;  %v11987_v19 = vld [vmem:[%s12711_s1 + $0x510] sm:$0xff]   ;;  %v12912_v32 = vld [vmem:[#allocation26_spill] sm:$0xff]  ;;  %v12008_v20 = vld [vmem:[%s12711_s1 + $0x560] sm:$0xff]  }
 0x2e3   : > { %4855 = vmatmul.mubr.bf16.gmra.mrb[136].mxu0 %v8615_v54  ;;  %12909 = vst [vmem:[#allocation24_spill] sm:$0xff] %v11987_v19  ;;  %12913 = vst [vmem:[#allocation26_spill] sm:$0xff] %v12001_v10  ;;  %v12916_v54 = vld [vmem:[#allocation28_spill] sm:$0xff]  ;;  %v12015_v50 = vld [vmem:[%s12711_s1 + $0x520] sm:$0xff]  }
 0x2e4   : > { %7697 = vmatpush3.bf16.msra.mxu0 %v11987_v19  ;;  %4944 = vmatprep.mubr.bf16.mxu0 %v8621_v15  ;;  %12915 = vst [vmem:[#allocation27_spill] sm:$0xff] %v12008_v20  ;;  %12917 = vst [vmem:[#allocation28_spill] sm:$0xff] %v12015_v50  ;;  %v12918_v15 = vld [vmem:[#allocation29_spill] sm:$0xff]  ;;  %v12924_v19 = vld [vmem:[#allocation32_spill] sm:$0xff] }
 0x2e5   : > { %7723 = vmatpush3.bf16.msra.mxu1 %v12908_v63  ;;  %7698 = vmatprep.subr.bf16.mxu0 %v11994_v16  ;;  %v12045_v47 = vld [vmem:[%s12711_s1 + $0x530] sm:$0xff]  }
 0x2e6   : > { %7724 = vmatprep.subr.bf16.mxu1 %v12910_v6  ;;  %12925 = vst [vmem:[#allocation32_spill] sm:$0xff] %v12045_v47 }
 0x2e8   : > { %4904 = vmatmul.mubr.bf16.gmra.mrb[136].mxu1 %v8618_v8  ;;  %7699 = vmatpush3.bf16.msra.mxu0 %v12001_v10  ;;  %v12022_v8 = vld [vmem:[%s12711_s1 + $0x568] sm:$0xff]  }
 0x2e9   : > { %7725 = vmatpush3.bf16.msra.mxu1 %v12912_v32  ;;  %4993 = vmatprep.mubr.bf16.mxu1 %v8624_v17  ;;  %12919 = vst [vmem:[#allocation29_spill] sm:$0xff] %v12022_v8  ;;  %v12920_v17 = vld [vmem:[#allocation30_spill] sm:$0xff] }
 0x2ea   : > { %7726 = vmatprep.subr.bf16.mxu1 %v12914_v4  ;;  %7700 = vmatprep.subr.bf16.mxu0 %v12008_v20 }
 0x2ec   : > { %7701 = vmatpush3.bf16.msra.mxu0 %v12015_v50 }
 0x2ed   : > { %7727 = vmatpush3.bf16.msra.mxu1 %v12916_v54  ;;  %7702 = vmatprep.subr.bf16.mxu0 %v12022_v8  ;;  %v7334_v63 = vpop.f32.mrb[84].mxu0  ;;  %v12029_v54 = vld [vmem:[%s12711_s1 + $0x528] sm:$0xff]   ;;  %v12036_v8 = vld [vmem:[%s12711_s1 + $0x570] sm:$0xff]  }
 0x2ee   : > { %7728 = vmatprep.subr.bf16.mxu1 %v12918_v15  ;;  %v7335_v6 = vpop.f32.mrb[85].mxu0  ;;  %12921 = vst [vmem:[#allocation30_spill] sm:$0xff] %v12029_v54  ;;  %v12922_v15 = vld [vmem:[#allocation31_spill] sm:$0xff] }
 0x2ef   : > { %v7336_v32 = vadd.f32 %v7335_v6, %v7334_v63  ;;  %v7337_v4 = vpop.f32.mrb[86].mxu0  ;;  %12923 = vst [vmem:[#allocation31_spill] sm:$0xff] %v12036_v8 }
 0x2f0   : > { %7703 = vmatpush3.bf16.msra.mxu0 %v12029_v54  ;;  %v7338_v20 = vpop.f32.mrb[87].mxu0 }
 0x2f1   : > { %7729 = vmatpush3.bf16.msra.mxu1 %v12920_v17  ;;  %7704 = vmatprep.subr.bf16.mxu0 %v12036_v8  ;;  %v3948_v63 = vadd.f32 %v7336_v32, %v11917_v7  ;;  %v7339_v17 = vadd.f32 %v7338_v20, %v7337_v4  ;;  %v12926_v8 = vld [vmem:[#allocation33_spill] sm:$0xff]  ;;  %v12928_v32 = vld [vmem:[#allocation34_spill] sm:$0xff] }
 0x2f2   : > { %7730 = vmatprep.subr.bf16.mxu1 %v12922_v15 }
 0x2f3   : > { %v7362_v50 = vpop.f32.mrb[88].mxu1  ;;  %v3951_v15 = vadd.f32 %v7339_v17, %v11925_v23  ;;  %v8619_v17 = vld [vmem:[%s9720_s27 + $0x370] ss:$100 sps:$4 sm:$0xff]  }
 0x2f4   : > { %v7363_v6 = vpop.f32.mrb[89].mxu1  ;;  %7705 = vmatpush3.bf16.msra.mxu0 %v12045_v47 }
 0x2f5   : > { %v7364_v10 = vadd.f32 %v7363_v6, %v7362_v50  ;;  %v7365_v16 = vpop.f32.mrb[90].mxu1  ;;  %7731 = vmatpush3.bf16.msra.mxu1 %v12924_v19  ;;  %v12054_v50 = vld [vmem:[%s12711_s1 + $0x578] sm:$0xff]   ;;  %v7340_v23 = vpop.f32.mrb[88].mxu0 }
 0x2f6   : > { %v7366_v54 = vpop.f32.mrb[91].mxu1  ;;  %7732 = vmatprep.subr.bf16.mxu1 %v12926_v8  ;;  %12927 = vst [vmem:[#allocation33_spill] sm:$0xff] %v12054_v50  ;;  %7706 = vmatprep.subr.bf16.mxu0 %v12054_v50  ;;  %v7341_v4 = vpop.f32.mrb[89].mxu0  ;;  %v8622_v50 = vld [vmem:[%s9720_s27 + $0x378] ss:$100 sps:$4 sm:$0xff]  }
 0x2f7   : > { %v12049_v7 = vadd.f32 %v7364_v10, %v3948_v63  ;;  %v7367_v20 = vadd.f32 %v7366_v54, %v7365_v16  ;;  %v7342_v8 = vadd.f32 %v7341_v4, %v7340_v23  ;;  %v7343_v10 = vpop.f32.mrb[90].mxu0  ;;  %v12064_v16 = vld [vmem:[%s12711_s1 + $0x538] sm:$0xff]   ;;  %v12930_v54 = vld [vmem:[#allocation35_spill] sm:$0xff] }
 0x2f8   : > { %12929 = vst [vmem:[#allocation34_spill] sm:$0xff] %v12064_v16  ;;  %7707 = vmatpush3.bf16.msra.mxu0 %v12064_v16  ;;  %v7344_v6 = vpop.f32.mrb[91].mxu0  ;;  %v12931_v16 = vld [vmem:[#allocation36_spill] sm:$0xff] }
 0x2f9   : > { %v12057_v19 = vadd.f32 %v7367_v20, %v3951_v15  ;;  %7733 = vmatpush3.bf16.msra.mxu1 %v12928_v32  ;;  %v12071_v15 = vld [vmem:[%s12711_s1 + $0x600] sm:$0xff]   ;;  %v3956_v23 = vadd.f32 %v7342_v8, %v11955_v61  ;;  %v7345_v32 = vadd.f32 %v7344_v6, %v7343_v10  ;;  %v12087_v10 = vld [vmem:[%s12711_s1 + $0x608] sm:$0xff]  }
 0x2fa   : > { %7734 = vmatprep.subr.bf16.mxu1 %v12930_v54  ;;  %8144 = vmatprep.subr.bf16.mxu0 %v12071_v15  ;;  %v8625_v20 = vld [vmem:[%s9720_s27 + $0x43c] ss:$100 sps:$4 sm:$0x1f]   ;;  %v8628_v54 = vld [vmem:[%s9720_s27 + $0x444] ss:$100 sps:$4 sm:$0x1f]  }
 0x2fb   : > { %v7368_v63 = vpop.f32.mrb[92].mxu1  ;;  %4945 = vmatmul.mubr.bf16.vlgmr.msra.gmra.mrb[140].mxu0 %v8619_v17  ;;  %v3959_v11 = vadd.f32 %v7345_v32, %v11963_v59  ;;  %v8627_v17 = vld [vmem:[%s9720_s27 + $0x438] ss:$100 sps:$4 sm:$0x1f]  }
 0x2fc   : > { %v7369_v4 = vpop.f32.mrb[93].mxu1  ;;  %8145 = vmatpush3.bf16.msra.mxu0 %v12071_v15  ;;  %4952 = vmatprep.mubr.bf16.mxu0 %v8625_v20 }
 0x2fd   : > { %v7370_v47 = vadd.f32 %v7369_v4, %v7368_v63  ;;  %v7371_v46 = vpop.f32.mrb[94].mxu1  ;;  %7735 = vmatpush3.bf16.msra.mxu1 %v12931_v16  ;;  %8146 = vmatprep.subr.bf16.mxu0 %v12087_v10  ;;  %v12936_v16 = vld [vmem:[#allocation40_spill] sm:$0xff] }
 0x2fe   : > { %v7372_v30 = vpop.f32.mrb[95].mxu1  ;;  %7758 = vmatprep.subr.bf16.mxu1 %v11238_v60  ;;  %v12099_v60 = vld [vmem:[%s12711_s1 + $0x610] sm:$0xff]  }
 0x2ff   : > { %v12082_v61 = vadd.f32 %v7370_v47, %v3956_v23  ;;  %v7373_v8 = vadd.f32 %v7372_v30, %v7371_v46  ;;  %v8631_v30 = vld [vmem:[%s9720_s27 + $0x380] ss:$100 sps:$4 sm:$0xff]   ;;  %v12937_v23 = vld [vmem:[#allocation41_spill] sm:$0xff] }
 0x300   : > { %4994 = vmatmul.mubr.bf16.vlgmr.msra.gmra.mrb[140].mxu1 %v8622_v50  ;;  %8147 = vmatpush3.bf16.msra.mxu0 %v12087_v10  ;;  %v8630_v46 = vld [vmem:[%s9720_s27 + $0x440] ss:$100 sps:$4 sm:$0x1f]  }
 0x301   : > { %v12090_v59 = vadd.f32 %v7373_v8, %v3959_v11  ;;  %7759 = vmatpush3.bf16.msra.mxu1 %v11248_v44  ;;  %5001 = vmatprep.mubr.bf16.mxu1 %v8628_v54  ;;  %v8635_v11 = vld [vmem:[%s9720_s27 + $0x4b4] ss:$100 sps:$4 sm:$0xff]   ;;  %v12934_v47 = vld [vmem:[#allocation39_spill] sm:$0xff] }
 0x302   : > { %7760 = vmatprep.subr.bf16.mxu1 %v11257_v18  ;;  %8148 = vmatprep.subr.bf16.mxu0 %v12099_v60  ;;  %v12111_v44 = vld [vmem:[%s12711_s1 + $0x618] sm:$0xff]   ;;  %v12932_v18 = vld [vmem:[#allocation37_spill] sm:$0xff] }
 0x303   : > { %4953 = vmatmul.mubr.bf16.gmra.mrb[144].mxu0 %v8627_v17  ;;  %v12138_v54 = vld [vmem:[%s12711_s1 + $0x630] sm:$0xff]  }
 0x304   : > { %8149 = vmatpush3.bf16.msra.mxu0 %v12099_v60  ;;  %8160 = vmatprep.mubr.bf16.mxu0 %v8631_v30  ;;  %12938 = vst [vmem:[#allocation36_spill] sm:$0xff] %v12138_v54 }
 0x305   : > { %7761 = vmatpush3.bf16.msra.mxu1 %v11267_v43  ;;  %8150 = vmatprep.subr.bf16.mxu0 %v12111_v44  ;;  %v12120_v43 = vld [vmem:[%s12711_s1 + $0x620] sm:$0xff]  }
 0x306   : > { %7762 = vmatprep.subr.bf16.mxu1 %v11276_v33  ;;  %v12933_v33 = vld [vmem:[#allocation38_spill] sm:$0xff] }
 0x308   : > { %5002 = vmatmul.mubr.bf16.gmra.mrb[144].mxu1 %v8630_v46  ;;  %8151 = vmatpush3.bf16.msra.mxu0 %v12111_v44  ;;  %v12939_v46 = vld [vmem:[#allocation44_spill] sm:$0xff] }
 0x309   : > { %7763 = vmatpush3.bf16.msra.mxu1 %v11286_v35  ;;  %5404 = vmatprep.mubr.bf16.mxu1 %v8635_v11  ;;  %v12129_v35 = vld [vmem:[%s12711_s1 + $0x628] sm:$0xff]  }
 0x30a   : > { %7764 = vmatprep.subr.bf16.mxu1 %v12932_v18  ;;  %8152 = vmatprep.subr.bf16.mxu0 %v12120_v43  ;;  %12935 = vst [vmem:[#allocation35_spill] sm:$0xff] %v12129_v35 }
 0x30c   : > { %8153 = vmatpush3.bf16.msra.mxu0 %v12120_v43 }
 0x30d   : > { %7765 = vmatpush3.bf16.msra.mxu1 %v12933_v33  ;;  %8154 = vmatprep.subr.bf16.mxu0 %v12129_v35  ;;  %v7390_v50 = vpop.f32.mrb[92].mxu0 }
 0x30e   : > { %7766 = vmatprep.subr.bf16.mxu1 %v12934_v47  ;;  %v7391_v63 = vpop.f32.mrb[93].mxu0 }
 0x30f   : > { %v7392_v6 = vadd.f32 %v7391_v63, %v7390_v50  ;;  %v7393_v20 = vpop.f32.mrb[94].mxu0  ;;  %v12940_v50 = vld [vmem:[#allocation46_spill] sm:$0xff] }
 0x310   : > { %8155 = vmatpush3.bf16.msra.mxu0 %v12129_v35  ;;  %v7394_v32 = vpop.f32.mrb[95].mxu0 }
 0x311   : > { %7767 = vmatpush3.bf16.msra.mxu1 %v12936_v16  ;;  %8156 = vmatprep.subr.bf16.mxu0 %v12138_v54  ;;  %v7395_v8 = vadd.f32 %v7394_v32, %v7393_v20  ;;  %v4046_v17 = vadd.f32 %v7392_v6, %v12049_v7  ;;  %v12149_v16 = vld [vmem:[%s12711_s1 + $0x638] sm:$0xff]   ;;  %v12941_v7 = vld [vmem:[#allocation43_spill] sm:$0xff]  ;;  %v12942_v32 = vld [vmem:[#allocation48_spill] sm:$0xff] }
 0x312   : > { %7768 = vmatprep.subr.bf16.mxu1 %v12937_v23  ;;  %v3163_v63 = vmax.f32 %v12941_v7, 0.0  ;;  %v12945_v7 = vld [vmem:[#allocation49_spill] sm:$0xff] }
 0x313   : > { %v8142_v4 = vpop.f32.mrb[96].mxu1  ;;  %v4049_v33 = vadd.f32 %v7395_v8, %v12057_v19  ;;  %v8632_v19 = vld [vmem:[%s9720_s27 + $0x448] ss:$100 sps:$4 sm:$0x1f]   ;;  %v12943_v8 = vld [vmem:[#allocation47_spill] sm:$0xff] }
 0x314   : > { %v4094_v30 = vpop.f32.mrb[97].mxu1  ;;  %8157 = vmatpush3.bf16.msra.mxu0 %v12138_v54 }
 0x315   : > { %7769 = vmatpush3.bf16.msra.mxu1 %v12939_v46  ;;  %v8143_v11 = vpop.f32.mrb[98].mxu1  ;;  %v4095_v18 = vadd.f32 %v4094_v30, %v4046_v17  ;;  %8158 = vmatprep.subr.bf16.mxu0 %v12149_v16  ;;  %v3164_v30 = vmax.f32 %v12943_v8, 0.0  ;;  %v8633_v8 = vld [vmem:[%s9720_s27 + $0x4b0] ss:$100 sps:$4 sm:$0xff]  }
 0x316   : > { %v4097_v47 = vpop.f32.mrb[99].mxu1  ;;  %7770 = vmatprep.subr.bf16.mxu1 %v12940_v50  ;;  %v7396_v23 = vpop.f32.mrb[96].mxu0 }
 0x317   : > { %v4109_v6 = vmax.f32 %v4095_v18, 0.0  ;;  %v4098_v20 = vadd.f32 %v4097_v47, %v4049_v33  ;;  %v7397_v17 = vpop.f32.mrb[97].mxu0  ;;  %v9029_v33 = vld [vmem:[%s12711_s1 + $0xc0] sm:$0xff]  }
 0x318   : > { %v7398_v54 = vadd.f32 %v7397_v17, %v7396_v23  ;;  %v7399_v35 = vpop.f32.mrb[98].mxu0  ;;  %8159 = vmatpush3.bf16.msra.mxu0 %v12149_v16  ;;  %v8641_v47 = vld [vmem:[%s9720_s27 + $0x4bc] ss:$100 sps:$4 sm:$0xff]  }
 0x319   : > { %7771 = vmatpush3.bf16.msra.mxu1 %v12942_v32  ;;  %v12156_v46 = vmax.f32 %v3163_v63, %v4109_v6  ;;  %v4110_v50 = vmax.f32 %v4098_v20, 0.0  ;;  %v7400_v18 = vpop.f32.mrb[99].mxu0  ;;  %7786 = vmatprep.subr.bf16.mxu0 %v9029_v33  ;;  %v12946_v20 = vld [vmem:[#allocation50_spill] sm:$0xff]  ;;  %v12947_v33 = vld [vmem:[#allocation51_spill] sm:$0xff] }
 0x31a   : > { %7772 = vmatprep.subr.bf16.mxu1 %v12945_v7  ;;  %v4054_v63 = vadd.f32 %v7398_v54, %v12082_v61  ;;  %v7401_v6 = vadd.f32 %v7400_v18, %v7399_v35  ;;  %v8636_v23 = vld [vmem:[%s9720_s27 + $0x57c] ss:$100 sps:$4 sm:$0x1f]   ;;  %v9031_v61 = vld [vmem:[%s12711_s1 + $0xc8] sm:$0xff]  }
 0x31b   : > { %12944 = vst [vmem:[#allocation37_spill] sm:$0xff] %v12156_v46  ;;  %v12164_v32 = vmax.f32 %v3164_v30, %v4110_v50  ;;  %8161 = vmatmul.mubr.bf16.vlgmr.msra.gmra.mrb[148].mxu0 %v8632_v19  ;;  %v9030_v46 = vld [vmem:[%s12711_s1 + $0x80] sm:$0xff]   ;;  %v12948_v35 = vld [vmem:[#allocation42_spill] sm:$0xff]  ;;  %v9032_v50 = vld [vmem:[%s12711_s1 + $0x88] sm:$0xff]  }
 0x31c   : > { %v4103_v17 = vadd.f32 %v8142_v4, %v4054_v63  ;;  %v4057_v7 = vadd.f32 %v7401_v6, %v12090_v59  ;;  %7787 = vmatpush3.bf16.msra.mxu0 %v9030_v46  ;;  %5453 = vmatprep.mubr.bf16.mxu0 %v8641_v47  ;;  %v3165_v54 = vmax.f32 %v12948_v35, 0.0  ;;  %v12949_v59 = vld [vmem:[#allocation45_spill] sm:$0xff]  ;;  %v8638_v47 = vld [vmem:[%s9720_s27 + $0x578] ss:$100 sps:$4 sm:$0x1f]   ;;  %v12954_v35 = vld [vmem:[#allocation56_spill] sm:$0xff] }
 0x31d   : > { %7773 = vmatpush3.bf16.msra.mxu1 %v12946_v20  ;;  %7788 = vmatprep.subr.bf16.mxu0 %v9031_v61  ;;  %v3166_v30 = vmax.f32 %v12949_v59, 0.0  ;;  %v8644_v63 = vld [vmem:[%s9720_s27 + $0x4c4] ss:$100 sps:$4 sm:$0xff]   ;;  %v9034_v6 = vld [vmem:[%s12711_s1 + $0x90] sm:$0xff]  }
 0x31e   : > { %7814 = vmatprep.subr.bf16.mxu1 %v12947_v33  ;;  %v4111_v19 = vmax.f32 %v4103_v17, 0.0  ;;  %v4106_v4 = vadd.f32 %v8143_v11, %v4057_v7  ;;  %v9033_v11 = vld [vmem:[%s12711_s1 + $0xd0] sm:$0xff]   ;;  %v9038_v17 = vld [vmem:[%s12711_s1 + $0xa0] sm:$0xff]   ;;  %v9039_v33 = vld [vmem:[%s12711_s1 + $0xe8] sm:$0xff]  }
 0x31f   : > { %v12951_v20 = vld [vmem:[#allocation53_spill] sm:$0xff]  ;;  %v12953_v7 = vld [vmem:[#allocation55_spill] sm:$0xff]  ;;  %v9040_v59 = vld [vmem:[%s12711_s1 + $0xa8] sm:$0xff]  }
 0x320   : > { %5405 = vmatmul.mubr.bf16.vlgmr.msra.gmra.mrb[148].mxu1 %v8633_v8  ;;  %v4112_v46 = vmax.f32 %v4106_v4, 0.0  ;;  %7789 = vmatpush3.bf16.msra.mxu0 %v9032_v50  ;;  %v12185_v18 = vmax.f32 %v3165_v54, %v4111_v19  ;;  %v12950_v8 = vld [vmem:[#allocation52_spill] sm:$0xff] }
 0x321   : > { %7815 = vmatpush3.bf16.msra.mxu1 %v11414_v9  ;;  %5412 = vmatprep.mubr.bf16.mxu1 %v8636_v23  ;;  %v12952_v23 = vld [vmem:[#allocation54_spill] sm:$0xff] }
 0x322   : > { %7816 = vmatprep.subr.bf16.mxu1 %v11423_v2  ;;  %7790 = vmatprep.subr.bf16.mxu0 %v9033_v11  ;;  %v12191_v9 = vmax.f32 %v3166_v30, %v4112_v46  ;;  %v9035_v2 = vld [vmem:[%s12711_s1 + $0xd8] sm:$0xff]   ;;  %v12955_v30 = vld [vmem:[#allocation57_spill] sm:$0xff] }
 0x323   : > { %v9041_v11 = vld [vmem:[%s12711_s1 + $0xf0] sm:$0xff]  }
 0x324   : > { %7791 = vmatpush3.bf16.msra.mxu0 %v9034_v6 }
 0x325   : > { %7817 = vmatpush3.bf16.msra.mxu1 %v11433_v53  ;;  %7792 = vmatprep.subr.bf16.mxu0 %v9035_v2  ;;  %v9036_v53 = vld [vmem:[%s12711_s1 + $0x98] sm:$0xff]  }
 0x326   : > { %7818 = vmatprep.subr.bf16.mxu1 %v11440_v56  ;;  %v9037_v56 = vld [vmem:[%s12711_s1 + $0xe0] sm:$0xff]  }
 0x328   : > { %5413 = vmatmul.mubr.bf16.gmra.mrb[152].mxu1 %v8638_v47  ;;  %7793 = vmatpush3.bf16.msra.mxu0 %v9036_v53  ;;  %v12956_v53 = vld [vmem:[#allocation58_spill] sm:$0xff] }
 0x329   : > { %7819 = vmatpush3.bf16.msra.mxu1 %v12950_v8  ;;  %5502 = vmatprep.mubr.bf16.mxu1 %v8644_v63 }
 0x32a   : > { %7820 = vmatprep.subr.bf16.mxu1 %v12951_v20  ;;  %7794 = vmatprep.subr.bf16.mxu0 %v9037_v56 }
 0x32c   : > { %7795 = vmatpush3.bf16.msra.mxu0 %v9038_v17 }
 0x32d   : > { %7821 = vmatpush3.bf16.msra.mxu1 %v12952_v23  ;;  %7796 = vmatprep.subr.bf16.mxu0 %v9039_v33  ;;  %v9042_v23 = vld [vmem:[%s12711_s1 + $0xb0] sm:$0xff]   ;;  %v9043_v33 = vld [vmem:[%s12711_s1 + $0xf8] sm:$0xff]  }
 0x32e   : > { %7822 = vmatprep.subr.bf16.mxu1 %v12953_v7  ;;  %v7428_v61 = vpop.f32.mrb[100].mxu0 }
 0x32f   : > { %v7429_v54 = vpop.f32.mrb[101].mxu0 }
 0x330   : > { %v7430_v19 = vadd.f32 %v7429_v54, %v7428_v61  ;;  %v7431_v4 = vpop.f32.mrb[102].mxu0  ;;  %7797 = vmatpush3.bf16.msra.mxu0 %v9040_v59  ;;  %v8639_v54 = vld [vmem:[%s9720_s27 + $0x4b8] ss:$100 sps:$4 sm:$0xff]  }
 0x331   : > { %7823 = vmatpush3.bf16.msra.mxu1 %v12954_v35  ;;  %v7432_v50 = vpop.f32.mrb[103].mxu0  ;;  %7798 = vmatprep.subr.bf16.mxu0 %v9041_v11  ;;  %v12957_v35 = vld [vmem:[#allocation59_spill] sm:$0xff] }
 0x332   : > { %7824 = vmatprep.subr.bf16.mxu1 %v12955_v30  ;;  %v4457_v47 = vadd.f32 %v11492_v12, %v7430_v19  ;;  %v7433_v63 = vadd.f32 %v7432_v50, %v7431_v4  ;;  %v12958_v4 = vld [vmem:[#allocation60_spill] sm:$0xff] }
 0x333   : > { %v7456_v46 = vpop.f32.mrb[100].mxu1  ;;  %v8645_v50 = vld [vmem:[%s9720_s27 + $0x584] ss:$100 sps:$4 sm:$0x1f]  }
 0x334   : > { %v7457_v6 = vpop.f32.mrb[101].mxu1  ;;  %v4460_v20 = vadd.f32 %v11492_v12, %v7433_v63  ;;  %7799 = vmatpush3.bf16.msra.mxu0 %v9042_v23  ;;  %v8642_v63 = vld [vmem:[%s9720_s27 + $0x4c0] ss:$100 sps:$4 sm:$0xff]  }
 0x335   : > { %v7458_v2 = vadd.f32 %v7457_v6, %v7456_v46  ;;  %v7459_v8 = vpop.f32.mrb[102].mxu1  ;;  %7825 = vmatpush3.bf16.msra.mxu1 %v12956_v53  ;;  %7800 = vmatprep.subr.bf16.mxu0 %v9043_v33  ;;  %v9045_v46 = vld [vmem:[%s12711_s1 + $0x1c0] sm:$0xff]  }
 0x336   : > { %v7460_v56 = vpop.f32.mrb[103].mxu1  ;;  %7826 = vmatprep.subr.bf16.mxu1 %v11506_v3  ;;  %v7434_v61 = vpop.f32.mrb[104].mxu0  ;;  %v9044_v3 = vld [vmem:[%s12711_s1 + $0xb8] sm:$0xff]   ;;  %v12254_v6 = vld [vmem:[%s12712_s2] ss:$0 sm:$0xff] }
 0x337   : > { %v12233_v17 = vadd.f32 %v7458_v2, %v4457_v47  ;;  %v7461_v7 = vadd.f32 %v7460_v56, %v7459_v8  ;;  %v7435_v19 = vpop.f32.mrb[105].mxu0  ;;  %v8648_v56 = vld [vmem:[%s9720_s27 + $0x58c] ss:$100 sps:$4 sm:$0x1f]   ;;  %v9047_v33 = vld [vmem:[%s12711_s1 + $0x180] sm:$0xff]  }
 0x338   : > { %7801 = vmatpush3.bf16.msra.mxu0 %v9044_v3  ;;  %v7436_v59 = vadd.f32 %v7435_v19, %v7434_v61  ;;  %v7437_v30 = vpop.f32.mrb[106].mxu0  ;;  %v12960_v61 = vld [vmem:[#allocation62_spill] sm:$0xff]  ;;  %v9048_v3 = vld [vmem:[%s12711_s1 + $0x1c8] sm:$0xff]  }
 0x339   : > { %v12238_v12 = vadd.f32 %v7461_v7, %v4460_v20  ;;  %7827 = vmatpush3.bf16.msra.mxu1 %v12957_v35  ;;  %7842 = vmatprep.subr.bf16.mxu0 %v9045_v46  ;;  %v7438_v47 = vpop.f32.mrb[107].mxu0  ;;  %v12959_v20 = vld [vmem:[#allocation61_spill] sm:$0xff]  ;;  %v9049_v46 = vld [vmem:[%s12711_s1 + $0x188] sm:$0xff]  }
 0x33a   : > { %7828 = vmatprep.subr.bf16.mxu1 %v12958_v4  ;;  %v4465_v2 = vadd.f32 %v12254_v6, %v7436_v59  ;;  %v7439_v8 = vadd.f32 %v7438_v47, %v7437_v30  ;;  %v8647_v59 = vld [vmem:[%s9720_s27 + $0x580] ss:$100 sps:$4 sm:$0x1f]   ;;  %v8650_v47 = vld [vmem:[%s9720_s27 + $0x588] ss:$100 sps:$4 sm:$0x1f]  }
 0x33b   : > { %v7462_v11 = vpop.f32.mrb[104].mxu1  ;;  %5454 = vmatmul.mubr.bf16.vlgmr.msra.gmra.mrb[152].mxu0 %v8639_v54 }
 0x33c   : > { %v7463_v53 = vpop.f32.mrb[105].mxu1  ;;  %7843 = vmatpush3.bf16.msra.mxu0 %v9047_v33  ;;  %v4468_v35 = vadd.f32 %v12254_v6, %v7439_v8  ;;  %5461 = vmatprep.mubr.bf16.mxu0 %v8645_v50  ;;  %v9050_v50 = vld [vmem:[%s12711_s1 + $0x1d0] sm:$0xff]  }
 0x33d   : > { %7829 = vmatpush3.bf16.msra.mxu1 %v12959_v20  ;;  %v7464_v23 = vadd.f32 %v7463_v53, %v7462_v11  ;;  %v7465_v7 = vpop.f32.mrb[106].mxu1  ;;  %7844 = vmatprep.subr.bf16.mxu0 %v9048_v3  ;;  %v8653_v11 = vld [vmem:[%s9720_s27 + $0x4cc] ss:$100 sps:$4 sm:$0xff]  }
 0x33e   : > { %7870 = vmatprep.subr.bf16.mxu1 %v12960_v61  ;;  %v7466_v19 = vpop.f32.mrb[107].mxu1 }
 0x33f   : > { %v12267_v54 = vadd.f32 %v7464_v23, %v4465_v2  ;;  %v7467_v4 = vadd.f32 %v7466_v19, %v7465_v7  ;;  %v9055_v2 = vld [vmem:[%s12711_s1 + $0x1a0] sm:$0xff]   ;;  %v9058_v23 = vld [vmem:[%s12711_s1 + $0x1f0] sm:$0xff]  }
 0x340   : > { %5503 = vmatmul.mubr.bf16.vlgmr.msra.gmra.mrb[156].mxu1 %v8642_v63  ;;  %7845 = vmatpush3.bf16.msra.mxu0 %v9049_v46  ;;  %v9051_v63 = vld [vmem:[%s12711_s1 + $0x190] sm:$0xff]  }
 0x341   : > { %7871 = vmatpush3.bf16.msra.mxu1 %v11555_v34  ;;  %5510 = vmatprep.mubr.bf16.mxu1 %v8648_v56  ;;  %v12271_v30 = vadd.f32 %v7467_v4, %v4468_v35  ;;  %v8656_v34 = vld [vmem:[%s9720_s27 + $0x4d4] ss:$100 sps:$4 sm:$0xff]  }
 0x342   : > { %7872 = vmatprep.subr.bf16.mxu1 %v11564_v39  ;;  %7846 = vmatprep.subr.bf16.mxu0 %v9050_v50  ;;  %v9052_v39 = vld [vmem:[%s12711_s1 + $0x1d8] sm:$0xff]   ;;  %v8651_v50 = vld [vmem:[%s9720_s27 + $0x4c8] ss:$100 sps:$4 sm:$0xff]  }
 0x343   : > { %5462 = vmatmul.mubr.bf16.gmra.mrb[156].mxu0 %v8647_v59  ;;  %v9060_v59 = vld [vmem:[%s12711_s1 + $0x1f8] sm:$0xff]  }
 0x344   : > { %7847 = vmatpush3.bf16.msra.mxu0 %v9051_v63  ;;  %5551 = vmatprep.mubr.bf16.mxu0 %v8653_v11 }
 0x345   : > { %7873 = vmatpush3.bf16.msra.mxu1 %v11574_v38  ;;  %7848 = vmatprep.subr.bf16.mxu0 %v9052_v39  ;;  %v9053_v38 = vld [vmem:[%s12711_s1 + $0x198] sm:$0xff]   ;;  %v9062_v39 = vld [vmem:[%s12711_s1 + $0x2c0] sm:$0xff]  }
 0x346   : > { %7874 = vmatprep.subr.bf16.mxu1 %v11581_v51  ;;  %v9054_v51 = vld [vmem:[%s12711_s1 + $0x1e0] sm:$0xff]  }
 0x348   : > { %5511 = vmatmul.mubr.bf16.gmra.mrb[160].mxu1 %v8650_v47  ;;  %7849 = vmatpush3.bf16.msra.mxu0 %v9053_v38 }
 0x349   : > { %7875 = vmatpush3.bf16.msra.mxu1 %v11591_v21  ;;  %5600 = vmatprep.mubr.bf16.mxu1 %v8656_v34  ;;  %v9056_v21 = vld [vmem:[%s12711_s1 + $0x1e8] sm:$0xff]  }
 0x34a   : > { %7876 = vmatprep.subr.bf16.mxu1 %v11598_v52  ;;  %7850 = vmatprep.subr.bf16.mxu0 %v9054_v51 }
 0x34c   : > { %7851 = vmatpush3.bf16.msra.mxu0 %v9055_v2 }
 0x34d   : > { %7877 = vmatpush3.bf16.msra.mxu1 %v11605_v49  ;;  %7852 = vmatprep.subr.bf16.mxu0 %v9056_v21  ;;  %v9057_v49 = vld [vmem:[%s12711_s1 + $0x1a8] sm:$0xff]   ;;  %v8654_v21 = vld [vmem:[%s9720_s27 + $0x4d0] ss:$100 sps:$4 sm:$0xff]  }
 0x34e   : > { %7878 = vmatprep.subr.bf16.mxu1 %v11612_v0  ;;  %v7484_v52 = vpop.f32.mrb[108].mxu0 }
 0x34f   : > { %v7485_v8 = vpop.f32.mrb[109].mxu0 }
 0x350   : > { %v7486_v53 = vadd.f32 %v7485_v8, %v7484_v52  ;;  %v7487_v20 = vpop.f32.mrb[110].mxu0  ;;  %7853 = vmatpush3.bf16.msra.mxu0 %v9057_v49  ;;  %v9063_v49 = vld [vmem:[%s12711_s1 + $0x280] sm:$0xff]  }
 0x351   : > { %7879 = vmatpush3.bf16.msra.mxu1 %v11619_v57  ;;  %v7488_v0 = vpop.f32.mrb[111].mxu0  ;;  %7854 = vmatprep.subr.bf16.mxu0 %v9058_v23  ;;  %v9066_v23 = vld [vmem:[%s12711_s1 + $0x2d0] sm:$0xff]  }
 0x352   : > { %7880 = vmatprep.subr.bf16.mxu1 %v11626_v62  ;;  %v4555_v7 = vadd.f32 %v7486_v53, %v12233_v17  ;;  %v7489_v57 = vadd.f32 %v7488_v0, %v7487_v20  ;;  %v9059_v62 = vld [vmem:[%s12711_s1 + $0x1b0] sm:$0xff]  }
 0x353   : > { %v7512_v56 = vpop.f32.mrb[108].mxu1  ;;  %v8659_v0 = vld [vmem:[%s9720_s27 + $0x590] ss:$100 sps:$4 sm:$0x1f]  }
 0x354   : > { %v7513_v33 = vpop.f32.mrb[109].mxu1  ;;  %v4558_v19 = vadd.f32 %v7489_v57, %v12238_v12  ;;  %7855 = vmatpush3.bf16.msra.mxu0 %v9059_v62  ;;  %v8662_v57 = vld [vmem:[%s9720_s27 + $0x598] ss:$100 sps:$4 sm:$0x1f]  }
 0x355   : > { %v7514_v61 = vadd.f32 %v7513_v33, %v7512_v56  ;;  %v7515_v35 = vpop.f32.mrb[110].mxu1  ;;  %7881 = vmatpush3.bf16.msra.mxu1 %v11633_v14  ;;  %7856 = vmatprep.subr.bf16.mxu0 %v9060_v59  ;;  %v9067_v33 = vld [vmem:[%s12711_s1 + $0x290] sm:$0xff]  }
 0x356   : > { %v7516_v3 = vpop.f32.mrb[111].mxu1  ;;  %7882 = vmatprep.subr.bf16.mxu1 %v11640_v28  ;;  %v7490_v14 = vpop.f32.mrb[112].mxu0  ;;  %v9061_v28 = vld [vmem:[%s12711_s1 + $0x1b8] sm:$0xff]  }
 0x357   : > { %v12322_v4 = vadd.f32 %v7514_v61, %v4555_v7  ;;  %v7517_v17 = vadd.f32 %v7516_v3, %v7515_v35  ;;  %v7491_v12 = vpop.f32.mrb[113].mxu0  ;;  %v8665_v7 = vld [vmem:[%s9720_s27 + $0x4dc] ss:$100 sps:$4 sm:$0xff]  }
 0x358   : > { %v7492_v11 = vadd.f32 %v7491_v12, %v7490_v14  ;;  %v7493_v47 = vpop.f32.mrb[114].mxu0  ;;  %7857 = vmatpush3.bf16.msra.mxu0 %v9061_v28  ;;  %v9071_v61 = vld [vmem:[%s12711_s1 + $0x2a0] sm:$0xff]  }
 0x359   : > { %v12327_v46 = vadd.f32 %v7517_v17, %v4558_v19  ;;  %7883 = vmatpush3.bf16.msra.mxu1 %v11649_v41  ;;  %v7494_v63 = vpop.f32.mrb[115].mxu0  ;;  %7898 = vmatprep.subr.bf16.mxu0 %v9062_v39  ;;  %v8657_v41 = vld [vmem:[%s9720_s27 + $0x594] ss:$100 sps:$4 sm:$0x1f]  }
 0x35a   : > { %7884 = vmatprep.subr.bf16.mxu1 %v11658_v48  ;;  %v4563_v38 = vadd.f32 %v7492_v11, %v12267_v54  ;;  %v7495_v51 = vadd.f32 %v7494_v63, %v7493_v47  ;;  %v8660_v48 = vld [vmem:[%s9720_s27 + $0x59c] ss:$100 sps:$4 sm:$0x1f]   ;;  %v9074_v17 = vld [vmem:[%s12711_s1 + $0x2f0] sm:$0xff]  }
 0x35b   : > { %v7518_v34 = vpop.f32.mrb[112].mxu1  ;;  %5552 = vmatmul.mubr.bf16.vlgmr.msra.gmra.mrb[160].mxu0 %v8651_v50  ;;  %v8663_v39 = vld [vmem:[%s9720_s27 + $0x4d8] ss:$100 sps:$4 sm:$0xff]  }
 0x35c   : > { %v7519_v2 = vpop.f32.mrb[113].mxu1  ;;  %v4566_v53 = vadd.f32 %v7495_v51, %v12271_v30  ;;  %7899 = vmatpush3.bf16.msra.mxu0 %v9063_v49  ;;  %5559 = vmatprep.mubr.bf16.mxu0 %v8657_v41 }
 0x35d   : > { %v7520_v52 = vadd.f32 %v7519_v2, %v7518_v34  ;;  %v7521_v8 = vpop.f32.mrb[114].mxu1  ;;  %7885 = vmatpush3.bf16.msra.mxu1 %v11668_v26  ;;  %v9064_v26 = vld [vmem:[%s12711_s1 + $0x2c8] sm:$0xff]   ;;  %v9076_v34 = vld [vmem:[%s12711_s1 + $0x2f8] sm:$0xff]  }
 0x35e   : > { %v7522_v20 = vpop.f32.mrb[115].mxu1  ;;  %7926 = vmatprep.subr.bf16.mxu1 %v11675_v5  ;;  %7900 = vmatprep.subr.bf16.mxu0 %v9064_v26  ;;  %v9065_v5 = vld [vmem:[%s12711_s1 + $0x288] sm:$0xff]  }
 0x35f   : > { %v12348_v54 = vadd.f32 %v7520_v52, %v4563_v38  ;;  %v7523_v56 = vadd.f32 %v7522_v20, %v7521_v8 }
 0x360   : > { %5601 = vmatmul.mubr.bf16.vlgmr.msra.gmra.mrb[164].mxu1 %v8654_v21  ;;  %7901 = vmatpush3.bf16.msra.mxu0 %v9065_v5  ;;  %v9078_v21 = vld [vmem:[%s12711_s1 + $0x3c0] sm:$0xff]  }
 0x361   : > { %v12353_v30 = vadd.f32 %v7523_v56, %v4566_v53  ;;  %7927 = vmatpush3.bf16.msra.mxu1 %v11687_v58  ;;  %5608 = vmatprep.mubr.bf16.mxu1 %v8660_v48  ;;  %v8668_v58 = vld [vmem:[%s9720_s27 + $0x4e4] ss:$100 sps:$4 sm:$0xff]  }
 0x362   : > { %7928 = vmatprep.subr.bf16.mxu1 %v11696_v45  ;;  %7902 = vmatprep.subr.bf16.mxu0 %v9066_v23  ;;  %v9068_v45 = vld [vmem:[%s12711_s1 + $0x2d8] sm:$0xff]   ;;  %v8666_v53 = vld [vmem:[%s9720_s27 + $0x4e0] ss:$100 sps:$4 sm:$0xff]  }
 0x363   : > { %5560 = vmatmul.mubr.bf16.gmra.mrb[164].mxu0 %v8659_v0  ;;  %v9079_v0 = vld [vmem:[%s12711_s1 + $0x380] sm:$0xff]  }
 0x364   : > { %7903 = vmatpush3.bf16.msra.mxu0 %v9067_v33  ;;  %5649 = vmatprep.mubr.bf16.mxu0 %v8665_v7  ;;  %v12961_v5 = vld [vmem:[#allocation3_spill] sm:$0xff]  ;;  %v12962_v7 = vld [vmem:[#allocation4_spill] sm:$0xff]  ;;  %v12963_v33 = vld [vmem:[#allocation5_spill] sm:$0xff] }
 0x365   : > { %7929 = vmatpush3.bf16.msra.mxu1 %v11706_v24  ;;  %7904 = vmatprep.subr.bf16.mxu0 %v9068_v45  ;;  %v9069_v24 = vld [vmem:[%s12711_s1 + $0x298] sm:$0xff]   ;;  %v9082_v45 = vld [vmem:[%s12711_s1 + $0x3d0] sm:$0xff]  }
 0x366   : > { %7930 = vmatprep.subr.bf16.mxu1 %v11713_v1  ;;  %v9070_v1 = vld [vmem:[%s12711_s1 + $0x2e0] sm:$0xff]  }
 0x368   : > { %5609 = vmatmul.mubr.bf16.gmra.mrb[168].mxu1 %v8662_v57  ;;  %7905 = vmatpush3.bf16.msra.mxu0 %v9069_v24  ;;  %v8671_v57 = vld [vmem:[%s9720_s27 + $0x5a0] ss:$100 sps:$4 sm:$0x1f]   ;;  %v8677_v24 = vld [vmem:[%s9720_s27 + $0x4ec] ss:$100 sps:$4 sm:$0xff]  }
 0x369   : > { %7931 = vmatpush3.bf16.msra.mxu1 %v11723_v29  ;;  %5698 = vmatprep.mubr.bf16.mxu1 %v8668_v58  ;;  %v9072_v29 = vld [vmem:[%s12711_s1 + $0x2e8] sm:$0xff]  }
 0x36a   : > { %7932 = vmatprep.subr.bf16.mxu1 %v11730_v31  ;;  %7906 = vmatprep.subr.bf16.mxu0 %v9070_v1  ;;  %v9081_v58 = vld [vmem:[%s12711_s1 + $0x388] sm:$0xff]  }
 0x36b   : > { %v8674_v1 = vld [vmem:[%s9720_s27 + $0x5a8] ss:$100 sps:$4 sm:$0x1f]  }
 0x36c   : > { %7907 = vmatpush3.bf16.msra.mxu0 %v9071_v61  ;;  %v12964_v61 = vld [vmem:[#allocation6_spill] sm:$0xff] }
 0x36d   : > { %7933 = vmatpush3.bf16.msra.mxu1 %v11737_v37  ;;  %7908 = vmatprep.subr.bf16.mxu0 %v9072_v29  ;;  %v9073_v37 = vld [vmem:[%s12711_s1 + $0x2a8] sm:$0xff]   ;;  %v8680_v29 = vld [vmem:[%s9720_s27 + $0x4f4] ss:$100 sps:$4 sm:$0xff]  }
 0x36e   : > { %7934 = vmatprep.subr.bf16.mxu1 %v11744_v42  ;;  %v7540_v31 = vpop.f32.mrb[116].mxu0 }
 0x36f   : > { %v7541_v35 = vpop.f32.mrb[117].mxu0 }
 0x370   : > { %v7542_v19 = vadd.f32 %v7541_v35, %v7540_v31  ;;  %v7543_v3 = vpop.f32.mrb[118].mxu0  ;;  %7909 = vmatpush3.bf16.msra.mxu0 %v9073_v37  ;;  %v9083_v31 = vld [vmem:[%s12711_s1 + $0x390] sm:$0xff]   ;;  %v12965_v35 = vld [vmem:[#allocation7_spill] sm:$0xff]  ;;  %v9085_v37 = vld [vmem:[%s12711_s1 + $0x398] sm:$0xff]  }
 0x371   : > { %7935 = vmatpush3.bf16.msra.mxu1 %v11751_v55  ;;  %v7544_v42 = vpop.f32.mrb[119].mxu0  ;;  %7910 = vmatprep.subr.bf16.mxu0 %v9074_v17  ;;  %v12968_v17 = vld [vmem:[#allocation10_spill] sm:$0xff] }
 0x372   : > { %7936 = vmatprep.subr.bf16.mxu1 %v11758_v22  ;;  %v4653_v59 = vadd.f32 %v7542_v19, %v12322_v4  ;;  %v7545_v55 = vadd.f32 %v7544_v42, %v7543_v3  ;;  %v9075_v22 = vld [vmem:[%s12711_s1 + $0x2b0] sm:$0xff]   ;;  %v9084_v19 = vld [vmem:[%s12711_s1 + $0x3d8] sm:$0xff]   ;;  %v12966_v3 = vld [vmem:[#allocation8_spill] sm:$0xff] }
 0x373   : > { %v7568_v62 = vpop.f32.mrb[116].mxu1  ;;  %v9086_v42 = vld [vmem:[%s12711_s1 + $0x3e0] sm:$0xff]  }
 0x374   : > { %v7569_v14 = vpop.f32.mrb[117].mxu1  ;;  %v4656_v11 = vadd.f32 %v7545_v55, %v12327_v46  ;;  %7911 = vmatpush3.bf16.msra.mxu0 %v9075_v22  ;;  %v12969_v55 = vld [vmem:[#allocation11_spill] sm:$0xff] }
 0x375   : > { %v7570_v12 = vadd.f32 %v7569_v14, %v7568_v62  ;;  %v7571_v50 = vpop.f32.mrb[118].mxu1  ;;  %7937 = vmatpush3.bf16.msra.mxu1 %v11765_v27  ;;  %7912 = vmatprep.subr.bf16.mxu0 %v9076_v34  ;;  %v12967_v62 = vld [vmem:[#allocation9_spill] sm:$0xff]  ;;  %v9088_v14 = vld [vmem:[%s12711_s1 + $0x3e8] sm:$0xff]  }
 0x376   : > { %v7572_v47 = vpop.f32.mrb[119].mxu1  ;;  %7938 = vmatprep.subr.bf16.mxu1 %v11772_v36  ;;  %v7546_v27 = vpop.f32.mrb[120].mxu0  ;;  %v9077_v36 = vld [vmem:[%s12711_s1 + $0x2b8] sm:$0xff]   ;;  %v12971_v34 = vld [vmem:[#allocation13_spill] sm:$0xff] }
 0x377   : > { %v12406_v28 = vadd.f32 %v7570_v12, %v4653_v59  ;;  %v7573_v4 = vadd.f32 %v7572_v47, %v7571_v50  ;;  %v7547_v46 = vpop.f32.mrb[121].mxu0  ;;  %v9087_v59 = vld [vmem:[%s12711_s1 + $0x3a0] sm:$0xff]   ;;  %v12970_v50 = vld [vmem:[#allocation12_spill] sm:$0xff] }
 0x378   : > { %v7548_v41 = vadd.f32 %v7547_v46, %v7546_v27  ;;  %v7549_v38 = vpop.f32.mrb[122].mxu0  ;;  %7913 = vmatpush3.bf16.msra.mxu0 %v9077_v36 }
 0x379   : > { %v12411_v63 = vadd.f32 %v7573_v4, %v4656_v11  ;;  %7939 = vmatpush3.bf16.msra.mxu1 %v11781_v13  ;;  %v7550_v2 = vpop.f32.mrb[123].mxu0  ;;  %7954 = vmatprep.subr.bf16.mxu0 %v9078_v21  ;;  %v8669_v13 = vld [vmem:[%s9720_s27 + $0x5a4] ss:$100 sps:$4 sm:$0x1f]   ;;  %v12972_v21 = vld [vmem:[#allocation14_spill] sm:$0xff] }
 0x37a   : > { %7940 = vmatprep.subr.bf16.mxu1 %v11790_v25  ;;  %v4661_v52 = vadd.f32 %v7548_v41, %v12348_v54  ;;  %v7551_v8 = vadd.f32 %v7550_v2, %v7549_v38  ;;  %v8672_v25 = vld [vmem:[%s9720_s27 + $0x5ac] ss:$100 sps:$4 sm:$0x1f]  }
 0x37b   : > { %v7574_v51 = vpop.f32.mrb[120].mxu1  ;;  %5650 = vmatmul.mubr.bf16.vlgmr.msra.gmra.mrb[168].mxu0 %v8663_v39  ;;  %v9089_v4 = vld [vmem:[%s12711_s1 + $0x3a8] sm:$0xff]   ;;  %v9090_v39 = vld [vmem:[%s12711_s1 + $0x3f0] sm:$0xff]  }
 0x37c   : > { %v7575_v48 = vpop.f32.mrb[121].mxu1  ;;  %v4664_v56 = vadd.f32 %v7551_v8, %v12353_v30  ;;  %7955 = vmatpush3.bf16.msra.mxu0 %v9079_v0  ;;  %5657 = vmatprep.mubr.bf16.mxu0 %v8669_v13  ;;  %v9091_v8 = vld [vmem:[%s12711_s1 + $0x3b0] sm:$0xff]  }
 0x37d   : > { %v7576_v20 = vadd.f32 %v7575_v48, %v7574_v51  ;;  %v7577_v49 = vpop.f32.mrb[122].mxu1  ;;  %7941 = vmatpush3.bf16.msra.mxu1 %v11800_v40  ;;  %v9080_v40 = vld [vmem:[%s12711_s1 + $0x3c8] sm:$0xff]   ;;  %v12973_v48 = vld [vmem:[#allocation15_spill] sm:$0xff] }
 0x37e   : > { %v7578_v26 = vpop.f32.mrb[123].mxu1  ;;  %7982 = vmatprep.subr.bf16.mxu1 %v12961_v5  ;;  %7956 = vmatprep.subr.bf16.mxu0 %v9080_v40  ;;  %v12975_v40 = vld [vmem:[#allocation17_spill] sm:$0xff] }
 0x37f   : > { %v12432_v54 = vadd.f32 %v7576_v20, %v4661_v52  ;;  %v7579_v23 = vadd.f32 %v7578_v26, %v7577_v49  ;;  %v9092_v20 = vld [vmem:[%s12711_s1 + $0x3f8] sm:$0xff]   ;;  %v8675_v26 = vld [vmem:[%s9720_s27 + $0x4e8] ss:$100 sps:$4 sm:$0xff]  }
 0x380   : > { %5699 = vmatmul.mubr.bf16.vlgmr.msra.gmra.mrb[172].mxu1 %v8666_v53  ;;  %7957 = vmatpush3.bf16.msra.mxu0 %v9081_v58  ;;  %v9094_v58 = vld [vmem:[%s12711_s1 + $0x4c0] sm:$0xff]  }
 0x381   : > { %v12437_v30 = vadd.f32 %v7579_v23, %v4664_v56  ;;  %7983 = vmatpush3.bf16.msra.mxu1 %v12962_v7  ;;  %5706 = vmatprep.mubr.bf16.mxu1 %v8672_v25  ;;  %v9093_v23 = vld [vmem:[%s12711_s1 + $0x3b8] sm:$0xff]  }
 0x382   : > { %7984 = vmatprep.subr.bf16.mxu1 %v12963_v33  ;;  %7958 = vmatprep.subr.bf16.mxu0 %v9082_v45  ;;  %v8681_v33 = vld [vmem:[%s9720_s27 + $0x5b4] ss:$100 sps:$4 sm:$0x1f]  }
 0x383   : > { %5658 = vmatmul.mubr.bf16.gmra.mrb[172].mxu0 %v8671_v57 }
 0x384   : > { %7959 = vmatpush3.bf16.msra.mxu0 %v9083_v31  ;;  %5747 = vmatprep.mubr.bf16.mxu0 %v8677_v24 }
 0x385   : > { %7985 = vmatpush3.bf16.msra.mxu1 %v12964_v61  ;;  %7960 = vmatprep.subr.bf16.mxu0 %v9084_v19  ;;  %v8678_v61 = vld [vmem:[%s9720_s27 + $0x4f0] ss:$100 sps:$4 sm:$0xff]   ;;  %v8684_v19 = vld [vmem:[%s9720_s27 + $0x5bc] ss:$100 sps:$4 sm:$0x1f]  }
 0x386   : > { %7986 = vmatprep.subr.bf16.mxu1 %v12965_v35  ;;  %v12976_v35 = vld [vmem:[#allocation18_spill] sm:$0xff] }
 0x388   : > { %5707 = vmatmul.mubr.bf16.gmra.mrb[176].mxu1 %v8674_v1  ;;  %7961 = vmatpush3.bf16.msra.mxu0 %v9085_v37 }
 0x389   : > { %7987 = vmatpush3.bf16.msra.mxu1 %v12966_v3  ;;  %5796 = vmatprep.mubr.bf16.mxu1 %v8680_v29 }
 0x38a   : > { %7988 = vmatprep.subr.bf16.mxu1 %v12967_v62  ;;  %7962 = vmatprep.subr.bf16.mxu0 %v9086_v42  ;;  %v9095_v62 = vld [vmem:[%s12711_s1 + $0x480] sm:$0xff]  }
 0x38b   : > { %v12977_v42 = vld [vmem:[#allocation19_spill] sm:$0xff] }
 0x38c   : > { %7963 = vmatpush3.bf16.msra.mxu0 %v9087_v59  ;;  %v9096_v59 = vld [vmem:[%s12711_s1 + $0x4c8] sm:$0xff]  }
 0x38d   : > { %7989 = vmatpush3.bf16.msra.mxu1 %v12968_v17  ;;  %7964 = vmatprep.subr.bf16.mxu0 %v9088_v14  ;;  %v8683_v14 = vld [vmem:[%s9720_s27 + $0x5b0] ss:$100 sps:$4 sm:$0x1f]  }
 0x38e   : > { %7990 = vmatprep.subr.bf16.mxu1 %v12969_v55  ;;  %v7596_v12 = vpop.f32.mrb[124].mxu0  ;;  %v12978_v55 = vld [vmem:[#allocation20_spill] sm:$0xff] }
 0x38f   : > { %v7597_v11 = vpop.f32.mrb[125].mxu0 }
 0x390   : > { %v7598_v47 = vadd.f32 %v7597_v11, %v7596_v12  ;;  %v7599_v22 = vpop.f32.mrb[126].mxu0  ;;  %7965 = vmatpush3.bf16.msra.mxu0 %v9089_v4  ;;  %v9097_v12 = vld [vmem:[%s12711_s1 + $0x488] sm:$0xff]   ;;  %v9098_v11 = vld [vmem:[%s12711_s1 + $0x4d0] sm:$0xff]   ;;  %v12980_v4 = vld [vmem:[#allocation22_spill] sm:$0xff] }
 0x391   : > { %7991 = vmatpush3.bf16.msra.mxu1 %v12970_v50  ;;  %v7600_v46 = vpop.f32.mrb[127].mxu0  ;;  %7966 = vmatprep.subr.bf16.mxu0 %v9090_v39  ;;  %v12979_v50 = vld [vmem:[#allocation21_spill] sm:$0xff]  ;;  %v9100_v39 = vld [vmem:[%s12711_s1 + $0x4d8] sm:$0xff]  }
 0x392   : > { %7992 = vmatprep.subr.bf16.mxu1 %v12971_v34  ;;  %v4751_v41 = vadd.f32 %v7598_v47, %v12406_v28  ;;  %v7601_v38 = vadd.f32 %v7600_v46, %v7599_v22  ;;  %v8689_v47 = vld [vmem:[%s9720_s27 + $0x4fc] ss:$100 sps:$4 sm:$0xff]   ;;  %v8692_v34 = vld [vmem:[%s9720_s27 + $0x504] ss:$100 sps:$4 sm:$0xff]  }
 0x393   : > { %v7624_v27 = vpop.f32.mrb[124].mxu1  ;;  %v8686_v22 = vld [vmem:[%s9720_s27 + $0x5b8] ss:$100 sps:$4 sm:$0x1f]   ;;  %v12981_v46 = vld [vmem:[#allocation23_spill] sm:$0xff] }
 0x394   : > { %v7625_v36 = vpop.f32.mrb[125].mxu1  ;;  %v4754_v13 = vadd.f32 %v7601_v38, %v12411_v63  ;;  %7967 = vmatpush3.bf16.msra.mxu0 %v9091_v8  ;;  %v12974_v63 = vld [vmem:[#allocation16_spill] sm:$0xff]  ;;  %v9101_v38 = vld [vmem:[%s12711_s1 + $0x498] sm:$0xff]  }
 0x395   : > { %v7626_v51 = vadd.f32 %v7625_v36, %v7624_v27  ;;  %v7627_v2 = vpop.f32.mrb[126].mxu1  ;;  %7993 = vmatpush3.bf16.msra.mxu1 %v12972_v21  ;;  %7968 = vmatprep.subr.bf16.mxu0 %v9092_v20  ;;  %v9099_v27 = vld [vmem:[%s12711_s1 + $0x490] sm:$0xff]   ;;  %v9103_v21 = vld [vmem:[%s12711_s1 + $0x4a0] sm:$0xff]  }
 0x396   : > { %v7628_v52 = vpop.f32.mrb[127].mxu1  ;;  %7994 = vmatprep.subr.bf16.mxu1 %v12973_v48  ;;  %v7602_v49 = vpop.f32.mrb[128].mxu0  ;;  %v12983_v36 = vld [vmem:[#allocation25_spill] sm:$0xff]  ;;  %v12986_v48 = vld [vmem:[#allocation28_spill] sm:$0xff] }
 0x397   : > { %v12490_v53 = vadd.f32 %v7626_v51, %v4751_v41  ;;  %v7629_v28 = vadd.f32 %v7628_v52, %v7627_v2  ;;  %v7603_v56 = vpop.f32.mrb[129].mxu0  ;;  %v12982_v41 = vld [vmem:[#allocation24_spill] sm:$0xff]  ;;  %v9102_v51 = vld [vmem:[%s12711_s1 + $0x4e0] sm:$0xff]   ;;  %v12984_v2 = vld [vmem:[#allocation26_spill] sm:$0xff] }
 0x398   : > { %v7604_v0 = vadd.f32 %v7603_v56, %v7602_v49  ;;  %v7605_v5 = vpop.f32.mrb[130].mxu0  ;;  %7969 = vmatpush3.bf16.msra.mxu0 %v9093_v23  ;;  %v9104_v52 = vld [vmem:[%s12711_s1 + $0x4e8] sm:$0xff]   ;;  %v12987_v56 = vld [vmem:[#allocation29_spill] sm:$0xff] }
 0x399   : > { %v12495_v25 = vadd.f32 %v7629_v28, %v4754_v13  ;;  %7995 = vmatpush3.bf16.msra.mxu1 %v12974_v63  ;;  %v7606_v57 = vpop.f32.mrb[131].mxu0  ;;  %8010 = vmatprep.subr.bf16.mxu0 %v9094_v58  ;;  %v12985_v13 = vld [vmem:[#allocation27_spill] sm:$0xff]  ;;  %v9105_v63 = vld [vmem:[%s12711_s1 + $0x4a8] sm:$0xff]  }
 0x39a   : > { %7996 = vmatprep.subr.bf16.mxu1 %v12975_v40  ;;  %v4759_v45 = vadd.f32 %v7604_v0, %v12432_v54  ;;  %v7607_v24 = vadd.f32 %v7606_v57, %v7605_v5  ;;  %v9106_v5 = vld [vmem:[%s12711_s1 + $0x4f0] sm:$0xff]  }
 0x39b   : > { %v7630_v7 = vpop.f32.mrb[128].mxu1  ;;  %5748 = vmatmul.mubr.bf16.vlgmr.msra.gmra.mrb[176].mxu0 %v8675_v26 }
 0x39c   : > { %v7631_v1 = vpop.f32.mrb[129].mxu1  ;;  %v4762_v3 = vadd.f32 %v7607_v24, %v12437_v30  ;;  %8011 = vmatpush3.bf16.msra.mxu0 %v9095_v62  ;;  %5755 = vmatprep.mubr.bf16.mxu0 %v8681_v33  ;;  %v12988_v33 = vld [vmem:[#allocation30_spill] sm:$0xff] }
 0x39d   : > { %v7632_v29 = vadd.f32 %v7631_v1, %v7630_v7  ;;  %v7633_v31 = vpop.f32.mrb[130].mxu1  ;;  %7997 = vmatpush3.bf16.msra.mxu1 %v12976_v35  ;;  %8012 = vmatprep.subr.bf16.mxu0 %v9096_v59  ;;  %v9107_v1 = vld [vmem:[%s12711_s1 + $0x4b0] sm:$0xff]  }
 0x39e   : > { %v7634_v37 = vpop.f32.mrb[131].mxu1  ;;  %8038 = vmatprep.subr.bf16.mxu1 %v12977_v42  ;;  %v12991_v59 = vld [vmem:[#allocation33_spill] sm:$0xff] }
 0x39f   : > { %v12516_v54 = vadd.f32 %v7632_v29, %v4759_v45  ;;  %v7635_v17 = vadd.f32 %v7634_v37, %v7633_v31  ;;  %v9108_v31 = vld [vmem:[%s12711_s1 + $0x4f8] sm:$0xff]  }
 0x3a0   : > { %5797 = vmatmul.mubr.bf16.vlgmr.msra.gmra.mrb[180].mxu1 %v8678_v61  ;;  %8013 = vmatpush3.bf16.msra.mxu0 %v9097_v12  ;;  %v12989_v61 = vld [vmem:[#allocation31_spill] sm:$0xff]  ;;  %v8687_v37 = vld [vmem:[%s9720_s27 + $0x4f8] ss:$100 sps:$4 sm:$0xff]  }
 0x3a1   : > { %v12521_v30 = vadd.f32 %v7635_v17, %v4762_v3  ;;  %8039 = vmatpush3.bf16.msra.mxu1 %v12978_v55  ;;  %5804 = vmatprep.mubr.bf16.mxu1 %v8684_v19  ;;  %v9109_v17 = vld [vmem:[%s12711_s1 + $0x4b8] sm:$0xff]   ;;  %v9110_v12 = vld [vmem:[%s12711_s1 + $0x5c0] sm:$0xff]  }
 0x3a2   : > { %8040 = vmatprep.subr.bf16.mxu1 %v12979_v50  ;;  %8014 = vmatprep.subr.bf16.mxu0 %v9098_v11  ;;  %v8693_v50 = vld [vmem:[%s9720_s27 + $0x5c4] ss:$100 sps:$4 sm:$0x1f]  }
 0x3a3   : > { %5756 = vmatmul.mubr.bf16.gmra.mrb[180].mxu0 %v8683_v14 }
 0x3a4   : > { %8015 = vmatpush3.bf16.msra.mxu0 %v9099_v27  ;;  %5845 = vmatprep.mubr.bf16.mxu0 %v8689_v47 }
 0x3a5   : > { %8041 = vmatpush3.bf16.msra.mxu1 %v12980_v4  ;;  %8016 = vmatprep.subr.bf16.mxu0 %v9100_v39  ;;  %v8690_v4 = vld [vmem:[%s9720_s27 + $0x500] ss:$100 sps:$4 sm:$0xff]   ;;  %v8696_v39 = vld [vmem:[%s9720_s27 + $0x5cc] ss:$100 sps:$4 sm:$0x1f]  }
 0x3a6   : > { %8042 = vmatprep.subr.bf16.mxu1 %v12981_v46  ;;  %v12992_v46 = vld [vmem:[#allocation34_spill] sm:$0xff] }
 0x3a8   : > { %5805 = vmatmul.mubr.bf16.gmra.mrb[184].mxu1 %v8686_v22  ;;  %8017 = vmatpush3.bf16.msra.mxu0 %v9101_v38 }
 0x3a9   : > { %8043 = vmatpush3.bf16.msra.mxu1 %v12982_v41  ;;  %5894 = vmatprep.mubr.bf16.mxu1 %v8692_v34 }
 0x3aa   : > { %8044 = vmatprep.subr.bf16.mxu1 %v12983_v36  ;;  %8018 = vmatprep.subr.bf16.mxu0 %v9102_v51  ;;  %v9111_v36 = vld [vmem:[%s12711_s1 + $0x580] sm:$0xff]  }
 0x3ac   : > { %8019 = vmatpush3.bf16.msra.mxu0 %v9103_v21  ;;  %v8695_v21 = vld [vmem:[%s9720_s27 + $0x5c0] ss:$100 sps:$4 sm:$0x1f]  }
 0x3ad   : > { %8045 = vmatpush3.bf16.msra.mxu1 %v12984_v2  ;;  %8020 = vmatprep.subr.bf16.mxu0 %v9104_v52  ;;  %v9112_v2 = vld [vmem:[%s12711_s1 + $0x5c8] sm:$0xff]   ;;  %v9114_v52 = vld [vmem:[%s12711_s1 + $0x5d0] sm:$0xff]  }
 0x3ae   : > { %8046 = vmatprep.subr.bf16.mxu1 %v12985_v13  ;;  %v7652_v8 = vpop.f32.mrb[132].mxu0  ;;  %v9113_v13 = vld [vmem:[%s12711_s1 + $0x588] sm:$0xff]  }
 0x3af   : > { %v7653_v28 = vpop.f32.mrb[133].mxu0 }
 0x3b0   : > { %v7654_v20 = vadd.f32 %v7653_v28, %v7652_v8  ;;  %v7655_v49 = vpop.f32.mrb[134].mxu0  ;;  %8021 = vmatpush3.bf16.msra.mxu0 %v9105_v63  ;;  %v8701_v8 = vld [vmem:[%s9720_s27 + $0x50c] ss:$100 sps:$4 sm:$0xff]   ;;  %v9119_v63 = vld [vmem:[%s12711_s1 + $0x5a0] sm:$0xff]  }
 0x3b1   : > { %8047 = vmatpush3.bf16.msra.mxu1 %v12986_v48  ;;  %v7656_v0 = vpop.f32.mrb[135].mxu0  ;;  %8022 = vmatprep.subr.bf16.mxu0 %v9106_v5  ;;  %v8698_v48 = vld [vmem:[%s9720_s27 + $0x5c8] ss:$100 sps:$4 sm:$0x1f]   ;;  %v9115_v28 = vld [vmem:[%s12711_s1 + $0x590] sm:$0xff]  }
 0x3b2   : > { %8048 = vmatprep.subr.bf16.mxu1 %v12987_v56  ;;  %v4849_v23 = vadd.f32 %v7654_v20, %v12490_v53  ;;  %v7657_v40 = vadd.f32 %v7656_v0, %v7655_v49  ;;  %v9116_v20 = vld [vmem:[%s12711_s1 + $0x5d8] sm:$0xff]   ;;  %v9118_v49 = vld [vmem:[%s12711_s1 + $0x5e0] sm:$0xff]  }
 0x3b3   : > { %v7680_v26 = vpop.f32.mrb[132].mxu1 }
 0x3b4   : > { %v7681_v7 = vpop.f32.mrb[133].mxu1  ;;  %v4852_v45 = vadd.f32 %v7657_v40, %v12495_v25  ;;  %8023 = vmatpush3.bf16.msra.mxu0 %v9107_v1  ;;  %v12990_v25 = vld [vmem:[#allocation32_spill] sm:$0xff] }
 0x3b5   : > { %v7682_v57 = vadd.f32 %v7681_v7, %v7680_v26  ;;  %v7683_v58 = vpop.f32.mrb[134].mxu1  ;;  %8049 = vmatpush3.bf16.msra.mxu1 %v12988_v33  ;;  %8024 = vmatprep.subr.bf16.mxu0 %v9108_v31  ;;  %v12994_v31 = vld [vmem:[#allocation36_spill] sm:$0xff] }
 0x3b6   : > { %v7684_v24 = vpop.f32.mrb[135].mxu1  ;;  %8050 = vmatprep.subr.bf16.mxu1 %v12989_v61  ;;  %v7658_v35 = vpop.f32.mrb[136].mxu0 }
 0x3b7   : > { %v12574_v29 = vadd.f32 %v7682_v57, %v4849_v23  ;;  %v7685_v53 = vadd.f32 %v7684_v24, %v7683_v58  ;;  %v7659_v3 = vpop.f32.mrb[137].mxu0  ;;  %v12993_v23 = vld [vmem:[#allocation35_spill] sm:$0xff]  ;;  %v9122_v57 = vld [vmem:[%s12711_s1 + $0x5f0] sm:$0xff]  }
 0x3b8   : > { %v7660_v62 = vadd.f32 %v7659_v3, %v7658_v35  ;;  %v7661_v42 = vpop.f32.mrb[138].mxu0  ;;  %8025 = vmatpush3.bf16.msra.mxu0 %v9109_v17 }
 0x3b9   : > { %v12579_v19 = vadd.f32 %v7685_v53, %v4852_v45  ;;  %8051 = vmatpush3.bf16.msra.mxu1 %v12990_v25  ;;  %v7662_v14 = vpop.f32.mrb[139].mxu0  ;;  %8066 = vmatprep.subr.bf16.mxu0 %v9110_v12  ;;  %v9123_v53 = vld [vmem:[%s12711_s1 + $0x5b0] sm:$0xff]  }
 0x3ba   : > { %8052 = vmatprep.subr.bf16.mxu1 %v12991_v59  ;;  %v4857_v11 = vadd.f32 %v7660_v62, %v12516_v54  ;;  %v7663_v47 = vadd.f32 %v7662_v14, %v7661_v42  ;;  %v9125_v59 = vld [vmem:[%s12711_s1 + $0x5b8] sm:$0xff]  }
 0x3bb   : > { %v7686_v55 = vpop.f32.mrb[136].mxu1  ;;  %5846 = vmatmul.mubr.bf16.vlgmr.msra.gmra.mrb[184].mxu0 %v8687_v37 }
 0x3bc   : > { %v7687_v22 = vpop.f32.mrb[137].mxu1  ;;  %v4860_v41 = vadd.f32 %v7663_v47, %v12521_v30  ;;  %8067 = vmatpush3.bf16.msra.mxu0 %v9111_v36  ;;  %5853 = vmatprep.mubr.bf16.mxu0 %v8693_v50 }
 0x3bd   : > { %v7688_v34 = vadd.f32 %v7687_v22, %v7686_v55  ;;  %v7689_v27 = vpop.f32.mrb[138].mxu1  ;;  %8053 = vmatpush3.bf16.msra.mxu1 %v12992_v46  ;;  %8068 = vmatprep.subr.bf16.mxu0 %v9112_v2  ;;  %v8704_v55 = vld [vmem:[%s9720_s27 + $0x5d4] ss:$100 sps:$4 sm:$0x1f]  }
 0x3be   : > { %v7690_v38 = vpop.f32.mrb[139].mxu1  ;;  %8164 = vmatprep.subr.bf16.mxu1 %v12071_v15  ;;  %v8703_v22 = vld [vmem:[%s9720_s27 + $0x5d8] ss:$100 sps:$4 sm:$0x1f]  }
 0x3bf   : > { %v12600_v54 = vadd.f32 %v7688_v34, %v4857_v11  ;;  %v7691_v51 = vadd.f32 %v7690_v38, %v7689_v27  ;;  %v8706_v38 = vld [vmem:[%s9720_s27 + $0x5d0] ss:$100 sps:$4 sm:$0x1f]  }
 0x3c0   : > { %5895 = vmatmul.mubr.bf16.vlgmr.msra.gmra.mrb[188].mxu1 %v8690_v4  ;;  %8069 = vmatpush3.bf16.msra.mxu0 %v9113_v13 }
 0x3c1   : > { %v12605_v30 = vadd.f32 %v7691_v51, %v4860_v41  ;;  %8165 = vmatpush3.bf16.msra.mxu1 %v12071_v15  ;;  %5902 = vmatprep.mubr.bf16.mxu1 %v8696_v39  ;;  %v8702_v15 = vld [vmem:[%s9720_s27 + $0x510] ss:$100 sps:$4 sm:$0xff]  }
 0x3c2   : > { %8166 = vmatprep.subr.bf16.mxu1 %v12087_v10  ;;  %8070 = vmatprep.subr.bf16.mxu0 %v9114_v52 }
 0x3c3   : > { %5854 = vmatmul.mubr.bf16.gmra.mrb[188].mxu0 %v8695_v21 }
 0x3c4   : > { %8071 = vmatpush3.bf16.msra.mxu0 %v9115_v28  ;;  %5943 = vmatprep.mubr.bf16.mxu0 %v8701_v8 }
 0x3c5   : > { %8167 = vmatpush3.bf16.msra.mxu1 %v12087_v10  ;;  %8072 = vmatprep.subr.bf16.mxu0 %v9116_v20  ;;  %v9117_v10 = vld [vmem:[%s12711_s1 + $0x598] sm:$0xff]  }
 0x3c6   : > { %8168 = vmatprep.subr.bf16.mxu1 %v12099_v60 }
 0x3c8   : > { %5903 = vmatmul.mubr.bf16.gmra.mrb[192].mxu1 %v8698_v48  ;;  %8073 = vmatpush3.bf16.msra.mxu0 %v9117_v10 }
 0x3c9   : > { %8169 = vmatpush3.bf16.msra.mxu1 %v12099_v60  ;;  %8180 = vmatprep.mubr.bf16.mxu1 %v8702_v15  ;;  %v9120_v60 = vld [vmem:[%s12711_s1 + $0x5e8] sm:$0xff]  }
 0x3ca   : > { %8170 = vmatprep.subr.bf16.mxu1 %v12111_v44  ;;  %8074 = vmatprep.subr.bf16.mxu0 %v9118_v49 }
 0x3cc   : > { %8075 = vmatpush3.bf16.msra.mxu0 %v9119_v63 }
 0x3cd   : > { %8171 = vmatpush3.bf16.msra.mxu1 %v12111_v44  ;;  %8076 = vmatprep.subr.bf16.mxu0 %v9120_v60  ;;  %v9121_v44 = vld [vmem:[%s12711_s1 + $0x5a8] sm:$0xff]   ;;  %v12995_v60 = vld [vmem:[#allocation37_spill] sm:$0xff] }
 0x3ce   : > { %8172 = vmatprep.subr.bf16.mxu1 %v12120_v43  ;;  %v7708_v56 = vpop.f32.mrb[140].mxu0 }
 0x3cf   : > { %v7709_v26 = vpop.f32.mrb[141].mxu0 }
 0x3d0   : > { %v7710_v0 = vadd.f32 %v7709_v26, %v7708_v56  ;;  %v7711_v5 = vpop.f32.mrb[142].mxu0  ;;  %8077 = vmatpush3.bf16.msra.mxu0 %v9121_v44 }
 0x3d1   : > { %8173 = vmatpush3.bf16.msra.mxu1 %v12120_v43  ;;  %v7712_v7 = vpop.f32.mrb[143].mxu0  ;;  %8078 = vmatprep.subr.bf16.mxu0 %v9122_v57 }
 0x3d2   : > { %8174 = vmatprep.subr.bf16.mxu1 %v12993_v23  ;;  %v4947_v58 = vadd.f32 %v7710_v0, %v12574_v29  ;;  %v7713_v33 = vadd.f32 %v7712_v7, %v7711_v5  ;;  %v9124_v29 = vld [vmem:[%s12711_s1 + $0x5f8] sm:$0xff]  }
 0x3d3   : > { %v7736_v40 = vpop.f32.mrb[140].mxu1 }
 0x3d4   : > { %v7737_v43 = vpop.f32.mrb[141].mxu1  ;;  %v4950_v1 = vadd.f32 %v7713_v33, %v12579_v19  ;;  %8079 = vmatpush3.bf16.msra.mxu0 %v9123_v53  ;;  %v8699_v19 = vld [vmem:[%s9720_s27 + $0x508] ss:$100 sps:$4 sm:$0xff]   ;;  %s6710_s27 = sshll.u32 %s13000_s15, 4 }
 0x3d5   : > { %v7738_v45 = vadd.f32 %v7737_v43, %v7736_v40  ;;  %v7739_v24 = vpop.f32.mrb[142].mxu1  ;;  %8175 = vmatpush3.bf16.msra.mxu1 %v12993_v23  ;;  %8080 = vmatprep.subr.bf16.mxu0 %v9124_v29  ;;  %s613_s4 = scalar_lea.vmem %s12713_s3, %s6710_s27 }
 0x3d6   : > { %v7740_v61 = vpop.f32.mrb[143].mxu1  ;;  %8176 = vmatprep.subr.bf16.mxu1 %v12994_v31  ;;  %v7714_v3 = vpop.f32.mrb[144].mxu0 }
 0x3d7   : > { %v7741_v35 = vadd.f32 %v7740_v61, %v7739_v24  ;;  %v4996_v25 = vadd.f32 %v7738_v45, %v4947_v58  ;;  %v7715_v37 = vpop.f32.mrb[145].mxu0 }
 0x3d8   : > { %v7716_v42 = vadd.f32 %v7715_v37, %v7714_v3  ;;  %v7717_v17 = vpop.f32.mrb[146].mxu0  ;;  %8081 = vmatpush3.bf16.msra.mxu0 %v9125_v59 }
 0x3d9   : > { %8177 = vmatpush3.bf16.msra.mxu1 %v12994_v31  ;;  %v4999_v62 = vadd.f32 %v7741_v35, %v4950_v1  ;;  %v7718_v12 = vpop.f32.mrb[147].mxu0 }
 0x3da   : > { %8178 = vmatprep.subr.bf16.mxu1 %v12149_v16  ;;  %v4955_v50 = vadd.f32 %v7716_v42, %v12600_v54  ;;  %v7719_v11 = vadd.f32 %v7718_v12, %v7717_v17 }
 0x3db   : > { %v7742_v14 = vpop.f32.mrb[144].mxu1  ;;  %5944 = vmatmul.mubr.bf16.vlgmr.msra.gmra.mrb[192].mxu0 %v8699_v19 }
 0x3dc   : > { %v7743_v47 = vpop.f32.mrb[145].mxu1  ;;  %v4958_v27 = vadd.f32 %v7719_v11, %v12605_v30  ;;  %5951 = vmatprep.mubr.bf16.mxu0 %v8704_v55 }
 0x3dd   : > { %v7744_v4 = vadd.f32 %v7743_v47, %v7742_v14  ;;  %v7745_v34 = vpop.f32.mrb[146].mxu1  ;;  %8179 = vmatpush3.bf16.msra.mxu1 %v12149_v16 }
 0x3de   : > { %v7746_v46 = vpop.f32.mrb[147].mxu1 }
 0x3df   : > { %v7747_v39 = vadd.f32 %v7746_v46, %v7745_v34  ;;  %v5004_v41 = vadd.f32 %v7744_v4, %v4955_v50 }
 0x3e0   : > { %8181 = vmatmul.mubr.bf16.vlgmr.msra.gmra.mrb[196].mxu1 %v8703_v22 }
 0x3e1   : > { %v5007_v36 = vadd.f32 %v7747_v39, %v4958_v27 }
 0x3e3   : > { %5952 = vmatmul.mubr.bf16.gmra.mrb[196].mxu0 %v8706_v38 }
 0x3ee   : > { %v8162_v51 = vpop.f32.mrb[148].mxu0 }
 0x3ef   : > { %v5053_v54 = vadd.f32 %v8162_v51, %v5004_v41  ;;  %v5044_v2 = vpop.f32.mrb[149].mxu0 }
 0x3f0   : > { %v5045_v21 = vadd.f32 %v5044_v2, %v4996_v25  ;;  %v8163_v13 = vpop.f32.mrb[150].mxu0 }
 0x3f1   : > { %v5061_v52 = vmax.f32 %v5053_v54, 0.0  ;;  %v5056_v8 = vadd.f32 %v8163_v13, %v5007_v36  ;;  %v5047_v48 = vpop.f32.mrb[151].mxu0 }
 0x3f2   : > { %v5059_v16 = vmax.f32 %v5045_v21, 0.0  ;;  %v5048_v28 = vadd.f32 %v5047_v48, %v4999_v62 }
 0x3f3   : > { %v7774_v15 = vpop.f32.mrb[148].mxu1  ;;  %v12674_v20 = vmax.f32 %v12185_v18, %v5061_v52  ;;  %v5062_v10 = vmax.f32 %v5056_v8, 0.0 }
 0x3f4   : > { %v7775_v30 = vpop.f32.mrb[149].mxu1  ;;  %v12677_v56 = vmax.f32 %v12995_v60, %v5059_v16  ;;  %v5060_v26 = vmax.f32 %v5048_v28, 0.0 }
 0x3f5   : > { %v7776_v49 = vadd.f32 %v7775_v30, %v7774_v15  ;;  %v7777_v63 = vpop.f32.mrb[150].mxu1  ;;  %v12680_v5 = vmax.f32 %v12191_v9, %v5062_v10 }
 0x3f6   : > { %v7778_v0 = vpop.f32.mrb[151].mxu1  ;;  %v12683_v23 = vmax.f32 %v12164_v32, %v5060_v26 }
 0x3f7   : > { %v7779_v44 = vadd.f32 %v7778_v0, %v7777_v63  ;;  %v5407_v24 = vadd.f32 %v12254_v6, %v7776_v49 }
 0x3f9   : > { %v5410_v9 = vadd.f32 %v12254_v6, %v7779_v44 }
 0x3fb   : > { %v7780_v40 = vpop.f32.mrb[152].mxu1 }
 0x3fc   : > { %v7781_v7 = vpop.f32.mrb[153].mxu1 }
 0x3fd   : > { %v7782_v57 = vadd.f32 %v7781_v7, %v7780_v40  ;;  %v7783_v18 = vpop.f32.mrb[154].mxu1 }
 0x3fe   : > { %v7784_v58 = vpop.f32.mrb[155].mxu1 }
 0x3ff   : > { %v7785_v33 = vadd.f32 %v7784_v58, %v7783_v18  ;;  %v5415_v17 = vadd.f32 %v12254_v6, %v7782_v57 }
 0x401   : > { %v5418_v22 = vadd.f32 %v12254_v6, %v7785_v33 }
 0x40e   : > { %v7802_v43 = vpop.f32.mrb[152].mxu0 }
 0x40f   : > { %v7803_v45 = vpop.f32.mrb[153].mxu0 }
 0x410   : > { %v7804_v1 = vadd.f32 %v7803_v45, %v7802_v43  ;;  %v7805_v61 = vpop.f32.mrb[154].mxu0 }
 0x411   : > { %v7806_v31 = vpop.f32.mrb[155].mxu0 }
 0x412   : > { %v5456_v35 = vadd.f32 %v7804_v1, %v5407_v24  ;;  %v7807_v29 = vadd.f32 %v7806_v31, %v7805_v61 }
 0x413   : > { %v7830_v53 = vpop.f32.mrb[156].mxu1 }
 0x414   : > { %v7831_v32 = vpop.f32.mrb[157].mxu1  ;;  %v5459_v37 = vadd.f32 %v7807_v29, %v5410_v9 }
 0x415   : > { %v7832_v25 = vadd.f32 %v7831_v32, %v7830_v53  ;;  %v7833_v3 = vpop.f32.mrb[158].mxu1 }
 0x416   : > { %v7834_v19 = vpop.f32.mrb[159].mxu1  ;;  %v7808_v59 = vpop.f32.mrb[156].mxu0 }
 0x417   : > { %v5505_v62 = vadd.f32 %v7832_v25, %v5456_v35  ;;  %v7835_v42 = vadd.f32 %v7834_v19, %v7833_v3  ;;  %v7809_v14 = vpop.f32.mrb[157].mxu0 }
 0x418   : > { %v7810_v12 = vadd.f32 %v7809_v14, %v7808_v59  ;;  %v7811_v50 = vpop.f32.mrb[158].mxu0 }
 0x419   : > { %v5508_v55 = vadd.f32 %v7835_v42, %v5459_v37  ;;  %v7812_v47 = vpop.f32.mrb[159].mxu0 }
 0x41a   : > { %v5464_v4 = vadd.f32 %v7810_v12, %v5415_v17  ;;  %v7813_v34 = vadd.f32 %v7812_v47, %v7811_v50 }
 0x41b   : > { %v7836_v11 = vpop.f32.mrb[160].mxu1 }
 0x41c   : > { %v7837_v27 = vpop.f32.mrb[161].mxu1  ;;  %v5467_v41 = vadd.f32 %v7813_v34, %v5418_v22 }
 0x41d   : > { %v7838_v46 = vadd.f32 %v7837_v27, %v7836_v11  ;;  %v7839_v39 = vpop.f32.mrb[162].mxu1 }
 0x41e   : > { %v7840_v38 = vpop.f32.mrb[163].mxu1 }
 0x41f   : > { %v5513_v36 = vadd.f32 %v7838_v46, %v5464_v4  ;;  %v7841_v51 = vadd.f32 %v7840_v38, %v7839_v39 }
 0x421   : > { %v5516_v54 = vadd.f32 %v7841_v51, %v5467_v41 }
 0x42e   : > { %v7858_v2 = vpop.f32.mrb[160].mxu0 }
 0x42f   : > { %v7859_v21 = vpop.f32.mrb[161].mxu0 }
 0x430   : > { %v7860_v13 = vadd.f32 %v7859_v21, %v7858_v2  ;;  %v7861_v52 = vpop.f32.mrb[162].mxu0 }
 0x431   : > { %v7862_v48 = vpop.f32.mrb[163].mxu0 }
 0x432   : > { %v5554_v15 = vadd.f32 %v7860_v13, %v5505_v62  ;;  %v7863_v16 = vadd.f32 %v7862_v48, %v7861_v52 }
 0x433   : > { %v7886_v8 = vpop.f32.mrb[164].mxu1 }
 0x434   : > { %v7887_v28 = vpop.f32.mrb[165].mxu1  ;;  %v5557_v10 = vadd.f32 %v7863_v16, %v5508_v55 }
 0x435   : > { %v7888_v6 = vadd.f32 %v7887_v28, %v7886_v8  ;;  %v7889_v30 = vpop.f32.mrb[166].mxu1 }
 0x436   : > { %v7890_v49 = vpop.f32.mrb[167].mxu1  ;;  %v7864_v26 = vpop.f32.mrb[164].mxu0 }
 0x437   : > { %v5603_v63 = vadd.f32 %v7888_v6, %v5554_v15  ;;  %v7891_v60 = vadd.f32 %v7890_v49, %v7889_v30  ;;  %v7865_v44 = vpop.f32.mrb[165].mxu0 }
 0x438   : > { %v7866_v40 = vadd.f32 %v7865_v44, %v7864_v26  ;;  %v7867_v7 = vpop.f32.mrb[166].mxu0 }
 0x439   : > { %v5606_v0 = vadd.f32 %v7891_v60, %v5557_v10  ;;  %v7868_v18 = vpop.f32.mrb[167].mxu0 }
 0x43a   : > { %v5562_v58 = vadd.f32 %v7866_v40, %v5513_v36  ;;  %v7869_v33 = vadd.f32 %v7868_v18, %v7867_v7 }
 0x43b   : > { %v7892_v57 = vpop.f32.mrb[168].mxu1 }
 0x43c   : > { %v7893_v43 = vpop.f32.mrb[169].mxu1  ;;  %v5565_v1 = vadd.f32 %v7869_v33, %v5516_v54 }
 0x43d   : > { %v7894_v45 = vadd.f32 %v7893_v43, %v7892_v57  ;;  %v7895_v24 = vpop.f32.mrb[170].mxu1 }
 0x43e   : > { %v7896_v61 = vpop.f32.mrb[171].mxu1 }
 0x43f   : > { %v5611_v53 = vadd.f32 %v7894_v45, %v5562_v58  ;;  %v7897_v31 = vadd.f32 %v7896_v61, %v7895_v24 }
 0x441   : > { %v5614_v9 = vadd.f32 %v7897_v31, %v5565_v1 }
 0x44e   : > { %v7914_v35 = vpop.f32.mrb[168].mxu0 }
 0x44f   : > { %v7915_v29 = vpop.f32.mrb[169].mxu0 }
 0x450   : > { %v7916_v32 = vadd.f32 %v7915_v29, %v7914_v35  ;;  %v7917_v25 = vpop.f32.mrb[170].mxu0 }
 0x451   : > { %v7918_v37 = vpop.f32.mrb[171].mxu0 }
 0x452   : > { %v5652_v19 = vadd.f32 %v7916_v32, %v5603_v63  ;;  %v7919_v62 = vadd.f32 %v7918_v37, %v7917_v25 }
 0x453   : > { %v7942_v3 = vpop.f32.mrb[172].mxu1 }
 0x454   : > { %v7943_v42 = vpop.f32.mrb[173].mxu1  ;;  %v5655_v55 = vadd.f32 %v7919_v62, %v5606_v0 }
 0x455   : > { %v7944_v17 = vadd.f32 %v7943_v42, %v7942_v3  ;;  %v7945_v59 = vpop.f32.mrb[174].mxu1 }
 0x456   : > { %v7946_v14 = vpop.f32.mrb[175].mxu1  ;;  %v7920_v11 = vpop.f32.mrb[172].mxu0 }
 0x457   : > { %v5701_v12 = vadd.f32 %v7944_v17, %v5652_v19  ;;  %v7947_v50 = vadd.f32 %v7946_v14, %v7945_v59  ;;  %v7921_v22 = vpop.f32.mrb[173].mxu0 }
 0x458   : > { %v7922_v4 = vadd.f32 %v7921_v22, %v7920_v11  ;;  %v7923_v34 = vpop.f32.mrb[174].mxu0 }
 0x459   : > { %v5704_v47 = vadd.f32 %v7947_v50, %v5655_v55  ;;  %v7924_v46 = vpop.f32.mrb[175].mxu0 }
 0x45a   : > { %v5660_v39 = vadd.f32 %v7922_v4, %v5611_v53  ;;  %v7925_v41 = vadd.f32 %v7924_v46, %v7923_v34 }
 0x45b   : > { %v7948_v27 = vpop.f32.mrb[176].mxu1 }
 0x45c   : > { %v7949_v38 = vpop.f32.mrb[177].mxu1  ;;  %v5663_v54 = vadd.f32 %v7925_v41, %v5614_v9 }
 0x45d   : > { %v7950_v36 = vadd.f32 %v7949_v38, %v7948_v27  ;;  %v7951_v51 = vpop.f32.mrb[178].mxu1 }
 0x45e   : > { %v7952_v2 = vpop.f32.mrb[179].mxu1 }
 0x45f   : > { %v5709_v21 = vadd.f32 %v7950_v36, %v5660_v39  ;;  %v7953_v13 = vadd.f32 %v7952_v2, %v7951_v51 }
 0x461   : > { %v5712_v52 = vadd.f32 %v7953_v13, %v5663_v54 }
 0x46e   : > { %v7970_v8 = vpop.f32.mrb[176].mxu0 }
 0x46f   : > { %v7971_v48 = vpop.f32.mrb[177].mxu0 }
 0x470   : > { %v7972_v15 = vadd.f32 %v7971_v48, %v7970_v8  ;;  %v7973_v16 = vpop.f32.mrb[178].mxu0 }
 0x471   : > { %v7974_v6 = vpop.f32.mrb[179].mxu0 }
 0x472   : > { %v5750_v30 = vadd.f32 %v7972_v15, %v5701_v12  ;;  %v7975_v10 = vadd.f32 %v7974_v6, %v7973_v16 }
 0x473   : > { %v7998_v28 = vpop.f32.mrb[180].mxu1 }
 0x474   : > { %v7999_v49 = vpop.f32.mrb[181].mxu1  ;;  %v5753_v26 = vadd.f32 %v7975_v10, %v5704_v47 }
 0x475   : > { %v8000_v63 = vadd.f32 %v7999_v49, %v7998_v28  ;;  %v8001_v60 = vpop.f32.mrb[182].mxu1 }
 0x476   : > { %v8002_v0 = vpop.f32.mrb[183].mxu1  ;;  %v7976_v7 = vpop.f32.mrb[180].mxu0 }
 0x477   : > { %v5799_v44 = vadd.f32 %v8000_v63, %v5750_v30  ;;  %v8003_v40 = vadd.f32 %v8002_v0, %v8001_v60  ;;  %v7977_v18 = vpop.f32.mrb[181].mxu0 }
 0x478   : > { %v7978_v58 = vadd.f32 %v7977_v18, %v7976_v7  ;;  %v7979_v33 = vpop.f32.mrb[182].mxu0 }
 0x479   : > { %v5802_v57 = vadd.f32 %v8003_v40, %v5753_v26  ;;  %v7980_v45 = vpop.f32.mrb[183].mxu0 }
 0x47a   : > { %v5758_v24 = vadd.f32 %v7978_v58, %v5709_v21  ;;  %v7981_v1 = vadd.f32 %v7980_v45, %v7979_v33 }
 0x47b   : > { %v8004_v43 = vpop.f32.mrb[184].mxu1 }
 0x47c   : > { %v8005_v61 = vpop.f32.mrb[185].mxu1  ;;  %v5761_v9 = vadd.f32 %v7981_v1, %v5712_v52 }
 0x47d   : > { %v8006_v53 = vadd.f32 %v8005_v61, %v8004_v43  ;;  %v8007_v31 = vpop.f32.mrb[186].mxu1 }
 0x47e   : > { %v8008_v35 = vpop.f32.mrb[187].mxu1 }
 0x47f   : > { %v5807_v29 = vadd.f32 %v8006_v53, %v5758_v24  ;;  %v8009_v32 = vadd.f32 %v8008_v35, %v8007_v31 }
 0x481   : > { %v5810_v25 = vadd.f32 %v8009_v32, %v5761_v9 }
 0x48e   : > { %v8026_v3 = vpop.f32.mrb[184].mxu0 }
 0x48f   : > { %v8027_v37 = vpop.f32.mrb[185].mxu0 }
 0x490   : > { %v8028_v19 = vadd.f32 %v8027_v37, %v8026_v3  ;;  %v8029_v62 = vpop.f32.mrb[186].mxu0 }
 0x491   : > { %v8030_v17 = vpop.f32.mrb[187].mxu0 }
 0x492   : > { %v5848_v59 = vadd.f32 %v8028_v19, %v5799_v44  ;;  %v8031_v55 = vadd.f32 %v8030_v17, %v8029_v62 }
 0x493   : > { %v8054_v42 = vpop.f32.mrb[188].mxu1 }
 0x494   : > { %v8055_v14 = vpop.f32.mrb[189].mxu1  ;;  %v5851_v11 = vadd.f32 %v8031_v55, %v5802_v57 }
 0x495   : > { %v8056_v12 = vadd.f32 %v8055_v14, %v8054_v42  ;;  %v8057_v50 = vpop.f32.mrb[190].mxu1  ;;  %v6039_v42 = vld [vmem:[%s613_s4 + $0xc] sm:$0x1] }
 0x496   : > { %v8058_v47 = vpop.f32.mrb[191].mxu1  ;;  %v8032_v34 = vpop.f32.mrb[188].mxu0 }
 0x497   : > { %v5897_v22 = vadd.f32 %v8056_v12, %v5848_v59  ;;  %v8059_v4 = vadd.f32 %v8058_v47, %v8057_v50  ;;  %v8033_v46 = vpop.f32.mrb[189].mxu0 }
 0x498   : > { %v8034_v39 = vadd.f32 %v8033_v46, %v8032_v34  ;;  %v8035_v41 = vpop.f32.mrb[190].mxu0 }
 0x499   : > { %v5900_v27 = vadd.f32 %v8059_v4, %v5851_v11  ;;  %v8036_v36 = vpop.f32.mrb[191].mxu0 }
 0x49a   : > { %v5856_v51 = vadd.f32 %v8034_v39, %v5807_v29  ;;  %v8037_v54 = vadd.f32 %v8036_v36, %v8035_v41 }
 0x49b   : > { %v8060_v38 = vpop.f32.mrb[192].mxu1 }
 0x49c   : > { %v8061_v2 = vpop.f32.mrb[193].mxu1  ;;  %v5859_v52 = vadd.f32 %v8037_v54, %v5810_v25 }
 0x49d   : > { %v8062_v21 = vadd.f32 %v8061_v2, %v8060_v38  ;;  %v8063_v13 = vpop.f32.mrb[194].mxu1 }
 0x49e   : > { %v8064_v8 = vpop.f32.mrb[195].mxu1 }
 0x49f   : > { %v5905_v48 = vadd.f32 %v8062_v21, %v5856_v51  ;;  %v8065_v15 = vadd.f32 %v8064_v8, %v8063_v13 }
 0x4a1   : > { %v5908_v16 = vadd.f32 %v8065_v15, %v5859_v52 }
 0x4ae   : > { %v8082_v28 = vpop.f32.mrb[192].mxu0 }
 0x4af   : > { %v8083_v6 = vpop.f32.mrb[193].mxu0 }
 0x4b0   : > { %v8084_v30 = vadd.f32 %v8083_v6, %v8082_v28  ;;  %v8085_v10 = vpop.f32.mrb[194].mxu0 }
 0x4b1   : > { %v8086_v49 = vpop.f32.mrb[195].mxu0 }
 0x4b2   : > { %v8087_v60 = vadd.f32 %v8086_v49, %v8085_v10  ;;  %v5946_v26 = vadd.f32 %v8084_v30, %v5897_v22 }
 0x4b3   : > { %v8182_v63 = vpop.f32.mrb[196].mxu1 }
 0x4b4   : > { %v5994_v0 = vpop.f32.mrb[197].mxu1  ;;  %v5949_v7 = vadd.f32 %v8087_v60, %v5900_v27 }
 0x4b5   : > { %v8183_v44 = vpop.f32.mrb[198].mxu1  ;;  %v5995_v40 = vadd.f32 %v5994_v0, %v5946_v26 }
 0x4b6   : > { %v5997_v57 = vpop.f32.mrb[199].mxu1  ;;  %v8088_v33 = vpop.f32.mrb[196].mxu0 }
 0x4b7   : > { %v6009_v18 = vmax.f32 %v5995_v40, 0.0  ;;  %v5998_v58 = vadd.f32 %v5997_v57, %v5949_v7  ;;  %v8089_v43 = vpop.f32.mrb[197].mxu0 }
 0x4b8   : > { %v8090_v1 = vadd.f32 %v8089_v43, %v8088_v33  ;;  %v8091_v61 = vpop.f32.mrb[198].mxu0 }
 0x4b9   : > { %v6013_v45 = vmax.f32 %v12677_v56, %v6009_v18  ;;  %v6010_v24 = vmax.f32 %v5998_v58, 0.0  ;;  %v8092_v53 = vpop.f32.mrb[199].mxu0 }
 0x4ba   : > { %v5954_v9 = vadd.f32 %v8090_v1, %v5905_v48  ;;  %v8093_v35 = vadd.f32 %v8092_v53, %v8091_v61 }
 0x4bb   : > { %v6014_v31 = vmax.f32 %v12683_v23, %v6010_v24 }
 0x4bc   : > { %v6003_v32 = vadd.f32 %v8182_v63, %v5954_v9  ;;  %v5957_v25 = vadd.f32 %v8093_v35, %v5908_v16 }
 0x4bd   : > { %v6718_v29 = vpack.c.bf16 %v6014_v31, %v6013_v45 }
 0x4be   : > { %v6011_v3 = vmax.f32 %v6003_v32, 0.0  ;;  %v6006_v37 = vadd.f32 %v8183_v44, %v5957_v25 }
 0x4bf   : > { %6719 = vst [vmem:[%s613_s4] sm:$0xff] %v6718_v29  }
 0x4c0   : > { %v6015_v56 = vmax.f32 %v12674_v20, %v6011_v3  ;;  %v6012_v19 = vmax.f32 %v6006_v37, 0.0 }
 0x4c2   : > { %v6713_v62 = vpack.c.bf16 %v6015_v56, %v6015_v56  ;;  %v6016_v23 = vmax.f32 %v12680_v5, %v6012_v19 }
 0x4c4   : > { %6035 = vst [vmem:[%s613_s4 + $0x8] sm:$0xf] %v6713_v62  ;;  %v6714_v17 = vpack.c.bf16 %v6016_v23, %v6016_v23 }
 0x4c6   : > { %v6040_v59 = vsel %vm6038_vm2, %v6714_v17, %v6039_v42 }
 0x4c7   : > { %6041 = vst [vmem:[%s613_s4 + $0xc] sm:$0x1] %v6040_v59 }
 0x4c8 PF: > { %p10_p9 = scmp.ge.s32.totalorder %s9187_s16, 4   ;;  %s12996_s12 = smov %s9144_s13 }
 0x4c9   : > { %s12997_s13 = smov %s9196_s19  ;;  %s12998_s14 = smov %s9187_s16 }
 0x4ca   :  { %12 = sbr.rel (!%p10_p9) target bundleno = 2 (0x2), region = 102 }

</bundles_post_ra>
